<compile_context>
chip_gen: v5e
topology: v5e:2x2
jax: 0.10.0
libtpu: 0.0.40
codegen_flags: <defaults>
</compile_context>

<pallas_src>
import jax
import jax.numpy as jnp
from jax import lax
from jax.experimental import pallas as pl
from jax.experimental.pallas import tpu as pltpu

HIDDEN = 10            # hidden_layers in the PyTorch module
H_IMG = 28             # spatial size implied by Linear(hidden * 7 * 7, out)
WPAD = H_IMG + 2       # zero-padded width/height of block-1 grid (30)
NFLAT = WPAD * WPAD    # 900
NP = 1024              # per-image flat length (8 lane tiles), 124-lane zero tail
W2P = 16               # padded width of the block-2 (14x14) grid
NP2 = W2P * W2P        # 256 lanes (2 lane tiles) per image in block 2
MAX_PACK = 8           # images lane-packed per grid step

# Circular-roll safety: the per-image zero tail must cover the largest tap
# shift so wrap-around only ever reaches masked / zero-weight positions.
assert NP - NFLAT >= WPAD + 1


# ----------------------------------------------------------------------------
# Fused kernel: whole forward pass for K lane-packed images per grid step
# ----------------------------------------------------------------------------
def _cnn_fused_kernel(xs_ref, w1_ref, b1_ref, w2_ref, b2_ref, mint_ref,
                      sel_ref, w3_ref, b3_ref, w4_ref, b4_ref, m16_ref,
                      wsel2_ref, dmask_ref, asum_ref, bfold_ref, bc_ref,
                      o_ref, s1_ref, s2_ref, x3c_ref):
    CP = w1_ref.shape[0]           # padded hidden-channel count (16)
    K = asum_ref.shape[0]          # images packed per grid step
    NLANE = xs_ref.shape[1]        # K * NP
    KCP = x3c_ref.shape[0]         # K * CP

    def shifted(v, off, n):
        # shifted[..., q] == v[..., q + off]; circular wrap only reaches
        # positions that are masked / zero-weighted downstream.
        if off == 0:
            return v
        return pltpu.roll(v, (-off) % n, 1)

    # ---- block 1 : conv1 + ReLU (taps pre-stacked by the wrapper) ---------
    x2 = jnp.maximum(
        jnp.dot(w1_ref[...], xs_ref[...],
                preferred_element_type=jnp.float32) + b1_ref[...], 0.0)
    x2 = x2 * mint_ref[...]        # zero the 1-px border, lane tail, wrap junk

    # ---- block 1 : conv2 + ReLU (9 rolled copies -> one fused matmul) -----
    for t in range(9):
        dy, dx = t // 3, t % 3
        s1_ref[t * CP:(t + 1) * CP, :] = shifted(
            x2, (dy - 1) * WPAD + (dx - 1), NLANE)
    y2 = jnp.maximum(
        jnp.dot(w2_ref[...], s1_ref[...],
                preferred_element_type=jnp.float32) + b2_ref[...], 0.0)

    # ---- block 1 : maxpool 2x2 (valid values at stride-2 interior points) -
    x3 = jnp.maximum(jnp.maximum(y2, shifted(y2, 1, NLANE)),
                     jnp.maximum(shifted(y2, WPAD, NLANE),
                                 shifted(y2, WPAD + 1, NLANE)))

    # ---- compact to dense padded 16x16 grid, images stacked on sublanes ---
    sel = sel_ref[...]
    for k in range(K):
        x3c_ref[k * CP:(k + 1) * CP, :] = jnp.dot(
            x3[:, k * NP:(k + 1) * NP], sel,
            preferred_element_type=jnp.float32)

    # ---- block 2 : conv3/conv4 with per-image block-diagonal weights ------
    def conv16(x, w_ref, b_ref):
        for t in range(9):
            dy, dx = t // 3, t % 3
            s2_ref[t * KCP:(t + 1) * KCP, :] = shifted(
                x, (dy - 1) * W2P + (dx - 1), NP2)
        return jnp.maximum(
            jnp.dot(w_ref[...], s2_ref[...],
                    preferred_element_type=jnp.float32) + b_ref[...], 0.0)

    x4 = conv16(x3c_ref[...], w3_ref, b3_ref) * m16_ref[...]
    y4 = conv16(x4, w4_ref, b4_ref)

    # ---- block 2 : maxpool 2x2 (7x7 valid values at stride-2 points) ------
    m4 = jnp.maximum(jnp.maximum(y4, shifted(y4, 1, NP2)),
                     jnp.maximum(shifted(y4, W2P, NP2),
                                 shifted(y4, W2P + 1, NP2)))

    # ---- classifier for all K images: 3 small matmuls ---------------------
    # r2[k*CP+c, c'*Dout+d] = sum_q m4[k*CP+c, q] * Wlin[d, c', q]
    r2 = jnp.dot(m4, wsel2_ref[...], preferred_element_type=jnp.float32)
    r2 = r2 * dmask_ref[...]                        # keep c == c' terms only
    mid = jnp.dot(asum_ref[...], r2,                # sum channels per image
                  preferred_element_type=jnp.float32)
    out = jnp.dot(mid, bfold_ref[...],              # fold the C lane groups
                  preferred_element_type=jnp.float32) + bc_ref[...]
    o_ref[...] = out.astype(o_ref.dtype)


# ----------------------------------------------------------------------------
# One-time parameter repacking (hoisted out of the per-call forward)
# ----------------------------------------------------------------------------
def prepare_params(p, pack):
    f32 = jnp.float32
    w1 = p["w1"].astype(f32)
    C, cin = w1.shape[0], w1.shape[1]
    CP = ((C + 7) // 8) * 8
    dout = p["wc"].shape[0]
    DP = ((dout + 127) // 128) * 128
    K = pack
    pp = {}

    def tapmat(w, cin_pad):                         # (C,ci,3,3) -> (CP,9*cin_pad)
        ci = w.shape[1]
        arr = jnp.transpose(w.astype(f32), (0, 2, 3, 1)).reshape(C, 9, ci)
        out = jnp.zeros((CP, 9, cin_pad), f32).at[:C, :, :ci].set(arr)
        return out.reshape(CP, 9 * cin_pad)

    def biasp(b):
        return jnp.zeros((CP, 1), f32).at[:C, 0].set(b.astype(f32))

    pp["w1"], pp["b1"] = tapmat(w1, cin), biasp(p["b1"])
    pp["w2"], pp["b2"] = tapmat(p["w2"], CP), biasp(p["b2"])

    def blockdiag(w):                               # per-image block-diag weights
        arr = jnp.transpose(w.astype(f32), (0, 2, 3, 1)).reshape(C, 9, C)
        blk = jnp.zeros((CP, 9, CP), f32).at[:C, :, :C].set(arr)
        bd = jnp.zeros((K, CP, 9, K, CP), f32)
        for k in range(K):
            bd = bd.at[k, :, :, k, :].set(blk)
        return bd.reshape(K * CP, 9 * K * CP)

    def biasbd(b):
        bb = jnp.zeros((K, CP), f32).at[:, :C].set(b.astype(f32)[None, :])
        return bb.reshape(K * CP, 1)

    pp["w3"], pp["b3"] = blockdiag(p["w3"]), biasbd(p["b3"])
    pp["w4"], pp["b4"] = blockdiag(p["w4"]), biasbd(p["b4"])

    # interior (28x28) mask on the padded-flat 30x30 grid, tiled over K images
    mint = jnp.zeros((WPAD, WPAD), f32).at[1:WPAD - 1, 1:WPAD - 1].set(1.0)
    mint = jnp.pad(mint.reshape(1, NFLAT), ((0, 0), (0, NP - NFLAT)))
    pp["mint"] = jnp.tile(mint, (1, K))

    # interior (14x14) mask on the padded 16x16 block-2 grid
    m16 = jnp.zeros((W2P, W2P), f32).at[1:15, 1:15].set(1.0)
    pp["m16"] = m16.reshape(1, NP2)

    # selection matrix: stride-2 points of the 30-grid -> 16-grid interior
    ii = jnp.arange(14)
    src = ((1 + 2 * ii)[:, None] * WPAD + (1 + 2 * ii)[None, :]).reshape(-1)
    dst = ((1 + ii)[:, None] * W2P + (1 + ii)[None, :]).reshape(-1)
    pp["sel"] = jnp.zeros((NP, NP2), f32).at[src, dst].set(1.0)

    # classifier: Linear(C*7*7 -> dout) folded onto the 16-grid pool positions
    wc = p["wc"].astype(f32).reshape(dout, C, 49)
    i7 = jnp.arange(7)
    q49 = ((1 + 2 * i7)[:, None] * W2P + (1 + 2 * i7)[None, :]).reshape(-1)
    wsel2 = jnp.zeros((NP2, C, dout), f32).at[q49, :, :].set(
        jnp.transpose(wc, (2, 1, 0)))
    pp["wsel2"] = wsel2.reshape(NP2, C * dout)

    eyecp = jnp.zeros((CP, C), f32).at[jnp.arange(C), jnp.arange(C)].set(1.0)
    dmask = jnp.repeat(eyecp[:, :, None], dout, axis=2).reshape(CP, C * dout)
    pp["dmask"] = jnp.tile(dmask, (K, 1))
    pp["asum"] = jnp.kron(jnp.eye(K, dtype=f32), jnp.ones((1, CP), f32))
    pp["bfold"] = jnp.pad(jnp.tile(jnp.eye(dout, dtype=f32), (C, 1)),
                          ((0, 0), (0, DP - dout)))
    pp["bc"] = jnp.pad(p["bc"].astype(f32).reshape(1, dout),
                       ((0, 0), (0, DP - dout)))
    return pp


# ----------------------------------------------------------------------------
# Forward wrapper: single fused pallas_call over ceil(B / K) grid steps
# ----------------------------------------------------------------------------
@jax.jit
def cnn_forward(x_nchw, pp):
    f32 = jnp.float32
    B, cin = x_nchw.shape[0], x_nchw.shape[1]
    CP = pp["w1"].shape[0]
    K = pp["asum"].shape[0]
    DP = pp["bc"].shape[1]
    dout = pp["wsel2"].shape[1] // HIDDEN
    G = -(-B // K)                      # grid steps (>=2 keeps both v7x TCs busy)
    B_pad = G * K
    NL = K * NP

    x = x_nchw.astype(f32)
    if B_pad != B:
        x = jnp.pad(x, ((0, B_pad - B), (0, 0), (0, 0), (0, 0)))
    # pre-stack the 9 conv1 taps so conv1 is a single in-kernel matmul
    taps = [jnp.pad(x, ((0, 0), (0, 0), (2 - ky, ky), (2 - kx, kx)))
            for ky in range(3) for kx in range(3)]          # (B_pad,cin,30,30)
    xs = jnp.stack(taps, axis=1).reshape(B_pad, 9 * cin, NFLAT)
    xs = jnp.pad(xs, ((0, 0), (0, 0), (0, NP - NFLAT)))
    xs = jnp.transpose(xs, (1, 0, 2)).reshape(9 * cin, B_pad * NP)

    c2 = lambda i: (0, 0)
    specs = [
        pl.BlockSpec((9 * cin, NL), lambda i: (0, i)),       # lane-packed taps
        pl.BlockSpec(pp["w1"].shape, c2), pl.BlockSpec(pp["b1"].shape, c2),
        pl.BlockSpec(pp["w2"].shape, c2), pl.BlockSpec(pp["b2"].shape, c2),
        pl.BlockSpec(pp["mint"].shape, c2),
        pl.BlockSpec(pp["sel"].shape, c2),
        pl.BlockSpec(pp["w3"].shape, c2), pl.BlockSpec(pp["b3"].shape, c2),
        pl.BlockSpec(pp["w4"].shape, c2), pl.BlockSpec(pp["b4"].shape, c2),
        pl.BlockSpec(pp["m16"].shape, c2),
        pl.BlockSpec(pp["wsel2"].shape, c2),
        pl.BlockSpec(pp["dmask"].shape, c2),
        pl.BlockSpec(pp["asum"].shape, c2),
        pl.BlockSpec(pp["bfold"].shape, c2),
        pl.BlockSpec(pp["bc"].shape, c2),
    ]
    out = pl.pallas_call(
        _cnn_fused_kernel,
        out_shape=jax.ShapeDtypeStruct((B_pad, DP), f32),
        grid=(G,),
        in_specs=specs,
        out_specs=pl.BlockSpec((K, DP), lambda i: (i, 0)),
        scratch_shapes=[
            pltpu.VMEM((9 * CP, NL), f32),       # conv2 rolled-tap stack
            pltpu.VMEM((9 * K * CP, NP2), f32),  # conv3/conv4 rolled-tap stack
            pltpu.VMEM((K * CP, NP2), f32),      # compact block-2 activations
        ],
        compiler_params=pltpu.CompilerParams(
            dimension_semantics=("parallel",),
            vmem_limit_bytes=32 * 1024 * 1024),
    )(xs, pp["w1"], pp["b1"], pp["w2"], pp["b2"], pp["mint"], pp["sel"],
      pp["w3"], pp["b3"], pp["w4"], pp["b4"], pp["m16"], pp["wsel2"],
      pp["dmask"], pp["asum"], pp["bfold"], pp["bc"])
    return out[:B, :dout]


# ----------------------------------------------------------------------------
# Pure-JAX reference (correctness check only)
# ----------------------------------------------------------------------------
def _ref_forward(x_nchw, p):
    def conv(x, w, b):
        y = lax.conv_general_dilated(x, w, (1, 1), ((1, 1), (1, 1)),
                                     dimension_numbers=("NCHW", "OIHW", "NCHW"))
        return jnp.maximum(y + b[None, :, None, None], 0.0)

    def pool(x):
        return lax.reduce_window(x, -jnp.inf, lax.max,
                                 (1, 1, 2, 2), (1, 1, 2, 2), "VALID")

    x = conv(x_nchw, p["w1"], p["b1"])
    x = pool(conv(x, p["w2"], p["b2"]))
    x = conv(x, p["w3"], p["b3"])
    x = pool(conv(x, p["w4"], p["b4"]))
    x = x.reshape(x.shape[0], -1)
    return x @ p["wc"].T + p["bc"]


# ----------------------------------------------------------------------------
# Deterministic parameter init (PyTorch-default-style uniform bounds)
# ----------------------------------------------------------------------------
def _uniform(key, shape, bound):
    return jax.random.uniform(key, shape, jnp.float32, -bound, bound)


def init_params(key, input_layer, hidden, output_layer):
    ks = jax.random.split(key, 10)
    p = {}
    chans = [(input_layer, hidden), (hidden, hidden),
             (hidden, hidden), (hidden, hidden)]
    for n, (cin, cout) in enumerate(chans, start=1):
        bound = 1.0 / (cin * 9) ** 0.5
        p[f"w{n}"] = _uniform(ks[2 * n - 2], (cout, cin, 3, 3), bound)
        p[f"b{n}"] = _uniform(ks[2 * n - 1], (cout,), bound)
    fan_in = hidden * 7 * 7
    bound = 1.0 / fan_in ** 0.5
    p["wc"] = _uniform(ks[8], (output_layer, fan_in), bound)
    p["bc"] = _uniform(ks[9], (output_layer,), bound)
    return p


if __name__ == "__main__":
    B, INPUT_LAYER, OUTPUT_LAYER = 2, 1, 10
    key = jax.random.PRNGKey(0)
    k_x, k_p = jax.random.split(key)
    x = jax.random.normal(k_x, (B, INPUT_LAYER, H_IMG, H_IMG), jnp.float32)
    params = init_params(k_p, INPUT_LAYER, HIDDEN, OUTPUT_LAYER)

    pack = MAX_PACK if B >= MAX_PACK else B
    prepped = prepare_params(params, pack)       # one-time weight repacking
    out = jax.block_until_ready(cnn_forward(x, prepped))
    assert out.shape == (B, OUTPUT_LAYER), out.shape

    ref = jax.block_until_ready(_ref_forward(x, params))
    assert jnp.allclose(out, ref, atol=5e-3, rtol=5e-3), (
        float(jnp.max(jnp.abs(out - ref))))

    print("KERNEL_OK")
</pallas_src>

<mosaic_0001>
module attributes {stable_mosaic.version = 11 : i64} {
  func.func @_cnn_fused_kernel(%arg0: i32, %arg1: memref<9x2048xf32, #tpu.memory_space<vmem>>, %arg2: memref<16x9xf32, #tpu.memory_space<vmem>>, %arg3: memref<16x1xf32, #tpu.memory_space<vmem>>, %arg4: memref<16x144xf32, #tpu.memory_space<vmem>>, %arg5: memref<16x1xf32, #tpu.memory_space<vmem>>, %arg6: memref<1x2048xf32, #tpu.memory_space<vmem>>, %arg7: memref<1024x256xf32, #tpu.memory_space<vmem>>, %arg8: memref<32x288xf32, #tpu.memory_space<vmem>>, %arg9: memref<32x1xf32, #tpu.memory_space<vmem>>, %arg10: memref<32x288xf32, #tpu.memory_space<vmem>>, %arg11: memref<32x1xf32, #tpu.memory_space<vmem>>, %arg12: memref<1x256xf32, #tpu.memory_space<vmem>>, %arg13: memref<256x100xf32, #tpu.memory_space<vmem>>, %arg14: memref<32x100xf32, #tpu.memory_space<vmem>>, %arg15: memref<2x32xf32, #tpu.memory_space<vmem>>, %arg16: memref<100x128xf32, #tpu.memory_space<vmem>>, %arg17: memref<1x128xf32, #tpu.memory_space<vmem>>, %arg18: memref<2x128xf32, #tpu.memory_space<vmem>>, %arg19: memref<144x2048xf32, #tpu.memory_space<vmem>>, %arg20: memref<288x256xf32, #tpu.memory_space<vmem>>, %arg21: memref<32x256xf32, #tpu.memory_space<vmem>>) attributes {dimension_semantics = [#tpu.dimension_semantics<parallel>], iteration_bounds = array<i64: 1>, scalar_prefetch = 0 : i64, scratch_operands = 3 : i64, tpu.core_type = #tpu.core_type<tc>, window_params = [{transform_indices = @transform_0, window_bounds = array<i64: 9, 2048>}, {pipeline_mode = #tpu.pipeline_mode<synchronous>, transform_indices = @transform_1, window_bounds = array<i64: 16, 9>}, {pipeline_mode = #tpu.pipeline_mode<synchronous>, transform_indices = @transform_2, window_bounds = array<i64: 16, 1>}, {pipeline_mode = #tpu.pipeline_mode<synchronous>, transform_indices = @transform_3, window_bounds = array<i64: 16, 144>}, {pipeline_mode = #tpu.pipeline_mode<synchronous>, transform_indices = @transform_4, window_bounds = array<i64: 16, 1>}, {pipeline_mode = #tpu.pipeline_mode<synchronous>, transform_indices = @transform_5, window_bounds = array<i64: 1, 2048>}, {pipeline_mode = #tpu.pipeline_mode<synchronous>, transform_indices = @transform_6, window_bounds = array<i64: 1024, 256>}, {pipeline_mode = #tpu.pipeline_mode<synchronous>, transform_indices = @transform_7, window_bounds = array<i64: 32, 288>}, {pipeline_mode = #tpu.pipeline_mode<synchronous>, transform_indices = @transform_8, window_bounds = array<i64: 32, 1>}, {pipeline_mode = #tpu.pipeline_mode<synchronous>, transform_indices = @transform_9, window_bounds = array<i64: 32, 288>}, {pipeline_mode = #tpu.pipeline_mode<synchronous>, transform_indices = @transform_10, window_bounds = array<i64: 32, 1>}, {pipeline_mode = #tpu.pipeline_mode<synchronous>, transform_indices = @transform_11, window_bounds = array<i64: 1, 256>}, {pipeline_mode = #tpu.pipeline_mode<synchronous>, transform_indices = @transform_12, window_bounds = array<i64: 256, 100>}, {pipeline_mode = #tpu.pipeline_mode<synchronous>, transform_indices = @transform_13, window_bounds = array<i64: 32, 100>}, {pipeline_mode = #tpu.pipeline_mode<synchronous>, transform_indices = @transform_14, window_bounds = array<i64: 2, 32>}, {pipeline_mode = #tpu.pipeline_mode<synchronous>, transform_indices = @transform_15, window_bounds = array<i64: 100, 128>}, {pipeline_mode = #tpu.pipeline_mode<synchronous>, transform_indices = @transform_16, window_bounds = array<i64: 1, 128>}, {transform_indices = @transform_17, window_bounds = array<i64: 2, 128>}]} {
    %c0 = arith.constant 0 : index
    %c0_0 = arith.constant 0 : index
    %0 = vector.load %arg2[%c0, %c0_0] : memref<16x9xf32, #tpu.memory_space<vmem>>, vector<16x9xf32>
    %c0_1 = arith.constant 0 : index
    %c0_2 = arith.constant 0 : index
    %1 = vector.load %arg1[%c0_1, %c0_2] : memref<9x2048xf32, #tpu.memory_space<vmem>>, vector<9x2048xf32>
    %cst = arith.constant dense<0.000000e+00> : vector<16x2048xf32>
    %2 = tpu.matmul %0, %1, %cst {dimension_numbers = #tpu.dot_dimension_numbers<[1], [0], [0], [1], [0, 0, 1, 1], [], []>} : vector<16x9xf32>, vector<9x2048xf32>, vector<16x2048xf32> -> vector<16x2048xf32>
    %c0_3 = arith.constant 0 : index
    %c0_4 = arith.constant 0 : index
    %3 = vector.load %arg3[%c0_3, %c0_4] : memref<16x1xf32, #tpu.memory_space<vmem>>, vector<16x1xf32>
    %4 = vector.broadcast %3 : vector<16x1xf32> to vector<16x2048xf32>
    %5 = arith.addf %2, %4 : vector<16x2048xf32>
    %cst_5 = arith.constant 0.000000e+00 : f32
    %6 = vector.broadcast %cst_5 : f32 to vector<16x2048xf32>
    %7 = arith.maximumf %5, %6 : vector<16x2048xf32>
    %c0_6 = arith.constant 0 : index
    %c0_7 = arith.constant 0 : index
    %8 = vector.load %arg6[%c0_6, %c0_7] : memref<1x2048xf32, #tpu.memory_space<vmem>>, vector<1x2048xf32>
    %9 = vector.broadcast %8 : vector<1x2048xf32> to vector<16x2048xf32>
    %10 = arith.mulf %7, %9 : vector<16x2048xf32>
    %c31_i32 = arith.constant 31 : i32
    %11 = tpu.dynamic_rotate %10 by %c31_i32 dim 1 : vector<16x2048xf32>, i32 -> vector<16x2048xf32>
    %c0_8 = arith.constant 0 : index
    %c0_9 = arith.constant 0 : index
    %12 = vector.load %arg19[%c0_8, %c0_9] : memref<144x2048xf32, #tpu.memory_space<vmem>>, vector<16x2048xf32>
    tpu.vector_store %arg19[%c0_8, %c0_9], %11 {strides = array<i32>} : memref<144x2048xf32, #tpu.memory_space<vmem>>, vector<16x2048xf32>,
    %c30_i32 = arith.constant 30 : i32
    %13 = tpu.dynamic_rotate %10 by %c30_i32 dim 1 : vector<16x2048xf32>, i32 -> vector<16x2048xf32>
    %c16 = arith.constant 16 : index
    %c0_10 = arith.constant 0 : index
    %14 = vector.load %arg19[%c16, %c0_10] : memref<144x2048xf32, #tpu.memory_space<vmem>>, vector<16x2048xf32>
    tpu.vector_store %arg19[%c16, %c0_10], %13 {strides = array<i32>} : memref<144x2048xf32, #tpu.memory_space<vmem>>, vector<16x2048xf32>,
    %c29_i32 = arith.constant 29 : i32
    %15 = tpu.dynamic_rotate %10 by %c29_i32 dim 1 : vector<16x2048xf32>, i32 -> vector<16x2048xf32>
    %c32 = arith.constant 32 : index
    %c0_11 = arith.constant 0 : index
    %16 = vector.load %arg19[%c32, %c0_11] : memref<144x2048xf32, #tpu.memory_space<vmem>>, vector<16x2048xf32>
    tpu.vector_store %arg19[%c32, %c0_11], %15 {strides = array<i32>} : memref<144x2048xf32, #tpu.memory_space<vmem>>, vector<16x2048xf32>,
    %c1_i32 = arith.constant 1 : i32
    %17 = tpu.dynamic_rotate %10 by %c1_i32 dim 1 : vector<16x2048xf32>, i32 -> vector<16x2048xf32>
    %c48 = arith.constant 48 : index
    %c0_12 = arith.constant 0 : index
    %18 = vector.load %arg19[%c48, %c0_12] : memref<144x2048xf32, #tpu.memory_space<vmem>>, vector<16x2048xf32>
    tpu.vector_store %arg19[%c48, %c0_12], %17 {strides = array<i32>} : memref<144x2048xf32, #tpu.memory_space<vmem>>, vector<16x2048xf32>,
    %c64 = arith.constant 64 : index
    %c0_13 = arith.constant 0 : index
    %19 = vector.load %arg19[%c64, %c0_13] : memref<144x2048xf32, #tpu.memory_space<vmem>>, vector<16x2048xf32>
    tpu.vector_store %arg19[%c64, %c0_13], %10 {strides = array<i32>} : memref<144x2048xf32, #tpu.memory_space<vmem>>, vector<16x2048xf32>,
    %c2047_i32 = arith.constant 2047 : i32
    %20 = tpu.dynamic_rotate %10 by %c2047_i32 dim 1 : vector<16x2048xf32>, i32 -> vector<16x2048xf32>
    %c80 = arith.constant 80 : index
    %c0_14 = arith.constant 0 : index
    %21 = vector.load %arg19[%c80, %c0_14] : memref<144x2048xf32, #tpu.memory_space<vmem>>, vector<16x2048xf32>
    tpu.vector_store %arg19[%c80, %c0_14], %20 {strides = array<i32>} : memref<144x2048xf32, #tpu.memory_space<vmem>>, vector<16x2048xf32>,
    %c2019_i32 = arith.constant 2019 : i32
    %22 = tpu.dynamic_rotate %10 by %c2019_i32 dim 1 : vector<16x2048xf32>, i32 -> vector<16x2048xf32>
    %c96 = arith.constant 96 : index
    %c0_15 = arith.constant 0 : index
    %23 = vector.load %arg19[%c96, %c0_15] : memref<144x2048xf32, #tpu.memory_space<vmem>>, vector<16x2048xf32>
    tpu.vector_store %arg19[%c96, %c0_15], %22 {strides = array<i32>} : memref<144x2048xf32, #tpu.memory_space<vmem>>, vector<16x2048xf32>,
    %c2018_i32 = arith.constant 2018 : i32
    %24 = tpu.dynamic_rotate %10 by %c2018_i32 dim 1 : vector<16x2048xf32>, i32 -> vector<16x2048xf32>
    %c112 = arith.constant 112 : index
    %c0_16 = arith.constant 0 : index
    %25 = vector.load %arg19[%c112, %c0_16] : memref<144x2048xf32, #tpu.memory_space<vmem>>, vector<16x2048xf32>
    tpu.vector_store %arg19[%c112, %c0_16], %24 {strides = array<i32>} : memref<144x2048xf32, #tpu.memory_space<vmem>>, vector<16x2048xf32>,
    %c2017_i32 = arith.constant 2017 : i32
    %26 = tpu.dynamic_rotate %10 by %c2017_i32 dim 1 : vector<16x2048xf32>, i32 -> vector<16x2048xf32>
    %c128 = arith.constant 128 : index
    %c0_17 = arith.constant 0 : index
    %27 = vector.load %arg19[%c128, %c0_17] : memref<144x2048xf32, #tpu.memory_space<vmem>>, vector<16x2048xf32>
    tpu.vector_store %arg19[%c128, %c0_17], %26 {strides = array<i32>} : memref<144x2048xf32, #tpu.memory_space<vmem>>, vector<16x2048xf32>,
    %c0_18 = arith.constant 0 : index
    %c0_19 = arith.constant 0 : index
    %28 = vector.load %arg4[%c0_18, %c0_19] : memref<16x144xf32, #tpu.memory_space<vmem>>, vector<16x144xf32>
    %c0_20 = arith.constant 0 : index
    %c0_21 = arith.constant 0 : index
    %29 = vector.load %arg19[%c0_20, %c0_21] : memref<144x2048xf32, #tpu.memory_space<vmem>>, vector<144x2048xf32>
    %cst_22 = arith.constant dense<0.000000e+00> : vector<16x2048xf32>
    %30 = tpu.matmul %28, %29, %cst_22 {dimension_numbers = #tpu.dot_dimension_numbers<[1], [0], [0], [1], [0, 0, 1, 1], [], []>} : vector<16x144xf32>, vector<144x2048xf32>, vector<16x2048xf32> -> vector<16x2048xf32>
    %c0_23 = arith.constant 0 : index
    %c0_24 = arith.constant 0 : index
    %31 = vector.load %arg5[%c0_23, %c0_24] : memref<16x1xf32, #tpu.memory_space<vmem>>, vector<16x1xf32>
    %32 = vector.broadcast %31 : vector<16x1xf32> to vector<16x2048xf32>
    %33 = arith.addf %30, %32 : vector<16x2048xf32>
    %cst_25 = arith.constant 0.000000e+00 : f32
    %34 = vector.broadcast %cst_25 : f32 to vector<16x2048xf32>
    %35 = arith.maximumf %33, %34 : vector<16x2048xf32>
    %c2047_i32_26 = arith.constant 2047 : i32
    %36 = tpu.dynamic_rotate %35 by %c2047_i32_26 dim 1 : vector<16x2048xf32>, i32 -> vector<16x2048xf32>
    %37 = arith.maximumf %35, %36 : vector<16x2048xf32>
    %c2018_i32_27 = arith.constant 2018 : i32
    %38 = tpu.dynamic_rotate %35 by %c2018_i32_27 dim 1 : vector<16x2048xf32>, i32 -> vector<16x2048xf32>
    %c2017_i32_28 = arith.constant 2017 : i32
    %39 = tpu.dynamic_rotate %35 by %c2017_i32_28 dim 1 : vector<16x2048xf32>, i32 -> vector<16x2048xf32>
    %40 = arith.maximumf %38, %39 : vector<16x2048xf32>
    %41 = arith.maximumf %37, %40 : vector<16x2048xf32>
    %c0_29 = arith.constant 0 : index
    %c0_30 = arith.constant 0 : index
    %42 = vector.load %arg7[%c0_29, %c0_30] : memref<1024x256xf32, #tpu.memory_space<vmem>>, vector<1024x256xf32>
    %43 = vector.extract_strided_slice %41 {offsets = [0, 0], sizes = [16, 1024], strides = [1, 1]} : vector<16x2048xf32> to vector<16x1024xf32>
    %cst_31 = arith.constant dense<0.000000e+00> : vector<16x256xf32>
    %44 = tpu.matmul %43, %42, %cst_31 {dimension_numbers = #tpu.dot_dimension_numbers<[1], [0], [0], [1], [0, 0, 1, 1], [], []>} : vector<16x1024xf32>, vector<1024x256xf32>, vector<16x256xf32> -> vector<16x256xf32>
    %c0_32 = arith.constant 0 : index
    %c0_33 = arith.constant 0 : index
    %45 = vector.load %arg21[%c0_32, %c0_33] : memref<32x256xf32, #tpu.memory_space<vmem>>, vector<16x256xf32>
    tpu.vector_store %arg21[%c0_32, %c0_33], %44 {strides = array<i32>} : memref<32x256xf32, #tpu.memory_space<vmem>>, vector<16x256xf32>,
    %46 = vector.extract_strided_slice %41 {offsets = [0, 1024], sizes = [16, 1024], strides = [1, 1]} : vector<16x2048xf32> to vector<16x1024xf32>
    %cst_34 = arith.constant dense<0.000000e+00> : vector<16x256xf32>
    %47 = tpu.matmul %46, %42, %cst_34 {dimension_numbers = #tpu.dot_dimension_numbers<[1], [0], [0], [1], [0, 0, 1, 1], [], []>} : vector<16x1024xf32>, vector<1024x256xf32>, vector<16x256xf32> -> vector<16x256xf32>
    %c16_35 = arith.constant 16 : index
    %c0_36 = arith.constant 0 : index
    %48 = vector.load %arg21[%c16_35, %c0_36] : memref<32x256xf32, #tpu.memory_space<vmem>>, vector<16x256xf32>
    tpu.vector_store %arg21[%c16_35, %c0_36], %47 {strides = array<i32>} : memref<32x256xf32, #tpu.memory_space<vmem>>, vector<16x256xf32>,
    %c0_37 = arith.constant 0 : index
    %c0_38 = arith.constant 0 : index
    %49 = vector.load %arg21[%c0_37, %c0_38] : memref<32x256xf32, #tpu.memory_space<vmem>>, vector<32x256xf32>
    %c17_i32 = arith.constant 17 : i32
    %50 = tpu.dynamic_rotate %49 by %c17_i32 dim 1 : vector<32x256xf32>, i32 -> vector<32x256xf32>
    %c0_39 = arith.constant 0 : index
    %c0_40 = arith.constant 0 : index
    %51 = vector.load %arg20[%c0_39, %c0_40] : memref<288x256xf32, #tpu.memory_space<vmem>>, vector<32x256xf32>
    tpu.vector_store %arg20[%c0_39, %c0_40], %50 {strides = array<i32>} : memref<288x256xf32, #tpu.memory_space<vmem>>, vector<32x256xf32>,
    %c16_i32 = arith.constant 16 : i32
    %52 = tpu.dynamic_rotate %49 by %c16_i32 dim 1 : vector<32x256xf32>, i32 -> vector<32x256xf32>
    %c32_41 = arith.constant 32 : index
    %c0_42 = arith.constant 0 : index
    %53 = vector.load %arg20[%c32_41, %c0_42] : memref<288x256xf32, #tpu.memory_space<vmem>>, vector<32x256xf32>
    tpu.vector_store %arg20[%c32_41, %c0_42], %52 {strides = array<i32>} : memref<288x256xf32, #tpu.memory_space<vmem>>, vector<32x256xf32>,
    %c15_i32 = arith.constant 15 : i32
    %54 = tpu.dynamic_rotate %49 by %c15_i32 dim 1 : vector<32x256xf32>, i32 -> vector<32x256xf32>
    %c64_43 = arith.constant 64 : index
    %c0_44 = arith.constant 0 : index
    %55 = vector.load %arg20[%c64_43, %c0_44] : memref<288x256xf32, #tpu.memory_space<vmem>>, vector<32x256xf32>
    tpu.vector_store %arg20[%c64_43, %c0_44], %54 {strides = array<i32>} : memref<288x256xf32, #tpu.memory_space<vmem>>, vector<32x256xf32>,
    %c1_i32_45 = arith.constant 1 : i32
    %56 = tpu.dynamic_rotate %49 by %c1_i32_45 dim 1 : vector<32x256xf32>, i32 -> vector<32x256xf32>
    %c96_46 = arith.constant 96 : index
    %c0_47 = arith.constant 0 : index
    %57 = vector.load %arg20[%c96_46, %c0_47] : memref<288x256xf32, #tpu.memory_space<vmem>>, vector<32x256xf32>
    tpu.vector_store %arg20[%c96_46, %c0_47], %56 {strides = array<i32>} : memref<288x256xf32, #tpu.memory_space<vmem>>, vector<32x256xf32>,
    %c128_48 = arith.constant 128 : index
    %c0_49 = arith.constant 0 : index
    %58 = vector.load %arg20[%c128_48, %c0_49] : memref<288x256xf32, #tpu.memory_space<vmem>>, vector<32x256xf32>
    tpu.vector_store %arg20[%c128_48, %c0_49], %49 {strides = array<i32>} : memref<288x256xf32, #tpu.memory_space<vmem>>, vector<32x256xf32>,
    %c255_i32 = arith.constant 255 : i32
    %59 = tpu.dynamic_rotate %49 by %c255_i32 dim 1 : vector<32x256xf32>, i32 -> vector<32x256xf32>
    %c160 = arith.constant 160 : index
    %c0_50 = arith.constant 0 : index
    %60 = vector.load %arg20[%c160, %c0_50] : memref<288x256xf32, #tpu.memory_space<vmem>>, vector<32x256xf32>
    tpu.vector_store %arg20[%c160, %c0_50], %59 {strides = array<i32>} : memref<288x256xf32, #tpu.memory_space<vmem>>, vector<32x256xf32>,
    %c241_i32 = arith.constant 241 : i32
    %61 = tpu.dynamic_rotate %49 by %c241_i32 dim 1 : vector<32x256xf32>, i32 -> vector<32x256xf32>
    %c192 = arith.constant 192 : index
    %c0_51 = arith.constant 0 : index
    %62 = vector.load %arg20[%c192, %c0_51] : memref<288x256xf32, #tpu.memory_space<vmem>>, vector<32x256xf32>
    tpu.vector_store %arg20[%c192, %c0_51], %61 {strides = array<i32>} : memref<288x256xf32, #tpu.memory_space<vmem>>, vector<32x256xf32>,
    %c240_i32 = arith.constant 240 : i32
    %63 = tpu.dynamic_rotate %49 by %c240_i32 dim 1 : vector<32x256xf32>, i32 -> vector<32x256xf32>
    %c224 = arith.constant 224 : index
    %c0_52 = arith.constant 0 : index
    %64 = vector.load %arg20[%c224, %c0_52] : memref<288x256xf32, #tpu.memory_space<vmem>>, vector<32x256xf32>
    tpu.vector_store %arg20[%c224, %c0_52], %63 {strides = array<i32>} : memref<288x256xf32, #tpu.memory_space<vmem>>, vector<32x256xf32>,
    %c239_i32 = arith.constant 239 : i32
    %65 = tpu.dynamic_rotate %49 by %c239_i32 dim 1 : vector<32x256xf32>, i32 -> vector<32x256xf32>
    %c256 = arith.constant 256 : index
    %c0_53 = arith.constant 0 : index
    %66 = vector.load %arg20[%c256, %c0_53] : memref<288x256xf32, #tpu.memory_space<vmem>>, vector<32x256xf32>
    tpu.vector_store %arg20[%c256, %c0_53], %65 {strides = array<i32>} : memref<288x256xf32, #tpu.memory_space<vmem>>, vector<32x256xf32>,
    %c0_54 = arith.constant 0 : index
    %c0_55 = arith.constant 0 : index
    %67 = vector.load %arg8[%c0_54, %c0_55] : memref<32x288xf32, #tpu.memory_space<vmem>>, vector<32x288xf32>
    %c0_56 = arith.constant 0 : index
    %c0_57 = arith.constant 0 : index
    %68 = vector.load %arg20[%c0_56, %c0_57] : memref<288x256xf32, #tpu.memory_space<vmem>>, vector<288x256xf32>
    %cst_58 = arith.constant dense<0.000000e+00> : vector<32x256xf32>
    %69 = tpu.matmul %67, %68, %cst_58 {dimension_numbers = #tpu.dot_dimension_numbers<[1], [0], [0], [1], [0, 0, 1, 1], [], []>} : vector<32x288xf32>, vector<288x256xf32>, vector<32x256xf32> -> vector<32x256xf32>
    %c0_59 = arith.constant 0 : index
    %c0_60 = arith.constant 0 : index
    %70 = vector.load %arg9[%c0_59, %c0_60] : memref<32x1xf32, #tpu.memory_space<vmem>>, vector<32x1xf32>
    %71 = vector.broadcast %70 : vector<32x1xf32> to vector<32x256xf32>
    %72 = arith.addf %69, %71 : vector<32x256xf32>
    %cst_61 = arith.constant 0.000000e+00 : f32
    %73 = vector.broadcast %cst_61 : f32 to vector<32x256xf32>
    %74 = arith.maximumf %72, %73 : vector<32x256xf32>
    %c0_62 = arith.constant 0 : index
    %c0_63 = arith.constant 0 : index
    %75 = vector.load %arg12[%c0_62, %c0_63] : memref<1x256xf32, #tpu.memory_space<vmem>>, vector<1x256xf32>
    %76 = vector.broadcast %75 : vector<1x256xf32> to vector<32x256xf32>
    %77 = arith.mulf %74, %76 : vector<32x256xf32>
    %c17_i32_64 = arith.constant 17 : i32
    %78 = tpu.dynamic_rotate %77 by %c17_i32_64 dim 1 : vector<32x256xf32>, i32 -> vector<32x256xf32>
    %c0_65 = arith.constant 0 : index
    %c0_66 = arith.constant 0 : index
    %79 = vector.load %arg20[%c0_65, %c0_66] : memref<288x256xf32, #tpu.memory_space<vmem>>, vector<32x256xf32>
    tpu.vector_store %arg20[%c0_65, %c0_66], %78 {strides = array<i32>} : memref<288x256xf32, #tpu.memory_space<vmem>>, vector<32x256xf32>,
    %c16_i32_67 = arith.constant 16 : i32
    %80 = tpu.dynamic_rotate %77 by %c16_i32_67 dim 1 : vector<32x256xf32>, i32 -> vector<32x256xf32>
    %c32_68 = arith.constant 32 : index
    %c0_69 = arith.constant 0 : index
    %81 = vector.load %arg20[%c32_68, %c0_69] : memref<288x256xf32, #tpu.memory_space<vmem>>, vector<32x256xf32>
    tpu.vector_store %arg20[%c32_68, %c0_69], %80 {strides = array<i32>} : memref<288x256xf32, #tpu.memory_space<vmem>>, vector<32x256xf32>,
    %c15_i32_70 = arith.constant 15 : i32
    %82 = tpu.dynamic_rotate %77 by %c15_i32_70 dim 1 : vector<32x256xf32>, i32 -> vector<32x256xf32>
    %c64_71 = arith.constant 64 : index
    %c0_72 = arith.constant 0 : index
    %83 = vector.load %arg20[%c64_71, %c0_72] : memref<288x256xf32, #tpu.memory_space<vmem>>, vector<32x256xf32>
    tpu.vector_store %arg20[%c64_71, %c0_72], %82 {strides = array<i32>} : memref<288x256xf32, #tpu.memory_space<vmem>>, vector<32x256xf32>,
    %c1_i32_73 = arith.constant 1 : i32
    %84 = tpu.dynamic_rotate %77 by %c1_i32_73 dim 1 : vector<32x256xf32>, i32 -> vector<32x256xf32>
    %c96_74 = arith.constant 96 : index
    %c0_75 = arith.constant 0 : index
    %85 = vector.load %arg20[%c96_74, %c0_75] : memref<288x256xf32, #tpu.memory_space<vmem>>, vector<32x256xf32>
    tpu.vector_store %arg20[%c96_74, %c0_75], %84 {strides = array<i32>} : memref<288x256xf32, #tpu.memory_space<vmem>>, vector<32x256xf32>,
    %c128_76 = arith.constant 128 : index
    %c0_77 = arith.constant 0 : index
    %86 = vector.load %arg20[%c128_76, %c0_77] : memref<288x256xf32, #tpu.memory_space<vmem>>, vector<32x256xf32>
    tpu.vector_store %arg20[%c128_76, %c0_77], %77 {strides = array<i32>} : memref<288x256xf32, #tpu.memory_space<vmem>>, vector<32x256xf32>,
    %c255_i32_78 = arith.constant 255 : i32
    %87 = tpu.dynamic_rotate %77 by %c255_i32_78 dim 1 : vector<32x256xf32>, i32 -> vector<32x256xf32>
    %c160_79 = arith.constant 160 : index
    %c0_80 = arith.constant 0 : index
    %88 = vector.load %arg20[%c160_79, %c0_80] : memref<288x256xf32, #tpu.memory_space<vmem>>, vector<32x256xf32>
    tpu.vector_store %arg20[%c160_79, %c0_80], %87 {strides = array<i32>} : memref<288x256xf32, #tpu.memory_space<vmem>>, vector<32x256xf32>,
    %c241_i32_81 = arith.constant 241 : i32
    %89 = tpu.dynamic_rotate %77 by %c241_i32_81 dim 1 : vector<32x256xf32>, i32 -> vector<32x256xf32>
    %c192_82 = arith.constant 192 : index
    %c0_83 = arith.constant 0 : index
    %90 = vector.load %arg20[%c192_82, %c0_83] : memref<288x256xf32, #tpu.memory_space<vmem>>, vector<32x256xf32>
    tpu.vector_store %arg20[%c192_82, %c0_83], %89 {strides = array<i32>} : memref<288x256xf32, #tpu.memory_space<vmem>>, vector<32x256xf32>,
    %c240_i32_84 = arith.constant 240 : i32
    %91 = tpu.dynamic_rotate %77 by %c240_i32_84 dim 1 : vector<32x256xf32>, i32 -> vector<32x256xf32>
    %c224_85 = arith.constant 224 : index
    %c0_86 = arith.constant 0 : index
    %92 = vector.load %arg20[%c224_85, %c0_86] : memref<288x256xf32, #tpu.memory_space<vmem>>, vector<32x256xf32>
    tpu.vector_store %arg20[%c224_85, %c0_86], %91 {strides = array<i32>} : memref<288x256xf32, #tpu.memory_space<vmem>>, vector<32x256xf32>,
    %c239_i32_87 = arith.constant 239 : i32
    %93 = tpu.dynamic_rotate %77 by %c239_i32_87 dim 1 : vector<32x256xf32>, i32 -> vector<32x256xf32>
    %c256_88 = arith.constant 256 : index
    %c0_89 = arith.constant 0 : index
    %94 = vector.load %arg20[%c256_88, %c0_89] : memref<288x256xf32, #tpu.memory_space<vmem>>, vector<32x256xf32>
    tpu.vector_store %arg20[%c256_88, %c0_89], %93 {strides = array<i32>} : memref<288x256xf32, #tpu.memory_space<vmem>>, vector<32x256xf32>,
    %c0_90 = arith.constant 0 : index
    %c0_91 = arith.constant 0 : index
    %95 = vector.load %arg10[%c0_90, %c0_91] : memref<32x288xf32, #tpu.memory_space<vmem>>, vector<32x288xf32>
    %c0_92 = arith.constant 0 : index
    %c0_93 = arith.constant 0 : index
    %96 = vector.load %arg20[%c0_92, %c0_93] : memref<288x256xf32, #tpu.memory_space<vmem>>, vector<288x256xf32>
    %cst_94 = arith.constant dense<0.000000e+00> : vector<32x256xf32>
    %97 = tpu.matmul %95, %96, %cst_94 {dimension_numbers = #tpu.dot_dimension_numbers<[1], [0], [0], [1], [0, 0, 1, 1], [], []>} : vector<32x288xf32>, vector<288x256xf32>, vector<32x256xf32> -> vector<32x256xf32>
    %c0_95 = arith.constant 0 : index
    %c0_96 = arith.constant 0 : index
    %98 = vector.load %arg11[%c0_95, %c0_96] : memref<32x1xf32, #tpu.memory_space<vmem>>, vector<32x1xf32>
    %99 = vector.broadcast %98 : vector<32x1xf32> to vector<32x256xf32>
    %100 = arith.addf %97, %99 : vector<32x256xf32>
    %cst_97 = arith.constant 0.000000e+00 : f32
    %101 = vector.broadcast %cst_97 : f32 to vector<32x256xf32>
    %102 = arith.maximumf %100, %101 : vector<32x256xf32>
    %c255_i32_98 = arith.constant 255 : i32
    %103 = tpu.dynamic_rotate %102 by %c255_i32_98 dim 1 : vector<32x256xf32>, i32 -> vector<32x256xf32>
    %104 = arith.maximumf %102, %103 : vector<32x256xf32>
    %c240_i32_99 = arith.constant 240 : i32
    %105 = tpu.dynamic_rotate %102 by %c240_i32_99 dim 1 : vector<32x256xf32>, i32 -> vector<32x256xf32>
    %c239_i32_100 = arith.constant 239 : i32
    %106 = tpu.dynamic_rotate %102 by %c239_i32_100 dim 1 : vector<32x256xf32>, i32 -> vector<32x256xf32>
    %107 = arith.maximumf %105, %106 : vector<32x256xf32>
    %108 = arith.maximumf %104, %107 : vector<32x256xf32>
    %c0_101 = arith.constant 0 : index
    %c0_102 = arith.constant 0 : index
    %109 = vector.load %arg13[%c0_101, %c0_102] : memref<256x100xf32, #tpu.memory_space<vmem>>, vector<256x100xf32>
    %cst_103 = arith.constant dense<0.000000e+00> : vector<32x100xf32>
    %110 = tpu.matmul %108, %109, %cst_103 {dimension_numbers = #tpu.dot_dimension_numbers<[1], [0], [0], [1], [0, 0, 1, 1], [], []>} : vector<32x256xf32>, vector<256x100xf32>, vector<32x100xf32> -> vector<32x100xf32>
    %c0_104 = arith.constant 0 : index
    %c0_105 = arith.constant 0 : index
    %111 = vector.load %arg14[%c0_104, %c0_105] : memref<32x100xf32, #tpu.memory_space<vmem>>, vector<32x100xf32>
    %112 = arith.mulf %110, %111 : vector<32x100xf32>
    %c0_106 = arith.constant 0 : index
    %c0_107 = arith.constant 0 : index
    %113 = vector.load %arg15[%c0_106, %c0_107] : memref<2x32xf32, #tpu.memory_space<vmem>>, vector<2x32xf32>
    %cst_108 = arith.constant dense<0.000000e+00> : vector<2x100xf32>
    %114 = tpu.matmul %113, %112, %cst_108 {dimension_numbers = #tpu.dot_dimension_numbers<[1], [0], [0], [1], [0, 0, 1, 1], [], []>} : vector<2x32xf32>, vector<32x100xf32>, vector<2x100xf32> -> vector<2x100xf32>
    %c0_109 = arith.constant 0 : index
    %c0_110 = arith.constant 0 : index
    %115 = vector.load %arg16[%c0_109, %c0_110] : memref<100x128xf32, #tpu.memory_space<vmem>>, vector<100x128xf32>
    %cst_111 = arith.constant dense<0.000000e+00> : vector<2x128xf32>
    %116 = tpu.matmul %114, %115, %cst_111 {dimension_numbers = #tpu.dot_dimension_numbers<[1], [0], [0], [1], [0, 0, 1, 1], [], []>} : vector<2x100xf32>, vector<100x128xf32>, vector<2x128xf32> -> vector<2x128xf32>
    %c0_112 = arith.constant 0 : index
    %c0_113 = arith.constant 0 : index
    %117 = vector.load %arg17[%c0_112, %c0_113] : memref<1x128xf32, #tpu.memory_space<vmem>>, vector<1x128xf32>
    %118 = vector.broadcast %117 : vector<1x128xf32> to vector<2x128xf32>
    %119 = arith.addf %116, %118 : vector<2x128xf32>
    %c0_114 = arith.constant 0 : index
    %c0_115 = arith.constant 0 : index
    %120 = vector.load %arg18[%c0_114, %c0_115] : memref<2x128xf32, #tpu.memory_space<vmem>>, vector<2x128xf32>
    tpu.vector_store %arg18[%c0_114, %c0_115], %119 {strides = array<i32>} : memref<2x128xf32, #tpu.memory_space<vmem>>, vector<2x128xf32>,
    return
  }
  func.func @transform_0(%arg0: i32) -> (i32, i32) {
    %c0_i32 = arith.constant 0 : i32
    %c0_i32_0 = arith.constant 0 : i32
    return %c0_i32, %arg0 : i32, i32
  }
  func.func @transform_1(%arg0: i32) -> (i32, i32) {
    %c0_i32 = arith.constant 0 : i32
    %c0_i32_0 = arith.constant 0 : i32
    %c0_i32_1 = arith.constant 0 : i32
    return %c0_i32, %c0_i32_0 : i32, i32
  }
  func.func @transform_2(%arg0: i32) -> (i32, i32) {
    %c0_i32 = arith.constant 0 : i32
    %c0_i32_0 = arith.constant 0 : i32
    %c0_i32_1 = arith.constant 0 : i32
    return %c0_i32, %c0_i32_0 : i32, i32
  }
  func.func @transform_3(%arg0: i32) -> (i32, i32) {
    %c0_i32 = arith.constant 0 : i32
    %c0_i32_0 = arith.constant 0 : i32
    %c0_i32_1 = arith.constant 0 : i32
    return %c0_i32, %c0_i32_0 : i32, i32
  }
  func.func @transform_4(%arg0: i32) -> (i32, i32) {
    %c0_i32 = arith.constant 0 : i32
    %c0_i32_0 = arith.constant 0 : i32
    %c0_i32_1 = arith.constant 0 : i32
    return %c0_i32, %c0_i32_0 : i32, i32
  }
  func.func @transform_5(%arg0: i32) -> (i32, i32) {
    %c0_i32 = arith.constant 0 : i32
    %c0_i32_0 = arith.constant 0 : i32
    %c0_i32_1 = arith.constant 0 : i32
    return %c0_i32, %c0_i32_0 : i32, i32
  }
  func.func @transform_6(%arg0: i32) -> (i32, i32) {
    %c0_i32 = arith.constant 0 : i32
    %c0_i32_0 = arith.constant 0 : i32
    %c0_i32_1 = arith.constant 0 : i32
    return %c0_i32, %c0_i32_0 : i32, i32
  }
  func.func @transform_7(%arg0: i32) -> (i32, i32) {
    %c0_i32 = arith.constant 0 : i32
    %c0_i32_0 = arith.constant 0 : i32
    %c0_i32_1 = arith.constant 0 : i32
    return %c0_i32, %c0_i32_0 : i32, i32
  }
  func.func @transform_8(%arg0: i32) -> (i32, i32) {
    %c0_i32 = arith.constant 0 : i32
    %c0_i32_0 = arith.constant 0 : i32
    %c0_i32_1 = arith.constant 0 : i32
    return %c0_i32, %c0_i32_0 : i32, i32
  }
  func.func @transform_9(%arg0: i32) -> (i32, i32) {
    %c0_i32 = arith.constant 0 : i32
    %c0_i32_0 = arith.constant 0 : i32
    %c0_i32_1 = arith.constant 0 : i32
    return %c0_i32, %c0_i32_0 : i32, i32
  }
  func.func @transform_10(%arg0: i32) -> (i32, i32) {
    %c0_i32 = arith.constant 0 : i32
    %c0_i32_0 = arith.constant 0 : i32
    %c0_i32_1 = arith.constant 0 : i32
    return %c0_i32, %c0_i32_0 : i32, i32
  }
  func.func @transform_11(%arg0: i32) -> (i32, i32) {
    %c0_i32 = arith.constant 0 : i32
    %c0_i32_0 = arith.constant 0 : i32
    %c0_i32_1 = arith.constant 0 : i32
    return %c0_i32, %c0_i32_0 : i32, i32
  }
  func.func @transform_12(%arg0: i32) -> (i32, i32) {
    %c0_i32 = arith.constant 0 : i32
    %c0_i32_0 = arith.constant 0 : i32
    %c0_i32_1 = arith.constant 0 : i32
    return %c0_i32, %c0_i32_0 : i32, i32
  }
  func.func @transform_13(%arg0: i32) -> (i32, i32) {
    %c0_i32 = arith.constant 0 : i32
    %c0_i32_0 = arith.constant 0 : i32
    %c0_i32_1 = arith.constant 0 : i32
    return %c0_i32, %c0_i32_0 : i32, i32
  }
  func.func @transform_14(%arg0: i32) -> (i32, i32) {
    %c0_i32 = arith.constant 0 : i32
    %c0_i32_0 = arith.constant 0 : i32
    %c0_i32_1 = arith.constant 0 : i32
    return %c0_i32, %c0_i32_0 : i32, i32
  }
  func.func @transform_15(%arg0: i32) -> (i32, i32) {
    %c0_i32 = arith.constant 0 : i32
    %c0_i32_0 = arith.constant 0 : i32
    %c0_i32_1 = arith.constant 0 : i32
    return %c0_i32, %c0_i32_0 : i32, i32
  }
  func.func @transform_16(%arg0: i32) -> (i32, i32) {
    %c0_i32 = arith.constant 0 : i32
    %c0_i32_0 = arith.constant 0 : i32
    %c0_i32_1 = arith.constant 0 : i32
    return %c0_i32, %c0_i32_0 : i32, i32
  }
  func.func @transform_17(%arg0: i32) -> (i32, i32) {
    %c0_i32 = arith.constant 0 : i32
    %c0_i32_0 = arith.constant 0 : i32
    return %arg0, %c0_i32 : i32, i32
  }
}

</mosaic_0001>

<bundles_post_ra>
// kernel: cnn_forward.1
= control target key start
LH: loop header
LB: loop body
LE: loop exit
PB: predicated region body
PF: predicated region fallthrough
CT: control target
= control target key end

     0   :  { %s13680_s0 = inlined_call_operand.vmem [shape: f32[9,2048], index: 0, kind: input, shape index: {}]   ;;  %s13681_s1 = inlined_call_operand.vmem [shape: f32[16,9], index: 1, kind: input, shape index: {}]   ;;  %s13682_s2 = inlined_call_operand.vmem [shape: f32[16,1], index: 2, kind: input, shape index: {}]   ;;  %s13683_s3 = inlined_call_operand.vmem [shape: f32[16,144], index: 3, kind: input, shape index: {}]   ;;  %s13684_s4 = inlined_call_operand.vmem [shape: f32[16,1], index: 4, kind: input, shape index: {}]   ;;  %s13685_s5 = inlined_call_operand.vmem [shape: f32[1,2048], index: 5, kind: input, shape index: {}]   ;;  %s13686_s6 = inlined_call_operand.vmem [shape: f32[1024,256], index: 6, kind: input, shape index: {}]   ;;  %s13687_s7 = inlined_call_operand.vmem [shape: f32[32,288], index: 7, kind: input, shape index: {}]   ;;  %s13688_s8 = inlined_call_operand.vmem [shape: f32[32,1], index: 8, kind: input, shape index: {}]   ;;  %s13689_s9 = inlined_call_operand.vmem [shape: f32[32,288], index: 9, kind: input, shape index: {}]   ;;  %s13690_s10 = inlined_call_operand.vmem [shape: f32[32,1], index: 10, kind: input, shape index: {}]   ;;  %s13691_s11 = inlined_call_operand.vmem [shape: f32[1,256], index: 11, kind: input, shape index: {}]   ;;  %s13692_s12 = inlined_call_operand.vmem [shape: f32[256,100], index: 12, kind: input, shape index: {}]   ;;  %s13693_s13 = inlined_call_operand.vmem [shape: f32[32,100], index: 13, kind: input, shape index: {}]   ;;  %s13694_s14 = inlined_call_operand.vmem [shape: f32[2,32], index: 14, kind: input, shape index: {}]   ;;  %s13695_s15 = inlined_call_operand.vmem [shape: f32[100,128], index: 15, kind: input, shape index: {}]   ;;  %s13696_s16 = inlined_call_operand.vmem [shape: f32[1,128], index: 16, kind: input, shape index: {}]   ;;  %s13697_s17 = inlined_call_operand.hbm [shape: f32[2,128], index: 17, kind: output, shape index: {}]  }
   0x1   :  { %13959 = sst [smem:[#allocation47_spill]] %s13680_s0 }
   0x2   :  { %13960 = sst [smem:[#allocation48_spill]] %s13681_s1 }
   0x3   :  { %s13961_s26 = sld [smem:[#allocation47_spill]]  ;;  %vm110_vm0 = vcmask 1040384   ;;  %v7231_v2 = vmov 0   ;;  %v91_v4 = vld [vmem:[%s13682_s2] sm:$0xff]  ;;  %vm103_vm1 = vcmask 72704   ;;  %v92_v16 = vld [vmem:[%s13682_s2 + $0x8] sm:$0xff] }
   0x4   :  { %5714 = vset.pattern.permute.xlu0 %v7231_v2  ;;  %s13962_s27 = sld [smem:[#allocation48_spill]] }
   0x5   :  { %95 = vperm.xlu0 %5714, %v91_v4  }
   0x9   :  { %v75_v0 = vld [vmem:[%s13961_s26 + $0x80] sm:$0x1]  ;;  %v77_v1 = vld [vmem:[%s13961_s26 + $0x90] sm:$0x1]  ;;  %v78_v3 = vld [vmem:[%s13961_s26 + $0x98] sm:$0x1] }
   0xa   :  { %5597 = vmatpush.msk.msra.mxu0 %vm110_vm0, %v75_v0  ;;  %v59_v5 = vld [vmem:[%s13961_s26] sm:$0xff]  ;;  %5696 = vmatpush.msk.msra.mxu1 %vm110_vm0, %v75_v0  ;;  %v61_v6 = vld [vmem:[%s13961_s26 + $0x10] sm:$0xff]  ;;  %v62_v7 = vld [vmem:[%s13961_s26 + $0x18] sm:$0xff] }
   0xb   :  { %5603 = vmatpush.msk.msra.mxu2 %vm110_vm0, %v77_v1  ;;  %5606 = vmatpush.msk.msra.mxu3 %vm110_vm0, %v78_v3  ;;  %v7366_v8 = vld [vmem:[%s13962_s27] sm:$0xff]  ;;  %v7371_v9 = vld [vmem:[%s13962_s27 + $0x8] sm:$0xff]  ;;  %v81_v12 = vld [vmem:[%s13961_s26 + $0xb0] sm:$0x1] }
   0xc   :  { %174 = vmatpush.msra.mxu0 %v59_v5  ;;  %5697 = vmatpush.msra.mxu1 %v59_v5  ;;  %v76_v10 = vld [vmem:[%s13961_s26 + $0x88] sm:$0x1]  ;;  %v79_v11 = vld [vmem:[%s13961_s26 + $0xa0] sm:$0x1]  ;;  %v82_v13 = vld [vmem:[%s13961_s26 + $0xb8] sm:$0x1] }
   0xd   :  { %220 = vmatpush.msra.mxu2 %v61_v6  ;;  %243 = vmatpush.msra.mxu3 %v62_v7  ;;  %v60_v14 = vld [vmem:[%s13961_s26 + $0x8] sm:$0xff]  ;;  %v63_v15 = vld [vmem:[%s13961_s26 + $0x20] sm:$0xff]  ;;  %v65_v17 = vld [vmem:[%s13961_s26 + $0x30] sm:$0xff] }
   0xe   :  { %5598 = vmatmul.msk.f32.vlgmr.msra.gmra.mxu0 %vm103_vm1, %v7366_v8  ;;  %5599 = vmatmul.msk.f32.vlgmr.msra.gmra.mxu1 %vm103_vm1, %v7371_v9  ;;  %v66_v18 = vld [vmem:[%s13961_s26 + $0x38] sm:$0xff]  ;;  %v80_v19 = vld [vmem:[%s13961_s26 + $0xa8] sm:$0x1]  ;;  %v83_v20 = vld [vmem:[%s13961_s26 + $0xc0] sm:$0x1] }
   0xf   :  { %5604 = vmatmul.msk.f32.vlgmr.msra.gmra.mxu2 %vm103_vm1, %v7366_v8  ;;  %5607 = vmatmul.msk.f32.vlgmr.msra.gmra.mxu3 %vm103_vm1, %v7366_v8  ;;  %v85_v21 = vld [vmem:[%s13961_s26 + $0xd0] sm:$0x1] }
  0x10   :  { %5600 = vmatpush.msk.msrb.mxu1 %vm110_vm0, %v76_v10  ;;  %5609 = vmatpush.msk.msrb.mxu0 %vm110_vm0, %v79_v11 }
  0x11   :  { %5615 = vmatpush.msk.msrb.mxu2 %vm110_vm0, %v81_v12  ;;  %5618 = vmatpush.msk.msrb.mxu3 %vm110_vm0, %v82_v13 }
  0x12   :  { %197 = vmatpush.msrb.mxu1 %v60_v14  ;;  %266 = vmatpush.msrb.mxu0 %v63_v15 }
  0x13   :  { %22 = vsyncpa [#allocation6], 0  ;;  %100 = vperm.xlu0 %5714, %v92_v16   ;;  %312 = vmatpush.msrb.mxu2 %v65_v17  ;;  %v64_v22 = vld [vmem:[%s13961_s26 + $0x28] sm:$0xff]  ;;  %v67_v23 = vld [vmem:[%s13961_s26 + $0x40] sm:$0xff]  ;;  %s7232_s25 = smov 98   ;;  %s7233_s27 = smov 31  }
  0x14   :  { %335 = vmatpush.msrb.mxu3 %v66_v18  ;;  %5612 = vmatpush.msk.msra.mxu1 %vm110_vm0, %v80_v19  ;;  %v86_v24 = vld [vmem:[%s13961_s26 + $0xd8] sm:$0x1]  ;;  %v69_v25 = vld [vmem:[%s13961_s26 + $0x50] sm:$0xff]  ;;  %v84_v26 = vld [vmem:[%s13961_s26 + $0xc8] sm:$0x1]  ;;  %s7234_s28 = smov 99  }
  0x15   :  { %5621 = vmatpush.msk.msra.mxu0 %vm110_vm0, %v83_v20  ;;  %5627 = vmatpush.msk.msra.mxu2 %vm110_vm0, %v85_v21  ;;  %v87_v27 = vld [vmem:[%s13961_s26 + $0xe0] sm:$0x1]  ;;  %v70_v28 = vld [vmem:[%s13961_s26 + $0x58] sm:$0xff]  ;;  %v68_v29 = vld [vmem:[%s13961_s26 + $0x48] sm:$0xff]  ;;  %s7235_s29 = smov 127   ;;  %s7236_s0 = smov 29  }
  0x16   :  { %5601 = vmatmul.msk.f32.vlgmr.msrb.gmra.mxu1 %vm103_vm1, %v7366_v8  ;;  %5610 = vmatmul.msk.f32.vlgmr.msrb.gmra.mxu0 %vm103_vm1, %v7366_v8  ;;  %v71_v30 = vld [vmem:[%s13961_s26 + $0x60] sm:$0xff]  ;;  %v89_v31 = vld [vmem:[%s13961_s26 + $0xf0] sm:$0x1]  ;;  %v90_v32 = vld [vmem:[%s13961_s26 + $0xf8] sm:$0x1]  ;;  %s7237_s30 = smov 97  }
  0x17   :  { %5605 = vmatmul.msk.f32.gmra.mxu2 %vm103_vm1, %v7371_v9  ;;  %5608 = vmatmul.msk.f32.gmra.mxu3 %vm103_vm1, %v7371_v9  ;;  %v73_v33 = vld [vmem:[%s13961_s26 + $0x70] sm:$0xff]  ;;  %v74_v34 = vld [vmem:[%s13961_s26 + $0x78] sm:$0xff]  ;;  %v88_v35 = vld [vmem:[%s13961_s26 + $0xe8] sm:$0x1]  ;;  %s7238_s18 = smov 30   ;;  %s7239_s19 = smov 1  }
  0x18   :  { %289 = vmatpush.msra.mxu1 %v64_v22  ;;  %358 = vmatpush.msra.mxu0 %v67_v23  ;;  %v72_v36 = vld [vmem:[%s13961_s26 + $0x68] sm:$0xff]  ;;  %v7538_v38 = vld [vmem:[%s13685_s5] sm:$0xff]  ;;  %vm1997_vm10 = vcmask 130048   ;;  %s7242_s21 = smov 111   ;;  %s7243_s22 = smov 17  }
  0x19   :  { %5630 = vmatpush.msk.msra.mxu3 %vm110_vm0, %v86_v24  ;;  %404 = vmatpush.msra.mxu2 %v69_v25  ;;  %v563_v43 = vperm.slane %v7538_v38, 0  ;;  %v565_v54 = vperm.slane %v7538_v38, 2  ;;  %v564_v56 = vperm.slane %v7538_v38, 1  ;;  %v567_v25 = vperm.slane %v7538_v38, 4  ;;  %s7244_s2 = smov 112   ;;  %s7245_s23 = smov 113  }
  0x1a   :  { %5624 = vmatpush.msk.msrb.mxu1 %vm110_vm0, %v84_v26  ;;  %5633 = vmatpush.msk.msrb.mxu0 %vm110_vm0, %v87_v27  ;;  %s5588_s20 = sshll.u32 %s13697_s17, 4  ;;  %s5589_s20 = int_to_ptr.hbm [resolvable:$true] %s5588_s20 }
  0x1b   :  { %427 = vmatpush.msra.mxu3 %v70_v28  ;;  %6356 = vset.pattern.permute.xlu2 %v7231_v2 }
  0x1c   :  { %381 = vmatpush.msrb.mxu1 %v68_v29  ;;  %450 = vmatpush.msrb.mxu0 %v71_v30 }
  0x1d   :  { %6355 = vset.pattern.permute.xlu1 %v7231_v2 }
  0x1e   :  { %5602 = vmatmul.msk.f32.gmra.mxu1 %vm103_vm1, %v7371_v9  ;;  %5611 = vmatmul.msk.f32.gmra.mxu0 %vm103_vm1, %v7371_v9 }
  0x1f   :  { %5616 = vmatmul.msk.f32.vlgmr.msrb.gmra.mxu2 %vm103_vm1, %v7366_v8  ;;  %5619 = vmatmul.msk.f32.vlgmr.msrb.gmra.mxu3 %vm103_vm1, %v7366_v8 }
  0x20   :  { %5639 = vmatpush.msk.msrb.mxu2 %vm110_vm0, %v89_v31  ;;  %5642 = vmatpush.msk.msrb.mxu3 %vm110_vm0, %v90_v32 }
  0x22   :  { %496 = vmatpush.msrb.mxu2 %v73_v33  ;;  %519 = vmatpush.msrb.mxu3 %v74_v34 }
  0x26   :  { %5613 = vmatmul.msk.f32.vlgmr.msra.gmra.mxu1 %vm103_vm1, %v7366_v8  ;;  %5622 = vmatmul.msk.f32.vlgmr.msra.gmra.mxu0 %vm103_vm1, %v7366_v8 }
  0x27   :  { %5617 = vmatmul.msk.f32.gmra.mxu2 %vm103_vm1, %v7371_v9  ;;  %5620 = vmatmul.msk.f32.gmra.mxu3 %vm103_vm1, %v7371_v9 }
  0x28   :  { %5636 = vmatpush.msk.msra.mxu1 %vm110_vm0, %v88_v35  ;;  %vm4542_vm0 = vcmask 261120  }
  0x2a   :  { %473 = vmatpush.msra.mxu1 %v72_v36 }
  0x2e   :  { %5614 = vmatmul.msk.f32.gmra.mxu1 %vm103_vm1, %v7371_v9  ;;  %5623 = vmatmul.msk.f32.gmra.mxu0 %vm103_vm1, %v7371_v9 }
  0x2f   :  { %5628 = vmatmul.msk.f32.vlgmr.msra.gmra.mxu2 %vm103_vm1, %v7366_v8  ;;  %5631 = vmatmul.msk.f32.vlgmr.msra.gmra.mxu3 %vm103_vm1, %v7366_v8 }
  0x36   :  { %5625 = vmatmul.msk.f32.vlgmr.msrb.gmra.mxu1 %vm103_vm1, %v7366_v8  ;;  %5634 = vmatmul.msk.f32.vlgmr.msrb.gmra.mxu0 %vm103_vm1, %v7366_v8 }
  0x37   :  { %5629 = vmatmul.msk.f32.gmra.mxu2 %vm103_vm1, %v7371_v9  ;;  %5632 = vmatmul.msk.f32.gmra.mxu3 %vm103_vm1, %v7371_v9 }
  0x3e   :  { %5626 = vmatmul.msk.f32.gmra.mxu1 %vm103_vm1, %v7371_v9  ;;  %5635 = vmatmul.msk.f32.gmra.mxu0 %vm103_vm1, %v7371_v9 }
  0x3f   :  { %5640 = vmatmul.msk.f32.vlgmr.msrb.gmra.mxu2 %vm103_vm1, %v7366_v8  ;;  %5643 = vmatmul.msk.f32.vlgmr.msrb.gmra.mxu3 %vm103_vm1, %v7366_v8 }
  0x46   :  { %5637 = vmatmul.msk.f32.vlgmr.msra.gmra.mxu1 %vm103_vm1, %v7366_v8  ;;  %v566_v8 = vperm.slane %v7538_v38, 3 }
  0x47   :  { %5641 = vmatmul.msk.f32.gmra.mxu2 %vm103_vm1, %v7371_v9  ;;  %5644 = vmatmul.msk.f32.gmra.mxu3 %vm103_vm1, %v7371_v9 }
  0x4e   :  { %5638 = vmatmul.msk.f32.gmra.mxu1 %vm103_vm1, %v7371_v9 }
  0x77   :  { %v7533_v37 = vpop.permute.xlu0 %95 }
  0x85   :  { %v7540_v39 = vpop.permute.xlu0 %100 }
  0x8b   :  { %v176_v40 = vpop.f32.mrf.mxu0  ;;  %v179_v41 = vpop.f32.mrf.mxu1 }
  0x8c   :  { %v177_v42 = vadd.f32 %v176_v40, %v7533_v37  ;;  %v180_v44 = vadd.f32 %v179_v41, %v7540_v39 }
  0x8e   :  { %v527_v45 = vmax.f32 %v177_v42, 0.0  ;;  %v543_v46 = vmax.f32 %v180_v44, 0.0 }
  0x90   :  { %v7545_v47 = vmul.f32 %v563_v43, %v527_v45  ;;  %v7547_v48 = vmul.f32 %v563_v43, %v543_v46 }
  0x92   :  { %v222_v49 = vpop.f32.mrf.mxu2  ;;  %v5720_v50 = vpack.i.bf16 %v7545_v47, %v7547_v48  ;;  %v5715_v51 = vpack.i.bf16 %v7547_v48, %v7545_v47  ;;  %v245_v61 = vpop.f32.mrf.mxu3 }
  0x93   :  { %v223_v52 = vadd.f32 %v222_v49, %v7533_v37  ;;  %v199_v53 = vpop.f32.mrf.mxu1  ;;  %v246_v4 = vadd.f32 %v245_v61, %v7533_v37  ;;  %v268_v12 = vpop.f32.mrf.mxu0 }
  0x94   :  { %v200_v55 = vadd.f32 %v199_v53, %v7533_v37  ;;  %5721 = vrot.lane.b32.xlu2 %v5720_v50, %s7232_s25  ;;  %5716 = vrot.lane.b32.xlu1 %v5715_v51, %s7233_s27  ;;  %v269_v21 = vadd.f32 %v268_v12, %v7533_v37  ;;  %v569_v51 = vperm.slane %v7538_v38, 6  ;;  %v570_v53 = vperm.slane %v7538_v38, 7 }
  0x95   :  { %v529_v57 = vmax.f32 %v223_v52, 0.0  ;;  %v530_v7 = vmax.f32 %v246_v4, 0.0 }
  0x96   :  { %v528_v58 = vmax.f32 %v200_v55, 0.0  ;;  %v531_v24 = vmax.f32 %v269_v21, 0.0 }
  0x97   :  { %v7559_v59 = vmul.f32 %v565_v54, %v529_v57  ;;  %v7586_v11 = vmul.f32 %v566_v8, %v530_v7 }
  0x98   :  { %v7563_v60 = vmul.f32 %v564_v56, %v528_v58  ;;  %v7615_v28 = vmul.f32 %v567_v25, %v531_v24 }
  0x99   :  { %13964 = vst [vmem:[#allocation9_spill] sm:$0xff] %v7586_v11 }
  0x9a   :  { %v5740_v62 = vpack.i.bf16 %v7559_v59, %v7563_v60  ;;  %v5765_v63 = vpack.i.bf16 %v7563_v60, %v7545_v47  ;;  %v225_v0 = vpop.f32.mrf.mxu2  ;;  %v248_v1 = vpop.f32.mrf.mxu3 }
  0x9b   :  { %v226_v2 = vadd.f32 %v225_v0, %v7540_v39  ;;  %v249_v3 = vadd.f32 %v248_v1, %v7540_v39  ;;  %v271_v16 = vpop.f32.mrf.mxu0  ;;  %v202_v18 = vpop.f32.mrf.mxu1 }
  0x9c   :  { %5741 = vrot.lane.b32.xlu0 %v5740_v62, %s7232_s25  ;;  %5726 = vrot.lane.b32.xlu2 %v5720_v50, %s7234_s28  ;;  %v272_v19 = vadd.f32 %v271_v16, %v7540_v39  ;;  %v203_v20 = vadd.f32 %v202_v18, %v7540_v39 }
  0x9d   :  { %5731 = vrot.lane.b32.xlu1 %v5720_v50, %s7235_s29  ;;  %v545_v5 = vmax.f32 %v226_v2, 0.0  ;;  %v546_v6 = vmax.f32 %v249_v3, 0.0 }
  0x9e   :  { %v547_v22 = vmax.f32 %v272_v19, 0.0  ;;  %v544_v23 = vmax.f32 %v203_v20, 0.0 }
  0x9f   :  { %v7582_v9 = vmul.f32 %v565_v54, %v545_v5  ;;  %v7584_v10 = vmul.f32 %v566_v8, %v546_v6 }
  0xa0   :  { %v7609_v26 = vmul.f32 %v567_v25, %v547_v22  ;;  %v7613_v27 = vmul.f32 %v564_v56, %v544_v23 }
  0xa1   :  { %13963 = vst [vmem:[#allocation8_spill] sm:$0xff] %v7584_v10  ;;  %v5795_v13 = vpack.i.bf16 %v7586_v11, %v7584_v10  ;;  %v5775_v14 = vpack.i.bf16 %v7582_v9, %v7559_v59  ;;  %v5780_v15 = vpack.i.bf16 %v7584_v10, %v7586_v11  ;;  %v5800_v17 = vpack.i.bf16 %v7559_v59, %v7582_v9 }
  0xa2   :  { %v5840_v29 = vpack.i.bf16 %v7609_v26, %v7615_v28  ;;  %v5835_v30 = vpack.i.bf16 %v7613_v27, %v7563_v60  ;;  %v5860_v31 = vpack.i.bf16 %v7613_v27, %v7547_v48  ;;  %v5850_v32 = vpack.i.bf16 %v7582_v9, %v7613_v27  ;;  %v314_v33 = vpop.f32.mrf.mxu2  ;;  %v337_v34 = vpop.f32.mrf.mxu3 }
  0xa3   :  { %v5875_v35 = vpack.i.bf16 %v7615_v28, %v7609_v26  ;;  %v315_v44 = vadd.f32 %v314_v33, %v7533_v37  ;;  %v338_v45 = vadd.f32 %v337_v34, %v7533_v37  ;;  %v291_v61 = vpop.f32.mrf.mxu1  ;;  %v360_v7 = vpop.f32.mrf.mxu0 }
  0xa4   :  { %5746 = vrot.lane.b32.xlu0 %v5740_v62, %s7234_s28  ;;  %5766 = vrot.lane.b32.xlu2 %v5765_v63, %s7236_s0  ;;  %v292_v6 = vadd.f32 %v291_v61, %v7533_v37  ;;  %v361_v25 = vadd.f32 %v360_v7, %v7533_v37 }
  0xa5   :  { %5736 = vrot.lane.b32.xlu1 %v5720_v50, %s7237_s30  ;;  %v533_v50 = vmax.f32 %v315_v44, 0.0  ;;  %v534_v52 = vmax.f32 %v338_v45, 0.0 }
  0xa6   :  { %v535_v34 = vmax.f32 %v361_v25, 0.0 }
  0xa7   :  { %v7659_v57 = vmul.f32 %v569_v51, %v533_v50  ;;  %v7661_v58 = vmul.f32 %v570_v53, %v534_v52 }
  0xa9   :  { %13969 = vst [vmem:[#allocation14_spill] sm:$0xff] %v7659_v57 }
  0xaa   :  { %v317_v36 = vpop.f32.mrf.mxu2  ;;  %v340_v40 = vpop.f32.mrf.mxu3  ;;  %13970 = vst [vmem:[#allocation15_spill] sm:$0xff] %v7661_v58 }
  0xab   :  { %v318_v41 = vadd.f32 %v317_v36, %v7540_v39  ;;  %v341_v42 = vadd.f32 %v340_v40, %v7540_v39  ;;  %v294_v2 = vpop.f32.mrf.mxu1  ;;  %v363_v20 = vpop.f32.mrf.mxu0 }
  0xac   :  { %5751 = vrot.lane.b32.xlu0 %v5740_v62, %s7235_s29  ;;  %5771 = vrot.lane.b32.xlu2 %v5765_v63, %s7238_s18  ;;  %v295_v3 = vadd.f32 %v294_v2, %v7540_v39  ;;  %v364_v21 = vadd.f32 %v363_v20, %v7540_v39 }
  0xad   :  { %5756 = vrot.lane.b32.xlu1 %v5765_v63, %s7239_s19  ;;  %v549_v46 = vmax.f32 %v318_v41, 0.0  ;;  %v550_v49 = vmax.f32 %v341_v42, 0.0 }
  0xae   :  { %v548_v8 = vmax.f32 %v295_v3, 0.0 }
  0xaf   :  { %v7653_v54 = vmul.f32 %v569_v51, %v549_v46  ;;  %v7655_v55 = vmul.f32 %v570_v53, %v550_v49 }
  0xb1   :  { %13966 = vst [vmem:[#allocation11_spill] sm:$0xff] %v7653_v54  ;;  %v5915_v63 = vpack.i.bf16 %v7653_v54, %v7659_v57  ;;  %v7674_v1 = vpack.i.bf16 %v7659_v57, %v7653_v54  ;;  %v7689_v12 = vpack.i.bf16 %v7661_v58, %v7655_v55 }
  0xb2   :  { %13967 = vst [vmem:[#allocation12_spill] sm:$0xff] %v7655_v55  ;;  %v406_v45 = vpop.f32.mrf.mxu2 }
  0xb3   :  { %v407_v25 = vadd.f32 %v406_v45, %v7533_v37 }
  0xb4   :  { %5796 = vrot.lane.b32.xlu0 %v5795_v13, %s7235_s29  ;;  %5776 = vrot.lane.b32.xlu2 %v5775_v14, %s7233_s27  ;;  %v568_v14 = vperm.slane %v7538_v38, 5 }
  0xb5   :  { %5761 = vrot.lane.b32.xlu1 %v5740_v62, %s7237_s30  ;;  %v5920_v62 = vpack.i.bf16 %v7655_v55, %v7661_v58  ;;  %v691_v58 = vlaneseq }
  0xba   :  { %v409_v3 = vpop.f32.mrf.mxu2 }
  0xbc   :  { %5811 = vrot.lane.b32.xlu0 %v5795_v13, %s7237_s30  ;;  %5781 = vrot.lane.b32.xlu2 %v5780_v15, %s7233_s27  ;;  %v7698_v15 = vmul.f32 %v568_v14, %v548_v8  ;;  %v410_v8 = vadd.f32 %v409_v3, %v7540_v39 }
  0xbd   :  { %5801 = vrot.lane.b32.xlu1 %v5800_v17, %s7239_s19 }
  0xc4   :  { %5821 = vrot.lane.b32.xlu0 %v5800_v17, %s7238_s18  ;;  %5786 = vrot.lane.b32.xlu2 %v5795_v13, %s7232_s25 }
  0xc5   :  { %5816 = vrot.lane.b32.xlu1 %v5795_v13, %s7239_s19 }
  0xcc   :  { %5841 = vrot.lane.b32.xlu0 %v5840_v29, %s7233_s27  ;;  %5791 = vrot.lane.b32.xlu2 %v5795_v13, %s7234_s28  ;;  %v7726_v29 = vld [vmem:[%s13685_s5 + $0x8] sm:$0xff]  ;;  %s7241_s5 = smov 15  }
  0xcd   :  { %5836 = vrot.lane.b32.xlu1 %v5835_v30, %s7233_s27  ;;  %v383_v30 = vpop.f32.mrf.mxu1  ;;  %v572_v7 = vperm.slane %v7726_v29, 1 }
  0xd4   :  { %5861 = vrot.lane.b32.xlu0 %v5860_v31, %s7239_s19  ;;  %5806 = vrot.lane.b32.xlu2 %v5800_v17, %s7236_s0 }
  0xd5   :  { %5851 = vrot.lane.b32.xlu1 %v5850_v32, %s7234_s28  ;;  %v386_v49 = vpop.f32.mrf.mxu1 }
  0xd6   :  { %v387_v52 = vadd.f32 %v386_v49, %v7540_v39  ;;  %v573_v49 = vperm.slane %v7726_v29, 2 }
  0xd8   :  { %v552_v2 = vmax.f32 %v387_v52, 0.0 }
  0xdc   :  { %5866 = vrot.lane.b32.xlu0 %v5850_v32, %s7237_s30  ;;  %5826 = vrot.lane.b32.xlu2 %v5795_v13, %s7236_s0 }
  0xdd   :  { %5856 = vrot.lane.b32.xlu1 %v5850_v32, %s7235_s29 }
  0xe4   :  { %5876 = vrot.lane.b32.xlu0 %v5875_v35, %s7232_s25  ;;  %5831 = vrot.lane.b32.xlu2 %v5795_v13, %s7238_s18  ;;  %v532_v13 = vmax.f32 %v292_v6, 0.0 }
  0xe5   :  { %5871 = vrot.lane.b32.xlu1 %v5860_v31, %s7236_s0 }
  0xe6   :  { %v7706_v19 = vmul.f32 %v568_v14, %v532_v13  ;;  %v7770_v13 = vmul.f32 %v572_v7, %v552_v2 }
  0xe8   :  { %13973 = vst [vmem:[#allocation18_spill] sm:$0xff] %v7706_v19  ;;  %v5980_v38 = vpack.i.bf16 %v7706_v19, %v7698_v15  ;;  %v5965_v33 = vpack.i.bf16 %v7698_v15, %v7706_v19 }
  0xe9   :  { %13979 = vst [vmem:[#allocation24_spill] sm:$0xff] %v7770_v13 }
  0xec   :  { %5891 = vrot.lane.b32.xlu0 %v5875_v35, %s7235_s29  ;;  %5846 = vrot.lane.b32.xlu2 %v5850_v32, %s7232_s25  ;;  %v7728_v32 = vpop.f32.mrf.mxu3 }
  0xed   :  { %5886 = vrot.lane.b32.xlu1 %v5875_v35, %s7234_s28 }
  0xee   :  { %v7644_v43 = vpop.permute.xlu2 %5721 }
  0xef   :  { %13965 = vst [vmem:[#allocation10_spill] sm:$0xff] %v7644_v43  ;;  %v13714_v57 = vunpack.i.h.bf16 %v7644_v43 }
  0xf4   :  { %5906 = vrot.lane.b32.xlu0 %v5875_v35, %s7237_s30  ;;  %5881 = vrot.lane.b32.xlu2 %v5860_v31, %s7238_s18  ;;  %v551_v31 = vmax.f32 %v364_v21, 0.0  ;;  %v432_v51 = vpop.f32.mrf.mxu3 }
  0xf5   :  { %5896 = vrot.lane.b32.xlu1 %v5875_v35, %s7239_s19 }
  0xf6   :  { %v7657_v56 = vpop.permute.xlu2 %5726 }
  0xf7   :  { %13968 = vst [vmem:[#allocation13_spill] sm:$0xff] %v7657_v56 }
  0xfc   :  { %5921 = vrot.lane.b32.xlu0 %v5920_v62, %s7233_s27  ;;  %5916 = vrot.lane.b32.xlu2 %v5915_v63, %s7233_s27  ;;  %v384_v63 = vadd.f32 %v383_v30, %v7533_v37 }
  0xfd   :  { %5901 = vrot.lane.b32.xlu1 %v5875_v35, %s7236_s0 }
  0xfe   :  { %v7670_v0 = vpop.permute.xlu2 %5766  ;;  %v536_v6 = vmax.f32 %v384_v63, 0.0 }
 0x100   :  { %v7779_v30 = vmul.f32 %v572_v7, %v536_v6 }
 0x102   :  { %13982 = vst [vmem:[#allocation27_spill] sm:$0xff] %v7779_v30 }
 0x104   :  { %5926 = vrot.lane.b32.xlu0 %v7674_v1, %s7232_s25  ;;  %5931 = vrot.lane.b32.xlu2 %v7674_v1, %s7234_s28 }
 0x105   :  { %5911 = vrot.lane.b32.xlu1 %v5875_v35, %s7238_s18  ;;  %v571_v35 = vperm.slane %v7726_v29, 0 }
 0x106   :  { %v7682_v4 = vpop.permute.xlu2 %5771  ;;  %v7684_v5 = vpop.permute.xlu1 %5716 }
 0x107   :  { %v7737_v36 = vmul.f32 %v571_v35, %v551_v31  ;;  %v7745_v44 = vmul.f32 %v571_v35, %v535_v34  ;;  %v521_v31 = vpop.f32.mrf.mxu3  ;;  %v6035_v34 = vpack.i.bf16 %v7770_v13, %v7779_v30  ;;  %v537_v35 = vmax.f32 %v407_v25, 0.0 }
 0x109   :  { %13976 = vst [vmem:[#allocation21_spill] sm:$0xff] %v7737_v36  ;;  %v7749_v46 = vpack.i.bf16 %v7745_v44, %v7737_v36  ;;  %v5970_v50 = vpack.i.bf16 %v7737_v36, %v7745_v44  ;;  %v7796_v2 = vmul.f32 %v573_v49, %v537_v35  ;;  %v430_v35 = vadd.f32 %v7728_v32, %v7533_v37 }
 0x10a   :  { %13977 = vst [vmem:[#allocation22_spill] sm:$0xff] %v7745_v44  ;;  %v574_v44 = vperm.slane %v7726_v29, 3  ;;  %v13711_v36 = vunpack.i.l.bf16 %v7644_v43  ;;  %v13994_v43 = vunpack.i.l.bf16 %v7657_v56 }
 0x10b   :  { %13986 = vst [vmem:[#allocation31_spill] sm:$0xff] %v7796_v2 }
 0x10c   :  { %5936 = vrot.lane.b32.xlu0 %v7674_v1, %s7235_s29  ;;  %5941 = vrot.lane.b32.xlu2 %v7689_v12, %s7232_s25 }
 0x10d   :  { %5946 = vrot.lane.b32.xlu1 %v7689_v12, %s7234_s28 }
 0x10e   :  { %v7700_v16 = vpop.permute.xlu0 %5741  ;;  %v7702_v17 = vpop.permute.xlu2 %5776 }
 0x10f   :  { %13971 = vst [vmem:[#allocation16_spill] sm:$0xff] %v7702_v17  ;;  %v7704_v18 = vpop.permute.xlu1 %5731  ;;  %v524_v3 = vpop.f32.mrf.mxu3 }
 0x110   :  { %13972 = vst [vmem:[#allocation17_spill] sm:$0xff] %v7704_v18  ;;  %v525_v7 = vadd.f32 %v524_v3, %v7540_v39  ;;  %v578_v3 = vperm.slane %v7726_v29, 7  ;;  %v13998_v19 = vunpack.i.l.bf16 %v7704_v18 }
 0x114   :  { %5981 = vrot.lane.b32.xlu0 %v5980_v38, %s7234_s28  ;;  %5956 = vrot.lane.b32.xlu2 %v7674_v1, %s7239_s19 }
 0x115   :  { %5951 = vrot.lane.b32.xlu1 %v7689_v12, %s7235_s29 }
 0x116   :  { %v7716_v22 = vpop.permute.xlu0 %5746  ;;  %v7718_v23 = vpop.permute.xlu2 %5781 }
 0x117   :  { %13974 = vst [vmem:[#allocation19_spill] sm:$0xff] %v7718_v23  ;;  %v7720_v24 = vpop.permute.xlu1 %5736  ;;  %v5743_v23 = vunpack.i.l.bf16 %v7700_v16 }
 0x118   :  { %13975 = vst [vmem:[#allocation20_spill] sm:$0xff] %v7720_v24 }
 0x11c   :  { %5991 = vrot.lane.b32.xlu0 %v5980_v38, %s7239_s19  ;;  %5961 = vrot.lane.b32.xlu2 %v7674_v1, %s7237_s30 }
 0x11d   :  { %5966 = vrot.lane.b32.xlu1 %v5965_v33, %s7233_s27  ;;  %v553_v33 = vmax.f32 %v410_v8, 0.0 }
 0x11e   :  { %v7739_v40 = vpop.permute.xlu0 %5751  ;;  %v7741_v41 = vpop.permute.xlu2 %5786 }
 0x11f   :  { %v7743_v42 = vpop.permute.xlu1 %5756 }
 0x124   :  { %6001 = vrot.lane.b32.xlu0 %v7749_v46, %s7232_s25  ;;  %5986 = vrot.lane.b32.xlu2 %v5980_v38, %s7235_s29 }
 0x125   :  { %5971 = vrot.lane.b32.xlu1 %v5970_v50, %s7233_s27  ;;  %v7788_v50 = vmul.f32 %v573_v49, %v553_v33  ;;  %v522_v33 = vadd.f32 %v521_v31, %v7533_v37  ;;  %v433_v49 = vadd.f32 %v432_v51, %v7540_v39 }
 0x126   :  { %v7758_v53 = vpop.permute.xlu0 %5796  ;;  %v7760_v61 = vpop.permute.xlu2 %5791 }
 0x127   :  { %13978 = vst [vmem:[#allocation23_spill] sm:$0xff] %v7758_v53  ;;  %v7762_v62 = vpop.permute.xlu1 %5761  ;;  %v6025_v6 = vpack.i.bf16 %v7788_v50, %v7796_v2  ;;  %v542_v55 = vmax.f32 %v522_v33, 0.0  ;;  %v554_v32 = vmax.f32 %v433_v49, 0.0  ;;  %v7838_v33 = vand.u32 127, %v691_v58 }
 0x128   :  { %13983 = vst [vmem:[#allocation28_spill] sm:$0xff] %v7788_v50 }
 0x129   :  { %vm1499_vm2 = vcmp.lt.s32.totalorder %v7838_v33, 98  ;;  %v7852_v58 = vmul.f32 %v574_v44, %v554_v32  ;;  %vm1370_vm3 = vcmp.lt.s32.totalorder %v7838_v33, 99  ;;  %v13720_v32 = vunpack.i.h.bf16 %v7657_v56 }
 0x12a   :  { %vm1241_vm4 = vcmp.lt.s32.totalorder %v7838_v33, 127  ;;  %vm1628_vm5 = vcmp.lt.s32.totalorder %v7838_v33, 97  ;;  %vm1080_vm6 = vcmp.lt.s32.totalorder %v7838_v33, 1  ;;  %vm951_vm7 = vcmp.lt.s32.totalorder %v7838_v33, 29 }
 0x12b   :  { %13992 = vst [vmem:[#allocation37_spill] sm:$0xff] %v7852_v58  ;;  %vm822_vm8 = vcmp.lt.s32.totalorder %v7838_v33, 30  ;;  %vm693_vm9 = vcmp.lt.s32.totalorder %v7838_v33, 31  ;;  %vm4384_vm11 = vcmp.lt.s32.totalorder %v7838_v33, 112  ;;  %vm4246_vm12 = vcmp.lt.s32.totalorder %v7838_v33, 15 }
 0x12c   :  { %6006 = vrot.lane.b32.xlu0 %v5980_v38, %s7238_s18  ;;  %5996 = vrot.lane.b32.xlu2 %v5980_v38, %s7236_s0  ;;  %vm4213_vm13 = vcmp.lt.s32.totalorder %v7838_v33, 16  ;;  %vm4417_vm14 = vcmp.lt.s32.totalorder %v7838_v33, 111  ;;  %vm4180_vm15 = vcmp.lt.s32.totalorder %v7838_v33, 17  ;;  %vm4351_vm1 = vcmp.lt.s32.totalorder %v7838_v33, 113  ;;  %v5546_v33 = vld [vmem:[%s13695_s15 + $0x58] sm:$0xff] }
 0x12d   :  { %5976 = vrot.lane.b32.xlu1 %v5980_v38, %s7232_s25 }
 0x12e   :  { %v7772_v14 = vpop.permute.xlu0 %5811  ;;  %v7774_v20 = vpop.permute.xlu2 %5806 }
 0x12f   :  { %13980 = vst [vmem:[#allocation25_spill] sm:$0xff] %v7774_v20  ;;  %v7776_v21 = vpop.permute.xlu1 %5801 }
 0x130   :  { %13981 = vst [vmem:[#allocation26_spill] sm:$0xff] %v7776_v21 }
 0x134   :  { %6016 = vrot.lane.b32.xlu0 %v5980_v38, %s7237_s30  ;;  %6036 = vrot.lane.b32.xlu2 %v6035_v34, %s7233_s27  ;;  %v7802_v38 = vpack.i.bf16 %v7779_v30, %v7770_v13  ;;  %v7823_v30 = vpack.i.bf16 %v7796_v2, %v7788_v50  ;;  %v538_v13 = vmax.f32 %v430_v35, 0.0  ;;  %v7840_v35 = vmul.f32 %v578_v3, %v542_v55 }
 0x135   :  { %6011 = vrot.lane.b32.xlu1 %v7749_v46, %s7234_s28 }
 0x136   :  { %v7790_v45 = vpop.permute.xlu0 %5821  ;;  %v7792_v52 = vpop.permute.xlu2 %5826  ;;  %13990 = vst [vmem:[#allocation35_spill] sm:$0xff] %v7840_v35  ;;  %v6055_v54 = vpack.i.bf16 %v7852_v58, %v7840_v35 }
 0x137   :  { %13984 = vst [vmem:[#allocation29_spill] sm:$0xff] %v7790_v45  ;;  %v7794_v63 = vpop.permute.xlu1 %5816 }
 0x138   :  { %13985 = vst [vmem:[#allocation30_spill] sm:$0xff] %v7792_v52 }
 0x13c   :  { %6026 = vrot.lane.b32.xlu0 %v6025_v6, %s7233_s27  ;;  %6041 = vrot.lane.b32.xlu2 %v7802_v38, %s7232_s25  ;;  %v558_v6 = vmax.f32 %v525_v7, 0.0 }
 0x13d   :  { %6021 = vrot.lane.b32.xlu1 %v7749_v46, %s7235_s29 }
 0x13e   :  { %v7810_v8 = vpop.permute.xlu0 %5841  ;;  %v7812_v25 = vpop.permute.xlu2 %5831  ;;  %v7830_v51 = vmul.f32 %v578_v3, %v558_v6  ;;  %v7847_v6 = vmul.f32 %v574_v44, %v538_v13 }
 0x13f   :  { %13987 = vst [vmem:[#allocation32_spill] sm:$0xff] %v7810_v8  ;;  %v7815_v34 = vpop.permute.xlu1 %5836 }
 0x140   :  { %13988 = vst [vmem:[#allocation33_spill] sm:$0xff] %v7812_v25  ;;  %v7864_v13 = vpack.i.bf16 %v7840_v35, %v7830_v51 }
 0x141   :  { %13989 = vst [vmem:[#allocation34_spill] sm:$0xff] %v7830_v51 }
 0x142   :  { %13991 = vst [vmem:[#allocation36_spill] sm:$0xff] %v7847_v6 }
 0x144   :  { %6051 = vrot.lane.b32.xlu0 %v7802_v38, %s7235_s29  ;;  %6046 = vrot.lane.b32.xlu2 %v7802_v38, %s7234_s28 }
 0x145   :  { %6031 = vrot.lane.b32.xlu1 %v7823_v30, %s7232_s25 }
 0x146   :  { %v7834_v31 = vpop.permute.xlu0 %5861  ;;  %v7836_v7 = vpop.permute.xlu2 %5846 }
 0x147   :  { %v13713_v11 = vunpack.i.h.bf16 %v7836_v7  ;;  %v5848_v10 = vunpack.i.l.bf16 %v7836_v7  ;;  %v7845_v49 = vpop.permute.xlu1 %5851 }
 0x148   :  { %v5853_v44 = vunpack.i.l.bf16 %v7845_v49 }
 0x149   :  { %v1529_v55 = vsel %vm1499_vm2, %v13711_v36, %v5848_v10  ;;  %v1527_v3 = vsel %vm1499_vm2, %v5848_v10, %v13713_v11  ;;  %v5748_v36 = vunpack.i.l.bf16 %v7716_v22 }
 0x14a   :  { %2004 = vmatpush.msra.mxu0 %v1529_v55  ;;  %2050 = vmatpush.msra.mxu2 %v1527_v3  ;;  %v1528_v55 = vsel %vm1499_vm2, %v13714_v57, %v5743_v23  ;;  %v13993_v3 = vunpack.i.h.bf16 %v7700_v16 }
 0x14c   :  { %6071 = vrot.lane.b32.xlu0 %v7864_v13, %s7236_s0  ;;  %6066 = vrot.lane.b32.xlu2 %v7864_v13, %s7239_s19  ;;  %v1526_v11 = vsel %vm1499_vm2, %v5743_v23, %v13993_v3  ;;  %v1400_v23 = vsel %vm1370_vm3, %v13994_v43, %v5853_v44  ;;  %v13995_v3 = vunpack.i.h.bf16 %v7845_v49  ;;  %v13996_v43 = vunpack.i.h.bf16 %v7716_v22 }
 0x14d   :  { %2005 = vmatpush.msra.mxu0 %v1528_v55  ;;  %2051 = vmatpush.msra.mxu2 %v1526_v11 }
 0x14e   :  { %6056 = vrot.lane.b32.xlu1 %v6055_v54, %s7233_s27  ;;  %v5867_v57 = vpop.permute.xlu0 %5866  ;;  %v7892_v35 = vpop.permute.xlu2 %5881  ;;  %v1398_v8 = vsel %vm1370_vm3, %v5853_v44, %v13995_v3  ;;  %v1399_v54 = vsel %vm1370_vm3, %v13720_v32, %v5748_v36  ;;  %v1397_v25 = vsel %vm1370_vm3, %v5748_v36, %v13996_v43  ;;  %v5753_v44 = vunpack.i.l.bf16 %v7739_v40 }
 0x14f   :  { %v5869_v11 = vunpack.i.h.bf16 %v5867_v57  ;;  %v5868_v55 = vunpack.i.l.bf16 %v5867_v57  ;;  %v7903_v10 = vpop.permute.xlu1 %5856  ;;  %2006 = vmatpush.msra.mxu0 %v1400_v23  ;;  %2052 = vmatpush.msra.mxu2 %v1398_v8  ;;  %v5763_v3 = vunpack.i.l.bf16 %v7762_v62  ;;  %v5754_v23 = vunpack.i.h.bf16 %v7739_v40 }
 0x150   :  { %v5858_v52 = vunpack.i.l.bf16 %v7903_v10  ;;  %v13997_v32 = vunpack.i.l.bf16 %v7720_v24  ;;  %v13724_v43 = vunpack.i.h.bf16 %v7720_v24  ;;  %v5764_v57 = vunpack.i.h.bf16 %v7762_v62 }
 0x151   :  { %2007 = vmatpush.msra.mxu0 %v1399_v54  ;;  %2053 = vmatpush.msra.mxu2 %v1397_v25  ;;  %v1656_v36 = vsel %vm1628_vm5, %v5868_v55, %v5869_v11  ;;  %v13999_v25 = vunpack.i.h.bf16 %v7903_v10  ;;  %v13738_v40 = vunpack.i.h.bf16 %v7776_v21  ;;  %v576_v24 = vperm.slane %v7726_v29, 5 }
 0x152   :  { %v1658_v56 = vsel %vm1628_vm5, %v13997_v32, %v5868_v55  ;;  %v1271_v8 = vsel %vm1241_vm4, %v13998_v19, %v5858_v52  ;;  %2087 = vmatpush.msra.mxu3 %v1656_v36  ;;  %v13727_v32 = vunpack.i.h.bf16 %v7741_v41  ;;  %v13728_v55 = vunpack.i.l.bf16 %v7741_v41 }
 0x153   :  { %2041 = vmatpush.msrb.mxu1 %v1658_v56  ;;  %v1269_v54 = vsel %vm1241_vm4, %v5858_v52, %v13999_v25  ;;  %2008 = vmatpush.msra.mxu0 %v1271_v8  ;;  %v6060_v56 = vpack.i.bf16 %v7830_v51, %v7847_v6  ;;  %v14000_v19 = vunpack.i.h.bf16 %v7704_v18  ;;  %v1657_v52 = vsel %vm1628_vm5, %v13724_v43, %v5763_v3 }
 0x154   :  { %2054 = vmatpush.msra.mxu2 %v1269_v54  ;;  %6076 = vrot.lane.b32.xlu0 %v7674_v1, %s7236_s0  ;;  %v5814_v8 = vunpack.i.h.bf16 %v7772_v14  ;;  %v5813_v36 = vunpack.i.l.bf16 %v7772_v14  ;;  %v1268_v25 = vsel %vm1241_vm4, %v5753_v44, %v5754_v23  ;;  %v1655_v54 = vsel %vm1628_vm5, %v5763_v3, %v5764_v57 }
 0x155   :  { %6086 = vrot.lane.b32.xlu2 %v7864_v13, %s7238_s18  ;;  %v1270_v62 = vsel %vm1241_vm4, %v14000_v19, %v5753_v44  ;;  %2042 = vmatpush.msrb.mxu1 %v1657_v52  ;;  %v14001_v19 = vunpack.i.h.bf16 %v7836_v7  ;;  %v14003_v7 = vunpack.i.h.bf16 %v7700_v16 }
 0x156   :  { %2009 = vmatpush.msra.mxu0 %v1270_v62  ;;  %6061 = vrot.lane.b32.xlu1 %v6060_v56, %s7233_s27  ;;  %v7966_v62 = vpop.permute.xlu0 %5876  ;;  %v7968_v52 = vpop.permute.xlu2 %5916  ;;  %v1654_v44 = vsel %vm1628_vm5, %v5869_v11, %v5813_v36  ;;  %v1653_v16 = vsel %vm1628_vm5, %v5764_v57, %v5814_v8  ;;  %v5759_v11 = vunpack.i.h.bf16 %v7743_v42 }
 0x157   :  { %2055 = vmatpush.msra.mxu2 %v1268_v25  ;;  %v1525_v43 = vsel %vm1499_vm2, %v14001_v19, %v13728_v55  ;;  %14002 = vst [vmem:[#allocation38_spill] sm:$0xff] %v7968_v52  ;;  %2088 = vmatpush.msra.mxu3 %v1655_v54  ;;  %v7974_v56 = vpop.permute.xlu1 %5871  ;;  %v1524_v3 = vsel %vm1499_vm2, %v14003_v7, %v13727_v32  ;;  %v13725_v25 = vunpack.i.h.bf16 %v7760_v61  ;;  %v13726_v19 = vunpack.i.l.bf16 %v7760_v61 }
 0x158   :  { %2096 = vmatpush.msra.mxu1 %v1525_v43  ;;  %v5864_v43 = vunpack.i.h.bf16 %v7834_v31  ;;  %v13748_v54 = vunpack.i.l.bf16 %v7834_v31  ;;  %2010 = vmatpush.msra.mxu0 %v7547_v48  ;;  %v13730_v7 = vunpack.i.l.bf16 %v7743_v42  ;;  %v5874_v57 = vunpack.i.h.bf16 %v7974_v56 }
 0x159   :  { %2133 = vmatpush.msrb.mxu3 %v1654_v44  ;;  %2056 = vmatpush.msra.mxu2 %v7613_v27  ;;  %v14004_v44 = vunpack.i.h.bf16 %v7845_v49  ;;  %v13731_v27 = vunpack.i.h.bf16 %v7758_v53  ;;  %v5884_v32 = vunpack.i.h.bf16 %v7892_v35  ;;  %v13732_v55 = vunpack.i.l.bf16 %v7892_v35 }
 0x15a   :  { %2097 = vmatpush.msra.mxu1 %v1524_v3  ;;  %2011 = vmatpush.msra.mxu0 %v7545_v47  ;;  %v13729_v3 = vunpack.i.l.bf16 %v7758_v53  ;;  %v13735_v47 = vunpack.i.l.bf16 %v7974_v56  ;;  %v1110_v49 = vsel %vm1080_vm6, %v13748_v54, %v5864_v43 }
 0x15b   :  { %2134 = vmatpush.msrb.mxu3 %v1653_v16  ;;  %v1396_v48 = vsel %vm1370_vm3, %v14004_v44, %v13726_v19  ;;  %2057 = vmatpush.msra.mxu2 %v7563_v60  ;;  %v14005_v16 = vunpack.i.h.bf16 %v7716_v22  ;;  %v5769_v60 = vunpack.i.h.bf16 %v7670_v0  ;;  %v1109_v22 = vsel %vm1080_vm6, %v13730_v7, %v5759_v11 }
 0x15c   :  { %2098 = vmatpush.msra.mxu1 %v1396_v48  ;;  %6096 = vrot.lane.b32.xlu0 %v7823_v30, %s7234_s28  ;;  %v13733_v48 = vunpack.i.l.bf16 %v7670_v0 }
 0x15d   :  { %v1395_v44 = vsel %vm1370_vm3, %v14005_v16, %v13725_v25  ;;  %6091 = vrot.lane.b32.xlu2 %v7689_v12, %s7239_s19  ;;  %2058 = vmatpush.msra.mxu2 %v1110_v49  ;;  %v14006_v16 = vunpack.i.h.bf16 %v7903_v10  ;;  %v981_v10 = vsel %vm951_vm7, %v13735_v47, %v5874_v57  ;;  %v13744_v47 = vunpack.i.l.bf16 %v7774_v20 }
 0x15e   :  { %2099 = vmatpush.msra.mxu1 %v1395_v44  ;;  %6081 = vrot.lane.b32.xlu1 %v7689_v12, %s7237_s30  ;;  %v8037_v44 = vpop.permute.xlu0 %5891  ;;  %v8039_v25 = vpop.permute.xlu2 %5931  ;;  %v980_v7 = vsel %vm951_vm7, %v13733_v48, %v5769_v60  ;;  %v13745_v48 = vunpack.i.l.bf16 %v7684_v5 }
 0x15f   :  { %v1267_v49 = vsel %vm1241_vm4, %v14006_v16, %v13729_v3  ;;  %2059 = vmatpush.msra.mxu2 %v1109_v22  ;;  %v8041_v19 = vpop.permute.xlu1 %5886  ;;  %v1266_v22 = vsel %vm1241_vm4, %v5754_v23, %v13731_v27  ;;  %v452_v16 = vpop.f32.mrf.mxu0  ;;  %v13734_v3 = vunpack.i.l.bf16 %v7682_v4  ;;  %v13736_v23 = vunpack.i.l.bf16 %v7776_v21 }
 0x160   :  { %2100 = vmatpush.msra.mxu1 %v1267_v49  ;;  %v5774_v49 = vunpack.i.h.bf16 %v7682_v4 }
 0x161   :  { %2060 = vmatpush.msra.mxu2 %v981_v10  ;;  %v5839_v10 = vunpack.i.h.bf16 %v7815_v34 }
 0x162   :  { %2101 = vmatpush.msra.mxu1 %v1266_v22  ;;  %v852_v22 = vsel %vm822_vm8, %v13732_v55, %v5884_v32  ;;  %v851_v27 = vsel %vm822_vm8, %v13734_v3, %v5774_v49  ;;  %v1108_v55 = vsel %vm1080_vm6, %v5864_v43, %v13736_v23  ;;  %v13743_v3 = vunpack.i.h.bf16 %v7774_v20 }
 0x163   :  { %2061 = vmatpush.msra.mxu2 %v980_v7  ;;  %v5838_v7 = vunpack.i.l.bf16 %v7815_v34 }
 0x164   :  { %2102 = vmatpush.msra.mxu1 %v7582_v9  ;;  %6111 = vrot.lane.b32.xlu0 %v7689_v12, %s7236_s0  ;;  %v13737_v9 = vunpack.i.h.bf16 %v7684_v5 }
 0x165   :  { %6106 = vrot.lane.b32.xlu2 %v7749_v46, %s7239_s19  ;;  %2062 = vmatpush.msra.mxu2 %v852_v22 }
 0x166   :  { %2103 = vmatpush.msra.mxu1 %v7559_v59  ;;  %6101 = vrot.lane.b32.xlu1 %v7674_v1, %s7238_s18  ;;  %v8090_v22 = vpop.permute.xlu0 %5906  ;;  %v8092_v59 = vpop.permute.xlu2 %5941  ;;  %v723_v43 = vsel %vm693_vm9, %v13737_v9, %v5839_v10  ;;  %v722_v9 = vsel %vm693_vm9, %v13745_v48, %v5838_v7 }
 0x167   :  { %2063 = vmatpush.msra.mxu2 %v851_v27  ;;  %v13747_v1 = vunpack.i.l.bf16 %v8090_v22  ;;  %v8096_v34 = vpop.permute.xlu1 %5896  ;;  %v13746_v27 = vunpack.i.h.bf16 %v8090_v22 }
 0x168   :  { %2104 = vmatpush.msra.mxu1 %v1108_v55  ;;  %v1107_v55 = vsel %vm1080_vm6, %v5759_v11, %v13738_v40  ;;  %v979_v11 = vsel %vm951_vm7, %v5874_v57, %v13744_v47  ;;  %v13739_v40 = vunpack.i.l.bf16 %v7790_v45 }
 0x169   :  { %2064 = vmatpush.msra.mxu2 %v723_v43  ;;  %v1652_v23 = vsel %vm1628_vm5, %v5813_v36, %v13747_v1  ;;  %v455_v43 = vpop.f32.mrf.mxu0  ;;  %v978_v36 = vsel %vm951_vm7, %v5769_v60, %v13743_v3  ;;  %v1651_v57 = vsel %vm1628_vm5, %v5814_v8, %v13746_v27  ;;  %v13741_v8 = vunpack.i.h.bf16 %v7702_v17  ;;  %v8238_v27 = vld [vmem:[%s13683_s3 + $0x18] sm:$0xff] }
 0x16a   :  { %2105 = vmatpush.msra.mxu1 %v1107_v55  ;;  %v13742_v55 = vunpack.i.h.bf16 %v7790_v45  ;;  %v456_v14 = vadd.f32 %v455_v43, %v7540_v39  ;;  %v577_v45 = vperm.slane %v7726_v29, 6 }
 0x16b   :  { %2065 = vmatpush.msra.mxu2 %v722_v9  ;;  %v721_v43 = vsel %vm693_vm9, %v5839_v10, %v13741_v8  ;;  %v8221_v8 = vld [vmem:[%s13683_s3] sm:$0xff] }
 0x16c   :  { %2106 = vmatpush.msra.mxu1 %v979_v11  ;;  %6126 = vrot.lane.b32.xlu0 %v7689_v12, %s7238_s18  ;;  %v850_v12 = vsel %vm822_vm8, %v5884_v32, %v13739_v40 }
 0x16d   :  { %2179 = vmatpush.msrb.mxu2 %v1652_v23  ;;  %6121 = vrot.lane.b32.xlu2 %v7749_v46, %s7236_s0  ;;  %v453_v23 = vadd.f32 %v452_v16, %v7533_v37  ;;  %v849_v16 = vsel %vm822_vm8, %v5774_v49, %v13742_v55 }
 0x16e   :  { %2107 = vmatpush.msra.mxu1 %v978_v36  ;;  %6116 = vrot.lane.b32.xlu1 %v7823_v30, %s7235_s29  ;;  %v8151_v60 = vpop.permute.xlu0 %5921  ;;  %v8153_v9 = vpop.permute.xlu2 %5956  ;;  %v575_v36 = vperm.slane %v7726_v29, 4 }
 0x16f   :  { %2180 = vmatpush.msrb.mxu2 %v1651_v57  ;;  %14007 = vst [vmem:[#allocation39_spill] sm:$0xff] %v8151_v60  ;;  %v8156_v11 = vpop.permute.xlu1 %5901  ;;  %v539_v32 = vmax.f32 %v453_v23, 0.0  ;;  %v13740_v57 = vunpack.i.l.bf16 %v7702_v17 }
 0x170   :  { %2108 = vmatpush.msra.mxu1 %v850_v12  ;;  %v555_v12 = vmax.f32 %v456_v14, 0.0  ;;  %2066 = vmatmul.f32.vlgmr.msra.gmra.mxu2 %v8221_v8 }
 0x171   :  { %v720_v40 = vsel %vm693_vm9, %v5838_v7, %v13740_v57  ;;  %v8177_v49 = vmul.f32 %v575_v36, %v539_v32 }
 0x172   :  { %2109 = vmatpush.msra.mxu1 %v849_v16  ;;  %v8185_v14 = vmul.f32 %v575_v36, %v555_v12  ;;  %v8210_v12 = vld [vmem:[%s13683_s3 + $0x8] sm:$0xff] }
 0x173   :  { %v8191_v7 = vpack.i.bf16 %v8177_v49, %v7847_v6  ;;  %5645 = vmatmul.msk.f32.vlgmr.msrb.gmra.mxu1 %vm1997_vm10, %v8210_v12  ;;  %5647 = vmatmul.msk.f32.vlgmr.msra.gmra.mxu3 %vm1997_vm10, %v8210_v12 }
 0x174   :  { %2110 = vmatpush.msra.mxu1 %v721_v43  ;;  %6141 = vrot.lane.b32.xlu0 %v7802_v38, %s7239_s19  ;;  %v8195_v32 = vpack.i.bf16 %v8185_v14, %v7852_v58 }
 0x175   :  { %6136 = vrot.lane.b32.xlu2 %v7749_v46, %s7238_s18 }
 0x176   :  { %2111 = vmatpush.msra.mxu1 %v720_v40  ;;  %6131 = vrot.lane.b32.xlu1 %v7749_v46, %s7237_s30  ;;  %v8181_v10 = vpop.permute.xlu0 %5926  ;;  %v8183_v23 = vpop.permute.xlu2 %5961 }
 0x177   :  { %v8187_v16 = vpop.permute.xlu1 %5911  ;;  %v475_v40 = vpop.f32.mrf.mxu1 }
 0x178   :  { %v498_v46 = vpop.f32.mrf.mxu2  ;;  %v476_v3 = vadd.f32 %v475_v40, %v7533_v37 }
 0x179   :  { %v499_v40 = vadd.f32 %v498_v46, %v7533_v37 }
 0x17a   :  { %v540_v18 = vmax.f32 %v476_v3, 0.0 }
 0x17b   :  { %5646 = vmatmul.msk.f32.gmra.mxu1 %vm1997_vm10, %v8238_v27  ;;  %5648 = vmatmul.msk.f32.gmra.mxu3 %vm1997_vm10, %v8238_v27  ;;  %v541_v17 = vmax.f32 %v499_v40, 0.0 }
 0x17c   :  { %6156 = vrot.lane.b32.xlu0 %v8191_v7, %s7232_s25  ;;  %v8255_v21 = vmul.f32 %v576_v24, %v540_v18 }
 0x17d   :  { %6151 = vrot.lane.b32.xlu2 %v8195_v32, %s7232_s25  ;;  %v8268_v29 = vmul.f32 %v577_v45, %v541_v17 }
 0x17e   :  { %6146 = vrot.lane.b32.xlu1 %v7802_v38, %s7236_s0  ;;  %v8203_v36 = vpop.permute.xlu0 %5936  ;;  %v8205_v43 = vpop.permute.xlu2 %5986 }
 0x17f   :  { %v8212_v57 = vpop.permute.xlu1 %5946  ;;  %v478_v55 = vpop.f32.mrf.mxu1  ;;  %14009 = vst [vmem:[#allocation41_spill] sm:$0xff] %v8268_v29 }
 0x180   :  { %v501_v1 = vpop.f32.mrf.mxu2  ;;  %v479_v51 = vadd.f32 %v478_v55, %v7540_v39 }
 0x181   :  { %v502_v60 = vadd.f32 %v501_v1, %v7540_v39 }
 0x182   :  { %v556_v20 = vmax.f32 %v479_v51, 0.0 }
 0x183   :  { %v557_v37 = vmax.f32 %v502_v60, 0.0  ;;  %2112 = vmatmul.f32.vlgmr.msra.gmra.mxu1 %v8221_v8  ;;  %5649 = vmatmul.msk.f32.vlgmr.msrb.gmra.mxu3 %vm1997_vm10, %v8210_v12 }
 0x184   :  { %6171 = vrot.lane.b32.xlu0 %v8191_v7, %s7234_s28  ;;  %v8270_v51 = vmul.f32 %v576_v24, %v556_v20 }
 0x185   :  { %6166 = vrot.lane.b32.xlu2 %v8195_v32, %s7234_s28  ;;  %v8272_v18 = vmul.f32 %v577_v45, %v557_v37  ;;  %v8298_v45 = vpack.i.bf16 %v7847_v6, %v7796_v2  ;;  %v13774_v37 = vunpack.i.l.bf16 %v7966_v62  ;;  %v13775_v6 = vunpack.i.l.bf16 %v8181_v10 }
 0x186   :  { %6161 = vrot.lane.b32.xlu1 %v7802_v38, %s7238_s18  ;;  %v8231_v47 = vpop.permute.xlu0 %5981  ;;  %v8233_v48 = vpop.permute.xlu2 %5996 }
 0x187   :  { %v8240_v54 = vpop.permute.xlu1 %5951  ;;  %14010 = vst [vmem:[#allocation42_spill] sm:$0xff] %v8272_v18  ;;  %v8282_v1 = vpack.i.bf16 %v8272_v18, %v8270_v51  ;;  %v14014_v18 = vunpack.i.h.bf16 %v7966_v62 }
 0x189   :  { %14011 = vst [vmem:[#allocation43_spill] sm:$0xff] %v8282_v1 }
 0x18b   :  { %5650 = vmatmul.msk.f32.gmra.mxu3 %vm1997_vm10, %v8238_v27 }
 0x18c   :  { %6186 = vrot.lane.b32.xlu0 %v8191_v7, %s7235_s29 }
 0x18d   :  { %6181 = vrot.lane.b32.xlu2 %v8195_v32, %s7235_s29 }
 0x18e   :  { %6176 = vrot.lane.b32.xlu1 %v7802_v38, %s7237_s30  ;;  %v8259_v3 = vpop.permute.xlu0 %5991  ;;  %v8261_v55 = vpop.permute.xlu2 %6036  ;;  %v8276_v38 = vpack.i.bf16 %v8268_v29, %v8255_v21  ;;  %v13777_v29 = vunpack.i.h.bf16 %v8181_v10 }
 0x18f   :  { %14008 = vst [vmem:[#allocation40_spill] sm:$0xff] %v8261_v55  ;;  %v8263_v39 = vpop.permute.xlu1 %5966 }
 0x194   :  { %6201 = vrot.lane.b32.xlu0 %v8276_v38, %s7232_s25 }
 0x195   :  { %6196 = vrot.lane.b32.xlu2 %v7823_v30, %s7237_s30  ;;  %v6205_v30 = vpack.i.bf16 %v7852_v58, %v7788_v50  ;;  %v5983_v58 = vunpack.i.l.bf16 %v8231_v47 }
 0x196   :  { %6191 = vrot.lane.b32.xlu1 %v8282_v1, %s7232_s25  ;;  %v8288_v17 = vpop.permute.xlu0 %6001  ;;  %v8290_v24 = vpop.permute.xlu2 %6041 }
 0x197   :  { %v8292_v20 = vpop.permute.xlu1 %5971 }
 0x198   :  { %14012 = vst [vmem:[#allocation44_spill] sm:$0xff] %v8292_v20  ;;  %v5984_v20 = vunpack.i.h.bf16 %v8231_v47  ;;  %v14019_v47 = vunpack.i.h.bf16 %v8039_v25 }
 0x19c   :  { %6216 = vrot.lane.b32.xlu0 %v8298_v45, %s7239_s19 }
 0x19d   :  { %6211 = vrot.lane.b32.xlu2 %v8282_v1, %s7234_s28 }
 0x19e   :  { %6206 = vrot.lane.b32.xlu1 %v6205_v30, %s7239_s19  ;;  %v8307_v60 = vpop.permute.xlu0 %6006  ;;  %v8309_v46 = vpop.permute.xlu2 %6046 }
 0x19f   :  { %14013 = vst [vmem:[#allocation45_spill] sm:$0xff] %v8309_v46  ;;  %v5977_v40 = vpop.permute.xlu1 %5976 }
 0x1a0   :  { %v5979_v2 = vunpack.i.h.bf16 %v5977_v40  ;;  %v5978_v55 = vunpack.i.l.bf16 %v5977_v40 }
 0x1a2   :  { %v1521_v50 = vsel %vm1499_vm2, %v13774_v37, %v5978_v55  ;;  %v1519_v52 = vsel %vm1499_vm2, %v5978_v55, %v13775_v6  ;;  %v1520_v37 = vsel %vm1499_vm2, %v14014_v18, %v5979_v2  ;;  %v8335_v55 = vld [vmem:[%s13683_s3 + $0x10] sm:$0xff]  ;;  %v5988_v18 = vunpack.i.l.bf16 %v8205_v43 }
 0x1a3   :  { %2188 = vmatpush.msra.mxu3 %v1521_v50  ;;  %2234 = vmatpush.msra.mxu2 %v1519_v52  ;;  %v1518_v52 = vsel %vm1499_vm2, %v5979_v2, %v13777_v29  ;;  %v14018_v2 = vunpack.i.h.bf16 %v8041_v19 }
 0x1a4   :  { %6231 = vrot.lane.b32.xlu0 %v8282_v1, %s7235_s29  ;;  %2069 = vmatmul.f32.gmra.mxu2 %v8335_v55 }
 0x1a5   :  { %6226 = vrot.lane.b32.xlu2 %v6205_v30, %s7236_s0  ;;  %2189 = vmatpush.msra.mxu3 %v1520_v37  ;;  %v14015_v37 = vunpack.i.l.bf16 %v8041_v19  ;;  %v1391_v29 = vsel %vm1370_vm3, %v14018_v2, %v5984_v20  ;;  %v14023_v2 = vunpack.i.l.bf16 %v8090_v22 }
 0x1a6   :  { %6221 = vrot.lane.b32.xlu1 %v8276_v38, %s7234_s28  ;;  %2235 = vmatpush.msra.mxu2 %v1518_v52  ;;  %v8348_v40 = vpop.permute.xlu0 %6016  ;;  %v8350_v50 = vpop.permute.xlu2 %6066  ;;  %v14017_v52 = vunpack.i.l.bf16 %v8039_v25 }
 0x1a7   :  { %v1392_v46 = vsel %vm1370_vm3, %v14015_v37, %v5983_v58  ;;  %v8359_v6 = vpop.permute.xlu1 %6011  ;;  %2115 = vmatmul.f32.gmra.mxu1 %v8335_v55  ;;  %v14021_v37 = vunpack.i.l.bf16 %v8350_v50  ;;  %v14022_v1 = vunpack.i.l.bf16 %v8348_v40 }
 0x1a8   :  { %14016 = vst [vmem:[#allocation46_spill] sm:$0xff] %v8359_v6  ;;  %2190 = vmatpush.msra.mxu3 %v1392_v46  ;;  %v1390_v53 = vsel %vm1370_vm3, %v5983_v58, %v14017_v52  ;;  %v5989_v46 = vunpack.i.h.bf16 %v8205_v43  ;;  %v1389_v58 = vsel %vm1370_vm3, %v5984_v20, %v14019_v47  ;;  %v14020_v52 = vunpack.i.l.bf16 %v7834_v31 }
 0x1a9   :  { %2236 = vmatpush.msra.mxu2 %v1390_v53  ;;  %v1650_v43 = vsel %vm1628_vm5, %v14023_v2, %v14022_v1  ;;  %v13785_v6 = vunpack.i.h.bf16 %v8348_v40  ;;  %v14024_v31 = vunpack.i.l.bf16 %v8037_v44  ;;  %v13794_v47 = vunpack.i.h.bf16 %v8037_v44 }
 0x1aa   :  { %2191 = vmatpush.msra.mxu3 %v1391_v29  ;;  %v1112_v53 = vsel %vm1080_vm6, %v14021_v37, %v14020_v52  ;;  %v5939_v29 = vunpack.i.h.bf16 %v8203_v36  ;;  %2225 = vmatpush.msrb.mxu1 %v1650_v43  ;;  %v14025_v37 = vunpack.i.l.bf16 %v8203_v36  ;;  %v14027_v52 = vunpack.i.h.bf16 %v8350_v50 }
 0x1ab   :  { %2237 = vmatpush.msra.mxu2 %v1389_v58  ;;  %2012 = vmatpush.msra.mxu0 %v1112_v53  ;;  %v1263_v20 = vsel %vm1241_vm4, %v14024_v31, %v5988_v18  ;;  %v14026_v58 = vunpack.i.l.bf16 %v7743_v42  ;;  %v13784_v2 = vunpack.i.l.bf16 %v8092_v59  ;;  %v14028_v42 = vunpack.i.h.bf16 %v8090_v22 }
 0x1ac   :  { %2192 = vmatpush.msra.mxu3 %v1263_v20  ;;  %v1261_v1 = vsel %vm1241_vm4, %v5988_v18, %v14025_v37  ;;  %6246 = vrot.lane.b32.xlu0 %v6205_v30, %s7238_s18  ;;  %v1262_v18 = vsel %vm1241_vm4, %v13794_v47, %v5989_v46  ;;  %v1260_v43 = vsel %vm1241_vm4, %v5989_v46, %v5939_v29  ;;  %v13782_v37 = vunpack.i.h.bf16 %v8092_v59  ;;  %v14040_v47 = vld [vmem:[#allocation14_spill] sm:$0xff] }
 0x1ad   :  { %2238 = vmatpush.msra.mxu2 %v1261_v1  ;;  %v1111_v53 = vsel %vm1080_vm6, %v14027_v52, %v14026_v58  ;;  %6241 = vrot.lane.b32.xlu2 %v8276_v38, %s7235_s29  ;;  %v1649_v30 = vsel %vm1628_vm5, %v14028_v42, %v13785_v6  ;;  %v5898_v1 = vunpack.i.l.bf16 %v8096_v34  ;;  %v13783_v58 = vunpack.i.l.bf16 %v8212_v57 }
 0x1ae   :  { %2013 = vmatpush.msra.mxu0 %v1111_v53  ;;  %6236 = vrot.lane.b32.xlu1 %v8298_v45, %s7236_s0  ;;  %v8427_v31 = vpop.permute.xlu0 %6026  ;;  %v14029_v22 = vunpack.i.l.bf16 %v8181_v10  ;;  %v5993_v53 = vunpack.i.l.bf16 %v8259_v3  ;;  %v13786_v42 = vunpack.i.h.bf16 %v8212_v57  ;;  %v5904_v6 = vunpack.i.h.bf16 %v8156_v11 }
 0x1af   :  { %2193 = vmatpush.msra.mxu3 %v1262_v18  ;;  %v8429_v20 = vpop.permute.xlu2 %6086  ;;  %2226 = vmatpush.msrb.mxu1 %v1649_v30  ;;  %v8440_v46 = vpop.permute.xlu1 %6021  ;;  %v13793_v18 = vunpack.i.l.bf16 %v7794_v63  ;;  %v14030_v30 = vunpack.i.h.bf16 %v8181_v10  ;;  %v14032_v10 = vunpack.i.l.bf16 %v8039_v25 }
 0x1b0   :  { %2239 = vmatpush.msra.mxu2 %v1260_v43  ;;  %v1517_v52 = vsel %vm1499_vm2, %v14029_v22, %v13784_v2  ;;  %5653 = vmatmul.msk.f32.vlgmr.msrb.gmra.mxu1 %vm1997_vm10, %v8210_v12  ;;  %v5899_v22 = vunpack.i.h.bf16 %v8096_v34 }
 0x1b1   :  { %2280 = vmatpush.msra.mxu1 %v1517_v52  ;;  %2194 = vmatpush.msra.mxu3 %v7609_v26  ;;  %v1516_v43 = vsel %vm1499_vm2, %v14030_v30, %v13782_v37  ;;  %v13788_v26 = vunpack.i.l.bf16 %v8240_v54  ;;  %v13799_v52 = vunpack.i.h.bf16 %v8259_v3  ;;  %v1388_v30 = vsel %vm1370_vm3, %v14032_v10, %v13783_v58 }
 0x1b2   :  { %2240 = vmatpush.msra.mxu2 %v7698_v15  ;;  %v14031_v15 = vld [vmem:[#allocation18_spill] sm:$0xff]  ;;  %v1104_v34 = vsel %vm1080_vm6, %v13793_v18, %v5898_v1  ;;  %v13796_v37 = vunpack.i.l.bf16 %v8233_v48  ;;  %v13789_v10 = vunpack.i.h.bf16 %v8240_v54  ;;  %v14033_v58 = vunpack.i.h.bf16 %v8039_v25 }
 0x1b3   :  { %2281 = vmatpush.msra.mxu1 %v1516_v43  ;;  %2195 = vmatpush.msra.mxu3 %v7615_v28  ;;  %v13787_v28 = vunpack.i.h.bf16 %v7794_v63  ;;  %v5903_v43 = vunpack.i.l.bf16 %v8156_v11  ;;  %v1101_v11 = vsel %vm1080_vm6, %v5899_v22, %v13799_v52  ;;  %v13800_v18 = vunpack.i.l.bf16 %v8153_v9 }
 0x1b4   :  { %2241 = vmatpush.msra.mxu2 %v14031_v15  ;;  %v1102_v15 = vsel %vm1080_vm6, %v5898_v1, %v5993_v53  ;;  %v1387_v2 = vsel %vm1370_vm3, %v14033_v58, %v13786_v42  ;;  %6261 = vrot.lane.b32.xlu0 %v8191_v7, %s7237_s30  ;;  %v13795_v58 = vunpack.i.h.bf16 %v8233_v48  ;;  %v14035_v7 = vunpack.i.l.bf16 %v8203_v36 }
 0x1b5   :  { %2282 = vmatpush.msra.mxu1 %v1388_v30  ;;  %2196 = vmatpush.msra.mxu3 %v1104_v34  ;;  %v14034_v30 = vld [vmem:[#allocation30_spill] sm:$0xff]  ;;  %v1103_v1 = vsel %vm1080_vm6, %v13787_v28, %v5899_v22  ;;  %v5913_v28 = vunpack.i.l.bf16 %v8187_v16  ;;  %v13797_v22 = vunpack.i.l.bf16 %v8307_v60 }
 0x1b6   :  { %2242 = vmatpush.msra.mxu2 %v1102_v15  ;;  %v13792_v34 = vunpack.i.l.bf16 %v14034_v30  ;;  %6256 = vrot.lane.b32.xlu2 %v8298_v45, %s7238_s18  ;;  %v8494_v25 = vpop.permute.xlu0 %6051  ;;  %v1259_v45 = vsel %vm1241_vm4, %v14035_v7, %v13788_v26  ;;  %v13790_v42 = vunpack.i.h.bf16 %v14034_v30  ;;  %v14036_v7 = vld [vmem:[#allocation33_spill] sm:$0xff]  ;;  %v6009_v26 = vunpack.i.h.bf16 %v8307_v60 }
 0x1b7   :  { %2283 = vmatpush.msra.mxu1 %v1387_v2  ;;  %v8496_v15 = vpop.permute.xlu2 %6091  ;;  %6251 = vrot.lane.b32.xlu1 %v8195_v32, %s7237_s30  ;;  %v8511_v2 = vpop.permute.xlu1 %6031  ;;  %v972_v36 = vsel %vm951_vm7, %v5904_v6, %v13795_v58 }
 0x1b8   :  { %2197 = vmatpush.msra.mxu3 %v1103_v1  ;;  %2243 = vmatpush.msra.mxu2 %v1101_v11  ;;  %v975_v32 = vsel %vm951_vm7, %v13792_v34, %v5903_v43  ;;  %v973_v1 = vsel %vm951_vm7, %v5903_v43, %v13796_v37  ;;  %v1258_v11 = vsel %vm1241_vm4, %v5939_v29, %v13789_v10  ;;  %v5914_v43 = vunpack.i.h.bf16 %v8187_v16 }
 0x1b9   :  { %2284 = vmatpush.msra.mxu1 %v1259_v45  ;;  %5651 = vmatmul.msk.f32.vlgmr.msrb.gmra.mxu2 %vm1997_vm10, %v8210_v12  ;;  %v13791_v45 = vunpack.i.l.bf16 %v14036_v7  ;;  %v8545_v29 = vpack.i.bf16 %v8270_v51, %v8185_v14  ;;  %v13798_v10 = vunpack.i.h.bf16 %v14036_v7 }
 0x1ba   :  { %2198 = vmatpush.msra.mxu3 %v975_v32  ;;  %2244 = vmatpush.msra.mxu2 %v973_v1  ;;  %v974_v32 = vsel %vm951_vm7, %v13790_v42, %v5904_v6  ;;  %v14037_v1 = vld [vmem:[#allocation11_spill] sm:$0xff]  ;;  %v14038_v6 = vld [vmem:[#allocation32_spill] sm:$0xff]  ;;  %v5969_v42 = vunpack.i.h.bf16 %v8263_v39 }
 0x1bb   :  { %2285 = vmatpush.msra.mxu1 %v1258_v11  ;;  %v846_v16 = vsel %vm822_vm8, %v13791_v45, %v5913_v28  ;;  %v8556_v11 = vpack.i.bf16 %v8255_v21, %v8177_v49  ;;  %v5843_v34 = vunpack.i.l.bf16 %v14038_v6 }
 0x1bc   :  { %2199 = vmatpush.msra.mxu3 %v974_v32  ;;  %5654 = vmatmul.msk.f32.gmra.mxu1 %vm1997_vm10, %v8238_v27  ;;  %v5844_v32 = vunpack.i.h.bf16 %v14038_v6 }
 0x1bd   :  { %2245 = vmatpush.msra.mxu2 %v972_v36  ;;  %2286 = vmatpush.msra.mxu1 %v14037_v1  ;;  %v844_v36 = vsel %vm822_vm8, %v5913_v28, %v13797_v22  ;;  %v14039_v1 = vld [vmem:[#allocation19_spill] sm:$0xff]  ;;  %v845_v28 = vsel %vm822_vm8, %v13798_v10, %v5914_v43  ;;  %v1100_v22 = vsel %vm1080_vm6, %v5993_v53, %v13800_v18 }
 0x1be   :  { %2200 = vmatpush.msra.mxu3 %v846_v16  ;;  %6276 = vrot.lane.b32.xlu0 %v8545_v29, %s7236_s0  ;;  %v13814_v45 = vunpack.i.h.bf16 %v14039_v1  ;;  %v8571_v58 = vpop.permute.xlu0 %6071  ;;  %v13812_v52 = vunpack.i.l.bf16 %v14039_v1 }
 0x1bf   :  { %2246 = vmatpush.msra.mxu2 %v844_v36  ;;  %2287 = vmatpush.msra.mxu1 %v14040_v47  ;;  %v8573_v16 = vpop.permute.xlu2 %6106  ;;  %v843_v47 = vsel %vm822_vm8, %v5914_v43, %v6009_v26  ;;  %v13802_v6 = vunpack.i.l.bf16 %v8571_v58  ;;  %v13809_v36 = vunpack.i.h.bf16 %v8153_v9  ;;  %v13801_v10 = vunpack.i.h.bf16 %v8571_v58 }
 0x1c0   :  { %6271 = vrot.lane.b32.xlu2 %v8556_v11, %s7239_s19  ;;  %6266 = vrot.lane.b32.xlu1 %v8545_v29, %s7239_s19  ;;  %v8597_v37 = vpop.permute.xlu1 %6056  ;;  %v717_v43 = vsel %vm693_vm9, %v13814_v45, %v5844_v32 }
 0x1c1   :  { %2201 = vmatpush.msra.mxu3 %v845_v28  ;;  %2247 = vmatpush.msra.mxu2 %v843_v47  ;;  %v715_v28 = vsel %vm693_vm9, %v5844_v32, %v5969_v42  ;;  %v14041_v47 = vunpack.i.l.bf16 %v7974_v56  ;;  %v13806_v32 = vunpack.i.l.bf16 %v8429_v20  ;;  %v716_v56 = vsel %vm693_vm9, %v13812_v52, %v5843_v34  ;;  %v14064_v52 = vld [vmem:[#allocation45_spill] sm:$0xff] }
 0x1c2   :  { %2288 = vmatpush.msra.mxu1 %v1100_v22  ;;  %5652 = vmatmul.msk.f32.gmra.mxu2 %vm1997_vm10, %v8238_v27  ;;  %v14042_v22 = vunpack.i.h.bf16 %v8259_v3  ;;  %v14044_v3 = vunpack.i.l.bf16 %v7670_v0 }
 0x1c3   :  { %v983_v53 = vsel %vm951_vm7, %v13802_v6, %v14041_v47  ;;  %2202 = vmatpush.msra.mxu3 %v717_v43  ;;  %2248 = vmatpush.msra.mxu2 %v715_v28  ;;  %v14043_v47 = vunpack.i.l.bf16 %v8263_v39  ;;  %v13803_v28 = vunpack.i.h.bf16 %v8429_v20 }
 0x1c4   :  { %v1099_v18 = vsel %vm1080_vm6, %v14042_v22, %v13809_v36  ;;  %2014 = vmatpush.msra.mxu0 %v983_v53  ;;  %v14058_v36 = vunpack.i.h.bf16 %v8041_v19 }
 0x1c5   :  { %2289 = vmatpush.msra.mxu1 %v1099_v18  ;;  %v714_v43 = vsel %vm693_vm9, %v5843_v34, %v14043_v47  ;;  %2203 = vmatpush.msra.mxu3 %v716_v56  ;;  %v982_v18 = vsel %vm951_vm7, %v13801_v10, %v14044_v3  ;;  %v14045_v56 = vunpack.i.l.bf16 %v7892_v35  ;;  %v13804_v3 = vunpack.i.l.bf16 %v8597_v37 }
 0x1c6   :  { %2249 = vmatpush.msra.mxu2 %v714_v43  ;;  %6291 = vrot.lane.b32.xlu0 %v8545_v29, %s7238_s18  ;;  %v8640_v22 = vpop.permute.xlu0 %6076  ;;  %v14046_v10 = vunpack.i.l.bf16 %v7682_v4  ;;  %v14047_v35 = vunpack.i.l.bf16 %v8233_v48 }
 0x1c7   :  { %2015 = vmatpush.msra.mxu0 %v982_v18  ;;  %2204 = vmatmul.f32.vlgmr.msra.gmra.mxu3 %v8221_v8  ;;  %v13807_v0 = vunpack.i.h.bf16 %v8640_v22  ;;  %v13808_v34 = vunpack.i.l.bf16 %v8640_v22  ;;  %v8649_v53 = vpop.permute.xlu2 %6121  ;;  %v854_v47 = vsel %vm822_vm8, %v13806_v32, %v14045_v56  ;;  %v13825_v32 = vunpack.i.l.bf16 %v8290_v24 }
 0x1c8   :  { %6286 = vrot.lane.b32.xlu2 %v8556_v11, %s7236_s0  ;;  %6281 = vrot.lane.b32.xlu1 %v7864_v13, %s7232_s25  ;;  %v8657_v43 = vpop.permute.xlu1 %6061  ;;  %v853_v6 = vsel %vm822_vm8, %v13803_v28, %v14046_v10  ;;  %v14049_v10 = vunpack.i.h.bf16 %v8233_v48 }
 0x1c9   :  { %2016 = vmatpush.msra.mxu0 %v854_v47  ;;  %v13805_v18 = vunpack.i.h.bf16 %v8657_v43  ;;  %v971_v56 = vsel %vm951_vm7, %v14047_v35, %v13808_v34  ;;  %v14048_v47 = vunpack.i.h.bf16 %v7684_v5  ;;  %v13819_v34 = vunpack.i.h.bf16 %v8290_v24 }
 0x1ca   :  { %2250 = vmatmul.f32.vlgmr.msra.gmra.mxu2 %v8221_v8  ;;  %2290 = vmatpush.msra.mxu1 %v971_v56  ;;  %v970_v28 = vsel %vm951_vm7, %v14049_v10, %v13807_v0  ;;  %v13816_v0 = vunpack.i.h.bf16 %v8288_v17 }
 0x1cb   :  { %2017 = vmatpush.msra.mxu0 %v853_v6  ;;  %v725_v4 = vsel %vm693_vm9, %v13805_v18, %v14048_v47  ;;  %v14050_v6 = vunpack.i.l.bf16 %v7684_v5  ;;  %v14051_v5 = vunpack.i.l.bf16 %v7966_v62 }
 0x1cc   :  { %2291 = vmatpush.msra.mxu1 %v970_v28 }
 0x1cd   :  { %2018 = vmatpush.msra.mxu0 %v725_v4  ;;  %v724_v35 = vsel %vm693_vm9, %v13804_v3, %v14050_v6  ;;  %v13811_v4 = vunpack.i.l.bf16 %v8183_v23  ;;  %v14054_v3 = vunpack.i.h.bf16 %v7741_v41 }
 0x1ce   :  { %6306 = vrot.lane.b32.xlu0 %v8545_v29, %s7233_s27  ;;  %v8694_v56 = vpop.permute.xlu0 %6096  ;;  %v14052_v29 = vunpack.i.l.bf16 %v7741_v41  ;;  %v14056_v41 = vunpack.i.l.bf16 %v7760_v61 }
 0x1cf   :  { %2019 = vmatpush.msra.mxu0 %v724_v35  ;;  %2207 = vmatmul.f32.gmra.mxu3 %v8335_v55  ;;  %v8701_v48 = vpop.permute.xlu2 %6136  ;;  %v14053_v35 = vunpack.i.h.bf16 %v7966_v62  ;;  %v14055_v62 = vunpack.i.l.bf16 %v8041_v19  ;;  %v14062_v19 = vld [vmem:[#allocation23_spill] sm:$0xff] }
 0x1d0   :  { %6301 = vrot.lane.b32.xlu2 %v8556_v11, %s7238_s18  ;;  %6296 = vrot.lane.b32.xlu1 %v7864_v13, %s7234_s28  ;;  %v1523_v28 = vsel %vm1499_vm2, %v14052_v29, %v14051_v5  ;;  %v8710_v47 = vpop.permute.xlu1 %6081  ;;  %v13810_v5 = vunpack.i.h.bf16 %v8183_v23 }
 0x1d1   :  { %2020 = vmatmul.f32.vlgmr.msra.gmra.mxu0 %v8221_v8  ;;  %v13813_v10 = vunpack.i.h.bf16 %v8710_v47  ;;  %v13815_v6 = vunpack.i.l.bf16 %v8710_v47  ;;  %v1522_v18 = vsel %vm1499_vm2, %v14054_v3, %v14053_v35  ;;  %v1394_v3 = vsel %vm1370_vm3, %v14056_v41, %v14055_v62 }
 0x1d2   :  { %2142 = vmatpush.msrb.mxu0 %v1523_v28  ;;  %2253 = vmatmul.f32.gmra.mxu2 %v8335_v55  ;;  %v13817_v28 = vunpack.i.l.bf16 %v8288_v17  ;;  %v14059_v62 = vunpack.i.h.bf16 %v7760_v61  ;;  %v14061_v61 = vunpack.i.l.bf16 %v8037_v44 }
 0x1d3   :  { %v1646_v29 = vsel %vm1628_vm5, %v13811_v4, %v13815_v6  ;;  %v1645_v35 = vsel %vm1628_vm5, %v13810_v5, %v13813_v10  ;;  %v13824_v10 = vunpack.i.l.bf16 %v14064_v52 }
 0x1d4   :  { %2143 = vmatpush.msrb.mxu0 %v1522_v18  ;;  %2317 = vmatpush.msrb.mxu3 %v1646_v29  ;;  %v14057_v18 = vld [vmem:[#allocation43_spill] sm:$0xff]  ;;  %v1393_v29 = vsel %vm1370_vm3, %v14059_v62, %v14058_v36  ;;  %v14063_v36 = vunpack.i.l.bf16 %v14062_v19 }
 0x1d6   :  { %2144 = vmatpush.msrb.mxu0 %v1394_v3  ;;  %6321 = vrot.lane.b32.xlu0 %v14057_v18, %s7237_s30  ;;  %v8753_v41 = vpop.permute.xlu0 %6111  ;;  %v14060_v18 = vld [vmem:[#allocation46_spill] sm:$0xff] }
 0x1d7   :  { %2318 = vmatpush.msrb.mxu3 %v1645_v35  ;;  %v8757_v3 = vpop.permute.xlu2 %6151  ;;  %v13820_v5 = vunpack.i.l.bf16 %v14060_v18  ;;  %v1265_v35 = vsel %vm1241_vm4, %v14063_v36, %v14061_v61  ;;  %v13822_v45 = vunpack.i.h.bf16 %v14060_v18  ;;  %v14065_v61 = vunpack.i.h.bf16 %v8037_v44 }
 0x1d8   :  { %2145 = vmatpush.msrb.mxu0 %v1393_v29  ;;  %6316 = vrot.lane.b32.xlu2 %v8556_v11, %s7233_s27  ;;  %v1513_v11 = vsel %vm1499_vm2, %v13817_v28, %v13825_v32  ;;  %v8775_v62 = vpop.permute.xlu1 %6101  ;;  %v14066_v36 = vunpack.i.h.bf16 %v14062_v19  ;;  %v14067_v44 = vunpack.i.l.bf16 %v8307_v60  ;;  %v14070_v28 = vld [vmem:[#allocation8_spill] sm:$0xff]  ;;  %v14071_v60 = vld [vmem:[#allocation38_spill] sm:$0xff] }
 0x1d9   :  { %6311 = vrot.lane.b32.xlu1 %v7864_v13, %s7235_s29  ;;  %2023 = vmatmul.f32.gmra.mxu0 %v8335_v55  ;;  %v13821_v29 = vunpack.i.h.bf16 %v8775_v62  ;;  %v13818_v4 = vunpack.i.l.bf16 %v8775_v62  ;;  %v13828_v32 = vunpack.i.l.bf16 %v14071_v60 }
 0x1da   :  { %2146 = vmatpush.msrb.mxu0 %v1265_v35  ;;  %2372 = vmatpush.msra.mxu3 %v1513_v11  ;;  %v1264_v6 = vsel %vm1241_vm4, %v14066_v36, %v14065_v61  ;;  %v1512_v35 = vsel %vm1499_vm2, %v13816_v0, %v13819_v34  ;;  %v13823_v11 = vunpack.i.h.bf16 %v14064_v52  ;;  %v13831_v61 = vunpack.i.l.bf16 %v8494_v25 }
 0x1db   :  { %5657 = vmatmul.msk.f32.vlgmr.msrb.gmra.mxu3 %vm1997_vm10, %v8210_v12  ;;  %v842_v19 = vsel %vm822_vm8, %v14067_v44, %v13818_v4  ;;  %v1384_v36 = vsel %vm1370_vm3, %v13820_v5, %v13824_v10  ;;  %v841_v44 = vsel %vm822_vm8, %v6009_v26, %v13821_v29  ;;  %v13826_v4 = vunpack.i.l.bf16 %v8440_v46  ;;  %v14072_v5 = vld [vmem:[#allocation9_spill] sm:$0xff] }
 0x1dc   :  { %2147 = vmatpush.msrb.mxu0 %v1264_v6  ;;  %2373 = vmatpush.msra.mxu3 %v1512_v35  ;;  %v14068_v6 = vld [vmem:[#allocation42_spill] sm:$0xff]  ;;  %v14069_v35 = vld [vmem:[#allocation41_spill] sm:$0xff]  ;;  %v13830_v34 = vunpack.i.h.bf16 %v8494_v25  ;;  %v13829_v29 = vunpack.i.h.bf16 %v8440_v46 }
 0x1dd   :  { %2292 = vmatpush.msra.mxu1 %v842_v19  ;;  %v6335_v0 = vpack.i.bf16 %v14069_v35, %v14068_v6  ;;  %v1383_v19 = vsel %vm1370_vm3, %v13822_v45, %v13823_v11  ;;  %v14073_v45 = vunpack.i.l.bf16 %v7794_v63  ;;  %v14074_v11 = vld [vmem:[#allocation26_spill] sm:$0xff] }
 0x1de   :  { %2148 = vmatpush.msrb.mxu0 %v14070_v28  ;;  %2374 = vmatpush.msra.mxu3 %v1384_v36  ;;  %v8827_v28 = vpop.permute.xlu0 %6126  ;;  %v13827_v36 = vunpack.i.h.bf16 %v14071_v60 }
 0x1df   :  { %6336 = vrot.lane.b32.xlu0 %v6335_v0, %s7236_s0  ;;  %2293 = vmatpush.msra.mxu1 %v841_v44  ;;  %v8831_v26 = vpop.permute.xlu2 %6166  ;;  %v14075_v44 = vunpack.i.l.bf16 %v14074_v11 }
 0x1e0   :  { %2149 = vmatpush.msrb.mxu0 %v14072_v5  ;;  %2375 = vmatpush.msra.mxu3 %v1383_v19  ;;  %v1255_v5 = vsel %vm1241_vm4, %v13826_v4, %v13831_v61  ;;  %v8849_v19 = vpop.permute.xlu1 %6116 }
 0x1e1   :  { %6331 = vrot.lane.b32.xlu2 %v6335_v0, %s7239_s19  ;;  %6326 = vrot.lane.b32.xlu1 %v8276_v38, %s7237_s30  ;;  %v1106_v10 = vsel %vm1080_vm6, %v14075_v44, %v14073_v45  ;;  %v713_v38 = vsel %vm693_vm9, %v5969_v42, %v13827_v36  ;;  %v14076_v45 = vunpack.i.h.bf16 %v7794_v63  ;;  %v14077_v44 = vunpack.i.h.bf16 %v14074_v11 }
 0x1e2   :  { %2150 = vmatpush.msrb.mxu0 %v1106_v10  ;;  %2376 = vmatpush.msra.mxu3 %v1255_v5  ;;  %v1254_v10 = vsel %vm1241_vm4, %v13829_v29, %v13830_v34  ;;  %v14078_v63 = vunpack.i.l.bf16 %v8263_v39  ;;  %v13833_v11 = vunpack.i.l.bf16 %v8573_v16  ;;  %v14079_v5 = vunpack.i.l.bf16 %v14034_v30 }
 0x1e3   :  { %2294 = vmatpush.msra.mxu1 %v713_v38  ;;  %v1105_v4 = vsel %vm1080_vm6, %v14077_v44, %v14076_v45  ;;  %5658 = vmatmul.msk.f32.gmra.mxu3 %vm1997_vm10, %v8238_v27  ;;  %v14080_v38 = vld [vmem:[#allocation25_spill] sm:$0xff]  ;;  %v13843_v39 = vunpack.i.h.bf16 %v8573_v16  ;;  %v14083_v36 = vunpack.i.h.bf16 %v14034_v30  ;;  %v13835_v30 = vunpack.i.l.bf16 %v8753_v41 }
 0x1e4   :  { %2151 = vmatpush.msrb.mxu0 %v1105_v4  ;;  %2377 = vmatpush.msra.mxu3 %v1254_v10  ;;  %v712_v42 = vsel %vm693_vm9, %v14078_v63, %v13828_v32  ;;  %v14081_v45 = vunpack.i.l.bf16 %v14080_v38  ;;  %v14082_v4 = vld [vmem:[#allocation21_spill] sm:$0xff]  ;;  %v13832_v10 = vunpack.i.l.bf16 %v8496_v15  ;;  %v14084_v63 = vunpack.i.h.bf16 %v14080_v38 }
 0x1e5   :  { %2295 = vmatpush.msra.mxu1 %v712_v42  ;;  %v14087_v38 = vld [vmem:[#allocation29_spill] sm:$0xff]  ;;  %v13836_v29 = vunpack.i.l.bf16 %v8649_v53  ;;  %v13839_v34 = vunpack.i.h.bf16 %v8753_v41 }
 0x1e6   :  { %v977_v44 = vsel %vm951_vm7, %v14081_v45, %v14079_v5  ;;  %2378 = vmatpush.msra.mxu3 %v14082_v4  ;;  %v976_v42 = vsel %vm951_vm7, %v14084_v63, %v14083_v36  ;;  %2296 = vmatmul.f32.vlgmr.msra.gmra.mxu1 %v8221_v8  ;;  %v8896_v32 = vpop.permute.xlu0 %6141  ;;  %v14085_v5 = vld [vmem:[#allocation22_spill] sm:$0xff]  ;;  %v14086_v36 = vunpack.i.l.bf16 %v14036_v7  ;;  %v14088_v4 = vunpack.i.l.bf16 %v14087_v38 }
 0x1e7   :  { %2152 = vmatpush.msrb.mxu0 %v977_v44  ;;  %6351 = vrot.lane.b32.xlu0 %v6335_v0, %s7233_s27  ;;  %v8899_v45 = vpop.permute.xlu2 %6181  ;;  %v13834_v44 = vunpack.i.h.bf16 %v8496_v15 }
 0x1e8   :  { %2379 = vmatpush.msra.mxu3 %v14085_v5  ;;  %v848_v63 = vsel %vm822_vm8, %v14088_v4, %v14086_v36  ;;  %v8918_v5 = vpop.permute.xlu1 %6131  ;;  %v14089_v36 = vunpack.i.h.bf16 %v14036_v7  ;;  %v14090_v4 = vunpack.i.h.bf16 %v14087_v38  ;;  %v13840_v38 = vunpack.i.h.bf16 %v8649_v53 }
 0x1e9   :  { %2153 = vmatpush.msrb.mxu0 %v976_v42  ;;  %6346 = vrot.lane.b32.xlu2 %v7864_v13, %s7237_s30  ;;  %v1096_v42 = vsel %vm1080_vm6, %v13832_v10, %v13833_v11  ;;  %v13838_v13 = vunpack.i.h.bf16 %v8918_v5  ;;  %v14093_v10 = vld [vmem:[#allocation16_spill] sm:$0xff] }
 0x1ea   :  { %6341 = vrot.lane.b32.xlu1 %v6335_v0, %s7238_s18  ;;  %2380 = vmatpush.msra.mxu3 %v1096_v42  ;;  %v13837_v0 = vunpack.i.l.bf16 %v8918_v5  ;;  %v847_v61 = vsel %vm822_vm8, %v14090_v4, %v14089_v36  ;;  %v14091_v42 = vunpack.i.l.bf16 %v8710_v47  ;;  %v13841_v36 = vunpack.i.l.bf16 %v8827_v28  ;;  %s7246_s18 = smov [#allocation5]  }
 0x1eb   :  { %2154 = vmatpush.msrb.mxu0 %v848_v63  ;;  %v1095_v63 = vsel %vm1080_vm6, %v13834_v44, %v13843_v39  ;;  %v14092_v4 = vunpack.i.h.bf16 %v14039_v1  ;;  %v14094_v11 = vunpack.i.h.bf16 %v14093_v10 }
 0x1ec   :  { %2381 = vmatpush.msra.mxu3 %v1095_v63  ;;  %v1644_v7 = vsel %vm1628_vm5, %v14091_v42, %v13837_v0  ;;  %v6033_v63 = vunpack.i.l.bf16 %v8511_v2  ;;  %v1986_v42 = vld [vmem:[%s13684_s4 + $0x8] sm:$0xff] }
 0x1ed   :  { %2155 = vmatpush.msrb.mxu0 %v847_v61  ;;  %v719_v44 = vsel %vm693_vm9, %v14094_v11, %v14092_v4  ;;  %v967_v61 = vsel %vm951_vm7, %v13835_v30, %v13836_v29  ;;  %2363 = vmatpush.msrb.mxu2 %v1644_v7  ;;  %v1985_v11 = vld [vmem:[%s13684_s4] sm:$0xff]  ;;  %v14095_v4 = vunpack.i.h.bf16 %v8710_v47  ;;  %v13842_v7 = vunpack.i.l.bf16 %v8701_v48 }
 0x1ee   :  { %2382 = vmatpush.msra.mxu3 %v967_v61  ;;  %v14096_v61 = vunpack.i.l.bf16 %v14039_v1  ;;  %v14097_v29 = vunpack.i.l.bf16 %v14093_v10  ;;  %v966_v47 = vsel %vm951_vm7, %v13839_v34, %v13840_v38  ;;  %2299 = vmatmul.f32.gmra.mxu1 %v8335_v55  ;;  %v14098_v10 = vld [vmem:[#allocation44_spill] sm:$0xff]  ;;  %v14100_v38 = vunpack.i.l.bf16 %v8348_v40 }
 0x1ef   :  { %2156 = vmatpush.msrb.mxu0 %v719_v44  ;;  %v1643_v30 = vsel %vm1628_vm5, %v14095_v4, %v13838_v13  ;;  %v13844_v44 = vunpack.i.h.bf16 %v8827_v28  ;;  %v8983_v4 = vpop.permute.xlu0 %6156  ;;  %v6034_v13 = vunpack.i.h.bf16 %v8511_v2  ;;  %v8987_v1 = vpop.permute.xlu2 %6196 }
 0x1f0   :  { %v718_v0 = vsel %vm693_vm9, %v14097_v29, %v14096_v61  ;;  %2364 = vmatpush.msrb.mxu2 %v1643_v30  ;;  %2383 = vmatpush.msra.mxu3 %v966_v47  ;;  %v13845_v61 = vunpack.i.h.bf16 %v8701_v48  ;;  %v838_v30 = vsel %vm822_vm8, %v13841_v36, %v13842_v7  ;;  %v8997_v34 = vpop.permute.xlu1 %6146  ;;  %v14099_v47 = vunpack.i.l.bf16 %v8183_v23  ;;  %v14102_v7 = vld [vmem:[#allocation39_spill] sm:$0xff] }
 0x1f1   :  { %2157 = vmatpush.msrb.mxu0 %v718_v0  ;;  %1994 = vperm.xlu2 %6356, %v1986_v42   ;;  %v5924_v39 = vunpack.i.h.bf16 %v14102_v7  ;;  %v5973_v0 = vunpack.i.l.bf16 %v14098_v10  ;;  %v14104_v29 = vunpack.i.h.bf16 %v8348_v40  ;;  %v14107_v40 = vunpack.i.l.bf16 %v8092_v59 }
 0x1f2   :  { %1989 = vperm.xlu1 %6355, %v1985_v11   ;;  %2158 = vmatmul.f32.vlgmr.msrb.gmra.mxu0 %v8221_v8  ;;  %v1648_v42 = vsel %vm1628_vm5, %v14100_v38, %v14099_v47  ;;  %v14101_v11 = vunpack.i.l.bf16 %v8290_v24  ;;  %v837_v38 = vsel %vm822_vm8, %v13844_v44, %v13845_v61  ;;  %v14103_v47 = vunpack.i.h.bf16 %v8183_v23 }
 0x1f3   :  { %2384 = vmatpush.msra.mxu3 %v838_v30  ;;  %2271 = vmatpush.msra.mxu0 %v1648_v42  ;;  %v6099_v30 = vunpack.i.h.bf16 %v8694_v56  ;;  %v5923_v44 = vunpack.i.l.bf16 %v14102_v7  ;;  %v14106_v23 = vunpack.i.l.bf16 %v8288_v17 }
 0x1f4   :  { %v1511_v36 = vsel %vm1499_vm2, %v14101_v11, %v6033_v63  ;;  %v1647_v11 = vsel %vm1628_vm5, %v14104_v29, %v14103_v47  ;;  %5659 = vmatmul.msk.f32.vlgmr.msrb.gmra.mxu2 %vm1997_vm10, %v8210_v12  ;;  %v6118_v47 = vunpack.i.l.bf16 %v8849_v19 }
 0x1f5   :  { %2418 = vmatpush.msra.mxu2 %v1511_v36  ;;  %2385 = vmatpush.msra.mxu3 %v837_v38  ;;  %v14105_v36 = vunpack.i.h.bf16 %v8290_v24  ;;  %v1515_v29 = vsel %vm1499_vm2, %v14107_v40, %v14106_v23  ;;  %v14108_v38 = vunpack.i.h.bf16 %v14098_v10  ;;  %v14112_v23 = vunpack.i.h.bf16 %v8092_v59 }
 0x1f6   :  { %2272 = vmatpush.msra.mxu0 %v1647_v11  ;;  %v14109_v11 = vunpack.i.l.bf16 %v8694_v56  ;;  %v14113_v59 = vunpack.i.h.bf16 %v14064_v52 }
 0x1f7   :  { %v1510_v42 = vsel %vm1499_vm2, %v14105_v36, %v6034_v13  ;;  %v709_v24 = vsel %vm693_vm9, %v5924_v39, %v14108_v38  ;;  %v14110_v36 = vunpack.i.l.bf16 %v14064_v52  ;;  %v9068_v38 = vpop.permute.xlu0 %6171  ;;  %v14116_v52 = vunpack.i.l.bf16 %v8494_v25 }
 0x1f8   :  { %2419 = vmatpush.msra.mxu2 %v1510_v42  ;;  %2326 = vmatpush.msrb.mxu0 %v1515_v29  ;;  %v14111_v42 = vunpack.i.h.bf16 %v8288_v17  ;;  %v708_v29 = vsel %vm693_vm9, %v5923_v44, %v5973_v0  ;;  %v1381_v17 = vsel %vm1370_vm3, %v14113_v59, %v6099_v30  ;;  %v14118_v59 = vunpack.i.h.bf16 %v8212_v57 }
 0x1f9   :  { %2386 = vmatpush.msra.mxu3 %v709_v24  ;;  %v1382_v61 = vsel %vm1370_vm3, %v14110_v36, %v14109_v11  ;;  %v6119_v24 = vunpack.i.h.bf16 %v8849_v19  ;;  %v14114_v11 = vunpack.i.l.bf16 %v14060_v18  ;;  %v14115_v36 = vunpack.i.l.bf16 %v8212_v57 }
 0x1fa   :  { %v1514_v40 = vsel %vm1499_vm2, %v14112_v23, %v14111_v42  ;;  %2420 = vmatpush.msra.mxu2 %v1382_v61  ;;  %v9077_v61 = vpop.permute.xlu2 %6211  ;;  %v9086_v23 = vpop.permute.xlu1 %6161  ;;  %2161 = vmatmul.f32.gmra.mxu0 %v8335_v55 }
 0x1fb   :  { %2327 = vmatpush.msrb.mxu0 %v1514_v40  ;;  %2387 = vmatpush.msra.mxu3 %v708_v29  ;;  %v1386_v42 = vsel %vm1370_vm3, %v14115_v36, %v14114_v11  ;;  %v1253_v40 = vsel %vm1241_vm4, %v14116_v52, %v6118_v47  ;;  %v14117_v29 = vunpack.i.h.bf16 %v14060_v18  ;;  %v14120_v36 = vunpack.i.l.bf16 %v8440_v46 }
 0x1fc   :  { %2421 = vmatpush.msra.mxu2 %v1381_v17  ;;  %2388 = vmatmul.f32.vlgmr.msra.gmra.mxu3 %v8221_v8  ;;  %v14119_v8 = vunpack.i.h.bf16 %v8494_v25  ;;  %v14121_v18 = vunpack.i.l.bf16 %v8240_v54  ;;  %v14122_v52 = vunpack.i.h.bf16 %v8440_v46  ;;  %v14123_v25 = vunpack.i.h.bf16 %v8240_v54  ;;  %v14126_v46 = vld [vmem:[#allocation12_spill] sm:$0xff] }
 0x1fd   :  { %2328 = vmatpush.msrb.mxu0 %v1386_v42  ;;  %v1385_v17 = vsel %vm1370_vm3, %v14118_v59, %v14117_v29  ;;  %5660 = vmatmul.msk.f32.gmra.mxu2 %vm1997_vm10, %v8238_v27  ;;  %v13846_v42 = vunpack.i.l.bf16 %v8896_v32  ;;  %v14124_v29 = vld [vmem:[#allocation24_spill] sm:$0xff]  ;;  %v13847_v59 = vunpack.i.h.bf16 %v8896_v32  ;;  %v13850_v54 = vunpack.i.l.bf16 %v8997_v34 }
 0x1fe   :  { %2422 = vmatpush.msra.mxu2 %v1253_v40  ;;  %v1252_v11 = vsel %vm1241_vm4, %v14119_v8, %v6119_v24  ;;  %v1257_v57 = vsel %vm1241_vm4, %v14121_v18, %v14120_v36  ;;  %v1256_v40 = vsel %vm1241_vm4, %v14123_v25, %v14122_v52  ;;  %v14125_v8 = vld [vmem:[#allocation27_spill] sm:$0xff]  ;;  %v14127_v36 = vunpack.i.l.bf16 %v8573_v16 }
 0x1ff   :  { %2329 = vmatpush.msrb.mxu0 %v1385_v17  ;;  %v9123_v27 = vpop.permute.xlu0 %6186  ;;  %v6153_v25 = vunpack.i.l.bf16 %v8757_v3 }
 0x200   :  { %2423 = vmatpush.msra.mxu2 %v1252_v11  ;;  %v1094_v18 = vsel %vm1080_vm6, %v14127_v36, %v13846_v42  ;;  %v14130_v36 = vunpack.i.l.bf16 %v8918_v5  ;;  %v14132_v42 = vunpack.i.l.bf16 %v8153_v9 }
 0x201   :  { %2330 = vmatpush.msrb.mxu0 %v1257_v57 }
 0x202   :  { %2424 = vmatpush.msra.mxu2 %v14124_v29  ;;  %v9126_v17 = vpop.permute.xlu2 %6226  ;;  %v9130_v11 = vpop.permute.xlu1 %6176  ;;  %5655 = vmatmul.msk.f32.vlgmr.msra.gmra.mxu0 %vm1997_vm10, %v8210_v12  ;;  %v14128_v29 = vld [vmem:[#allocation15_spill] sm:$0xff] }
 0x203   :  { %2331 = vmatpush.msrb.mxu0 %v1256_v40  ;;  %v6179_v57 = vunpack.i.h.bf16 %v9130_v11  ;;  %v13848_v52 = vunpack.i.l.bf16 %v9130_v11  ;;  %v13849_v40 = vunpack.i.h.bf16 %v8997_v34 }
 0x204   :  { %2425 = vmatpush.msra.mxu2 %v14125_v8  ;;  %2391 = vmatmul.f32.gmra.mxu3 %v8335_v55  ;;  %v14129_v8 = vunpack.i.h.bf16 %v8573_v16  ;;  %v6163_v16 = vunpack.i.l.bf16 %v9086_v23 }
 0x205   :  { %2332 = vmatpush.msrb.mxu0 %v14126_v46  ;;  %v1642_v12 = vsel %vm1628_vm5, %v14130_v36, %v13848_v52  ;;  %v14134_v36 = vunpack.i.h.bf16 %v8918_v5  ;;  %v14137_v5 = vunpack.i.h.bf16 %v8649_v53 }
 0x206   :  { %2426 = vmatpush.msra.mxu2 %v1094_v18  ;;  %v1093_v46 = vsel %vm1080_vm6, %v14129_v8, %v13847_v59  ;;  %v14131_v18 = vunpack.i.l.bf16 %v8496_v15  ;;  %2409 = vmatpush.msrb.mxu1 %v1642_v12  ;;  %v14133_v8 = vunpack.i.l.bf16 %v8649_v53  ;;  %v14136_v12 = vunpack.i.h.bf16 %v8153_v9  ;;  %v9197_v9 = vld [vmem:[%s13683_s3 + $0x8] sm:$0xff] }
 0x207   :  { %2333 = vmatpush.msrb.mxu0 %v14128_v29  ;;  %v1641_v52 = vsel %vm1628_vm5, %v14134_v36, %v6179_v57  ;;  %v964_v36 = vsel %vm951_vm7, %v14137_v5, %v13849_v40  ;;  %v6168_v53 = vunpack.i.l.bf16 %v8831_v26  ;;  %v6173_v40 = vunpack.i.l.bf16 %v9068_v38 }
 0x208   :  { %v1098_v29 = vsel %vm1080_vm6, %v14132_v42, %v14131_v18  ;;  %2427 = vmatpush.msra.mxu2 %v1093_v46  ;;  %v965_v59 = vsel %vm951_vm7, %v14133_v8, %v13850_v54  ;;  %v6158_v42 = vunpack.i.l.bf16 %v8983_v4  ;;  %v14135_v46 = vunpack.i.h.bf16 %v8496_v15  ;;  %2410 = vmatpush.msrb.mxu1 %v1641_v52  ;;  %v9228_v54 = vld [vmem:[%s13683_s3 + $0x18] sm:$0xff] }
 0x209   :  { %2334 = vmatpush.msrb.mxu0 %v1098_v29  ;;  %v9185_v29 = vpop.permute.xlu0 %6201  ;;  %v6164_v8 = vunpack.i.h.bf16 %v9086_v23  ;;  %5661 = vmatmul.msk.f32.vlgmr.msrb.gmra.mxu1 %vm1997_vm10, %v9197_v9  ;;  %v1509_v15 = vsel %vm1499_vm2, %v6033_v63, %v6153_v25  ;;  %v14138_v52 = vunpack.i.l.bf16 %v8753_v41  ;;  %v14140_v63 = vunpack.i.l.bf16 %v8701_v48 }
 0x20a   :  { %v1097_v18 = vsel %vm1080_vm6, %v14136_v12, %v14135_v46  ;;  %2428 = vmatpush.msra.mxu2 %v965_v59  ;;  %v9207_v59 = vpop.permute.xlu2 %6241  ;;  %v14139_v46 = vunpack.i.l.bf16 %v8640_v22  ;;  %2464 = vmatpush.msra.mxu1 %v1509_v15  ;;  %v14142_v15 = vunpack.i.h.bf16 %v8640_v22 }
 0x20b   :  { %2335 = vmatpush.msrb.mxu0 %v1097_v18  ;;  %v9216_v18 = vpop.permute.xlu1 %6191  ;;  %v836_v5 = vsel %vm822_vm8, %v14140_v63, %v6163_v16 }
 0x20c   :  { %v969_v12 = vsel %vm951_vm7, %v14139_v46, %v14138_v52  ;;  %2429 = vmatpush.msra.mxu2 %v964_v36  ;;  %5656 = vmatmul.msk.f32.gmra.mxu0 %vm1997_vm10, %v9228_v54  ;;  %v14141_v36 = vunpack.i.h.bf16 %v8753_v41  ;;  %v1508_v46 = vsel %vm1499_vm2, %v6034_v13, %v6158_v42  ;;  %v14144_v41 = vunpack.i.h.bf16 %v8701_v48 }
 0x20d   :  { %2336 = vmatpush.msrb.mxu0 %v969_v12  ;;  %v14143_v12 = vld [vmem:[#allocation40_spill] sm:$0xff]  ;;  %2465 = vmatpush.msra.mxu1 %v1508_v46  ;;  %v14147_v13 = vunpack.i.l.bf16 %v8694_v56  ;;  %v14148_v46 = vunpack.i.h.bf16 %v14098_v10  ;;  %v14151_v56 = vunpack.i.h.bf16 %v14071_v60 }
 0x20e   :  { %v968_v52 = vsel %vm951_vm7, %v14142_v15, %v14141_v36  ;;  %2430 = vmatpush.msra.mxu2 %v836_v5  ;;  %v6039_v63 = vunpack.i.h.bf16 %v14143_v12  ;;  %v835_v22 = vsel %vm822_vm8, %v14144_v41, %v6164_v8  ;;  %v14145_v5 = vunpack.i.l.bf16 %v8827_v28  ;;  %v9307_v10 = vld [vmem:[%s13683_s3] sm:$0xff] }
 0x20f   :  { %2337 = vmatpush.msrb.mxu0 %v968_v52  ;;  %v14146_v36 = vunpack.i.l.bf16 %v8775_v62  ;;  %v1380_v15 = vsel %vm1370_vm3, %v14147_v13, %v6168_v53  ;;  %v6038_v48 = vunpack.i.l.bf16 %v14143_v12  ;;  %v6183_v52 = vunpack.i.l.bf16 %v8899_v45 }
 0x210   :  { %2431 = vmatpush.msra.mxu2 %v835_v22  ;;  %v707_v41 = vsel %vm693_vm9, %v14148_v46, %v6039_v63  ;;  %2466 = vmatpush.msra.mxu1 %v1380_v15  ;;  %v14149_v22 = vunpack.i.h.bf16 %v8827_v28  ;;  %v6188_v46 = vunpack.i.l.bf16 %v9123_v27  ;;  %v711_v28 = vsel %vm693_vm9, %v14151_v56, %v5924_v39 }
 0x211   :  { %v840_v2 = vsel %vm822_vm8, %v14146_v36, %v14145_v5  ;;  %v14150_v5 = vunpack.i.h.bf16 %v8775_v62  ;;  %v9283_v13 = vpop.permute.xlu0 %6216  ;;  %v706_v62 = vsel %vm693_vm9, %v5973_v0, %v6038_v48  ;;  %5662 = vmatmul.msk.f32.gmra.mxu1 %vm1997_vm10, %v9228_v54  ;;  %v1251_v39 = vsel %vm1241_vm4, %v6118_v47, %v6183_v52 }
 0x212   :  { %2338 = vmatpush.msrb.mxu0 %v840_v2  ;;  %2432 = vmatpush.msra.mxu2 %v707_v41  ;;  %v1379_v2 = vsel %vm1370_vm3, %v6099_v30, %v6173_v40  ;;  %v9300_v30 = vpop.permute.xlu2 %6256  ;;  %v6198_v0 = vunpack.i.l.bf16 %v8987_v1  ;;  %v14152_v41 = vunpack.i.l.bf16 %v14071_v60  ;;  %v6199_v47 = vunpack.i.h.bf16 %v8987_v1 }
 0x213   :  { %v839_v36 = vsel %vm822_vm8, %v14150_v5, %v14149_v22  ;;  %2467 = vmatpush.msra.mxu1 %v1379_v2  ;;  %v9302_v15 = vpop.permute.xlu1 %6206  ;;  %v6154_v5 = vunpack.i.h.bf16 %v8757_v3  ;;  %v14153_v60 = vunpack.i.l.bf16 %v9130_v11  ;;  %v13854_v56 = vunpack.i.h.bf16 %v8831_v26  ;;  %v14155_v11 = vld [vmem:[#allocation31_spill] sm:$0xff] }
 0x214   :  { %2339 = vmatpush.msrb.mxu0 %v839_v36  ;;  %2433 = vmatpush.msra.mxu2 %v706_v62  ;;  %v710_v22 = vsel %vm693_vm9, %v14152_v41, %v5923_v44  ;;  %v1250_v36 = vsel %vm1241_vm4, %v6119_v24, %v6188_v46  ;;  %v13855_v44 = vunpack.i.h.bf16 %v8983_v4  ;;  %v6208_v2 = vunpack.i.l.bf16 %v9302_v15  ;;  %v14154_v24 = vld [vmem:[#allocation28_spill] sm:$0xff] }
 0x215   :  { %2434 = vmatmul.f32.vlgmr.msra.gmra.mxu2 %v9307_v10  ;;  %2468 = vmatpush.msra.mxu1 %v1251_v39  ;;  %v1640_v7 = vsel %vm1628_vm5, %v14153_v60, %v6198_v0  ;;  %v1639_v19 = vsel %vm1628_vm5, %v6179_v57, %v6199_v47  ;;  %v1507_v39 = vsel %vm1499_vm2, %v6153_v25, %v6154_v5  ;;  %v13853_v41 = vunpack.i.h.bf16 %v9068_v38 }
 0x216   :  { %2340 = vmatpush.msrb.mxu0 %v711_v28  ;;  %v6218_v28 = vunpack.i.l.bf16 %v9283_v13  ;;  %v14156_v25 = vunpack.i.l.bf16 %v8896_v32 }
 0x217   :  { %2469 = vmatpush.msra.mxu1 %v1250_v36  ;;  %v1506_v36 = vsel %vm1499_vm2, %v6158_v42, %v13855_v44  ;;  %v1378_v42 = vsel %vm1370_vm3, %v6168_v53, %v13854_v56  ;;  %v14158_v53 = vunpack.i.l.bf16 %v8997_v34 }
 0x218   :  { %2341 = vmatpush.msrb.mxu0 %v710_v22  ;;  %v6228_v22 = vunpack.i.l.bf16 %v9126_v17  ;;  %v1092_v60 = vsel %vm1080_vm6, %v14156_v25, %v6208_v2 }
 0x219   :  { %2342 = vmatmul.f32.vlgmr.msrb.gmra.mxu0 %v9307_v10  ;;  %2470 = vmatpush.msra.mxu1 %v14154_v24  ;;  %v9345_v62 = vpop.permute.xlu0 %6231 }
 0x21a   :  { %2455 = vmatpush.msra.mxu0 %v1640_v7  ;;  %v9371_v7 = vpop.permute.xlu2 %6271 }
 0x21b   :  { %2471 = vmatpush.msra.mxu1 %v14155_v11  ;;  %v9356_v57 = vpop.permute.xlu1 %6221  ;;  %v9388_v11 = vld [vmem:[%s13683_s3 + $0x10] sm:$0xff] }
 0x21c   :  { %2456 = vmatpush.msra.mxu0 %v1639_v19  ;;  %v13851_v19 = vunpack.i.h.bf16 %v8899_v45 }
 0x21d   :  { %2437 = vmatmul.f32.gmra.mxu2 %v8335_v55  ;;  %2472 = vmatpush.msra.mxu1 %v1092_v60  ;;  %v14157_v55 = vunpack.i.h.bf16 %v8896_v32  ;;  %v1377_v32 = vsel %vm1370_vm3, %v6173_v40, %v13853_v41  ;;  %v14161_v41 = vld [vmem:[#allocation36_spill] sm:$0xff] }
 0x21e   :  { %2510 = vmatpush.msrb.mxu0 %v1507_v39  ;;  %v13852_v39 = vunpack.i.h.bf16 %v9123_v27  ;;  %v1249_v60 = vsel %vm1241_vm4, %v6183_v52, %v13851_v19  ;;  %v14159_v52 = vunpack.i.h.bf16 %v8997_v34  ;;  %v14160_v19 = vld [vmem:[#allocation37_spill] sm:$0xff]  ;;  %v6028_v34 = vunpack.i.l.bf16 %v8427_v31 }
 0x21f   :  { %v1091_v24 = vsel %vm1080_vm6, %v14157_v55, %v6218_v28 }
 0x220   :  { %2511 = vmatpush.msrb.mxu0 %v1506_v36  ;;  %2473 = vmatpush.msra.mxu1 %v1091_v24  ;;  %v963_v36 = vsel %vm951_vm7, %v14158_v53, %v6228_v22  ;;  %v1248_v40 = vsel %vm1241_vm4, %v6188_v46, %v13852_v39  ;;  %v13857_v53 = vunpack.i.h.bf16 %v9302_v15  ;;  %v6029_v46 = vunpack.i.h.bf16 %v8427_v31 }
 0x221   :  { %2345 = vmatmul.f32.gmra.mxu0 %v9388_v11  ;;  %v9401_v25 = vpop.permute.xlu0 %6246  ;;  %v13856_v39 = vunpack.i.h.bf16 %v9283_v13  ;;  %v6243_v31 = vunpack.i.l.bf16 %v9207_v59 }
 0x222   :  { %2512 = vmatpush.msrb.mxu0 %v1378_v42  ;;  %2474 = vmatpush.msra.mxu1 %v963_v36  ;;  %v6248_v55 = vunpack.i.l.bf16 %v9401_v25  ;;  %v9419_v36 = vpop.permute.xlu2 %6286  ;;  %v705_v23 = vsel %vm693_vm9, %v6039_v63, %v6029_v46  ;;  %v704_v63 = vsel %vm693_vm9, %v6038_v48, %v6028_v34 }
 0x223   :  { %v9409_v42 = vpop.permute.xlu1 %6236 }
 0x224   :  { %2513 = vmatpush.msrb.mxu0 %v1377_v32  ;;  %v6238_v24 = vunpack.i.l.bf16 %v9409_v42  ;;  %v6258_v32 = vunpack.i.l.bf16 %v9300_v30 }
 0x226   :  { %2514 = vmatpush.msrb.mxu0 %v1249_v60  ;;  %v962_v60 = vsel %vm951_vm7, %v14159_v52, %v6238_v24  ;;  %v1090_v52 = vsel %vm1080_vm6, %v6208_v2, %v13857_v53  ;;  %v833_v56 = vsel %vm822_vm8, %v6164_v8, %v6258_v32 }
 0x227   :  { %2475 = vmatpush.msra.mxu1 %v962_v60 }
 0x228   :  { %2515 = vmatpush.msrb.mxu0 %v1248_v40  ;;  %v834_v40 = vsel %vm822_vm8, %v6163_v16, %v6248_v55  ;;  %v9447_v16 = vpop.f32.mrf.mxu1 }
 0x229   :  { %5663 = vmatmul.msk.f32.vlgmr.msra.gmra.mxu0 %vm1997_vm10, %v9197_v9  ;;  %2476 = vmatpush.msra.mxu1 %v834_v40  ;;  %v9441_v60 = vpop.permute.xlu0 %6261  ;;  %v1089_v40 = vsel %vm1080_vm6, %v6218_v28, %v13856_v39  ;;  %v6249_v28 = vunpack.i.h.bf16 %v9401_v25 }
 0x22a   :  { %2516 = vmatpush.msrb.mxu0 %v14160_v19  ;;  %v13858_v19 = vunpack.i.h.bf16 %v9126_v17  ;;  %v6263_v8 = vunpack.i.l.bf16 %v9441_v60  ;;  %v13861_v53 = vunpack.i.h.bf16 %v9441_v60  ;;  %v9489_v12 = vpop.permute.xlu2 %6301 }
 0x22b   :  { %2477 = vmatpush.msra.mxu1 %v833_v56  ;;  %v9454_v44 = vpop.permute.xlu1 %6251 }
 0x22c   :  { %2517 = vmatpush.msrb.mxu0 %v14161_v41  ;;  %v6239_v41 = vunpack.i.h.bf16 %v9409_v42  ;;  %v13859_v2 = vunpack.i.h.bf16 %v9454_v44  ;;  %v6253_v56 = vunpack.i.l.bf16 %v9454_v44  ;;  %v961_v39 = vsel %vm951_vm7, %v6228_v22, %v13858_v19 }
 0x22d   :  { %2478 = vmatpush.msra.mxu1 %v705_v23  ;;  %v6193_v23 = vunpack.i.l.bf16 %v9216_v18  ;;  %v6259_v19 = vunpack.i.h.bf16 %v9300_v30  ;;  %v1635_v1 = vsel %vm1628_vm5, %v6263_v8, %v13861_v53  ;;  %v6233_v53 = vunpack.i.l.bf16 %v9345_v62 }
 0x22e   :  { %2518 = vmatpush.msrb.mxu0 %v1090_v52  ;;  %v9465_v52 = vpop.f32.mrf.mxu3  ;;  %v1636_v22 = vsel %vm1628_vm5, %v6253_v56, %v13859_v2  ;;  %v960_v48 = vsel %vm951_vm7, %v6238_v24, %v6239_v41  ;;  %v832_v2 = vsel %vm822_vm8, %v6248_v55, %v6249_v28 }
 0x22f   :  { %2479 = vmatpush.msra.mxu1 %v704_v63  ;;  %2547 = vmatpush.msrb.mxu2 %v1636_v22  ;;  %v6203_v63 = vunpack.i.l.bf16 %v9185_v29  ;;  %v6213_v22 = vunpack.i.l.bf16 %v9077_v61  ;;  %v831_v55 = vsel %vm822_vm8, %v6258_v32, %v6259_v19 }
 0x230   :  { %2519 = vmatpush.msrb.mxu0 %v1089_v40  ;;  %v1638_v40 = vsel %vm1628_vm5, %v6198_v0, %v6253_v56  ;;  %v13860_v0 = vunpack.i.h.bf16 %v9216_v18  ;;  %v6059_v56 = vunpack.i.h.bf16 %v8597_v37  ;;  %2480 = vmatmul.f32.vlgmr.msra.gmra.mxu1 %v9307_v10 }
 0x231   :  { %5664 = vmatmul.msk.f32.gmra.mxu0 %vm1997_vm10, %v9228_v54  ;;  %2501 = vmatpush.msrb.mxu3 %v1638_v40  ;;  %v9513_v24 = vpop.permute.xlu0 %6276  ;;  %v6063_v40 = vunpack.i.l.bf16 %v8657_v43 }
 0x232   :  { %2520 = vmatpush.msrb.mxu0 %v961_v39  ;;  %v1637_v39 = vsel %vm1628_vm5, %v6199_v47, %v6263_v8  ;;  %v6204_v47 = vunpack.i.h.bf16 %v9185_v29  ;;  %2548 = vmatpush.msrb.mxu2 %v1635_v1  ;;  %v1505_v8 = vsel %vm1499_vm2, %v6154_v5, %v6193_v23  ;;  %v1503_v32 = vsel %vm1499_vm2, %v6193_v23, %v13860_v0 }
 0x233   :  { %2502 = vmatpush.msrb.mxu3 %v1637_v39  ;;  %5667 = vmatmul.msk.f32.vlgmr.msrb.gmra.mxu2 %vm1997_vm10, %v9197_v9  ;;  %v6214_v39 = vunpack.i.h.bf16 %v9077_v61  ;;  %v6223_v1 = vunpack.i.l.bf16 %v9356_v57  ;;  %v703_v3 = vsel %vm693_vm9, %v6029_v46, %v6059_v56  ;;  %v14162_v5 = vunpack.i.h.bf16 %v8983_v4 }
 0x234   :  { %2521 = vmatpush.msrb.mxu0 %v960_v48  ;;  %5665 = vmatmul.msk.f32.vlgmr.msrb.gmra.mxu3 %vm1997_vm10, %v9197_v9  ;;  %v9532_v48 = vpop.f32.mrf.mxu1  ;;  %v1502_v23 = vsel %vm1499_vm2, %v6203_v63, %v6204_v47  ;;  %v702_v4 = vsel %vm693_vm9, %v6028_v34, %v6063_v40  ;;  %v14163_v46 = vunpack.i.h.bf16 %v8831_v26  ;;  %v14164_v26 = vunpack.i.h.bf16 %v9068_v38 }
 0x235   :  { %2556 = vmatpush.msra.mxu3 %v1505_v8  ;;  %2602 = vmatpush.msra.mxu2 %v1503_v32  ;;  %v6224_v8 = vunpack.i.h.bf16 %v9356_v57  ;;  %v14165_v38 = vunpack.i.h.bf16 %v8899_v45 }
 0x236   :  { %2522 = vmatpush.msrb.mxu0 %v832_v2  ;;  %v9530_v2 = vpop.permute.xlu1 %6266  ;;  %v9555_v0 = vpop.f32.mrf.mxu3  ;;  %v1376_v32 = vsel %vm1370_vm3, %v14163_v46, %v6213_v22  ;;  %v1375_v34 = vsel %vm1370_vm3, %v14164_v26, %v6223_v1 }
 0x237   :  { %2603 = vmatpush.msra.mxu2 %v1502_v23  ;;  %v13862_v23 = vunpack.i.h.bf16 %v9207_v59 }
 0x238   :  { %2523 = vmatpush.msrb.mxu0 %v831_v55  ;;  %v1504_v55 = vsel %vm1499_vm2, %v14162_v5, %v6203_v63  ;;  %v1374_v63 = vsel %vm1370_vm3, %v6213_v22, %v6214_v39  ;;  %v9574_v5 = vpop.permute.xlu2 %6316  ;;  %2483 = vmatmul.f32.gmra.mxu1 %v9388_v11  ;;  %v1373_v22 = vsel %vm1370_vm3, %v6223_v1, %v6224_v8 }
 0x239   :  { %2557 = vmatpush.msra.mxu3 %v1504_v55  ;;  %2604 = vmatpush.msra.mxu2 %v1374_v63  ;;  %v9581_v55 = vpop.permute.xlu0 %6291  ;;  %v1244_v26 = vsel %vm1241_vm4, %v6243_v31, %v13862_v23 }
 0x23a   :  { %2524 = vmatpush.msrb.mxu0 %v703_v3  ;;  %v6234_v3 = vunpack.i.h.bf16 %v9345_v62  ;;  %v6293_v23 = vunpack.i.l.bf16 %v9581_v55 }
 0x23b   :  { %2558 = vmatpush.msra.mxu3 %v1376_v32  ;;  %2605 = vmatpush.msra.mxu2 %v1373_v22  ;;  %v14166_v32 = vunpack.i.h.bf16 %v9123_v27  ;;  %v13864_v22 = vunpack.i.h.bf16 %v9530_v2  ;;  %v6273_v27 = vunpack.i.l.bf16 %v9371_v7 }
 0x23c   :  { %2525 = vmatpush.msrb.mxu0 %v702_v4  ;;  %5666 = vmatmul.msk.f32.gmra.mxu3 %vm1997_vm10, %v9228_v54  ;;  %v1247_v4 = vsel %vm1241_vm4, %v14165_v38, %v6233_v53  ;;  %v1245_v1 = vsel %vm1241_vm4, %v6233_v53, %v6234_v3  ;;  %v9607_v63 = vpop.f32.mrf.mxu1  ;;  %v830_v42 = vsel %vm822_vm8, %v6249_v28, %v6293_v23  ;;  %v6318_v28 = vunpack.i.l.bf16 %v9574_v5 }
 0x23d   :  { %2526 = vmatmul.f32.vlgmr.msrb.gmra.mxu0 %v9307_v10  ;;  %2559 = vmatpush.msra.mxu3 %v1375_v34  ;;  %v1246_v45 = vsel %vm1241_vm4, %v14166_v32, %v6243_v31  ;;  %v6268_v34 = vunpack.i.l.bf16 %v9530_v2  ;;  %v6278_v31 = vunpack.i.l.bf16 %v9513_v24 }
 0x23e   :  { %v9595_v46 = vpop.permute.xlu1 %6281  ;;  %5668 = vmatmul.msk.f32.gmra.mxu2 %vm1997_vm10, %v9228_v54  ;;  %v9616_v53 = vpop.f32.mrf.mxu3 }
 0x23f   :  { %2560 = vmatpush.msra.mxu3 %v1247_v4  ;;  %2606 = vmatpush.msra.mxu2 %v1245_v1  ;;  %v13863_v4 = vunpack.i.h.bf16 %v9371_v7 }
 0x240   :  { %v9626_v1 = vpop.permute.xlu2 %6331 }
 0x241   :  { %2561 = vmatpush.msra.mxu3 %v1246_v45  ;;  %2607 = vmatpush.msra.mxu2 %v1244_v26  ;;  %v9621_v38 = vpop.permute.xlu0 %6306  ;;  %v6288_v26 = vunpack.i.l.bf16 %v9419_v36 }
 0x243   :  { %2562 = vmatpush.msra.mxu3 %v8185_v14  ;;  %2608 = vmatpush.msra.mxu2 %v8270_v51  ;;  %v14167_v14 = vunpack.i.h.bf16 %v9302_v15  ;;  %v6279_v51 = vunpack.i.h.bf16 %v9513_v24 }
 0x245   :  { %2529 = vmatmul.f32.gmra.mxu0 %v9388_v11  ;;  %2563 = vmatpush.msra.mxu3 %v8177_v49  ;;  %v1088_v32 = vsel %vm1080_vm6, %v14167_v14, %v6268_v34  ;;  %v1086_v49 = vsel %vm1080_vm6, %v6268_v34, %v13864_v22  ;;  %v13865_v14 = vunpack.i.h.bf16 %v9419_v36  ;;  %v14169_v34 = vunpack.i.h.bf16 %v9126_v17 }
 0x246   :  { %2609 = vmatpush.msra.mxu2 %v8255_v21  ;;  %v9633_v45 = vpop.permute.xlu1 %6296  ;;  %v14168_v21 = vunpack.i.h.bf16 %v9283_v13  ;;  %v9655_v13 = vpop.f32.mrf.mxu1  ;;  %v958_v17 = vsel %vm951_vm7, %v6239_v41, %v6288_v26  ;;  %v6309_v41 = vunpack.i.h.bf16 %v9621_v38 }
 0x247   :  { %2564 = vmatpush.msra.mxu3 %v1088_v32  ;;  %v1085_v32 = vsel %vm1080_vm6, %v6273_v27, %v13863_v4 }
 0x248   :  { %2610 = vmatpush.msra.mxu2 %v1086_v49  ;;  %v1087_v15 = vsel %vm1080_vm6, %v14168_v21, %v6273_v27  ;;  %v959_v49 = vsel %vm951_vm7, %v14169_v34, %v6278_v31  ;;  %v6294_v21 = vunpack.i.h.bf16 %v9581_v55  ;;  %v6303_v27 = vunpack.i.l.bf16 %v9489_v12 }
 0x249   :  { %2565 = vmatpush.msra.mxu3 %v1087_v15  ;;  %v957_v15 = vsel %vm951_vm7, %v6278_v31, %v6279_v51  ;;  %v6304_v34 = vunpack.i.h.bf16 %v9489_v12  ;;  %v9672_v31 = vpop.f32.mrf.mxu3 }
 0x24a   :  { %2611 = vmatpush.msra.mxu2 %v1085_v32  ;;  %v6322_v32 = vpop.permute.xlu0 %6321 }
 0x24b   :  { %2566 = vmatpush.msra.mxu3 %v959_v49  ;;  %v956_v49 = vsel %vm951_vm7, %v6288_v26, %v13865_v14  ;;  %v6324_v4 = vunpack.i.h.bf16 %v6322_v32  ;;  %v6323_v22 = vunpack.i.l.bf16 %v6322_v32  ;;  %v828_v26 = vsel %vm822_vm8, %v6293_v23, %v6294_v21  ;;  %v6347_v14 = vpop.permute.xlu2 %6346 }
 0x24c   :  { %2612 = vmatpush.msra.mxu2 %v957_v15  ;;  %v6308_v15 = vunpack.i.l.bf16 %v9621_v38  ;;  %v14170_v32 = vunpack.i.h.bf16 %v9454_v44  ;;  %v6319_v23 = vunpack.i.h.bf16 %v9574_v5  ;;  %v827_v44 = vsel %vm822_vm8, %v6303_v27, %v6304_v34 }
 0x24d   :  { %2567 = vmatpush.msra.mxu3 %v958_v17  ;;  %v1632_v25 = vsel %vm1628_vm5, %v6323_v22, %v6324_v4  ;;  %v6348_v30 = vunpack.i.l.bf16 %v6347_v14 }
 0x24e   :  { %2613 = vmatpush.msra.mxu2 %v956_v49  ;;  %v9684_v17 = vpop.permute.xlu1 %6311  ;;  %v1634_v49 = vsel %vm1628_vm5, %v14170_v32, %v6323_v22  ;;  %2639 = vmatpush.msra.mxu0 %v1632_v25  ;;  %v701_v22 = vsel %vm693_vm9, %v6059_v56, %v6308_v15  ;;  %v6349_v32 = vunpack.i.h.bf16 %v6347_v14  ;;  %v698_v56 = vsel %vm693_vm9, %v6318_v28, %v6319_v23 }
 0x24f   :  { %2568 = vmatpush.msra.mxu3 %v830_v42  ;;  %v829_v42 = vsel %vm822_vm8, %v6259_v19, %v6303_v27  ;;  %2593 = vmatpush.msrb.mxu1 %v1634_v49  ;;  %v699_v19 = vsel %vm693_vm9, %v6308_v15, %v6309_v41  ;;  %v700_v27 = vsel %vm693_vm9, %v6063_v40, %v6318_v28  ;;  %v6283_v49 = vunpack.i.l.bf16 %v9595_v46  ;;  %v14171_v40 = vld [vmem:[#allocation20_spill] sm:$0xff] }
 0x250   :  { %2614 = vmatpush.msra.mxu2 %v828_v26  ;;  %v9714_v26 = vpop.f32.mrf.mxu1  ;;  %v1630_v15 = vsel %vm1628_vm5, %v6324_v4, %v6348_v30  ;;  %v14172_v25 = vunpack.i.l.bf16 %v14171_v40 }
 0x251   :  { %2569 = vmatpush.msra.mxu3 %v829_v42 }
 0x252   :  { %2615 = vmatpush.msra.mxu2 %v827_v44  ;;  %v1660_v14 = vsel %vm1628_vm5, %v6348_v30, %v14172_v25  ;;  %v9729_v44 = vpop.f32.mrf.mxu3 }
 0x253   :  { %2570 = vmatpush.msra.mxu3 %v701_v22 }
 0x254   :  { %2616 = vmatpush.msra.mxu2 %v699_v19  ;;  %v14173_v19 = vunpack.i.h.bf16 %v14171_v40  ;;  %v14175_v40 = vunpack.i.h.bf16 %v9216_v18 }
 0x255   :  { %2571 = vmatpush.msra.mxu3 %v700_v27  ;;  %v6284_v27 = vunpack.i.h.bf16 %v9595_v46  ;;  %v6298_v46 = vunpack.i.l.bf16 %v9633_v45 }
 0x256   :  { %2617 = vmatpush.msra.mxu2 %v698_v56  ;;  %2572 = vmatmul.f32.vlgmr.msra.gmra.mxu3 %v9307_v10  ;;  %v6327_v42 = vpop.permute.xlu1 %6326  ;;  %v1659_v4 = vsel %vm1628_vm5, %v6349_v32, %v14173_v19  ;;  %v14174_v56 = vunpack.i.h.bf16 %v9441_v60  ;;  %v14176_v60 = vld [vmem:[#allocation10_spill] sm:$0xff] }
 0x257   :  { %2618 = vmatmul.f32.vlgmr.msra.gmra.mxu2 %v9307_v10  ;;  %2685 = vmatpush.msrb.mxu3 %v1630_v15  ;;  %v6329_v28 = vunpack.i.h.bf16 %v6327_v42  ;;  %v6328_v22 = vunpack.i.l.bf16 %v6327_v42  ;;  %v14177_v42 = vunpack.i.l.bf16 %v14176_v60  ;;  %v1500_v18 = vsel %vm1499_vm2, %v6204_v47, %v6284_v27  ;;  %v2021_v47 = vpop.f32.mrf.mxu0 }
 0x258   :  { %2731 = vmatpush.msrb.mxu2 %v1660_v14  ;;  %v1501_v14 = vsel %vm1499_vm2, %v14175_v40, %v6283_v49  ;;  %v1372_v29 = vsel %vm1370_vm3, %v6214_v39, %v6298_v46 }
 0x259   :  { %v1633_v15 = vsel %vm1628_vm5, %v14174_v56, %v6328_v22  ;;  %v1631_v30 = vsel %vm1628_vm5, %v6328_v22, %v6329_v28  ;;  %v1629_v25 = vsel %vm1628_vm5, %v6329_v28, %v6349_v32  ;;  %v1531_v19 = vsel %vm1499_vm2, %v6283_v49, %v14177_v42  ;;  %v2231_v28 = vpop.f32.mrf.mxu1  ;;  %v2067_v22 = vpop.f32.mrf.mxu2 }
 0x25a   :  { %2732 = vmatpush.msrb.mxu2 %v1659_v4  ;;  %2594 = vmatpush.msrb.mxu1 %v1633_v15  ;;  %v6299_v32 = vunpack.i.h.bf16 %v9633_v45  ;;  %v14178_v49 = vunpack.i.h.bf16 %v14176_v60  ;;  %v6313_v56 = vunpack.i.l.bf16 %v9684_v17  ;;  %v14179_v15 = vld [vmem:[#allocation13_spill] sm:$0xff]  ;;  %v2208_v40 = vpop.f32.mrf.mxu3 }
 0x25b   :  { %2640 = vmatpush.msra.mxu0 %v1631_v30  ;;  %2686 = vmatpush.msrb.mxu3 %v1629_v25  ;;  %v14180_v30 = vunpack.i.l.bf16 %v14179_v15  ;;  %v14181_v61 = vunpack.i.h.bf16 %v14179_v15 }
 0x25c   :  { %2648 = vmatpush.msra.mxu1 %v1501_v14  ;;  %5671 = vmatmul.msk.f32.vlgmr.msra.gmra.mxu0 %vm1997_vm10, %v9197_v9  ;;  %v1530_v45 = vsel %vm1499_vm2, %v6284_v27, %v14178_v49  ;;  %v6314_v27 = vunpack.i.h.bf16 %v9684_v17  ;;  %v1371_v14 = vsel %vm1370_vm3, %v6224_v8, %v6299_v32  ;;  %v14182_v17 = vld [vmem:[#allocation17_spill] sm:$0xff]  ;;  %v14184_v8 = vunpack.i.h.bf16 %v9207_v59  ;;  %v9811_v49 = vpop.permute.xlu2 %1994 }
 0x25d   :  { %2694 = vmatpush.msrb.mxu0 %v1531_v19  ;;  %5669 = vmatmul.msk.f32.vlgmr.msrb.gmra.mxu1 %vm1997_vm10, %v9197_v9  ;;  %v1402_v25 = vsel %vm1370_vm3, %v6298_v46, %v14180_v30  ;;  %v1401_v39 = vsel %vm1370_vm3, %v6299_v32, %v14181_v61  ;;  %v1243_v46 = vsel %vm1241_vm4, %v6234_v3, %v6313_v56  ;;  %v14183_v60 = vunpack.i.l.bf16 %v14182_v17  ;;  %v6337_v19 = vpop.permute.xlu0 %6336  ;;  %v14187_v61 = vld [vmem:[#allocation35_spill] sm:$0xff] }
 0x25e   :  { %2575 = vmatmul.f32.gmra.mxu3 %v9388_v11  ;;  %2649 = vmatpush.msra.mxu1 %v1500_v18  ;;  %v9768_v4 = vpop.permute.xlu1 %6341  ;;  %v1242_v42 = vsel %vm1241_vm4, %v14184_v8, %v6314_v27  ;;  %v14185_v62 = vunpack.i.h.bf16 %v14182_v17  ;;  %v6333_v18 = vunpack.i.l.bf16 %v9626_v1  ;;  %v2209_v30 = vadd.f32 %v2208_v40, %v9811_v49 }
 0x25f   :  { %2621 = vmatmul.f32.gmra.mxu2 %v9388_v11  ;;  %2695 = vmatpush.msrb.mxu0 %v1530_v45  ;;  %v1273_v57 = vsel %vm1241_vm4, %v6313_v56, %v14183_v60  ;;  %v6338_v40 = vunpack.i.l.bf16 %v6337_v19  ;;  %v14190_v60 = vunpack.i.h.bf16 %v9371_v7  ;;  %v14191_v8 = vunpack.i.h.bf16 %v8350_v50 }
 0x260   :  { %2650 = vmatpush.msra.mxu1 %v1372_v29  ;;  %v1272_v3 = vsel %vm1241_vm4, %v6314_v27, %v14185_v62  ;;  %v6334_v29 = vunpack.i.h.bf16 %v9626_v1  ;;  %v9838_v17 = vadd.f32 %v2231_v28, %v2209_v30  ;;  %vm5552_vm3 = vcmask 818176  }
 0x261   :  { %2696 = vmatpush.msrb.mxu0 %v1402_v25  ;;  %v2070_v15 = vpop.f32.mrf.mxu2  ;;  %v14186_v25 = vld [vmem:[#allocation34_spill] sm:$0xff]  ;;  %v955_v7 = vsel %vm951_vm7, %v6279_v51, %v6338_v40  ;;  %v6344_v51 = vunpack.i.h.bf16 %v9768_v4 }
 0x262   :  { %2651 = vmatpush.msra.mxu1 %v1371_v14  ;;  %v2024_v14 = vpop.f32.mrf.mxu0  ;;  %v2320_v1 = vpop.f32.mrf.mxu3 }
 0x263   :  { %2697 = vmatpush.msrb.mxu0 %v1401_v39  ;;  %v2297_v59 = vpop.f32.mrf.mxu1  ;;  %v825_v55 = vsel %vm822_vm8, %v6304_v34, %v6344_v51  ;;  %v14197_v34 = vunpack.i.h.bf16 %v8657_v43  ;;  %v14198_v43 = vunpack.i.l.bf16 %v8597_v37 }
 0x264   :  { %2652 = vmatpush.msra.mxu1 %v1243_v46  ;;  %5672 = vmatmul.msk.f32.gmra.mxu0 %vm1997_vm10, %v9228_v54  ;;  %v6339_v46 = vunpack.i.h.bf16 %v6337_v19  ;;  %v6343_v19 = vunpack.i.l.bf16 %v9768_v4 }
 0x265   :  { %2698 = vmatpush.msrb.mxu0 %v1273_v57  ;;  %5670 = vmatmul.msk.f32.gmra.mxu1 %vm1997_vm10, %v9228_v54 }
 0x266   :  { %2653 = vmatpush.msra.mxu1 %v1242_v42  ;;  %v9808_v32 = vpop.permute.xlu1 %1989  ;;  %5673 = vmatmul.msk.f32.vlgmr.msrb.gmra.mxu3 %vm1997_vm10, %v9197_v9  ;;  %v1081_v42 = vsel %vm1080_vm6, %v6334_v29, %v14191_v8 }
 0x267   :  { %2699 = vmatpush.msrb.mxu0 %v1272_v3  ;;  %v2022_v45 = vadd.f32 %v2021_v47, %v9808_v32  ;;  %v2068_v56 = vadd.f32 %v2067_v22, %v9808_v32  ;;  %5675 = vmatmul.msk.f32.vlgmr.msrb.gmra.mxu2 %vm1997_vm10, %v9197_v9  ;;  %v2298_v27 = vadd.f32 %v2297_v59, %v9808_v32  ;;  %v6352_v3 = vpop.permute.xlu0 %6351  ;;  %v14193_v59 = vunpack.i.h.bf16 %v9419_v36 }
 0x268   :  { %2654 = vmatpush.msra.mxu1 %v14068_v6  ;;  %v14188_v6 = vunpack.i.h.bf16 %v9530_v2  ;;  %v1083_v2 = vsel %vm1080_vm6, %v14190_v60, %v6334_v29  ;;  %v6353_v4 = vunpack.i.l.bf16 %v6352_v3 }
 0x269   :  { %2700 = vmatpush.msrb.mxu0 %v14186_v25  ;;  %v9825_v47 = vadd.f32 %v9447_v16, %v2022_v45  ;;  %v9828_v22 = vadd.f32 %v9465_v52, %v2068_v56  ;;  %v14189_v52 = vunpack.i.l.bf16 %v8350_v50  ;;  %v9848_v57 = vadd.f32 %v2320_v1, %v2298_v27  ;;  %v2182_v62 = vpop.f32.mrf.mxu2 }
 0x26a   :  { %2655 = vmatpush.msra.mxu1 %v14069_v35  ;;  %v1084_v9 = vsel %vm1080_vm6, %v14188_v6, %v6333_v18  ;;  %v954_v24 = vsel %vm951_vm7, %v14193_v59, %v6339_v46  ;;  %v2025_v45 = vadd.f32 %v2024_v14, %v9811_v49  ;;  %v13878_v56 = vmax.f32 %v9838_v17, 0.0 }
 0x26b   :  { %2701 = vmatpush.msrb.mxu0 %v14187_v61  ;;  %v2740_v39 = vmax.f32 %v9825_v47, 0.0  ;;  %v13892_v16 = vmax.f32 %v9828_v22, 0.0  ;;  %v1082_v35 = vsel %vm1080_vm6, %v6333_v18, %v14189_v52  ;;  %v14192_v18 = vunpack.i.l.bf16 %v8571_v58  ;;  %v3187_v47 = vld [vmem:[%s13686_s6 + $0xf8] sm:$0xff] }
 0x26c   :  { %2656 = vmatpush.msra.mxu1 %v1084_v9  ;;  %v13877_v29 = vmax.f32 %v9848_v57, 0.0  ;;  %v14194_v25 = vunpack.i.h.bf16 %v8571_v58  ;;  %v2071_v27 = vadd.f32 %v2070_v15, %v9811_v49  ;;  %v826_v14 = vsel %vm822_vm8, %v6294_v21, %v6343_v19 }
 0x26d   :  { %2702 = vmatpush.msrb.mxu0 %v1082_v35  ;;  %v6367_v28 = vpack.i.bf16 %v13892_v16, %v2740_v39  ;;  %v953_v50 = vsel %vm951_vm7, %v6338_v40, %v14192_v18  ;;  %v14195_v58 = vunpack.i.l.bf16 %v8429_v20  ;;  %v9896_v40 = vadd.f32 %v9532_v48, %v2025_v45 }
 0x26e   :  { %2657 = vmatpush.msra.mxu1 %v1083_v2  ;;  %v952_v36 = vsel %vm951_vm7, %v6339_v46, %v14194_v25  ;;  %5674 = vmatmul.msk.f32.gmra.mxu3 %vm1997_vm10, %v9228_v54  ;;  %v6354_v15 = vunpack.i.h.bf16 %v6352_v3  ;;  %v14196_v21 = vunpack.i.h.bf16 %v8429_v20  ;;  %v9911_v48 = vadd.f32 %v9555_v0, %v2071_v27  ;;  %v2300_v2 = vpop.f32.mrf.mxu1 }
 0x26f   :  { %2703 = vmatpush.msrb.mxu0 %v1081_v42  ;;  %6368 = vrot.lane.b32.xlu2 %v6367_v28, %s7237_s30  ;;  %v2159_v30 = vpop.f32.mrf.mxu0  ;;  %v824_v1 = vsel %vm822_vm8, %v6343_v19, %v14195_v58  ;;  %v697_v12 = vsel %vm693_vm9, %v6309_v41, %v6353_v4  ;;  %v695_v20 = vsel %vm693_vm9, %v6353_v4, %v14197_v34  ;;  %v2756_v6 = vmax.f32 %v9896_v40, 0.0 }
 0x270   :  { %2658 = vmatpush.msra.mxu1 %v955_v7  ;;  %6363 = vrot.lane.b32.xlu1 %v6367_v28, %s7232_s25  ;;  %v823_v61 = vsel %vm822_vm8, %v6344_v51, %v14196_v21  ;;  %v2160_v0 = vadd.f32 %v2159_v30, %v9808_v32  ;;  %v696_v38 = vsel %vm693_vm9, %v6319_v23, %v6354_v15  ;;  %v13885_v46 = vmax.f32 %v9911_v48, 0.0  ;;  %v9945_v23 = vpop.f32.mrf.mxu3 }
 0x271   :  { %2704 = vmatpush.msrb.mxu0 %v953_v50  ;;  %6358 = vrot.lane.b32.xlu0 %v6367_v28, %s7235_s29  ;;  %v2185_v41 = vpop.f32.mrf.mxu2  ;;  %v694_v9 = vsel %vm693_vm9, %v6354_v15, %v14198_v43  ;;  %v2114_v35 = vadd.f32 %v9607_v63, %v9808_v32  ;;  %v2117_v28 = vadd.f32 %v9655_v13, %v9811_v49 }
 0x272   :  { %2659 = vmatpush.msra.mxu1 %v954_v24  ;;  %5676 = vmatmul.msk.f32.gmra.mxu2 %vm1997_vm10, %v9228_v54  ;;  %v6377_v54 = vpack.i.bf16 %v13877_v29, %v13878_v56  ;;  %v9939_v5 = vadd.f32 %v2182_v62, %v2160_v0  ;;  %v6397_v37 = vpack.i.bf16 %v13885_v46, %v2756_v6 }
 0x273   :  { %2705 = vmatpush.msrb.mxu0 %v952_v36  ;;  %v9949_v60 = vadd.f32 %v9616_v53, %v2114_v35  ;;  %v9967_v62 = vadd.f32 %v9672_v31, %v2117_v28  ;;  %v2206_v59 = vadd.f32 %v9729_v44, %v9808_v32  ;;  %v3186_v44 = vld [vmem:[%s13686_s6 + $0xf0] sm:$0xff] }
 0x274   :  { %2660 = vmatpush.msra.mxu1 %v826_v14  ;;  %v13882_v63 = vmax.f32 %v9939_v5, 0.0  ;;  %3412 = vmatpush.msra.mxu3 %v3186_v44  ;;  %v3182_v35 = vld [vmem:[%s13686_s6 + $0xd0] sm:$0xff] }
 0x275   :  { %2706 = vmatpush.msrb.mxu0 %v824_v1  ;;  %v13891_v42 = vmax.f32 %v9949_v60, 0.0  ;;  %v13883_v18 = vmax.f32 %v9967_v62, 0.0  ;;  %v9985_v30 = vadd.f32 %v9714_v26, %v2206_v59  ;;  %v3250_v44 = vld [vmem:[%s13686_s6 + $0x2f0] sm:$0xff] }
 0x276   :  { %2661 = vmatpush.msra.mxu1 %v825_v55  ;;  %3458 = vmatpush.msra.mxu2 %v3250_v44  ;;  %v3280_v44 = vld [vmem:[%s13686_s6 + $0x3e0] sm:$0xff] }
 0x277   :  { %2707 = vmatpush.msrb.mxu0 %v823_v61  ;;  %6378 = vrot.lane.b32.xlu2 %v6377_v54, %s7232_s25  ;;  %v2162_v52 = vpop.f32.mrf.mxu0  ;;  %v6412_v7 = vpack.i.bf16 %v13882_v63, %v13891_v42  ;;  %v13881_v4 = vmax.f32 %v9985_v30, 0.0 }
 0x278   :  { %2662 = vmatpush.msra.mxu1 %v697_v12  ;;  %6383 = vrot.lane.b32.xlu1 %v6377_v54, %s7237_s30 }
 0x279   :  { %2708 = vmatpush.msrb.mxu0 %v695_v20  ;;  %6373 = vrot.lane.b32.xlu0 %v6377_v54, %s7235_s29  ;;  %v2251_v19 = vpop.f32.mrf.mxu2  ;;  %v3184_v20 = vld [vmem:[%s13686_s6 + $0xe0] sm:$0xff] }
 0x27a   :  { %2663 = vmatpush.msra.mxu1 %v696_v38  ;;  %v2252_v50 = vadd.f32 %v2251_v19, %v9808_v32  ;;  %3413 = vmatpush.msra.mxu3 %v3184_v20  ;;  %v3178_v19 = vld [vmem:[%s13686_s6 + $0xb0] sm:$0xff]  ;;  %v3244_v20 = vld [vmem:[%s13686_s6 + $0x2c0] sm:$0xff] }
 0x27b   :  { %2709 = vmatpush.msrb.mxu0 %v694_v9  ;;  %2664 = vmatmul.f32.vlgmr.msra.gmra.mxu1 %v9307_v10 }
 0x27c   :  { %2710 = vmatmul.f32.vlgmr.msrb.gmra.mxu0 %v9307_v10  ;;  %v2163_v10 = vadd.f32 %v2162_v52, %v9811_v49  ;;  %3414 = vmatpush.msra.mxu3 %v3182_v35  ;;  %v3162_v35 = vld [vmem:[%s13686_s6 + $0x30] sm:$0xff] }
 0x27e   :  { %v9960_v53 = vadd.f32 %v2185_v41, %v2163_v10  ;;  %v2301_v41 = vadd.f32 %v2300_v2, %v9811_v49 }
 0x27f   :  { %6398 = vrot.lane.b32.xlu2 %v6397_v37, %s7237_s30  ;;  %v2274_v8 = vpop.f32.mrf.mxu0  ;;  %v2389_v3 = vpop.f32.mrf.mxu3 }
 0x280   :  { %6393 = vrot.lane.b32.xlu1 %v6397_v37, %s7232_s25  ;;  %v13879_v13 = vmax.f32 %v9960_v53, 0.0  ;;  %v9977_v24 = vadd.f32 %v2274_v8, %v2252_v50  ;;  %v2390_v15 = vadd.f32 %v2389_v3, %v9808_v32  ;;  %v10036_v28 = vadd.f32 %v9945_v23, %v2301_v41  ;;  %v3176_v23 = vld [vmem:[%s13686_s6 + $0xa0] sm:$0xff] }
 0x281   :  { %6388 = vrot.lane.b32.xlu0 %v6397_v37, %s7235_s29  ;;  %v2254_v51 = vpop.f32.mrf.mxu2  ;;  %v3180_v37 = vld [vmem:[%s13686_s6 + $0xc0] sm:$0xff] }
 0x282   :  { %v6422_v45 = vpack.i.bf16 %v13879_v13, %v13883_v18  ;;  %v13880_v25 = vmax.f32 %v9977_v24, 0.0  ;;  %v2255_v26 = vadd.f32 %v2254_v51, %v9811_v49  ;;  %3415 = vmatpush.msra.mxu3 %v3180_v37  ;;  %v3218_v51 = vld [vmem:[%s13686_s6 + $0x1f0] sm:$0xff]  ;;  %v3164_v41 = vld [vmem:[%s13686_s6 + $0x40] sm:$0xff]  ;;  %v3175_v18 = vld [vmem:[%s13686_s6 + $0x98] sm:$0xff] }
 0x283   :  { %2667 = vmatmul.f32.gmra.mxu1 %v9388_v11  ;;  %v3242_v37 = vld [vmem:[%s13686_s6 + $0x2b0] sm:$0xff] }
 0x284   :  { %2713 = vmatmul.f32.gmra.mxu0 %v9388_v11  ;;  %v6442_v1 = vpack.i.bf16 %v13880_v25, %v13881_v4  ;;  %3416 = vmatpush.msra.mxu3 %v3178_v19  ;;  %v3240_v19 = vld [vmem:[%s13686_s6 + $0x2a0] sm:$0xff]  ;;  %v3382_v4 = vld [vmem:[%s13686_s6 + $0x710] sm:$0xff] }
 0x285   :  { %3435 = vmatpush.msrb.mxu1 %v3218_v51  ;;  %v3384_v25 = vld [vmem:[%s13686_s6 + $0x720] sm:$0xff] }
 0x286   :  { %v2412_v11 = vpop.f32.mrf.mxu1  ;;  %3417 = vmatpush.msra.mxu3 %v3176_v23  ;;  %v3204_v23 = vld [vmem:[%s13686_s6 + $0x180] sm:$0xff] }
 0x287   :  { %6413 = vrot.lane.b32.xlu2 %v6412_v7, %s7237_s30  ;;  %v2392_v36 = vpop.f32.mrf.mxu3  ;;  %v10007_v12 = vadd.f32 %v2412_v11, %v2390_v15  ;;  %v13874_v11 = vmax.f32 %v10036_v28, 0.0  ;;  %v3212_v15 = vld [vmem:[%s13686_s6 + $0x1c0] sm:$0xff] }
 0x288   :  { %6408 = vrot.lane.b32.xlu1 %v6412_v7, %s7232_s25  ;;  %v2393_v14 = vadd.f32 %v2392_v36, %v9811_v49  ;;  %v3216_v36 = vld [vmem:[%s13686_s6 + $0x1e0] sm:$0xff] }
 0x289   :  { %6403 = vrot.lane.b32.xlu0 %v6412_v7, %s7235_s29  ;;  %v2277_v31 = vpop.f32.mrf.mxu0  ;;  %v2366_v55 = vpop.f32.mrf.mxu2  ;;  %v13872_v9 = vmax.f32 %v10007_v12, 0.0  ;;  %3436 = vmatpush.msrb.mxu1 %v3216_v36  ;;  %v3202_v36 = vld [vmem:[%s13686_s6 + $0x170] sm:$0xff] }
 0x28a   :  { %v10004_v61 = vadd.f32 %v2277_v31, %v2255_v26  ;;  %v3174_v31 = vld [vmem:[%s13686_s6 + $0x90] sm:$0xff] }
 0x28b   :  { %3418 = vmatpush.msra.mxu3 %v3174_v31  ;;  %v3214_v26 = vld [vmem:[%s13686_s6 + $0x1d0] sm:$0xff] }
 0x28c   :  { %v13876_v43 = vmax.f32 %v10004_v61, 0.0  ;;  %3437 = vmatpush.msrb.mxu1 %v3214_v26  ;;  %v3282_v31 = vld [vmem:[%s13686_s6 + $0x3f0] sm:$0xff]  ;;  %v3236_v26 = vld [vmem:[%s13686_s6 + $0x280] sm:$0xff] }
 0x28d   :  { %3481 = vmatpush.msra.mxu0 %v3282_v31  ;;  %v3276_v31 = vld [vmem:[%s13686_s6 + $0x3c0] sm:$0xff] }
 0x28e   :  { %v2415_v27 = vpop.f32.mrf.mxu1  ;;  %3438 = vmatpush.msrb.mxu1 %v3212_v15 }
 0x28f   :  { %6423 = vrot.lane.b32.xlu2 %v6422_v45, %s7232_s25  ;;  %v10001_v54 = vadd.f32 %v2415_v27, %v2393_v14  ;;  %v3170_v27 = vld [vmem:[%s13686_s6 + $0x70] sm:$0xff]  ;;  %v3248_v14 = vld [vmem:[%s13686_s6 + $0x2e0] sm:$0xff]  ;;  %3482 = vmatpush.msra.mxu0 %v3280_v44 }
 0x290   :  { %6428 = vrot.lane.b32.xlu1 %v6422_v45, %s7237_s30  ;;  %3459 = vmatpush.msra.mxu2 %v3248_v14  ;;  %v3156_v14 = vld [vmem:[%s13686_s6] sm:$0xff]  ;;  %v3274_v44 = vld [vmem:[%s13686_s6 + $0x3b0] sm:$0xff] }
 0x291   :  { %6418 = vrot.lane.b32.xlu0 %v6422_v45, %s7235_s29  ;;  %v13868_v0 = vmax.f32 %v10001_v54, 0.0  ;;  %v2369_v7 = vpop.f32.mrf.mxu2  ;;  %v3172_v45 = vld [vmem:[%s13686_s6 + $0x80] sm:$0xff] }
 0x292   :  { %3419 = vmatpush.msra.mxu3 %v3172_v45 }
 0x293   :  { %v6447_v2 = vpack.i.bf16 %v13868_v0, %v13872_v9  ;;  %v3388_v9 = vld [vmem:[%s13686_s6 + $0x740] sm:$0xff] }
 0x294   :  { %3420 = vmatpush.msra.mxu3 %v3170_v27 }
 0x296   :  { %v2343_v58 = vpop.f32.mrf.mxu0 }
 0x297   :  { %v2344_v21 = vadd.f32 %v2343_v58, %v9808_v32  ;;  %6443 = vrot.lane.b32.xlu2 %v6442_v1, %s7237_s30  ;;  %v3168_v58 = vld [vmem:[%s13686_s6 + $0x60] sm:$0xff] }
 0x298   :  { %6433 = vrot.lane.b32.xlu1 %v6442_v1, %s7235_s29  ;;  %3421 = vmatpush.msra.mxu3 %v3168_v58  ;;  %v3314_v58 = vld [vmem:[%s13686_s6 + $0x4f0] sm:$0xff] }
 0x299   :  { %v10009_v34 = vadd.f32 %v2366_v55, %v2344_v21  ;;  %6438 = vrot.lane.b32.xlu0 %v6442_v1, %s7232_s25  ;;  %v3246_v1 = vld [vmem:[%s13686_s6 + $0x2d0] sm:$0xff] }
 0x29a   :  { %v3166_v55 = vld [vmem:[%s13686_s6 + $0x50] sm:$0xff]  ;;  %3460 = vmatpush.msra.mxu2 %v3246_v1  ;;  %v3200_v1 = vld [vmem:[%s13686_s6 + $0x160] sm:$0xff] }
 0x29b   :  { %v13875_v38 = vmax.f32 %v10009_v34, 0.0  ;;  %v3210_v21 = vld [vmem:[%s13686_s6 + $0x1b0] sm:$0xff]  ;;  %3422 = vmatpush.msra.mxu3 %v3166_v55 }
 0x29c   :  { %3461 = vmatpush.msra.mxu2 %v3244_v20  ;;  %3439 = vmatpush.msrb.mxu1 %v3210_v21  ;;  %v3234_v21 = vld [vmem:[%s13686_s6 + $0x270] sm:$0xff] }
 0x29d   :  { %v6462_v52 = vpack.i.bf16 %v13876_v43, %v13875_v38  ;;  %3423 = vmatpush.msra.mxu3 %v3164_v41  ;;  %v3312_v41 = vld [vmem:[%s13686_s6 + $0x4e0] sm:$0xff]  ;;  %v3386_v38 = vld [vmem:[%s13686_s6 + $0x730] sm:$0xff] }
 0x29e   :  { %v2346_v10 = vpop.f32.mrf.mxu0  ;;  %3462 = vmatpush.msra.mxu2 %v3242_v37  ;;  %v3232_v37 = vld [vmem:[%s13686_s6 + $0x260] sm:$0xff] }
 0x29f   :  { %v2347_v8 = vadd.f32 %v2346_v10, %v9811_v49  ;;  %6463 = vrot.lane.b32.xlu2 %v6462_v52, %s7237_s30  ;;  %v3206_v10 = vld [vmem:[%s13686_s6 + $0x190] sm:$0xff]  ;;  %3424 = vmatpush.msra.mxu3 %v3162_v35 }
 0x2a0   :  { %6448 = vrot.lane.b32.xlu1 %v6447_v2, %s7235_s29  ;;  %3463 = vmatpush.msra.mxu2 %v3240_v19  ;;  %v3198_v35 = vld [vmem:[%s13686_s6 + $0x150] sm:$0xff] }
 0x2a1   :  { %v10044_v3 = vadd.f32 %v2369_v7, %v2347_v8  ;;  %6458 = vrot.lane.b32.xlu0 %v6462_v52, %s7232_s25  ;;  %v3160_v8 = vld [vmem:[%s13686_s6 + $0x20] sm:$0xff]  ;;  %v2435_v7 = vpop.f32.mrf.mxu2 }
 0x2a2   :  { %3425 = vmatpush.msra.mxu3 %v3160_v8  ;;  %v2436_v27 = vadd.f32 %v2435_v7, %v9808_v32  ;;  %v3310_v7 = vld [vmem:[%s13686_s6 + $0x4d0] sm:$0xff] }
 0x2a3   :  { %v13873_v50 = vmax.f32 %v10044_v3, 0.0 }
 0x2a5   :  { %v6477_v59 = vpack.i.bf16 %v13873_v50, %v13874_v11 }
 0x2a6   :  { %v2458_v45 = vpop.f32.mrf.mxu0 }
 0x2a7   :  { %6478 = vrot.lane.b32.xlu2 %v6477_v59, %s7232_s25  ;;  %v10156_v15 = vadd.f32 %v2458_v45, %v2436_v27  ;;  %v3308_v45 = vld [vmem:[%s13686_s6 + $0x4c0] sm:$0xff]  ;;  %v3306_v27 = vld [vmem:[%s13686_s6 + $0x4b0] sm:$0xff] }
 0x2a8   :  { %6453 = vrot.lane.b32.xlu1 %v6462_v52, %s7235_s29  ;;  %v3208_v52 = vld [vmem:[%s13686_s6 + $0x1a0] sm:$0xff] }
 0x2a9   :  { %6468 = vrot.lane.b32.xlu0 %v6477_v59, %s7235_s29  ;;  %3440 = vmatpush.msrb.mxu1 %v3208_v52  ;;  %v13869_v8 = vmax.f32 %v10156_v15, 0.0 }
 0x2ab   :  { %3441 = vmatpush.msrb.mxu1 %v3206_v10  ;;  %v3278_v10 = vld [vmem:[%s13686_s6 + $0x3d0] sm:$0xff] }
 0x2ac   :  { %3483 = vmatpush.msra.mxu0 %v3278_v10  ;;  %v3268_v10 = vld [vmem:[%s13686_s6 + $0x380] sm:$0xff] }
 0x2ad   :  { %v2481_v51 = vpop.f32.mrf.mxu1  ;;  %3442 = vmatpush.msrb.mxu1 %v3204_v23 }
 0x2ae   :  { %v2482_v55 = vadd.f32 %v2481_v51, %v9808_v32  ;;  %v3194_v51 = vld [vmem:[%s13686_s6 + $0x130] sm:$0xff]  ;;  %3484 = vmatpush.msra.mxu0 %v3276_v31 }
 0x2af   :  { %6488 = vrot.lane.b32.xlu2 %v6447_v2, %s7237_s30  ;;  %3443 = vmatpush.msrb.mxu1 %v3202_v36  ;;  %v3228_v36 = vld [vmem:[%s13686_s6 + $0x240] sm:$0xff]  ;;  %v3298_v31 = vld [vmem:[%s13686_s6 + $0x470] sm:$0xff] }
 0x2b0   :  { %6483 = vrot.lane.b32.xlu1 %v6477_v59, %s7237_s30  ;;  %v3238_v59 = vld [vmem:[%s13686_s6 + $0x290] sm:$0xff]  ;;  %3485 = vmatpush.msra.mxu0 %v3274_v44  ;;  %v3296_v44 = vld [vmem:[%s13686_s6 + $0x460] sm:$0xff] }
 0x2b1   :  { %6473 = vrot.lane.b32.xlu0 %v6447_v2, %s7232_s25  ;;  %v3158_v2 = vld [vmem:[%s13686_s6 + $0x10] sm:$0xff]  ;;  %3464 = vmatpush.msra.mxu2 %v3238_v59 }
 0x2b2   :  { %3426 = vmatpush.msra.mxu3 %v3158_v2  ;;  %3444 = vmatpush.msrb.mxu1 %v3200_v1  ;;  %v3196_v2 = vld [vmem:[%s13686_s6 + $0x140] sm:$0xff]  ;;  %v3230_v59 = vld [vmem:[%s13686_s6 + $0x250] sm:$0xff] }
 0x2b3   :  { %3465 = vmatpush.msra.mxu2 %v3236_v26  ;;  %v3226_v26 = vld [vmem:[%s13686_s6 + $0x230] sm:$0xff]  ;;  %v3304_v1 = vld [vmem:[%s13686_s6 + $0x4a0] sm:$0xff] }
 0x2b4   :  { %3427 = vmatpush.msra.mxu3 %v3156_v14  ;;  %3445 = vmatpush.msrb.mxu1 %v3198_v35  ;;  %v3192_v14 = vld [vmem:[%s13686_s6 + $0x120] sm:$0xff] }
 0x2b5   :  { %3466 = vmatpush.msra.mxu2 %v3234_v21  ;;  %v3224_v21 = vld [vmem:[%s13686_s6 + $0x220] sm:$0xff] }
 0x2b6   :  { %3504 = vmatpush.msrb.mxu3 %v3314_v58  ;;  %3446 = vmatpush.msrb.mxu1 %v3196_v2  ;;  %v3272_v58 = vld [vmem:[%s13686_s6 + $0x3a0] sm:$0xff] }
 0x2b7   :  { %v2504_v20 = vpop.f32.mrf.mxu3  ;;  %3467 = vmatpush.msra.mxu2 %v3232_v37  ;;  %3486 = vmatpush.msra.mxu0 %v3272_v58  ;;  %v3188_v35 = vld [vmem:[%s13686_s6 + $0x100] sm:$0xff]  ;;  %v3222_v37 = vld [vmem:[%s13686_s6 + $0x210] sm:$0xff] }
 0x2b8   :  { %v10165_v52 = vadd.f32 %v2504_v20, %v2482_v55  ;;  %3505 = vmatpush.msrb.mxu3 %v3312_v41  ;;  %3447 = vmatpush.msrb.mxu1 %v3194_v51  ;;  %v3190_v55 = vld [vmem:[%s13686_s6 + $0x110] sm:$0xff]  ;;  %v3220_v2 = vld [vmem:[%s13686_s6 + $0x200] sm:$0xff] }
 0x2b9   :  { %3468 = vmatpush.msra.mxu2 %v3230_v59  ;;  %v3270_v20 = vld [vmem:[%s13686_s6 + $0x390] sm:$0xff] }
 0x2ba   :  { %v13867_v19 = vmax.f32 %v10165_v52, 0.0  ;;  %3506 = vmatpush.msrb.mxu3 %v3310_v7  ;;  %3448 = vmatpush.msrb.mxu1 %v3192_v14  ;;  %v3302_v41 = vld [vmem:[%s13686_s6 + $0x490] sm:$0xff]  ;;  %v3300_v7 = vld [vmem:[%s13686_s6 + $0x480] sm:$0xff] }
 0x2bb   :  { %3469 = vmatpush.msra.mxu2 %v3228_v36  ;;  %3487 = vmatpush.msra.mxu0 %v3270_v20  ;;  %v3266_v59 = vld [vmem:[%s13686_s6 + $0x370] sm:$0xff]  ;;  %v3264_v36 = vld [vmem:[%s13686_s6 + $0x360] sm:$0xff] }
 0x2bc   :  { %v6502_v23 = vpack.i.bf16 %v13867_v19, %v13869_v8  ;;  %3507 = vmatpush.msrb.mxu3 %v3308_v45  ;;  %3449 = vmatpush.msrb.mxu1 %v3190_v55  ;;  %v3344_v45 = vld [vmem:[%s13686_s6 + $0x5e0] sm:$0xff]  ;;  %v3378_v51 = vld [vmem:[%s13686_s6 + $0x6f0] sm:$0xff]  ;;  %v10441_v19 = vpop.f32.mrf.mxu0 }
 0x2bd   :  { %3470 = vmatpush.msra.mxu2 %v3226_v26  ;;  %3488 = vmatpush.msra.mxu0 %v3268_v10  ;;  %v3376_v14 = vld [vmem:[%s13686_s6 + $0x6e0] sm:$0xff]  ;;  %v3262_v26 = vld [vmem:[%s13686_s6 + $0x350] sm:$0xff] }
 0x2be   :  { %6503 = vrot.lane.b32.xlu2 %v6502_v23, %s7237_s30  ;;  %6498 = vrot.lane.b32.xlu1 %v6502_v23, %s7232_s25  ;;  %v3294_v58 = vld [vmem:[%s13686_s6 + $0x450] sm:$0xff]  ;;  %v3292_v20 = vld [vmem:[%s13686_s6 + $0x440] sm:$0xff] }
 0x2bf   :  { %6493 = vrot.lane.b32.xlu0 %v6502_v23, %s7235_s29  ;;  %3508 = vmatpush.msrb.mxu3 %v3306_v27  ;;  %v3346_v23 = vld [vmem:[%s13686_s6 + $0x5f0] sm:$0xff] }
 0x2c0   :  { %3471 = vmatpush.msra.mxu2 %v3224_v21  ;;  %3450 = vmatpush.msrb.mxu1 %v3188_v35  ;;  %v3342_v27 = vld [vmem:[%s13686_s6 + $0x5d0] sm:$0xff]  ;;  %v3260_v21 = vld [vmem:[%s13686_s6 + $0x340] sm:$0xff] }
 0x2c1   :  { %3509 = vmatpush.msrb.mxu3 %v3304_v1  ;;  %3489 = vmatpush.msra.mxu0 %v3266_v59  ;;  %v3340_v1 = vld [vmem:[%s13686_s6 + $0x5c0] sm:$0xff]  ;;  %v3374_v55 = vld [vmem:[%s13686_s6 + $0x6d0] sm:$0xff] }
 0x2c2   :  { %3472 = vmatpush.msra.mxu2 %v3222_v37  ;;  %3527 = vmatpush.msra.mxu1 %v3346_v23  ;;  %v3372_v35 = vld [vmem:[%s13686_s6 + $0x6c0] sm:$0xff]  ;;  %v3258_v37 = vld [vmem:[%s13686_s6 + $0x330] sm:$0xff] }
 0x2c3   :  { %3510 = vmatpush.msrb.mxu3 %v3302_v41  ;;  %3490 = vmatpush.msra.mxu0 %v3264_v36  ;;  %v3338_v41 = vld [vmem:[%s13686_s6 + $0x5b0] sm:$0xff]  ;;  %v3336_v23 = vld [vmem:[%s13686_s6 + $0x5a0] sm:$0xff] }
 0x2c4   :  { %3473 = vmatpush.msra.mxu2 %v3220_v2  ;;  %3528 = vmatpush.msra.mxu1 %v3344_v45  ;;  %v3290_v10 = vld [vmem:[%s13686_s6 + $0x430] sm:$0xff]  ;;  %v3256_v59 = vld [vmem:[%s13686_s6 + $0x320] sm:$0xff] }
 0x2c5   :  { %3511 = vmatpush.msrb.mxu3 %v3300_v7  ;;  %3491 = vmatpush.msra.mxu0 %v3262_v26  ;;  %v3370_v2 = vld [vmem:[%s13686_s6 + $0x6b0] sm:$0xff]  ;;  %v3252_v26 = vld [vmem:[%s13686_s6 + $0x300] sm:$0xff] }
 0x2c6   :  { %3550 = vmatpush.msrb.mxu2 %v3378_v51  ;;  %3529 = vmatpush.msra.mxu1 %v3342_v27  ;;  %v3334_v45 = vld [vmem:[%s13686_s6 + $0x590] sm:$0xff]  ;;  %v3368_v51 = vld [vmem:[%s13686_s6 + $0x6a0] sm:$0xff] }
 0x2c7   :  { %3512 = vmatpush.msrb.mxu3 %v3298_v31  ;;  %3492 = vmatpush.msra.mxu0 %v3260_v21  ;;  %v3288_v31 = vld [vmem:[%s13686_s6 + $0x420] sm:$0xff]  ;;  %v3254_v36 = vld [vmem:[%s13686_s6 + $0x310] sm:$0xff] }
 0x2c8   :  { %3551 = vmatpush.msrb.mxu2 %v3376_v14  ;;  %3530 = vmatpush.msra.mxu1 %v3340_v1  ;;  %v3332_v27 = vld [vmem:[%s13686_s6 + $0x580] sm:$0xff]  ;;  %v3366_v14 = vld [vmem:[%s13686_s6 + $0x690] sm:$0xff] }
 0x2c9   :  { %3513 = vmatpush.msrb.mxu3 %v3296_v44  ;;  %v10308_v7 = vpop.permute.xlu2 %6368  ;;  %3493 = vmatpush.msra.mxu0 %v3258_v37  ;;  %v3286_v44 = vld [vmem:[%s13686_s6 + $0x410] sm:$0xff] }
 0x2ca   :  { %3552 = vmatpush.msrb.mxu2 %v3374_v55  ;;  %14199 = vst [vmem:[#allocation18_spill] sm:$0xff] %v10308_v7  ;;  %3531 = vmatpush.msra.mxu1 %v3338_v41  ;;  %v3330_v1 = vld [vmem:[%s13686_s6 + $0x570] sm:$0xff]  ;;  %v3364_v55 = vld [vmem:[%s13686_s6 + $0x680] sm:$0xff] }
 0x2cb   :  { %3514 = vmatpush.msrb.mxu3 %v3294_v58  ;;  %3494 = vmatpush.msra.mxu0 %v3256_v59  ;;  %v3284_v58 = vld [vmem:[%s13686_s6 + $0x400] sm:$0xff]  ;;  %v3410_v21 = vld [vmem:[%s13686_s6 + $0x7f0] sm:$0xff]  ;;  %v10374_v59 = vpop.f32.mrf.mxu3 }
 0x2cc   :  { %3553 = vmatpush.msrb.mxu2 %v3372_v35  ;;  %3532 = vmatpush.msra.mxu1 %v3336_v23  ;;  %v3362_v41 = vld [vmem:[%s13686_s6 + $0x670] sm:$0xff]  ;;  %v3408_v35 = vld [vmem:[%s13686_s6 + $0x7e0] sm:$0xff] }
 0x2cd   :  { %3515 = vmatpush.msrb.mxu3 %v3292_v20  ;;  %3495 = vmatpush.msra.mxu0 %v3254_v36  ;;  %v3328_v20 = vld [vmem:[%s13686_s6 + $0x560] sm:$0xff] }
 0x2ce   :  { %3554 = vmatpush.msrb.mxu2 %v3370_v2  ;;  %3533 = vmatpush.msra.mxu1 %v3334_v45  ;;  %v3360_v23 = vld [vmem:[%s13686_s6 + $0x660] sm:$0xff]  ;;  %v10372_v2 = vpop.f32.mrf.mxu1 }
 0x2cf   :  { %3516 = vmatpush.msrb.mxu3 %v3290_v10  ;;  %3496 = vmatpush.msra.mxu0 %v3252_v26  ;;  %v3326_v10 = vld [vmem:[%s13686_s6 + $0x550] sm:$0xff]  ;;  %v3324_v45 = vld [vmem:[%s13686_s6 + $0x540] sm:$0xff] }
 0x2d0   :  { %3555 = vmatpush.msrb.mxu2 %v3368_v51  ;;  %3534 = vmatpush.msra.mxu1 %v3332_v27  ;;  %v3358_v51 = vld [vmem:[%s13686_s6 + $0x650] sm:$0xff]  ;;  %v3404_v36 = vld [vmem:[%s13686_s6 + $0x7c0] sm:$0xff]  ;;  %v13866_v27 = vunpack.i.l.bf16 %v10308_v7 }
 0x2d1   :  { %3517 = vmatpush.msrb.mxu3 %v3288_v31  ;;  %v10364_v37 = vpop.permute.xlu2 %6378  ;;  %3573 = vmatpush.msrb.mxu0 %v3410_v21  ;;  %v3406_v31 = vld [vmem:[%s13686_s6 + $0x7d0] sm:$0xff] }
 0x2d2   :  { %3556 = vmatpush.msrb.mxu2 %v3366_v14  ;;  %3535 = vmatpush.msra.mxu1 %v3330_v1  ;;  %v3322_v26 = vld [vmem:[%s13686_s6 + $0x530] sm:$0xff] }
 0x2d3   :  { %3518 = vmatpush.msrb.mxu3 %v3286_v44  ;;  %3574 = vmatpush.msrb.mxu0 %v3408_v35  ;;  %v6371_v44 = vunpack.i.h.bf16 %v10308_v7  ;;  %v3402_v1 = vld [vmem:[%s13686_s6 + $0x7b0] sm:$0xff] }
 0x2d4   :  { %3557 = vmatpush.msrb.mxu2 %v3364_v55  ;;  %3536 = vmatpush.msra.mxu1 %v3328_v20  ;;  %v3354_v35 = vld [vmem:[%s13686_s6 + $0x630] sm:$0xff] }
 0x2d5   :  { %3519 = vmatpush.msrb.mxu3 %v3284_v58  ;;  %3575 = vmatpush.msrb.mxu0 %v3406_v31  ;;  %v3356_v58 = vld [vmem:[%s13686_s6 + $0x640] sm:$0xff]  ;;  %v3318_v31 = vld [vmem:[%s13686_s6 + $0x510] sm:$0xff] }
 0x2d6   :  { %3558 = vmatpush.msrb.mxu2 %v3362_v41  ;;  %3537 = vmatpush.msra.mxu1 %v3326_v10  ;;  %v3320_v41 = vld [vmem:[%s13686_s6 + $0x520] sm:$0xff] }
 0x2d7   :  { %3576 = vmatpush.msrb.mxu0 %v3404_v36 }
 0x2d8   :  { %3559 = vmatpush.msrb.mxu2 %v3360_v23  ;;  %3538 = vmatpush.msra.mxu1 %v3324_v45  ;;  %v3400_v23 = vld [vmem:[%s13686_s6 + $0x7a0] sm:$0xff]  ;;  %v3088_v45 = vsel %vm1628_vm5, %v13866_v27, %v6371_v44  ;;  %v3398_v27 = vld [vmem:[%s13686_s6 + $0x790] sm:$0xff] }
 0x2d9   :  { %3577 = vmatpush.msrb.mxu0 %v3402_v1  ;;  %v3352_v1 = vld [vmem:[%s13686_s6 + $0x620] sm:$0xff]  ;;  %v10443_v0 = vpop.permute.xlu2 %6398 }
 0x2da   :  { %3560 = vmatpush.msrb.mxu2 %v3358_v51  ;;  %3539 = vmatpush.msra.mxu1 %v3322_v26  ;;  %v10424_v51 = vpop.f32.mrf.mxu3  ;;  %v10426_v36 = vpop.f32.mrf.mxu1  ;;  %14202 = vst [vmem:[#allocation11_spill] sm:$0xff] %v10443_v0  ;;  %v13884_v11 = vunpack.i.l.bf16 %v10443_v0 }
 0x2db   :  { %3578 = vmatpush.msrb.mxu0 %v3400_v23  ;;  %v3396_v23 = vld [vmem:[%s13686_s6 + $0x780] sm:$0xff] }
 0x2dc   :  { %3561 = vmatpush.msrb.mxu2 %v3356_v58  ;;  %3540 = vmatpush.msra.mxu1 %v3320_v41  ;;  %v3350_v41 = vld [vmem:[%s13686_s6 + $0x610] sm:$0xff] }
 0x2dd   :  { %3579 = vmatpush.msrb.mxu0 %v3398_v27  ;;  %v3392_v27 = vld [vmem:[%s13686_s6 + $0x760] sm:$0xff] }
 0x2de   :  { %3562 = vmatpush.msrb.mxu2 %v3354_v35  ;;  %3541 = vmatpush.msra.mxu1 %v3318_v31 }
 0x2df   :  { %3580 = vmatpush.msrb.mxu0 %v3396_v23  ;;  %v3183_v23 = vld [vmem:[%s13686_s6 + $0xd8] sm:$0xff] }
 0x2e0   :  { %3563 = vmatpush.msrb.mxu2 %v3352_v1 }
 0x2e1   :  { %v10493_v50 = vpop.permute.xlu2 %6413 }
 0x2e2   :  { %v10390_v14 = vpop.permute.xlu1 %6363  ;;  %3564 = vmatpush.msrb.mxu2 %v3350_v41  ;;  %v3390_v41 = vld [vmem:[%s13686_s6 + $0x750] sm:$0xff] }
 0x2e3   :  { %14200 = vst [vmem:[#allocation30_spill] sm:$0xff] %v10390_v14  ;;  %v6366_v55 = vunpack.i.h.bf16 %v10390_v14  ;;  %v13870_v21 = vunpack.i.l.bf16 %v10390_v14  ;;  %v10403_v20 = vpop.permute.xlu0 %6358 }
 0x2e4   :  { %14201 = vst [vmem:[#allocation33_spill] sm:$0xff] %v10403_v20  ;;  %v6361_v10 = vunpack.i.h.bf16 %v10403_v20  ;;  %v13871_v58 = vunpack.i.l.bf16 %v10403_v20 }
 0x2e5   :  { %v2992_v26 = vsel %vm1499_vm2, %v13870_v21, %v6366_v55  ;;  %v3316_v21 = vld [vmem:[%s13686_s6 + $0x500] sm:$0xff] }
 0x2e6   :  { %v3092_v8 = vmax.f32 %v2992_v26, %v3088_v45  ;;  %v2864_v35 = vsel %vm1241_vm4, %v13871_v58, %v6361_v10  ;;  %v3348_v26 = vld [vmem:[%s13686_s6 + $0x600] sm:$0xff]  ;;  %3542 = vmatpush.msra.mxu1 %v3316_v21  ;;  %v3394_v58 = vld [vmem:[%s13686_s6 + $0x770] sm:$0xff]  ;;  %v2438_v21 = vpop.f32.mrf.mxu2 }
 0x2e7   :  { %v2868_v45 = vmax.f32 %v2740_v39, %v2864_v35  ;;  %3565 = vmatpush.msrb.mxu2 %v3348_v26  ;;  %3581 = vmatpush.msrb.mxu0 %v3394_v58  ;;  %v2527_v35 = vpop.f32.mrf.mxu0  ;;  %v2599_v26 = vpop.f32.mrf.mxu1  ;;  %v3181_v58 = vld [vmem:[%s13686_s6 + $0xc8] sm:$0xff] }
 0x2e8   :  { %v2528_v46 = vadd.f32 %v2527_v35, %v9808_v32 }
 0x2e9   :  { %v10468_v31 = vmax.f32 %v2868_v45, %v3092_v8  ;;  %v3185_v8 = vld [vmem:[%s13686_s6 + $0xe8] sm:$0xff]  ;;  %3582 = vmatpush.msrb.mxu0 %v3392_v27  ;;  %v2576_v45 = vpop.f32.mrf.mxu3 }
 0x2ea   :  { %v10470_v1 = vpop.permute.xlu1 %6383  ;;  %v2577_v43 = vadd.f32 %v2576_v45, %v9811_v49 }
 0x2eb   :  { %v10475_v39 = vpop.permute.xlu0 %6373  ;;  %3428 = vmatmul.f32.vlgmr.msra.gmra.mxu3 %v10468_v31  ;;  %3583 = vmatpush.msrb.mxu0 %v3390_v41 }
 0x2ec   :  { %3596 = vmatpush.msra.mxu3 %v3187_v47  ;;  %v13886_v47 = vunpack.i.h.bf16 %v10443_v0 }
 0x2ed   :  { %3584 = vmatpush.msrb.mxu0 %v3388_v9  ;;  %v3177_v9 = vld [vmem:[%s13686_s6 + $0xa8] sm:$0xff] }
 0x2ee   :  { %3597 = vmatpush.msra.mxu3 %v3185_v8  ;;  %v3179_v8 = vld [vmem:[%s13686_s6 + $0xb8] sm:$0xff]  ;;  %v3089_v45 = vsel %vm1628_vm5, %v13884_v11, %v13886_v47  ;;  %v2439_v11 = vadd.f32 %v2438_v21, %v9811_v49  ;;  %v10541_v47 = vadd.f32 %v2599_v26, %v2577_v43  ;;  %v13893_v21 = vunpack.i.h.bf16 %v10493_v50 }
 0x2ef   :  { %3585 = vmatpush.msrb.mxu0 %v3386_v38  ;;  %v6415_v43 = vunpack.i.l.bf16 %v10493_v50 }
 0x2f0   :  { %3598 = vmatpush.msra.mxu3 %v3183_v23  ;;  %v2550_v23 = vpop.f32.mrf.mxu2 }
 0x2f1   :  { %3586 = vmatpush.msrb.mxu0 %v3384_v25  ;;  %v3380_v25 = vld [vmem:[%s13686_s6 + $0x700] sm:$0xff]  ;;  %v10574_v40 = vadd.f32 %v2550_v23, %v2528_v46  ;;  %v3169_v23 = vld [vmem:[%s13686_s6 + $0x68] sm:$0xff] }
 0x2f2   :  { %v10500_v27 = vpop.permute.xlu1 %6393  ;;  %3599 = vmatpush.msra.mxu3 %v3181_v58 }
 0x2f3   :  { %14203 = vst [vmem:[#allocation32_spill] sm:$0xff] %v10500_v27  ;;  %v13890_v41 = vunpack.i.h.bf16 %v10500_v27  ;;  %v13887_v29 = vunpack.i.l.bf16 %v10500_v27  ;;  %v10511_v56 = vpop.permute.xlu0 %6388  ;;  %3587 = vmatpush.msrb.mxu0 %v3382_v4  ;;  %v14209_v20 = vunpack.i.h.bf16 %v10500_v27  ;;  %v3213_v27 = vld [vmem:[%s13686_s6 + $0x1c8] sm:$0xff] }
 0x2f4   :  { %14204 = vst [vmem:[#allocation19_spill] sm:$0xff] %v10511_v56  ;;  %v13889_v13 = vunpack.i.h.bf16 %v10511_v56  ;;  %v13888_v38 = vunpack.i.l.bf16 %v10511_v56  ;;  %3600 = vmatpush.msra.mxu3 %v3179_v8 }
 0x2f5   :  { %v2993_v58 = vsel %vm1499_vm2, %v13887_v29, %v13890_v41  ;;  %3588 = vmatpush.msrb.mxu0 %v3380_v25 }
 0x2f6   :  { %v3108_v63 = vmax.f32 %v2993_v58, %v3089_v45  ;;  %v2865_v8 = vsel %vm1241_vm4, %v13888_v38, %v13889_v13  ;;  %v2688_v45 = vpop.f32.mrf.mxu3  ;;  %3601 = vmatpush.msra.mxu3 %v3177_v9  ;;  %v2530_v58 = vpop.f32.mrf.mxu0  ;;  %v3173_v38 = vld [vmem:[%s13686_s6 + $0x88] sm:$0xff]  ;;  %v10561_v9 = vadd.f32 %v10441_v19, %v2439_v11  ;;  %v13896_v19 = vmax.f32 %v10541_v47, 0.0 }
 0x2f7   :  { %v2884_v26 = vmax.f32 %v2756_v6, %v2865_v8  ;;  %v10563_v13 = vpop.permute.xlu2 %6423  ;;  %v2531_v6 = vadd.f32 %v2530_v58, %v9811_v49 }
 0x2f8   :  { %v2665_v29 = vpop.f32.mrf.mxu1  ;;  %3602 = vmatpush.msra.mxu3 %v3175_v18 }
 0x2f9   :  { %v2666_v35 = vadd.f32 %v2665_v29, %v9808_v32  ;;  %v10569_v16 = vmax.f32 %v2884_v26, %v3108_v63  ;;  %v3171_v29 = vld [vmem:[%s13686_s6 + $0x78] sm:$0xff]  ;;  %v3084_v63 = vsel %vm1628_vm5, %v6415_v43, %v13893_v21 }
 0x2fa   :  { %v10567_v42 = vpop.permute.xlu1 %6408  ;;  %3603 = vmatpush.msra.mxu3 %v3173_v38  ;;  %v3086_v38 = vsel %vm1628_vm5, %v6371_v44, %v6415_v43  ;;  %v3167_v43 = vld [vmem:[%s13686_s6 + $0x58] sm:$0xff] }
 0x2fb   :  { %v10565_v41 = vadd.f32 %v2688_v45, %v2666_v35  ;;  %v13894_v18 = vunpack.i.h.bf16 %v10567_v42  ;;  %v6410_v4 = vunpack.i.l.bf16 %v10567_v42  ;;  %v10579_v11 = vpop.permute.xlu0 %6403  ;;  %3431 = vmatmul.f32.gmra.mxu3 %v10569_v16  ;;  %v2553_v35 = vpop.f32.mrf.mxu2 }
 0x2fc   :  { %v13897_v46 = vunpack.i.h.bf16 %v10579_v11  ;;  %v6405_v58 = vunpack.i.l.bf16 %v10579_v11  ;;  %3604 = vmatpush.msra.mxu3 %v3171_v29 }
 0x2fd   :  { %14205 = vst [vmem:[#allocation14_spill] sm:$0xff] %v10565_v41  ;;  %v13895_v8 = vmax.f32 %v10565_v41, 0.0  ;;  %v2988_v45 = vsel %vm1499_vm2, %v6410_v4, %v13894_v18  ;;  %v2990_v25 = vsel %vm1499_vm2, %v6366_v55, %v6410_v4  ;;  %v2485_v18 = vadd.f32 %v10372_v2, %v9811_v49  ;;  %v3165_v2 = vld [vmem:[%s13686_s6 + $0x48] sm:$0xff] }
 0x2fe   :  { %v3093_v26 = vmax.f32 %v2990_v25, %v3086_v38  ;;  %v3094_v21 = vmax.f32 %v2988_v45, %v3084_v63  ;;  %v2860_v55 = vsel %vm1241_vm4, %v6405_v58, %v13897_v46  ;;  %v2862_v29 = vsel %vm1241_vm4, %v6361_v10, %v6405_v58  ;;  %3605 = vmatpush.msra.mxu3 %v3169_v23  ;;  %v10641_v58 = vpop.f32.mrf.mxu0 }
 0x2ff   :  { %v6512_v44 = vpack.i.bf16 %v13895_v8, %v13896_v19  ;;  %v13901_v4 = vmax.f32 %v10574_v40, 0.0  ;;  %v14206_v63 = vmax.f32 %v9828_v22, 0.0  ;;  %v14207_v45 = vmax.f32 %v9949_v60, 0.0 }
 0x300   :  { %v10633_v8 = vadd.f32 %v10374_v59, %v2485_v18  ;;  %v10635_v10 = vadd.f32 %v2553_v35, %v2531_v6  ;;  %v13903_v23 = vunpack.i.h.bf16 %v10563_v13  ;;  %v6425_v22 = vunpack.i.l.bf16 %v10563_v13  ;;  %3606 = vmatpush.msra.mxu3 %v3167_v43  ;;  %v3219_v59 = vld [vmem:[%s13686_s6 + $0x1f8] sm:$0xff] }
 0x301   :  { %v2869_v38 = vmax.f32 %v14206_v63, %v2862_v29  ;;  %v2870_v25 = vmax.f32 %v14207_v45, %v2860_v55  ;;  %6513 = vrot.lane.b32.xlu2 %v6512_v44, %s7232_s25  ;;  %6518 = vrot.lane.b32.xlu1 %v6512_v44, %s7237_s30  ;;  %v13902_v60 = vmax.f32 %v10561_v9, 0.0  ;;  %v3251_v6 = vld [vmem:[%s13686_s6 + $0x2f8] sm:$0xff]  ;;  %v3217_v45 = vld [vmem:[%s13686_s6 + $0x1e8] sm:$0xff] }
 0x302   :  { %14208 = vst [vmem:[#allocation43_spill] sm:$0xff] %v10635_v10  ;;  %6508 = vrot.lane.b32.xlu0 %v6512_v44, %s7235_s29  ;;  %v10647_v63 = vpop.permute.xlu1 %6428  ;;  %3607 = vmatpush.msra.mxu3 %v3165_v2  ;;  %v2989_v43 = vsel %vm1499_vm2, %v6425_v22, %v13903_v23 }
 0x303   :  { %v10643_v55 = vmax.f32 %v2869_v38, %v3093_v26  ;;  %v10645_v29 = vmax.f32 %v2870_v25, %v3094_v21  ;;  %v13904_v18 = vunpack.i.h.bf16 %v10647_v63  ;;  %v6430_v35 = vunpack.i.l.bf16 %v10647_v63  ;;  %v10657_v44 = vpop.permute.xlu0 %6418  ;;  %v3163_v21 = vld [vmem:[%s13686_s6 + $0x38] sm:$0xff]  ;;  %v6444_v26 = vpop.permute.xlu2 %6443  ;;  %v3249_v25 = vld [vmem:[%s13686_s6 + $0x2e8] sm:$0xff] }
 0x304   :  { %v6420_v38 = vunpack.i.l.bf16 %v10657_v44  ;;  %v6532_v2 = vpack.i.bf16 %v13902_v60, %v13901_v4  ;;  %v2619_v14 = vpop.f32.mrf.mxu2  ;;  %v2991_v4 = vsel %vm1499_vm2, %v14209_v20, %v6425_v22  ;;  %v14210_v60 = vunpack.i.h.bf16 %v10443_v0  ;;  %v3247_v20 = vld [vmem:[%s13686_s6 + $0x2d8] sm:$0xff]  ;;  %3608 = vmatpush.msra.mxu3 %v3163_v21 }
 0x305   :  { %3451 = vmatmul.f32.vlgmr.msrb.gmra.mxu1 %v10643_v55  ;;  %3474 = vmatmul.f32.vlgmr.msra.gmra.mxu2 %v10645_v29  ;;  %v3085_v7 = vsel %vm1628_vm5, %v6430_v35, %v13904_v18  ;;  %v14211_v23 = vunpack.i.h.bf16 %v10657_v44  ;;  %v14212_v18 = vunpack.i.h.bf16 %v10511_v56  ;;  %v6446_v22 = vunpack.i.h.bf16 %v6444_v26 }
 0x306   :  { %3619 = vmatpush.msrb.mxu1 %v3219_v59  ;;  %3642 = vmatpush.msra.mxu2 %v3251_v6  ;;  %v3087_v46 = vsel %vm1628_vm5, %v14210_v60, %v6430_v35  ;;  %v3215_v6 = vld [vmem:[%s13686_s6 + $0x1d8] sm:$0xff]  ;;  %v14213_v60 = vmax.f32 %v9911_v48, 0.0  ;;  %v14214_v0 = vmax.f32 %v9967_v62, 0.0  ;;  %v3110_v21 = vmax.f32 %v2989_v43, %v3085_v7  ;;  %v3245_v48 = vld [vmem:[%s13686_s6 + $0x2c8] sm:$0xff] }
 0x307   :  { %v2861_v19 = vsel %vm1241_vm4, %v6420_v38, %v14211_v23  ;;  %v2863_v59 = vsel %vm1241_vm4, %v14212_v18, %v6420_v38  ;;  %v3109_v35 = vmax.f32 %v2991_v4, %v3087_v46  ;;  %v3161_v18 = vld [vmem:[%s13686_s6 + $0x28] sm:$0xff]  ;;  %v6445_v38 = vunpack.i.l.bf16 %v6444_v26 }
 0x308   :  { %3620 = vmatpush.msrb.mxu1 %v3217_v45  ;;  %3643 = vmatpush.msra.mxu2 %v3249_v25  ;;  %v2885_v23 = vmax.f32 %v14213_v60, %v2863_v59  ;;  %v2886_v56 = vmax.f32 %v14214_v0, %v2861_v19  ;;  %v13908_v62 = vunpack.i.h.bf16 %v10470_v1  ;;  %v14215_v19 = vmax.f32 %v10633_v8, 0.0  ;;  %v3211_v59 = vld [vmem:[%s13686_s6 + $0x1b8] sm:$0xff] }
 0x309   :  { %6533 = vrot.lane.b32.xlu2 %v6532_v2, %s7237_s30  ;;  %6528 = vrot.lane.b32.xlu1 %v6532_v2, %s7232_s25  ;;  %v14216_v46 = vmax.f32 %v10635_v10, 0.0  ;;  %v2574_v7 = vadd.f32 %v10424_v51, %v9808_v32  ;;  %v2620_v43 = vadd.f32 %v2619_v14, %v9808_v32  ;;  %v3159_v60 = vld [vmem:[%s13686_s6 + $0x18] sm:$0xff]  ;;  %v14221_v10 = vmax.f32 %v9977_v24, 0.0 }
 0x30a   :  { %3621 = vmatpush.msrb.mxu1 %v3215_v6  ;;  %3644 = vmatpush.msra.mxu2 %v3247_v20  ;;  %v10724_v0 = vmax.f32 %v2885_v23, %v3109_v35  ;;  %v6434_v45 = vpop.permute.xlu1 %6433  ;;  %v10735_v25 = vmax.f32 %v2886_v56, %v3110_v21  ;;  %v3243_v6 = vld [vmem:[%s13686_s6 + $0x2b8] sm:$0xff]  ;;  %v13911_v20 = vunpack.i.h.bf16 %v10475_v39  ;;  %v3078_v14 = vsel %vm1628_vm5, %v6446_v22, %v13908_v62  ;;  %v10751_v23 = vpop.f32.mrf.mxu0 }
 0x30b   :  { %v6542_v4 = vpack.i.bf16 %v14216_v46, %v14215_v19  ;;  %6523 = vrot.lane.b32.xlu0 %v6532_v2, %s7235_s29  ;;  %3609 = vmatpush.msra.mxu3 %v3161_v18  ;;  %v6436_v51 = vunpack.i.h.bf16 %v6434_v45  ;;  %v6435_v56 = vunpack.i.l.bf16 %v6434_v45  ;;  %v6439_v2 = vpop.permute.xlu0 %6438  ;;  %v3080_v35 = vsel %vm1628_vm5, %v6445_v38, %v6446_v22  ;;  %v3241_v46 = vld [vmem:[%s13686_s6 + $0x2a8] sm:$0xff] }
 0x30c   :  { %3622 = vmatpush.msrb.mxu1 %v3213_v27  ;;  %3645 = vmatpush.msra.mxu2 %v3245_v48  ;;  %v14217_v18 = vunpack.i.h.bf16 %v10493_v50  ;;  %v6441_v19 = vunpack.i.h.bf16 %v6439_v2  ;;  %v6440_v27 = vunpack.i.l.bf16 %v6439_v2  ;;  %v3209_v48 = vld [vmem:[%s13686_s6 + $0x1a8] sm:$0xff]  ;;  %v14219_v2 = vmax.f32 %v9939_v5, 0.0  ;;  %v3239_v5 = vld [vmem:[%s13686_s6 + $0x298] sm:$0xff] }
 0x30d   :  { %3454 = vmatmul.f32.gmra.mxu1 %v10724_v0  ;;  %3477 = vmatmul.f32.gmra.mxu2 %v10735_v25  ;;  %v2854_v50 = vsel %vm1241_vm4, %v6436_v51, %v13911_v20  ;;  %v2856_v22 = vsel %vm1241_vm4, %v6435_v56, %v6436_v51  ;;  %v14220_v62 = vmax.f32 %v9985_v30, 0.0  ;;  %v14222_v20 = vunpack.i.h.bf16 %v10364_v37 }
 0x30e   :  { %v3082_v21 = vsel %vm1628_vm5, %v14217_v18, %v6445_v38  ;;  %v14218_v38 = vunpack.i.h.bf16 %v10579_v11  ;;  %3623 = vmatpush.msrb.mxu1 %v3211_v59  ;;  %3646 = vmatpush.msra.mxu2 %v3243_v6  ;;  %v2873_v41 = vmax.f32 %v14221_v10, %v2854_v50  ;;  %v3207_v11 = vld [vmem:[%s13686_s6 + $0x198] sm:$0xff]  ;;  %v2984_v30 = vsel %vm1499_vm2, %v6440_v27, %v6441_v19  ;;  %v2622_v6 = vpop.f32.mrf.mxu2 }
 0x30f   :  { %v2872_v26 = vmax.f32 %v14220_v62, %v2856_v22  ;;  %v2982_v51 = vsel %vm1499_vm2, %v6441_v19, %v14222_v20  ;;  %3610 = vmatpush.msra.mxu3 %v3159_v60  ;;  %v14223_v24 = vunpack.i.h.bf16 %v10567_v42  ;;  %v3157_v62 = vld [vmem:[%s13686_s6 + $0x8] sm:$0xff]  ;;  %v10802_v20 = vpop.permute.xlu2 %6463  ;;  %v3096_v60 = vmax.f32 %v2984_v30, %v3080_v35  ;;  %v3235_v50 = vld [vmem:[%s13686_s6 + $0x278] sm:$0xff] }
 0x310   :  { %v2858_v45 = vsel %vm1241_vm4, %v14218_v38, %v6435_v56  ;;  %v3097_v59 = vmax.f32 %v2982_v51, %v3078_v14  ;;  %3624 = vmatpush.msrb.mxu1 %v3209_v48  ;;  %3647 = vmatpush.msra.mxu2 %v3241_v46  ;;  %v3205_v14 = vld [vmem:[%s13686_s6 + $0x188] sm:$0xff]  ;;  %v10813_v19 = vadd.f32 %v10426_v36, %v2574_v7  ;;  %v3283_v36 = vld [vmem:[%s13686_s6 + $0x3f8] sm:$0xff]  ;;  %v6375_v7 = vunpack.i.l.bf16 %v10475_v39 }
 0x311   :  { %v2871_v18 = vmax.f32 %v14219_v2, %v2858_v45  ;;  %v2986_v10 = vsel %vm1499_vm2, %v14223_v24, %v6440_v27  ;;  %6543 = vrot.lane.b32.xlu2 %v6542_v4, %s7232_s25  ;;  %6548 = vrot.lane.b32.xlu1 %v6542_v4, %s7237_s30  ;;  %v3237_v42 = vld [vmem:[%s13686_s6 + $0x288] sm:$0xff]  ;;  %v10818_v35 = vadd.f32 %v10641_v58, %v2620_v43  ;;  %v3203_v58 = vld [vmem:[%s13686_s6 + $0x178] sm:$0xff]  ;;  %v6380_v38 = vunpack.i.l.bf16 %v10364_v37 }
 0x312   :  { %v3095_v56 = vmax.f32 %v2986_v10, %v3082_v21  ;;  %v10815_v27 = vmax.f32 %v2873_v41, %v3097_v59  ;;  %3625 = vmatpush.msrb.mxu1 %v3207_v11  ;;  %3648 = vmatpush.msra.mxu2 %v3239_v5  ;;  %v10820_v21 = vmax.f32 %v2872_v26, %v3096_v60  ;;  %v10823_v48 = vpop.permute.xlu1 %6448  ;;  %v6385_v26 = vunpack.i.l.bf16 %v10470_v1  ;;  %v2711_v43 = vpop.f32.mrf.mxu0  ;;  %v3281_v22 = vld [vmem:[%s13686_s6 + $0x3e8] sm:$0xff] }
 0x313   :  { %6538 = vrot.lane.b32.xlu0 %v6542_v4, %s7235_s29  ;;  %3611 = vmatpush.msra.mxu3 %v3157_v62  ;;  %v10830_v41 = vpop.permute.xlu0 %6458  ;;  %v3315_v4 = vld [vmem:[%s13686_s6 + $0x4f8] sm:$0xff]  ;;  %v3201_v45 = vld [vmem:[%s13686_s6 + $0x168] sm:$0xff]  ;;  %v13912_v51 = vmax.f32 %v10818_v35, 0.0  ;;  %v14224_v11 = vunpack.i.h.bf16 %v10647_v63  ;;  %v14225_v59 = vunpack.i.h.bf16 %v10657_v44  ;;  %v2712_v10 = vadd.f32 %v2711_v43, %v9808_v32 }
 0x314   :  { %v10825_v46 = vmax.f32 %v2871_v18, %v3095_v56  ;;  %3626 = vmatpush.msrb.mxu1 %v3205_v14  ;;  %3649 = vmatpush.msra.mxu2 %v3237_v42  ;;  %v3313_v2 = vld [vmem:[%s13686_s6 + $0x4e8] sm:$0xff]  ;;  %v13913_v18 = vmax.f32 %v10813_v19, 0.0  ;;  %v3279_v63 = vld [vmem:[%s13686_s6 + $0x3d8] sm:$0xff]  ;;  %v14226_v56 = vunpack.i.h.bf16 %v10563_v13 }
 0x315   :  { %3520 = vmatmul.f32.vlgmr.msrb.gmra.mxu3 %v10820_v21  ;;  %3543 = vmatmul.f32.vlgmr.msra.gmra.mxu1 %v10815_v27  ;;  %v3083_v5 = vsel %vm1628_vm5, %v14224_v11, %v6385_v26  ;;  %v2859_v30 = vsel %vm1241_vm4, %v14225_v59, %v6375_v7  ;;  %v3233_v24 = vld [vmem:[%s13686_s6 + $0x268] sm:$0xff]  ;;  %v3199_v44 = vld [vmem:[%s13686_s6 + $0x158] sm:$0xff]  ;;  %v13916_v59 = vunpack.i.h.bf16 %v10830_v41 }
 0x316   :  { %3497 = vmatmul.f32.vlgmr.msra.gmra.mxu0 %v10825_v46  ;;  %3627 = vmatpush.msrb.mxu1 %v3203_v58  ;;  %v3311_v62 = vld [vmem:[%s13686_s6 + $0x4d8] sm:$0xff]  ;;  %v2987_v60 = vsel %vm1499_vm2, %v14226_v56, %v6380_v38  ;;  %v2734_v14 = vpop.f32.mrf.mxu2  ;;  %v3277_v42 = vld [vmem:[%s13686_s6 + $0x3c8] sm:$0xff]  ;;  %v6466_v56 = vunpack.i.h.bf16 %v10802_v20 }
 0x317   :  { %3665 = vmatpush.msra.mxu0 %v3283_v36  ;;  %3688 = vmatpush.msrb.mxu3 %v3315_v4  ;;  %v3231_v32 = vld [vmem:[%s13686_s6 + $0x258] sm:$0xff]  ;;  %v2623_v36 = vadd.f32 %v2622_v6, %v9811_v49  ;;  %v3197_v13 = vld [vmem:[%s13686_s6 + $0x148] sm:$0xff]  ;;  %v14227_v4 = vmax.f32 %v9960_v53, 0.0  ;;  %v6562_v6 = vpack.i.bf16 %v13912_v51, %v13913_v18  ;;  %v14230_v51 = vmax.f32 %v9838_v17, 0.0 }
 0x318   :  { %3650 = vmatpush.msra.mxu2 %v3235_v50  ;;  %3628 = vmatpush.msrb.mxu1 %v3201_v45  ;;  %v3309_v58 = vld [vmem:[%s13686_s6 + $0x4c8] sm:$0xff]  ;;  %v3111_v50 = vmax.f32 %v2987_v60, %v3083_v5  ;;  %v3303_v17 = vld [vmem:[%s13686_s6 + $0x498] sm:$0xff] }
 0x319   :  { %3666 = vmatpush.msra.mxu0 %v3281_v22  ;;  %3689 = vmatpush.msrb.mxu3 %v3313_v2  ;;  %v2887_v43 = vmax.f32 %v14227_v4, %v2859_v30  ;;  %v10904_v22 = vpop.permute.xlu2 %6478  ;;  %v10912_v2 = vadd.f32 %v2734_v14, %v2712_v10  ;;  %v3195_v30 = vld [vmem:[%s13686_s6 + $0x138] sm:$0xff]  ;;  %v2668_v4 = vpop.f32.mrf.mxu1 }
 0x31a   :  { %3651 = vmatpush.msra.mxu2 %v3233_v24  ;;  %3629 = vmatpush.msrb.mxu1 %v3199_v44  ;;  %v10910_v45 = vpop.permute.xlu1 %6453  ;;  %v10923_v24 = vadd.f32 %v10751_v23, %v2623_v36  ;;  %v3229_v44 = vld [vmem:[%s13686_s6 + $0x248] sm:$0xff]  ;;  %v6465_v23 = vunpack.i.l.bf16 %v10802_v20  ;;  %v3307_v14 = vld [vmem:[%s13686_s6 + $0x4b8] sm:$0xff]  ;;  %v14228_v36 = vunpack.i.h.bf16 %v10475_v39  ;;  %v2985_v39 = vsel %vm1499_vm2, %v6380_v38, %v13916_v59 }
 0x31b   :  { %3667 = vmatpush.msra.mxu0 %v3279_v63  ;;  %3690 = vmatpush.msrb.mxu3 %v3311_v62  ;;  %v13915_v11 = vunpack.i.h.bf16 %v10910_v45  ;;  %v13914_v53 = vunpack.i.l.bf16 %v10910_v45  ;;  %v10916_v5 = vpop.permute.xlu0 %6468  ;;  %v6460_v63 = vunpack.i.l.bf16 %v10830_v41  ;;  %v10928_v10 = vmax.f32 %v2887_v43, %v3111_v50  ;;  %v3275_v62 = vld [vmem:[%s13686_s6 + $0x3b8] sm:$0xff]  ;;  %v3305_v43 = vld [vmem:[%s13686_s6 + $0x4a8] sm:$0xff] }
 0x31c   :  { %3652 = vmatpush.msra.mxu2 %v3231_v32  ;;  %3630 = vmatpush.msrb.mxu1 %v3197_v13  ;;  %v3193_v32 = vld [vmem:[%s13686_s6 + $0x128] sm:$0xff]  ;;  %v3191_v50 = vld [vmem:[%s13686_s6 + $0x118] sm:$0xff]  ;;  %v13920_v59 = vunpack.i.h.bf16 %v10904_v22 }
 0x31d   :  { %3668 = vmatpush.msra.mxu0 %v3277_v42  ;;  %3691 = vmatpush.msrb.mxu3 %v3309_v58  ;;  %v2857_v60 = vsel %vm1241_vm4, %v6375_v7, %v13915_v11  ;;  %v13917_v42 = vmax.f32 %v10912_v2, 0.0  ;;  %v2852_v13 = vsel %vm1241_vm4, %v14228_v36, %v13914_v53  ;;  %v3227_v7 = vld [vmem:[%s13686_s6 + $0x238] sm:$0xff]  ;;  %v3273_v58 = vld [vmem:[%s13686_s6 + $0x3a8] sm:$0xff]  ;;  %v14229_v36 = vunpack.i.h.bf16 %v10364_v37 }
 0x31e   :  { %6563 = vrot.lane.b32.xlu2 %v6562_v6, %s7237_s30  ;;  %6553 = vrot.lane.b32.xlu1 %v6562_v6, %s7235_s29  ;;  %v2888_v18 = vmax.f32 %v14230_v51, %v2857_v60  ;;  %v14231_v37 = vunpack.i.h.bf16 %v10470_v1  ;;  %v3189_v51 = vld [vmem:[%s13686_s6 + $0x108] sm:$0xff]  ;;  %v2669_v1 = vadd.f32 %v2668_v4, %v9811_v49  ;;  %v2737_v11 = vpop.f32.mrf.mxu2 }
 0x31f   :  { %6558 = vrot.lane.b32.xlu0 %v6562_v6, %s7232_s25  ;;  %3500 = vmatmul.f32.gmra.mxu0 %v10928_v10  ;;  %v13918_v6 = vmax.f32 %v10923_v24, 0.0  ;;  %v2980_v38 = vsel %vm1499_vm2, %v14229_v36, %v6460_v63  ;;  %v3377_v20 = vld [vmem:[%s13686_s6 + $0x6e8] sm:$0xff] }
 0x320   :  { %3631 = vmatpush.msrb.mxu1 %v3195_v30  ;;  %3653 = vmatpush.msra.mxu2 %v3229_v44  ;;  %v2714_v30 = vpop.f32.mrf.mxu0  ;;  %v3225_v44 = vld [vmem:[%s13686_s6 + $0x228] sm:$0xff]  ;;  %v3076_v36 = vsel %vm1628_vm5, %v14231_v37, %v6465_v23 }
 0x321   :  { %3669 = vmatpush.msra.mxu0 %v3275_v62  ;;  %3692 = vmatpush.msrb.mxu3 %v3307_v14  ;;  %v3271_v62 = vld [vmem:[%s13686_s6 + $0x398] sm:$0xff]  ;;  %v3081_v14 = vsel %vm1628_vm5, %v6385_v26, %v6466_v56  ;;  %v3269_v26 = vld [vmem:[%s13686_s6 + $0x388] sm:$0xff]  ;;  %v2715_v4 = vadd.f32 %v2714_v30, %v9811_v49  ;;  %v3098_v37 = vmax.f32 %v2980_v38, %v3076_v36  ;;  %v6480_v49 = vunpack.i.l.bf16 %v10904_v22 }
 0x322   :  { %3632 = vmatpush.msrb.mxu1 %v3193_v32  ;;  %v14232_v32 = vmax.f32 %v9848_v57, 0.0  ;;  %3654 = vmatpush.msra.mxu2 %v3227_v7  ;;  %v11012_v60 = vpop.permute.xlu1 %6483  ;;  %v3223_v57 = vld [vmem:[%s13686_s6 + $0x218] sm:$0xff] }
 0x323   :  { %3670 = vmatpush.msra.mxu0 %v3273_v58  ;;  %3693 = vmatpush.msrb.mxu3 %v3305_v43  ;;  %v11025_v7 = vpop.permute.xlu0 %6473  ;;  %v3112_v58 = vmax.f32 %v2985_v39, %v3081_v14  ;;  %v2691_v43 = vpop.f32.mrf.mxu3  ;;  %v3347_v38 = vld [vmem:[%s13686_s6 + $0x5f8] sm:$0xff] }
 0x324   :  { %v2874_v53 = vmax.f32 %v14232_v32, %v2852_v13  ;;  %3633 = vmatpush.msrb.mxu1 %v3191_v50  ;;  %v6577_v13 = vpack.i.bf16 %v13918_v6, %v13917_v42  ;;  %v11028_v50 = vpop.permute.xlu2 %6488  ;;  %3655 = vmatpush.msra.mxu2 %v3225_v44  ;;  %v3301_v32 = vld [vmem:[%s13686_s6 + $0x488] sm:$0xff]  ;;  %v6485_v42 = vunpack.i.l.bf16 %v11012_v60  ;;  %v6486_v44 = vunpack.i.h.bf16 %v11012_v60  ;;  %v11212_v60 = vld [vmem:[%s13686_s6 + $0x598] sm:$0xff] }
 0x325   :  { %3671 = vmatpush.msra.mxu0 %v3271_v62  ;;  %3694 = vmatpush.msrb.mxu3 %v3303_v17  ;;  %v11035_v39 = vmax.f32 %v2888_v18, %v3112_v58  ;;  %v13919_v62 = vunpack.i.l.bf16 %v11025_v7  ;;  %v11045_v36 = vadd.f32 %v2691_v43, %v2669_v1  ;;  %v13926_v14 = vunpack.i.l.bf16 %v11028_v50  ;;  %v3221_v1 = vld [vmem:[%s13686_s6 + $0x208] sm:$0xff] }
 0x326   :  { %3634 = vmatpush.msrb.mxu1 %v3189_v51  ;;  %v11038_v30 = vmax.f32 %v2874_v53, %v3098_v37  ;;  %3656 = vmatpush.msra.mxu2 %v3223_v57  ;;  %v6470_v18 = vunpack.i.l.bf16 %v10916_v5  ;;  %v3267_v53 = vld [vmem:[%s13686_s6 + $0x378] sm:$0xff]  ;;  %v11053_v17 = vadd.f32 %v2737_v11, %v2715_v4  ;;  %v6471_v51 = vunpack.i.h.bf16 %v10916_v5  ;;  %v3265_v37 = vld [vmem:[%s13686_s6 + $0x368] sm:$0xff] }
 0x327   :  { %3672 = vmatpush.msra.mxu0 %v3269_v26  ;;  %3695 = vmatpush.msrb.mxu3 %v3301_v32  ;;  %v3299_v57 = vld [vmem:[%s13686_s6 + $0x478] sm:$0xff]  ;;  %v3079_v11 = vsel %vm1628_vm5, %v6466_v56, %v6485_v42  ;;  %v3345_v26 = vld [vmem:[%s13686_s6 + $0x5e8] sm:$0xff]  ;;  %v2981_v58 = vsel %vm1499_vm2, %v6480_v49, %v13920_v59  ;;  %v6450_v4 = vunpack.i.l.bf16 %v10823_v48  ;;  %v3077_v56 = vsel %vm1628_vm5, %v6485_v42, %v6486_v44 }
 0x328   :  { %6578 = vrot.lane.b32.xlu2 %v6577_v13, %s7237_s30  ;;  %6568 = vrot.lane.b32.xlu1 %v6577_v13, %s7235_s29  ;;  %v2978_v43 = vsel %vm1499_vm2, %v6460_v63, %v13919_v62  ;;  %v3297_v32 = vld [vmem:[%s13686_s6 + $0x468] sm:$0xff]  ;;  %v13922_v42 = vmax.f32 %v11045_v36, 0.0  ;;  %v3074_v63 = vsel %vm1628_vm5, %v6465_v23, %v13926_v14  ;;  %v14234_v6 = vunpack.i.h.bf16 %v10910_v45  ;;  %v3343_v59 = vld [vmem:[%s13686_s6 + $0x5d8] sm:$0xff] }
 0x329   :  { %6573 = vrot.lane.b32.xlu0 %v6577_v13, %s7232_s25  ;;  %3711 = vmatpush.msra.mxu1 %v3347_v38  ;;  %v3379_v13 = vld [vmem:[%s13686_s6 + $0x6f8] sm:$0xff]  ;;  %v14233_v38 = vunpack.i.h.bf16 %v10830_v41  ;;  %v13921_v41 = vmax.f32 %v11053_v17, 0.0  ;;  %v14235_v23 = vunpack.i.l.bf16 %v10910_v45  ;;  %v3099_v45 = vmax.f32 %v2978_v43, %v3074_v63  ;;  %v7000_v14 = vld [vmem:[%s13686_s6 + $0x1b0] sm:$0xff] }
 0x32a   :  { %3523 = vmatmul.f32.gmra.mxu3 %v11035_v39  ;;  %3566 = vmatmul.f32.vlgmr.msrb.gmra.mxu2 %v11038_v30  ;;  %v2855_v62 = vsel %vm1241_vm4, %v14234_v6, %v6470_v18  ;;  %v2853_v6 = vsel %vm1241_vm4, %v6470_v18, %v6471_v51  ;;  %v3375_v18 = vld [vmem:[%s13686_s6 + $0x6d8] sm:$0xff]  ;;  %v14236_v43 = vmax.f32 %v10004_v61, 0.0 }
 0x32b   :  { %3673 = vmatpush.msra.mxu0 %v3267_v53  ;;  %v2983_v53 = vsel %vm1499_vm2, %v14233_v38, %v6480_v49  ;;  %3657 = vmatpush.msra.mxu2 %v3221_v1  ;;  %v2850_v49 = vsel %vm1241_vm4, %v14235_v23, %v6450_v4  ;;  %v3263_v1 = vld [vmem:[%s13686_s6 + $0x358] sm:$0xff]  ;;  %v3341_v23 = vld [vmem:[%s13686_s6 + $0x5c8] sm:$0xff] }
 0x32c   :  { %3696 = vmatpush.msrb.mxu3 %v3299_v57  ;;  %3712 = vmatpush.msra.mxu1 %v3345_v26  ;;  %v3295_v57 = vld [vmem:[%s13686_s6 + $0x458] sm:$0xff]  ;;  %v3113_v38 = vmax.f32 %v2983_v53, %v3079_v11  ;;  %v3114_v26 = vmax.f32 %v2981_v58, %v3077_v56  ;;  %v3293_v11 = vld [vmem:[%s13686_s6 + $0x448] sm:$0xff]  ;;  %v14238_v58 = vmax.f32 %v10036_v28, 0.0  ;;  %v6592_v56 = vpack.i.bf16 %v13921_v41, %v13922_v42  ;;  %v6995_v41 = vld [vmem:[%s13686_s6 + $0x2f0] sm:$0xff] }
 0x32d   :  { %3734 = vmatpush.msrb.mxu2 %v3379_v13  ;;  %3674 = vmatpush.msra.mxu0 %v3265_v37  ;;  %v3261_v13 = vld [vmem:[%s13686_s6 + $0x348] sm:$0xff]  ;;  %v2889_v37 = vmax.f32 %v14236_v43, %v2855_v62  ;;  %v3339_v61 = vld [vmem:[%s13686_s6 + $0x5b8] sm:$0xff] }
 0x32e   :  { %3697 = vmatpush.msrb.mxu3 %v3297_v32  ;;  %3713 = vmatpush.msra.mxu1 %v3343_v59  ;;  %v14237_v32 = vmax.f32 %v10009_v34, 0.0  ;;  %v2890_v59 = vmax.f32 %v14238_v58, %v2853_v6  ;;  %v3373_v28 = vld [vmem:[%s13686_s6 + $0x6c8] sm:$0xff]  ;;  %v13923_v6 = vunpack.i.h.bf16 %v11028_v50  ;;  %v3287_v43 = vld [vmem:[%s13686_s6 + $0x418] sm:$0xff] }
 0x32f   :  { %3735 = vmatpush.msrb.mxu2 %v3377_v20  ;;  %3675 = vmatpush.msra.mxu0 %v3263_v1  ;;  %v11160_v62 = vmax.f32 %v2889_v37, %v3113_v38  ;;  %v13925_v20 = vunpack.i.h.bf16 %v11025_v7  ;;  %v3291_v1 = vld [vmem:[%s13686_s6 + $0x438] sm:$0xff]  ;;  %v11232_v37 = vld [vmem:[%s13686_s6 + $0x588] sm:$0xff] }
 0x330   :  { %v2875_v63 = vmax.f32 %v14237_v32, %v2850_v49  ;;  %3698 = vmatpush.msrb.mxu3 %v3295_v57  ;;  %3714 = vmatpush.msra.mxu1 %v3341_v23  ;;  %v11167_v53 = vmax.f32 %v2890_v59, %v3114_v26  ;;  %v3259_v49 = vld [vmem:[%s13686_s6 + $0x338] sm:$0xff]  ;;  %v3337_v57 = vld [vmem:[%s13686_s6 + $0x5a8] sm:$0xff]  ;;  %v13924_v23 = vunpack.i.h.bf16 %v10823_v48  ;;  %v14239_v26 = vunpack.i.h.bf16 %v10904_v22 }
 0x331   :  { %3736 = vmatpush.msrb.mxu2 %v3375_v18  ;;  %3676 = vmatpush.msra.mxu0 %v3261_v13  ;;  %v3371_v38 = vld [vmem:[%s13686_s6 + $0x6b8] sm:$0xff]  ;;  %v3075_v18 = vsel %vm1628_vm5, %v6486_v44, %v13923_v6  ;;  %v3369_v22 = vld [vmem:[%s13686_s6 + $0x6a8] sm:$0xff] }
 0x332   :  { %v11162_v34 = vmax.f32 %v2875_v63, %v3099_v45  ;;  %3699 = vmatpush.msrb.mxu3 %v3293_v11  ;;  %6593 = vrot.lane.b32.xlu2 %v6592_v56, %s7237_s30  ;;  %v3257_v45 = vld [vmem:[%s13686_s6 + $0x328] sm:$0xff]  ;;  %v2979_v13 = vsel %vm1499_vm2, %v14239_v26, %v13925_v20  ;;  %v2851_v44 = vsel %vm1241_vm4, %v6471_v51, %v13924_v23  ;;  %v3367_v5 = vld [vmem:[%s13686_s6 + $0x698] sm:$0xff] }
 0x333   :  { %6588 = vrot.lane.b32.xlu1 %v6592_v56, %s7232_s25  ;;  %6583 = vrot.lane.b32.xlu0 %v6592_v56, %s7235_s29  ;;  %v3289_v11 = vld [vmem:[%s13686_s6 + $0x428] sm:$0xff]  ;;  %v3115_v32 = vmax.f32 %v2979_v13, %v3075_v18  ;;  %v11247_v58 = vld [vmem:[%s13686_s6 + $0x578] sm:$0xff] }
 0x334   :  { %3715 = vmatpush.msra.mxu1 %v3339_v61  ;;  %3737 = vmatpush.msrb.mxu2 %v3373_v28  ;;  %v3253_v51 = vld [vmem:[%s13686_s6 + $0x308] sm:$0xff]  ;;  %v3411_v56 = vld [vmem:[%s13686_s6 + $0x7f8] sm:$0xff]  ;;  %v14240_v61 = vmax.f32 %v10044_v3, 0.0  ;;  %v6982_v3 = vld [vmem:[%s13686_s6 + $0xf0] sm:$0xff] }
 0x335   :  { %3546 = vmatmul.f32.gmra.mxu1 %v11160_v62  ;;  %3569 = vmatmul.f32.gmra.mxu2 %v11167_v53  ;;  %v3285_v63 = vld [vmem:[%s13686_s6 + $0x408] sm:$0xff]  ;;  %v11313_v26 = vld [vmem:[%s13686_s6 + $0x658] sm:$0xff] }
 0x336   :  { %3589 = vmatmul.f32.vlgmr.msrb.gmra.mxu0 %v11162_v34  ;;  %3612 = vmatmul.f32.vlgmr.msra.gmra.mxu3 %v10468_v31  ;;  %v3255_v31 = vld [vmem:[%s13686_s6 + $0x318] sm:$0xff]  ;;  %v11253_v59 = vld [vmem:[%s13686_s6 + $0x688] sm:$0xff]  ;;  %v2891_v28 = vmax.f32 %v14240_v61, %v2851_v44 }
 0x337   :  { %3677 = vmatpush.msra.mxu0 %v3259_v49  ;;  %3700 = vmatpush.msrb.mxu3 %v3291_v1  ;;  %v11267_v1 = vld [vmem:[%s13686_s6 + $0x568] sm:$0xff]  ;;  %v11339_v44 = vld [vmem:[%s13686_s6 + $0x7b8] sm:$0xff] }
 0x338   :  { %3716 = vmatpush.msra.mxu1 %v3337_v57  ;;  %3738 = vmatpush.msrb.mxu2 %v3371_v38  ;;  %v11261_v49 = vmax.f32 %v2891_v28, %v3115_v32  ;;  %v11276_v57 = vld [vmem:[%s13686_s6 + $0x678] sm:$0xff]  ;;  %v3409_v38 = vld [vmem:[%s13686_s6 + $0x7e8] sm:$0xff] }
 0x339   :  { %3678 = vmatpush.msra.mxu0 %v3257_v45  ;;  %3701 = vmatpush.msrb.mxu3 %v3289_v11  ;;  %v11286_v45 = vld [vmem:[%s13686_s6 + $0x558] sm:$0xff]  ;;  %v11293_v18 = vld [vmem:[%s13686_s6 + $0x668] sm:$0xff] }
 0x33a   :  { %3717 = vmatpush.msra.mxu1 %v11212_v60  ;;  %3739 = vmatpush.msrb.mxu2 %v3369_v22  ;;  %v11318_v13 = vld [vmem:[%s13686_s6 + $0x7c8] sm:$0xff]  ;;  %v11325_v11 = vld [vmem:[%s13686_s6 + $0x538] sm:$0xff]  ;;  %v6984_v22 = vld [vmem:[%s13686_s6 + $0xd0] sm:$0xff] }
 0x33b   :  { %3679 = vmatpush.msra.mxu0 %v3255_v31  ;;  %3702 = vmatpush.msrb.mxu3 %v3287_v43  ;;  %v11334_v31 = vld [vmem:[%s13686_s6 + $0x648] sm:$0xff]  ;;  %v6985_v43 = vld [vmem:[%s13686_s6 + $0xc0] sm:$0xff]  ;;  %v11361_v32 = vld [vmem:[%s13686_s6 + $0x638] sm:$0xff] }
 0x33c   :  { %3718 = vmatpush.msra.mxu1 %v11232_v37  ;;  %3740 = vmatpush.msrb.mxu2 %v3367_v5  ;;  %v11352_v5 = vld [vmem:[%s13686_s6 + $0x528] sm:$0xff]  ;;  %v11401_v61 = vld [vmem:[%s13686_s6 + $0x618] sm:$0xff] }
 0x33d   :  { %3680 = vmatpush.msra.mxu0 %v3253_v51  ;;  %3703 = vmatpush.msrb.mxu3 %v3285_v63  ;;  %v6986_v51 = vld [vmem:[%s13686_s6 + $0xb0] sm:$0xff]  ;;  %v11366_v63 = vld [vmem:[%s13686_s6 + $0x7a8] sm:$0xff]  ;;  %14245 = vst [vmem:[#allocation41_spill] sm:$0xff] %v11401_v61  ;;  %v11491_v23 = vld [vmem:[%s13686_s6 + $0x738] sm:$0xff] }
 0x33e   :  { %3719 = vmatpush.msra.mxu1 %v11247_v58  ;;  %3741 = vmatpush.msrb.mxu2 %v11253_v59  ;;  %14241 = vst [vmem:[#allocation46_spill] sm:$0xff] %v11366_v63  ;;  %v11406_v28 = vld [vmem:[%s13686_s6 + $0x788] sm:$0xff] }
 0x33f   :  { %3757 = vmatpush.msrb.mxu0 %v3411_v56  ;;  %3784 = vmatpush.msra.mxu3 %v6982_v3  ;;  %v11373_v56 = vld [vmem:[%s13686_s6 + $0x518] sm:$0xff]  ;;  %14246 = vst [vmem:[#allocation8_spill] sm:$0xff] %v11406_v28  ;;  %v6988_v3 = vld [vmem:[%s13686_s6 + $0x90] sm:$0xff]  ;;  %v11475_v42 = vld [vmem:[%s13686_s6 + $0x748] sm:$0xff] }
 0x340   :  { %3592 = vmatmul.f32.gmra.mxu0 %v11261_v49  ;;  %3615 = vmatmul.f32.gmra.mxu3 %v10569_v16  ;;  %v11298_v16 = vld [vmem:[%s13686_s6 + $0x7d8] sm:$0xff]  ;;  %14251 = vst [vmem:[#allocation21_spill] sm:$0xff] %v11475_v42 }
 0x341   :  { %3635 = vmatmul.f32.vlgmr.msrb.gmra.mxu1 %v10643_v55  ;;  %3658 = vmatmul.f32.vlgmr.msra.gmra.mxu2 %v10645_v29  ;;  %v11304_v55 = vld [vmem:[%s13686_s6 + $0x548] sm:$0xff]  ;;  %v6983_v29 = vld [vmem:[%s13686_s6 + $0xe0] sm:$0xff]  ;;  %14252 = vst [vmem:[#allocation22_spill] sm:$0xff] %v11491_v23 }
 0x342   :  { %3720 = vmatpush.msra.mxu1 %v11267_v1  ;;  %3742 = vmatpush.msrb.mxu2 %v11276_v57 }
 0x343   :  { %3758 = vmatpush.msrb.mxu0 %v3409_v38  ;;  %3785 = vmatpush.msra.mxu3 %v6983_v29  ;;  %v11417_v38 = vld [vmem:[%s13686_s6 + $0x608] sm:$0xff]  ;;  %v11422_v29 = vld [vmem:[%s13686_s6 + $0x778] sm:$0xff] }
 0x344   :  { %3721 = vmatpush.msra.mxu1 %v11286_v45  ;;  %3743 = vmatpush.msrb.mxu2 %v11293_v18  ;;  %14247 = vst [vmem:[#allocation38_spill] sm:$0xff] %v11417_v38 }
 0x345   :  { %3759 = vmatpush.msrb.mxu0 %v11298_v16  ;;  %3786 = vmatpush.msra.mxu3 %v6984_v22  ;;  %14248 = vst [vmem:[#allocation9_spill] sm:$0xff] %v11422_v29  ;;  %v6989_v22 = vld [vmem:[%s13686_s6 + $0x80] sm:$0xff] }
 0x346   :  { %3722 = vmatpush.msra.mxu1 %v11304_v55  ;;  %3744 = vmatpush.msrb.mxu2 %v11313_v26 }
 0x347   :  { %3760 = vmatpush.msrb.mxu0 %v11318_v13  ;;  %3787 = vmatpush.msra.mxu3 %v6985_v43  ;;  %v6990_v43 = vld [vmem:[%s13686_s6 + $0x1f0] sm:$0xff] }
 0x348   :  { %3723 = vmatpush.msra.mxu1 %v11325_v11  ;;  %3745 = vmatpush.msrb.mxu2 %v11334_v31 }
 0x349   :  { %3761 = vmatpush.msrb.mxu0 %v11339_v44  ;;  %3788 = vmatpush.msra.mxu3 %v6986_v51  ;;  %v6991_v51 = vld [vmem:[%s13686_s6 + $0x70] sm:$0xff] }
 0x34a   :  { %3638 = vmatmul.f32.gmra.mxu1 %v10724_v0  ;;  %3661 = vmatmul.f32.gmra.mxu2 %v10735_v25  ;;  %v11380_v0 = vld [vmem:[%s13686_s6 + $0x628] sm:$0xff]  ;;  %v11385_v25 = vld [vmem:[%s13686_s6 + $0x798] sm:$0xff] }
 0x34b   :  { %3681 = vmatmul.f32.vlgmr.msra.gmra.mxu0 %v10825_v46  ;;  %3704 = vmatmul.f32.vlgmr.msrb.gmra.mxu3 %v10820_v21  ;;  %14242 = vst [vmem:[#allocation23_spill] sm:$0xff] %v11380_v0  ;;  %v11392_v21 = vld [vmem:[%s13686_s6 + $0x508] sm:$0xff]  ;;  %v6987_v46 = vld [vmem:[%s13686_s6 + $0xa0] sm:$0xff] }
 0x34c   :  { %3724 = vmatpush.msra.mxu1 %v11352_v5  ;;  %14243 = vst [vmem:[#allocation45_spill] sm:$0xff] %v11385_v25  ;;  %3746 = vmatpush.msrb.mxu2 %v11361_v32 }
 0x34d   :  { %3762 = vmatpush.msrb.mxu0 %v11366_v63  ;;  %14244 = vst [vmem:[#allocation42_spill] sm:$0xff] %v11392_v21  ;;  %3789 = vmatpush.msra.mxu3 %v6987_v46  ;;  %v11441_v46 = vld [vmem:[%s13686_s6 + $0x768] sm:$0xff] }
 0x34e   :  { %3725 = vmatpush.msra.mxu1 %v11373_v56  ;;  %3747 = vmatpush.msrb.mxu2 %v11380_v0  ;;  %14249 = vst [vmem:[#allocation26_spill] sm:$0xff] %v11441_v46  ;;  %v14298_v0 = vld [vmem:[#allocation14_spill] sm:$0xff] }
 0x34f   :  { %3763 = vmatpush.msrb.mxu0 %v11385_v25  ;;  %3790 = vmatpush.msra.mxu3 %v6988_v3  ;;  %v11443_v3 = vpop.permute.xlu1 %6498 }
 0x350   :  { %3726 = vmatpush.msra.mxu1 %v11392_v21  ;;  %3748 = vmatpush.msrb.mxu2 %v11401_v61  ;;  %v14285_v61 = vmax.f32 %v10574_v40, 0.0  ;;  %v7129_v40 = vld [vmem:[%s13686_s6 + $0x2b8] sm:$0xff] }
 0x351   :  { %3764 = vmatpush.msrb.mxu0 %v11406_v28  ;;  %3791 = vmatpush.msra.mxu3 %v6989_v22  ;;  %v11445_v22 = vpop.permute.xlu0 %6493  ;;  %v14280_v28 = vmax.f32 %v10633_v8, 0.0  ;;  %v7117_v8 = vld [vmem:[%s13686_s6 + $0x2e8] sm:$0xff] }
 0x352   :  { %3807 = vmatpush.msrb.mxu1 %v6990_v43  ;;  %3749 = vmatpush.msrb.mxu2 %v11417_v38  ;;  %v6992_v43 = vld [vmem:[%s13686_s6 + $0x1e0] sm:$0xff] }
 0x353   :  { %3765 = vmatpush.msrb.mxu0 %v11422_v29  ;;  %3792 = vmatpush.msra.mxu3 %v6991_v51  ;;  %v11458_v51 = vpop.permute.xlu2 %6503  ;;  %v14275_v29 = vmax.f32 %v10165_v52, 0.0  ;;  %v7099_v52 = vld [vmem:[%s13686_s6 + $0xb8] sm:$0xff] }
 0x354   :  { %3684 = vmatmul.f32.gmra.mxu0 %v10928_v10  ;;  %3707 = vmatmul.f32.gmra.mxu3 %v11035_v39  ;;  %v11456_v10 = vld [vmem:[%s13686_s6 + $0x758] sm:$0xff]  ;;  %v13928_v39 = vunpack.i.l.bf16 %v11443_v3  ;;  %v6505_v6 = vunpack.i.l.bf16 %v11458_v51 }
 0x355   :  { %3727 = vmatmul.f32.vlgmr.msra.gmra.mxu1 %v10815_v27  ;;  %3750 = vmatmul.f32.vlgmr.msrb.gmra.mxu2 %v11038_v30  ;;  %14250 = vst [vmem:[#allocation25_spill] sm:$0xff] %v11456_v10  ;;  %v6993_v27 = vld [vmem:[%s13686_s6 + $0x60] sm:$0xff]  ;;  %v13927_v30 = vunpack.i.l.bf16 %v11445_v22 }
 0x356   :  { %3808 = vmatpush.msrb.mxu1 %v6992_v43  ;;  %3766 = vmatpush.msrb.mxu0 %v11441_v46  ;;  %v6994_v43 = vld [vmem:[%s13686_s6 + $0x1d0] sm:$0xff] }
 0x357   :  { %3793 = vmatpush.msra.mxu3 %v6993_v27  ;;  %3830 = vmatpush.msra.mxu2 %v6995_v41  ;;  %v6996_v27 = vld [vmem:[%s13686_s6 + $0x50] sm:$0xff]  ;;  %v6998_v41 = vld [vmem:[%s13686_s6 + $0x2e0] sm:$0xff] }
 0x358   :  { %3809 = vmatpush.msrb.mxu1 %v6994_v43  ;;  %3767 = vmatpush.msrb.mxu0 %v11456_v10  ;;  %v6997_v43 = vld [vmem:[%s13686_s6 + $0x1c0] sm:$0xff]  ;;  %v14271_v10 = vunpack.i.h.bf16 %v11028_v50 }
 0x359   :  { %3794 = vmatpush.msra.mxu3 %v6996_v27  ;;  %3831 = vmatpush.msra.mxu2 %v6998_v41  ;;  %v6999_v27 = vld [vmem:[%s13686_s6 + $0x40] sm:$0xff]  ;;  %v2848_v41 = vsel %vm1241_vm4, %v6450_v4, %v13927_v30  ;;  %v7002_v4 = vld [vmem:[%s13686_s6 + $0x30] sm:$0xff] }
 0x35a   :  { %3810 = vmatpush.msrb.mxu1 %v6997_v43  ;;  %3768 = vmatpush.msrb.mxu0 %v11475_v42  ;;  %v14253_v43 = vunpack.i.l.bf16 %v11025_v7  ;;  %v7003_v42 = vld [vmem:[%s13686_s6 + $0x1a0] sm:$0xff] }
 0x35b   :  { %3795 = vmatpush.msra.mxu3 %v6999_v27  ;;  %v7001_v27 = vld [vmem:[%s13686_s6 + $0x2d0] sm:$0xff] }
 0x35c   :  { %v2976_v20 = vsel %vm1499_vm2, %v14253_v43, %v13928_v39  ;;  %3811 = vmatpush.msrb.mxu1 %v7000_v14  ;;  %3832 = vmatpush.msra.mxu2 %v7001_v27  ;;  %v11518_v43 = vld [vmem:[%s13686_s6 + $0x728] sm:$0xff]  ;;  %v14255_v14 = vunpack.i.l.bf16 %v11028_v50  ;;  %v11535_v27 = vld [vmem:[%s13686_s6 + $0x718] sm:$0xff] }
 0x35d   :  { %14254 = vst [vmem:[#allocation29_spill] sm:$0xff] %v11518_v43  ;;  %3769 = vmatpush.msrb.mxu0 %v11491_v23  ;;  %3796 = vmatpush.msra.mxu3 %v7002_v4  ;;  %v14257_v23 = vmax.f32 %v10007_v12, 0.0  ;;  %v11552_v12 = vld [vmem:[%s13686_s6 + $0x708] sm:$0xff] }
 0x35e   :  { %v3072_v30 = vsel %vm1628_vm5, %v14255_v14, %v6505_v6  ;;  %3730 = vmatmul.f32.gmra.mxu1 %v11160_v62  ;;  %3753 = vmatmul.f32.gmra.mxu2 %v11167_v53  ;;  %14256 = vst [vmem:[#allocation16_spill] sm:$0xff] %v11535_v27  ;;  %v7004_v62 = vld [vmem:[%s13686_s6 + $0x20] sm:$0xff] }
 0x35f   :  { %v3100_v39 = vmax.f32 %v2976_v20, %v3072_v30  ;;  %v2876_v4 = vmax.f32 %v14257_v23, %v2848_v41  ;;  %3812 = vmatpush.msrb.mxu1 %v7003_v42  ;;  %3770 = vmatpush.msrb.mxu0 %v11518_v43  ;;  %v7005_v53 = vld [vmem:[%s13686_s6 + $0x2c0] sm:$0xff]  ;;  %14258 = vst [vmem:[#allocation44_spill] sm:$0xff] %v11552_v12  ;;  %v7006_v42 = vld [vmem:[%s13686_s6 + $0x190] sm:$0xff] }
 0x360   :  { %3797 = vmatpush.msra.mxu3 %v7004_v62  ;;  %3833 = vmatpush.msra.mxu2 %v7005_v53  ;;  %v7007_v20 = vld [vmem:[%s13686_s6 + $0x10] sm:$0xff]  ;;  %v7009_v41 = vld [vmem:[%s13686_s6 + $0x180] sm:$0xff] }
 0x361   :  { %3813 = vmatpush.msrb.mxu1 %v7006_v42  ;;  %3771 = vmatpush.msrb.mxu0 %v11535_v27  ;;  %v7008_v23 = vld [vmem:[%s13686_s6 + $0x2b0] sm:$0xff]  ;;  %v11564_v30 = vmax.f32 %v2876_v4, %v3100_v39  ;;  %v7010_v14 = vld [vmem:[%s13686_s6] sm:$0xff]  ;;  %v13933_v42 = vunpack.i.h.bf16 %v11443_v3 }
 0x362   :  { %3798 = vmatpush.msra.mxu3 %v7007_v20  ;;  %3834 = vmatpush.msra.mxu2 %v7008_v23  ;;  %v7011_v62 = vld [vmem:[%s13686_s6 + $0x2a0] sm:$0xff]  ;;  %v7012_v39 = vld [vmem:[%s13686_s6 + $0x170] sm:$0xff]  ;;  %v13931_v20 = vunpack.i.h.bf16 %v11445_v22 }
 0x363   :  { %3814 = vmatpush.msrb.mxu1 %v7009_v41  ;;  %3772 = vmatpush.msrb.mxu0 %v11552_v12  ;;  %v7013_v4 = vld [vmem:[%s13686_s6 + $0x290] sm:$0xff]  ;;  %v7016_v23 = vld [vmem:[%s13686_s6 + $0x160] sm:$0xff]  ;;  %v14263_v12 = vunpack.i.h.bf16 %v11025_v7 }
 0x364   :  { %3799 = vmatpush.msra.mxu3 %v7010_v14  ;;  %3835 = vmatpush.msra.mxu2 %v7011_v62  ;;  %v7014_v53 = vld [vmem:[%s13686_s6 + $0x3f0] sm:$0xff]  ;;  %v7017_v41 = vld [vmem:[%s13686_s6 + $0x280] sm:$0xff] }
 0x365   :  { %3773 = vmatmul.f32.vlgmr.msrb.gmra.mxu0 %v11162_v34  ;;  %3800 = vmatmul.f32.vlgmr.msra.gmra.mxu3 %v11564_v30  ;;  %v7015_v34 = vld [vmem:[%s13686_s6 + $0x4f0] sm:$0xff]  ;;  %v7018_v14 = vld [vmem:[%s13686_s6 + $0x3e0] sm:$0xff] }
 0x366   :  { %3815 = vmatpush.msrb.mxu1 %v7012_v39  ;;  %3836 = vmatpush.msra.mxu2 %v7013_v4  ;;  %v7019_v62 = vld [vmem:[%s13686_s6 + $0x4e0] sm:$0xff]  ;;  %v13932_v39 = vunpack.i.h.bf16 %v11458_v51  ;;  %v7020_v4 = vld [vmem:[%s13686_s6 + $0x150] sm:$0xff] }
 0x367   :  { %3853 = vmatpush.msra.mxu0 %v7014_v53  ;;  %3876 = vmatpush.msrb.mxu3 %v7015_v34  ;;  %v7021_v53 = vld [vmem:[%s13686_s6 + $0x270] sm:$0xff] }
 0x368   :  { %3816 = vmatpush.msrb.mxu1 %v7016_v23  ;;  %3837 = vmatpush.msra.mxu2 %v7017_v41  ;;  %v7022_v34 = vld [vmem:[%s13686_s6 + $0x3d0] sm:$0xff]  ;;  %v14259_v41 = vunpack.i.l.bf16 %v11443_v3 }
 0x369   :  { %3854 = vmatpush.msra.mxu0 %v7018_v14  ;;  %3877 = vmatpush.msrb.mxu3 %v7019_v62  ;;  %v7023_v23 = vld [vmem:[%s13686_s6 + $0x4d0] sm:$0xff]  ;;  %v14260_v62 = vunpack.i.l.bf16 %v11445_v22 }
 0x36a   :  { %3817 = vmatpush.msrb.mxu1 %v7020_v4  ;;  %3838 = vmatpush.msra.mxu2 %v7021_v53  ;;  %v2974_v14 = vsel %vm1499_vm2, %v14259_v41, %v13933_v42  ;;  %v7024_v53 = vld [vmem:[%s13686_s6 + $0x140] sm:$0xff]  ;;  %v3070_v41 = vsel %vm1628_vm5, %v6505_v6, %v13932_v39  ;;  %v7030_v6 = vld [vmem:[%s13686_s6 + $0x4b0] sm:$0xff] }
 0x36b   :  { %3855 = vmatpush.msra.mxu0 %v7022_v34  ;;  %3878 = vmatpush.msrb.mxu3 %v7023_v23  ;;  %v2846_v4 = vsel %vm1241_vm4, %v14260_v62, %v13931_v20  ;;  %v7025_v34 = vld [vmem:[%s13686_s6 + $0x260] sm:$0xff]  ;;  %v7027_v62 = vld [vmem:[%s13686_s6 + $0x130] sm:$0xff] }
 0x36c   :  { %3818 = vmatpush.msrb.mxu1 %v7024_v53  ;;  %3839 = vmatpush.msra.mxu2 %v7025_v34  ;;  %v7026_v23 = vld [vmem:[%s13686_s6 + $0x4c0] sm:$0xff]  ;;  %v3101_v53 = vmax.f32 %v2974_v14, %v3070_v41  ;;  %v14261_v34 = vmax.f32 %v10156_v15, 0.0  ;;  %v7033_v14 = vld [vmem:[%s13686_s6 + $0x3b0] sm:$0xff] }
 0x36d   :  { %3776 = vmatmul.f32.gmra.mxu0 %v11261_v49  ;;  %3879 = vmatpush.msrb.mxu3 %v7026_v23  ;;  %v7028_v49 = vld [vmem:[%s13686_s6 + $0x250] sm:$0xff]  ;;  %v7029_v20 = vld [vmem:[%s13686_s6 + $0x3c0] sm:$0xff] }
 0x36e   :  { %3819 = vmatpush.msrb.mxu1 %v7027_v62  ;;  %3840 = vmatpush.msra.mxu2 %v7028_v49  ;;  %v2877_v23 = vmax.f32 %v14261_v34, %v2846_v4  ;;  %v7031_v62 = vld [vmem:[%s13686_s6 + $0x120] sm:$0xff]  ;;  %v7035_v4 = vld [vmem:[%s13686_s6 + $0x110] sm:$0xff] }
 0x36f   :  { %3856 = vmatpush.msra.mxu0 %v7029_v20  ;;  %3880 = vmatpush.msrb.mxu3 %v7030_v6  ;;  %v7032_v15 = vld [vmem:[%s13686_s6 + $0x240] sm:$0xff]  ;;  %v7036_v41 = vld [vmem:[%s13686_s6 + $0x230] sm:$0xff] }
 0x370   :  { %3820 = vmatpush.msrb.mxu1 %v7031_v62  ;;  %3841 = vmatpush.msra.mxu2 %v7032_v15  ;;  %v7034_v20 = vld [vmem:[%s13686_s6 + $0x4a0] sm:$0xff]  ;;  %v11677_v49 = vmax.f32 %v2877_v23, %v3101_v53  ;;  %v7038_v6 = vld [vmem:[%s13686_s6 + $0x490] sm:$0xff] }
 0x371   :  { %3857 = vmatpush.msra.mxu0 %v7033_v14  ;;  %3881 = vmatpush.msrb.mxu3 %v7034_v20  ;;  %v7037_v34 = vld [vmem:[%s13686_s6 + $0x3a0] sm:$0xff]  ;;  %v7041_v23 = vld [vmem:[%s13686_s6 + $0x390] sm:$0xff] }
 0x372   :  { %3821 = vmatpush.msrb.mxu1 %v7035_v4  ;;  %3842 = vmatpush.msra.mxu2 %v7036_v41  ;;  %v7039_v62 = vld [vmem:[%s13686_s6 + $0x100] sm:$0xff]  ;;  %v7042_v15 = vld [vmem:[%s13686_s6 + $0x5f0] sm:$0xff] }
 0x373   :  { %3858 = vmatpush.msra.mxu0 %v7037_v34  ;;  %3882 = vmatpush.msrb.mxu3 %v7038_v6  ;;  %v7040_v53 = vld [vmem:[%s13686_s6 + $0x220] sm:$0xff]  ;;  %v7043_v14 = vld [vmem:[%s13686_s6 + $0x210] sm:$0xff] }
 0x374   :  { %3822 = vmatpush.msrb.mxu1 %v7039_v62  ;;  %3843 = vmatpush.msra.mxu2 %v7040_v53  ;;  %v7044_v20 = vld [vmem:[%s13686_s6 + $0x380] sm:$0xff]  ;;  %v7048_v6 = vld [vmem:[%s13686_s6 + $0x6f0] sm:$0xff] }
 0x375   :  { %3823 = vmatmul.f32.vlgmr.msrb.gmra.mxu1 %v11677_v49  ;;  %3859 = vmatpush.msra.mxu0 %v7041_v23  ;;  %v7045_v4 = vld [vmem:[%s13686_s6 + $0x480] sm:$0xff]  ;;  %v7049_v62 = vld [vmem:[%s13686_s6 + $0x370] sm:$0xff] }
 0x376   :  { %3899 = vmatpush.msra.mxu1 %v7042_v15  ;;  %3844 = vmatpush.msra.mxu2 %v7043_v14  ;;  %v7046_v41 = vld [vmem:[%s13686_s6 + $0x5e0] sm:$0xff]  ;;  %v7050_v53 = vld [vmem:[%s13686_s6 + $0x5d0] sm:$0xff]  ;;  %v11725_v15 = vpop.permute.xlu1 %6518  ;;  %v11727_v14 = vpop.permute.xlu0 %6508 }
 0x377   :  { %3860 = vmatpush.msra.mxu0 %v7044_v20  ;;  %3883 = vmatpush.msrb.mxu3 %v7045_v4  ;;  %v7047_v34 = vld [vmem:[%s13686_s6 + $0x200] sm:$0xff]  ;;  %v7051_v23 = vld [vmem:[%s13686_s6 + $0x470] sm:$0xff] }
 0x378   :  { %3900 = vmatpush.msra.mxu1 %v7046_v41  ;;  %3845 = vmatpush.msra.mxu2 %v7047_v34  ;;  %v7052_v20 = vld [vmem:[%s13686_s6 + $0x6e0] sm:$0xff]  ;;  %v11735_v41 = vpop.permute.xlu2 %6513 }
 0x379   :  { %3861 = vmatpush.msra.mxu0 %v7049_v62  ;;  %3884 = vmatpush.msrb.mxu3 %v7051_v23  ;;  %v7053_v4 = vld [vmem:[%s13686_s6 + $0x360] sm:$0xff]  ;;  %v7056_v62 = vld [vmem:[%s13686_s6 + $0x6d0] sm:$0xff] }
 0x37a   :  { %3922 = vmatpush.msrb.mxu2 %v7048_v6  ;;  %3901 = vmatpush.msra.mxu1 %v7050_v53  ;;  %v7054_v34 = vld [vmem:[%s13686_s6 + $0x5c0] sm:$0xff]  ;;  %v7057_v53 = vld [vmem:[%s13686_s6 + $0x350] sm:$0xff] }
 0x37b   :  { %3862 = vmatpush.msra.mxu0 %v7053_v4  ;;  %v7055_v6 = vld [vmem:[%s13686_s6 + $0x460] sm:$0xff]  ;;  %v7058_v23 = vld [vmem:[%s13686_s6 + $0x5b0] sm:$0xff] }
 0x37c   :  { %3923 = vmatpush.msrb.mxu2 %v7052_v20  ;;  %3902 = vmatpush.msra.mxu1 %v7054_v34  ;;  %v7059_v20 = vld [vmem:[%s13686_s6 + $0x450] sm:$0xff]  ;;  %v7060_v4 = vld [vmem:[%s13686_s6 + $0x6c0] sm:$0xff] }
 0x37d   :  { %3885 = vmatpush.msrb.mxu3 %v7055_v6  ;;  %3863 = vmatpush.msra.mxu0 %v7057_v53  ;;  %v7061_v34 = vld [vmem:[%s13686_s6 + $0x340] sm:$0xff]  ;;  %v7064_v53 = vld [vmem:[%s13686_s6 + $0x6b0] sm:$0xff] }
 0x37e   :  { %3924 = vmatpush.msrb.mxu2 %v7056_v62  ;;  %3903 = vmatpush.msra.mxu1 %v7058_v23  ;;  %v7062_v6 = vld [vmem:[%s13686_s6 + $0x5a0] sm:$0xff]  ;;  %v7065_v23 = vld [vmem:[%s13686_s6 + $0x330] sm:$0xff] }
 0x37f   :  { %3886 = vmatpush.msrb.mxu3 %v7059_v20  ;;  %3864 = vmatpush.msra.mxu0 %v7061_v34  ;;  %v7063_v62 = vld [vmem:[%s13686_s6 + $0x440] sm:$0xff]  ;;  %v7066_v20 = vld [vmem:[%s13686_s6 + $0x590] sm:$0xff] }
 0x380   :  { %3925 = vmatpush.msrb.mxu2 %v7060_v4  ;;  %3904 = vmatpush.msra.mxu1 %v7062_v6  ;;  %v7067_v4 = vld [vmem:[%s13686_s6 + $0x430] sm:$0xff]  ;;  %v7068_v34 = vld [vmem:[%s13686_s6 + $0x6a0] sm:$0xff] }
 0x381   :  { %3887 = vmatpush.msrb.mxu3 %v7063_v62  ;;  %3865 = vmatpush.msra.mxu0 %v7065_v23  ;;  %v7069_v6 = vld [vmem:[%s13686_s6 + $0x320] sm:$0xff]  ;;  %v11791_v23 = vpop.permute.xlu1 %6528 }
 0x382   :  { %3926 = vmatpush.msrb.mxu2 %v7064_v53  ;;  %3905 = vmatpush.msra.mxu1 %v7066_v20  ;;  %v7070_v62 = vld [vmem:[%s13686_s6 + $0x580] sm:$0xff]  ;;  %v11793_v20 = vpop.permute.xlu0 %6523  ;;  %v14266_v7 = vunpack.i.l.bf16 %v11791_v23 }
 0x383   :  { %3888 = vmatpush.msrb.mxu3 %v7067_v4  ;;  %3866 = vmatpush.msra.mxu0 %v7069_v6  ;;  %v7071_v53 = vld [vmem:[%s13686_s6 + $0x420] sm:$0xff]  ;;  %v7072_v4 = vld [vmem:[%s13686_s6 + $0x690] sm:$0xff]  ;;  %v11801_v6 = vpop.permute.xlu2 %6533 }
 0x384   :  { %3927 = vmatpush.msrb.mxu2 %v7068_v34  ;;  %3906 = vmatpush.msra.mxu1 %v7070_v62  ;;  %v7073_v34 = vld [vmem:[%s13686_s6 + $0x310] sm:$0xff]  ;;  %v7078_v39 = vld [vmem:[%s13686_s6 + $0x560] sm:$0xff] }
 0x385   :  { %3889 = vmatpush.msrb.mxu3 %v7071_v53  ;;  %3867 = vmatpush.msra.mxu0 %v7073_v34  ;;  %v7074_v62 = vld [vmem:[%s13686_s6 + $0x570] sm:$0xff]  ;;  %v7077_v34 = vld [vmem:[%s13686_s6 + $0x300] sm:$0xff] }
 0x386   :  { %3928 = vmatpush.msrb.mxu2 %v7072_v4  ;;  %3907 = vmatpush.msra.mxu1 %v7074_v62  ;;  %v7075_v53 = vld [vmem:[%s13686_s6 + $0x410] sm:$0xff]  ;;  %v7076_v4 = vld [vmem:[%s13686_s6 + $0x680] sm:$0xff] }
 0x387   :  { %3890 = vmatpush.msrb.mxu3 %v7075_v53  ;;  %3868 = vmatpush.msra.mxu0 %v7077_v34  ;;  %v7079_v62 = vld [vmem:[%s13686_s6 + $0x400] sm:$0xff]  ;;  %v7080_v53 = vld [vmem:[%s13686_s6 + $0x670] sm:$0xff]  ;;  %v14262_v34 = vunpack.i.h.bf16 %v11791_v23 }
 0x388   :  { %3929 = vmatpush.msrb.mxu2 %v7076_v4  ;;  %3908 = vmatpush.msra.mxu1 %v7078_v39  ;;  %v7081_v4 = vld [vmem:[%s13686_s6 + $0x7f0] sm:$0xff]  ;;  %v7084_v42 = vld [vmem:[%s13686_s6 + $0x660] sm:$0xff]  ;;  %v12106_v25 = vpop.f32.mrf.mxu2 }
 0x389   :  { %3891 = vmatpush.msrb.mxu3 %v7079_v62  ;;  %3945 = vmatpush.msrb.mxu0 %v7081_v4  ;;  %v7082_v39 = vld [vmem:[%s13686_s6 + $0x550] sm:$0xff]  ;;  %v7083_v62 = vld [vmem:[%s13686_s6 + $0xf8] sm:$0xff]  ;;  %v7087_v4 = vld [vmem:[%s13686_s6 + $0xe8] sm:$0xff] }
 0x38a   :  { %3930 = vmatpush.msrb.mxu2 %v7080_v53  ;;  %3909 = vmatpush.msra.mxu1 %v7082_v39  ;;  %v7085_v39 = vld [vmem:[%s13686_s6 + $0x7e0] sm:$0xff]  ;;  %v14264_v53 = vunpack.i.h.bf16 %v11793_v20  ;;  %v11889_v43 = vpop.permute.xlu0 %6538 }
 0x38b   :  { %3968 = vmatpush.msra.mxu3 %v7083_v62  ;;  %3946 = vmatpush.msrb.mxu0 %v7085_v39  ;;  %v7086_v62 = vld [vmem:[%s13686_s6 + $0x540] sm:$0xff]  ;;  %v7089_v39 = vld [vmem:[%s13686_s6 + $0x7d0] sm:$0xff] }
 0x38c   :  { %3931 = vmatpush.msrb.mxu2 %v7084_v42  ;;  %3910 = vmatpush.msra.mxu1 %v7086_v62  ;;  %v7088_v42 = vld [vmem:[%s13686_s6 + $0x650] sm:$0xff]  ;;  %v2977_v62 = vsel %vm1499_vm2, %v14263_v12, %v14262_v34  ;;  %v14267_v12 = vunpack.i.h.bf16 %v11443_v3  ;;  %v14268_v34 = vunpack.i.l.bf16 %v11793_v20 }
 0x38d   :  { %3969 = vmatpush.msra.mxu3 %v7087_v4  ;;  %3947 = vmatpush.msrb.mxu0 %v7089_v39  ;;  %v14265_v4 = vunpack.i.h.bf16 %v10823_v48  ;;  %v7091_v39 = vld [vmem:[%s13686_s6 + $0xd8] sm:$0xff] }
 0x38e   :  { %3932 = vmatpush.msrb.mxu2 %v7088_v42  ;;  %v7090_v42 = vld [vmem:[%s13686_s6 + $0x530] sm:$0xff]  ;;  %v2972_v48 = vsel %vm1499_vm2, %v14267_v12, %v14266_v7  ;;  %v7092_v7 = vld [vmem:[%s13686_s6 + $0x640] sm:$0xff]  ;;  %v14272_v12 = vunpack.i.l.bf16 %v11801_v6 }
 0x38f   :  { %v2849_v27 = vsel %vm1241_vm4, %v14265_v4, %v14264_v53  ;;  %3911 = vmatpush.msra.mxu1 %v7090_v42  ;;  %3970 = vmatpush.msra.mxu3 %v7091_v39  ;;  %v14269_v53 = vunpack.i.h.bf16 %v11445_v22  ;;  %v11887_v42 = vpop.permute.xlu1 %6548  ;;  %v14270_v39 = vunpack.i.h.bf16 %v11801_v6  ;;  %v7093_v22 = vld [vmem:[%s13686_s6 + $0x7c0] sm:$0xff] }
 0x390   :  { %3933 = vmatpush.msrb.mxu2 %v7092_v7  ;;  %3948 = vmatpush.msrb.mxu0 %v7093_v22  ;;  %v14274_v7 = vmax.f32 %v10001_v54, 0.0  ;;  %v7098_v54 = vld [vmem:[%s13686_s6 + $0x510] sm:$0xff] }
 0x391   :  { %v2844_v4 = vsel %vm1241_vm4, %v14269_v53, %v14268_v34  ;;  %v3073_v3 = vsel %vm1628_vm5, %v14271_v10, %v14270_v39  ;;  %v14273_v34 = vunpack.i.h.bf16 %v11458_v51  ;;  %v11909_v53 = vpop.permute.xlu2 %6543  ;;  %v7094_v10 = vld [vmem:[%s13686_s6 + $0x520] sm:$0xff]  ;;  %v7095_v39 = vld [vmem:[%s13686_s6 + $0xc8] sm:$0xff] }
 0x392   :  { %3912 = vmatpush.msra.mxu1 %v7094_v10  ;;  %3971 = vmatpush.msra.mxu3 %v7095_v39  ;;  %v2892_v22 = vmax.f32 %v14274_v7, %v2849_v27  ;;  %v3116_v46 = vmax.f32 %v2977_v62, %v3073_v3  ;;  %v7097_v10 = vld [vmem:[%s13686_s6 + $0x7b0] sm:$0xff]  ;;  %v7100_v27 = vld [vmem:[%s13686_s6 + $0x620] sm:$0xff]  ;;  %v6540_v3 = vunpack.i.l.bf16 %v11889_v43  ;;  %v7103_v39 = vld [vmem:[%s13686_s6 + $0xa8] sm:$0xff] }
 0x393   :  { %v3068_v50 = vsel %vm1628_vm5, %v14273_v34, %v14272_v12  ;;  %v2878_v12 = vmax.f32 %v14275_v29, %v2844_v4  ;;  %v7096_v34 = vld [vmem:[%s13686_s6 + $0x630] sm:$0xff]  ;;  %3949 = vmatpush.msrb.mxu0 %v7097_v10  ;;  %v6550_v29 = vunpack.i.l.bf16 %v11887_v42  ;;  %v7101_v62 = vld [vmem:[%s13686_s6 + $0x7a0] sm:$0xff]  ;;  %v13940_v4 = vunpack.i.h.bf16 %v11889_v43 }
 0x394   :  { %v3102_v51 = vmax.f32 %v2972_v48, %v3068_v50  ;;  %3934 = vmatpush.msrb.mxu2 %v7096_v34  ;;  %3913 = vmatpush.msra.mxu1 %v7098_v54  ;;  %v13941_v48 = vunpack.i.h.bf16 %v11887_v42  ;;  %v7102_v50 = vld [vmem:[%s13686_s6 + $0x500] sm:$0xff]  ;;  %v11949_v7 = vmax.f32 %v2892_v22, %v3116_v46  ;;  %v13942_v34 = vunpack.i.h.bf16 %v11909_v53  ;;  %v7106_v46 = vld [vmem:[%s13686_s6 + $0x790] sm:$0xff]  ;;  %v7107_v22 = vld [vmem:[%s13686_s6 + $0x98] sm:$0xff] }
 0x395   :  { %3972 = vmatpush.msra.mxu3 %v7099_v52  ;;  %3950 = vmatpush.msrb.mxu0 %v7101_v62  ;;  %v6545_v10 = vunpack.i.l.bf16 %v11909_v53  ;;  %v7104_v52 = vld [vmem:[%s13686_s6 + $0x1f8] sm:$0xff]  ;;  %v7108_v62 = vld [vmem:[%s13686_s6 + $0x1e8] sm:$0xff] }
 0x396   :  { %3935 = vmatpush.msrb.mxu2 %v7100_v27  ;;  %3914 = vmatpush.msra.mxu1 %v7102_v50  ;;  %v11953_v54 = vmax.f32 %v2878_v12, %v3102_v51  ;;  %v7105_v27 = vld [vmem:[%s13686_s6 + $0x610] sm:$0xff]  ;;  %v14276_v51 = vunpack.i.h.bf16 %v11801_v6  ;;  %v7109_v50 = vld [vmem:[%s13686_s6 + $0x600] sm:$0xff] }
 0x397   :  { %3973 = vmatpush.msra.mxu3 %v7103_v39  ;;  %3951 = vmatpush.msrb.mxu0 %v7106_v46  ;;  %v3069_v39 = vsel %vm1628_vm5, %v6550_v29, %v13941_v48  ;;  %v7113_v48 = vld [vmem:[%s13686_s6 + $0x2f8] sm:$0xff] }
 0x398   :  { %3991 = vmatpush.msrb.mxu1 %v7104_v52  ;;  %3936 = vmatpush.msrb.mxu2 %v7105_v27  ;;  %v3071_v12 = vsel %vm1628_vm5, %v14276_v51, %v6550_v29  ;;  %v2845_v52 = vsel %vm1241_vm4, %v6540_v3, %v13940_v4  ;;  %v14277_v27 = vunpack.i.h.bf16 %v11793_v20  ;;  %v11997_v29 = vpop.permute.xlu1 %6553  ;;  %v7112_v4 = vld [vmem:[%s13686_s6 + $0x88] sm:$0xff] }
 0x399   :  { %3974 = vmatpush.msra.mxu3 %v7107_v22  ;;  %v14278_v22 = vunpack.i.h.bf16 %v11791_v23  ;;  %3846 = vmatmul.f32.vlgmr.msra.gmra.mxu2 %v11953_v54 }
 0x39a   :  { %3992 = vmatpush.msrb.mxu1 %v7108_v62  ;;  %3937 = vmatpush.msrb.mxu2 %v7109_v50  ;;  %v2847_v46 = vsel %vm1241_vm4, %v14277_v27, %v6540_v3  ;;  %v7110_v62 = vld [vmem:[%s13686_s6 + $0x780] sm:$0xff]  ;;  %v11999_v50 = vpop.permute.xlu0 %6558  ;;  %v2973_v3 = vsel %vm1499_vm2, %v6545_v10, %v13942_v34  ;;  %v7111_v27 = vld [vmem:[%s13686_s6 + $0x1d8] sm:$0xff] }
 0x39b   :  { %v2975_v51 = vsel %vm1499_vm2, %v14278_v22, %v6545_v10  ;;  %3952 = vmatpush.msrb.mxu0 %v7110_v62  ;;  %3803 = vmatmul.f32.gmra.mxu3 %v11949_v7  ;;  %v6564_v62 = vpop.permute.xlu2 %6563  ;;  %v14279_v10 = vmax.f32 %v10561_v9, 0.0  ;;  %v3118_v38 = vmax.f32 %v2973_v3, %v3069_v39  ;;  %v7116_v9 = vld [vmem:[%s13686_s6 + $0x78] sm:$0xff]  ;;  %v6560_v39 = vunpack.i.l.bf16 %v11999_v50  ;;  %v7118_v3 = vld [vmem:[%s13686_s6 + $0x760] sm:$0xff] }
 0x39c   :  { %3993 = vmatpush.msrb.mxu1 %v7111_v27  ;;  %v3117_v22 = vmax.f32 %v2975_v51, %v3071_v12  ;;  %3975 = vmatpush.msra.mxu3 %v7112_v4  ;;  %v2894_v27 = vmax.f32 %v14280_v28, %v2845_v52  ;;  %v7114_v12 = vld [vmem:[%s13686_s6 + $0x770] sm:$0xff]  ;;  %v7115_v4 = vld [vmem:[%s13686_s6 + $0x1c8] sm:$0xff]  ;;  %v6555_v51 = vunpack.i.l.bf16 %v11997_v29  ;;  %v6556_v28 = vunpack.i.h.bf16 %v11997_v29 }
 0x39d   :  { %4014 = vmatpush.msra.mxu2 %v7113_v48  ;;  %v2893_v34 = vmax.f32 %v14279_v10, %v2847_v46  ;;  %3953 = vmatpush.msrb.mxu0 %v7114_v12  ;;  %v6561_v48 = vunpack.i.h.bf16 %v11999_v50  ;;  %v6566_v52 = vunpack.i.h.bf16 %v6564_v62  ;;  %v6565_v46 = vunpack.i.l.bf16 %v6564_v62  ;;  %v7119_v10 = vld [vmem:[%s13686_s6 + $0x1b8] sm:$0xff]  ;;  %v7120_v29 = vld [vmem:[%s13686_s6 + $0x68] sm:$0xff] }
 0x39e   :  { %3994 = vmatpush.msrb.mxu1 %v7115_v4  ;;  %3976 = vmatpush.msra.mxu3 %v7116_v9  ;;  %v7121_v50 = vld [vmem:[%s13686_s6 + $0x2d8] sm:$0xff]  ;;  %v12050_v4 = vmax.f32 %v2894_v27, %v3118_v38  ;;  %v13947_v9 = vunpack.i.h.bf16 %v11735_v41 }
 0x39f   :  { %4015 = vmatpush.msra.mxu2 %v7117_v8  ;;  %3954 = vmatpush.msrb.mxu0 %v7118_v3  ;;  %v12048_v62 = vmax.f32 %v2893_v34, %v3117_v22  ;;  %v6511_v8 = vunpack.i.h.bf16 %v11727_v14  ;;  %v12054_v3 = vpop.f32.mrf.mxu1  ;;  %v14281_v34 = vunpack.i.l.bf16 %v11793_v20  ;;  %v12066_v22 = vpop.f32.mrf.mxu3  ;;  %v7124_v27 = vld [vmem:[%s13686_s6 + $0x58] sm:$0xff]  ;;  %v2968_v20 = vsel %vm1499_vm2, %v6560_v39, %v6561_v48 }
 0x3a0   :  { %3995 = vmatpush.msrb.mxu1 %v7119_v10  ;;  %3977 = vmatpush.msra.mxu3 %v7120_v29  ;;  %v7122_v10 = vld [vmem:[%s13686_s6 + $0x750] sm:$0xff]  ;;  %v7123_v29 = vld [vmem:[%s13686_s6 + $0x1a8] sm:$0xff]  ;;  %v3064_v12 = vsel %vm1628_vm5, %v6565_v46, %v6566_v52 }
 0x3a1   :  { %4016 = vmatpush.msra.mxu2 %v7121_v50  ;;  %3955 = vmatpush.msrb.mxu0 %v7122_v10  ;;  %v2842_v38 = vsel %vm1241_vm4, %v14281_v34, %v6555_v51  ;;  %v7125_v50 = vld [vmem:[%s13686_s6 + $0x2c8] sm:$0xff]  ;;  %v2840_v10 = vsel %vm1241_vm4, %v6555_v51, %v6556_v28  ;;  %v7127_v51 = vld [vmem:[%s13686_s6 + $0x198] sm:$0xff] }
 0x3a2   :  { %3996 = vmatpush.msrb.mxu1 %v7123_v29  ;;  %3978 = vmatpush.msra.mxu3 %v7124_v27  ;;  %v14282_v29 = vunpack.i.l.bf16 %v11791_v23  ;;  %v7126_v27 = vld [vmem:[%s13686_s6 + $0x740] sm:$0xff]  ;;  %v2838_v23 = vsel %vm1241_vm4, %v6556_v28, %v6511_v8  ;;  %v2879_v28 = vmax.f32 %v14285_v61, %v2842_v38  ;;  %v12122_v61 = vpop.permute.xlu1 %6568 }
 0x3a3   :  { %4017 = vmatpush.msra.mxu2 %v7125_v50  ;;  %3956 = vmatpush.msrb.mxu0 %v7126_v27  ;;  %v14283_v50 = vunpack.i.l.bf16 %v11801_v6  ;;  %v14284_v27 = vunpack.i.h.bf16 %v11725_v15  ;;  %v14286_v6 = vmax.f32 %v10813_v19, 0.0  ;;  %v12124_v38 = vpop.permute.xlu2 %6578 }
 0x3a4   :  { %v2970_v34 = vsel %vm1499_vm2, %v14282_v29, %v6560_v39  ;;  %3997 = vmatpush.msrb.mxu1 %v7127_v51  ;;  %v2966_v39 = vsel %vm1499_vm2, %v6561_v48, %v13947_v9  ;;  %3849 = vmatmul.f32.gmra.mxu2 %v12050_v4  ;;  %v12112_v48 = vpop.permute.xlu0 %6573 }
 0x3a5   :  { %v3066_v29 = vsel %vm1628_vm5, %v14283_v50, %v6565_v46  ;;  %v3062_v51 = vsel %vm1628_vm5, %v6566_v52, %v14284_v27  ;;  %3826 = vmatmul.f32.gmra.mxu1 %v12048_v62  ;;  %v2880_v9 = vmax.f32 %v14286_v6, %v2840_v10  ;;  %v3104_v50 = vmax.f32 %v2968_v20, %v3064_v12  ;;  %v7128_v52 = vld [vmem:[%s13686_s6 + $0x48] sm:$0xff]  ;;  %v7130_v12 = vld [vmem:[%s13686_s6 + $0x730] sm:$0xff] }
 0x3a6   :  { %v3103_v46 = vmax.f32 %v2970_v34, %v3066_v29  ;;  %3979 = vmatpush.msra.mxu3 %v7128_v52  ;;  %4018 = vmatpush.msra.mxu2 %v7129_v40  ;;  %v14287_v27 = vmax.f32 %v10818_v35, 0.0  ;;  %v3105_v10 = vmax.f32 %v2966_v39, %v3062_v51  ;;  %v7131_v20 = vld [vmem:[%s13686_s6 + $0x188] sm:$0xff]  ;;  %v7132_v34 = vld [vmem:[%s13686_s6 + $0x38] sm:$0xff]  ;;  %v13949_v29 = vunpack.i.h.bf16 %v12122_v61 }
 0x3a7   :  { %3957 = vmatpush.msrb.mxu0 %v7130_v12  ;;  %3998 = vmatpush.msrb.mxu1 %v7131_v20  ;;  %v7133_v35 = vld [vmem:[%s13686_s6 + $0x2a8] sm:$0xff]  ;;  %v7135_v39 = vld [vmem:[%s13686_s6 + $0x178] sm:$0xff]  ;;  %v13948_v51 = vunpack.i.h.bf16 %v12112_v48  ;;  %v12150_v52 = vmax.f32 %v2880_v9, %v3104_v50  ;;  %v13950_v12 = vunpack.i.l.bf16 %v12122_v61  ;;  %v13951_v20 = vunpack.i.l.bf16 %v12112_v48 }
 0x3a8   :  { %v2881_v19 = vmax.f32 %v14287_v27, %v2838_v23  ;;  %3980 = vmatpush.msra.mxu3 %v7132_v34  ;;  %4019 = vmatpush.msra.mxu2 %v7133_v35  ;;  %v7134_v23 = vld [vmem:[%s13686_s6 + $0x720] sm:$0xff]  ;;  %v12148_v6 = vmax.f32 %v2879_v28, %v3103_v46  ;;  %v7136_v40 = vld [vmem:[%s13686_s6 + $0x28] sm:$0xff]  ;;  %v7137_v27 = vld [vmem:[%s13686_s6 + $0x298] sm:$0xff]  ;;  %v6515_v34 = vunpack.i.l.bf16 %v11735_v41  ;;  %v6510_v28 = vunpack.i.l.bf16 %v11727_v14  ;;  %v12163_v46 = vpop.f32.mrf.mxu3 }
 0x3a9   :  { %3958 = vmatpush.msrb.mxu0 %v7134_v23  ;;  %3999 = vmatpush.msrb.mxu1 %v7135_v39  ;;  %v7138_v35 = vld [vmem:[%s13686_s6 + $0x710] sm:$0xff]  ;;  %v7139_v23 = vld [vmem:[%s13686_s6 + $0x168] sm:$0xff]  ;;  %v7143_v39 = vld [vmem:[%s13686_s6 + $0x158] sm:$0xff]  ;;  %v14291_v14 = vunpack.i.h.bf16 %v11887_v42  ;;  %v14294_v42 = vunpack.i.l.bf16 %v12124_v38 }
 0x3aa   :  { %3981 = vmatpush.msra.mxu3 %v7136_v40  ;;  %4020 = vmatpush.msra.mxu2 %v7137_v27  ;;  %v12165_v50 = vmax.f32 %v2881_v19, %v3105_v10  ;;  %v12174_v40 = vpop.f32.mrf.mxu1  ;;  %v7140_v27 = vld [vmem:[%s13686_s6 + $0x18] sm:$0xff]  ;;  %v7141_v19 = vld [vmem:[%s13686_s6 + $0x288] sm:$0xff]  ;;  %v6520_v10 = vunpack.i.l.bf16 %v11725_v15 }
 0x3ab   :  { %3959 = vmatpush.msrb.mxu0 %v7138_v35  ;;  %4000 = vmatpush.msrb.mxu1 %v7139_v23  ;;  %v12183_v35 = vpop.f32.mrf.mxu0  ;;  %v7142_v23 = vld [vmem:[%s13686_s6 + $0x700] sm:$0xff] }
 0x3ac   :  { %14288 = vst [vmem:[#allocation39_spill] sm:$0xff] %v12165_v50  ;;  %3982 = vmatpush.msra.mxu3 %v7140_v27  ;;  %4021 = vmatpush.msra.mxu2 %v7141_v19  ;;  %v2841_v27 = vsel %vm1241_vm4, %v6510_v28, %v13949_v29  ;;  %v2969_v19 = vsel %vm1499_vm2, %v6515_v34, %v13948_v51  ;;  %v14290_v51 = vunpack.i.h.bf16 %v12124_v38 }
 0x3ad   :  { %3960 = vmatpush.msrb.mxu0 %v7142_v23  ;;  %4001 = vmatpush.msrb.mxu1 %v7143_v39  ;;  %v2836_v23 = vsel %vm1241_vm4, %v6511_v8, %v13950_v12  ;;  %v14289_v39 = vunpack.i.h.bf16 %v11735_v41  ;;  %v3067_v8 = vsel %vm1628_vm5, %v14291_v14, %v6520_v10  ;;  %v14292_v12 = vunpack.i.h.bf16 %v11889_v43 }
 0x3ae   :  { %3869 = vmatmul.f32.vlgmr.msra.gmra.mxu0 %v12148_v6  ;;  %3892 = vmatmul.f32.vlgmr.msrb.gmra.mxu3 %v12150_v52  ;;  %v3065_v29 = vsel %vm1628_vm5, %v6520_v10, %v14290_v51  ;;  %v12231_v51 = vpop.permute.xlu0 %6583  ;;  %v14295_v10 = vunpack.i.h.bf16 %v11725_v15  ;;  %v14296_v14 = vmax.f32 %v10541_v47, 0.0  ;;  %v14297_v15 = vunpack.i.h.bf16 %v11909_v53  ;;  %v7148_v47 = vld [vmem:[%s13686_s6 + $0x4f8] sm:$0xff]  ;;  %v7149_v53 = vld [vmem:[%s13686_s6 + $0x268] sm:$0xff] }
 0x3af   :  { %v2964_v9 = vsel %vm1499_vm2, %v14289_v39, %v13951_v20  ;;  %v2843_v41 = vsel %vm1241_vm4, %v14292_v12, %v6510_v28  ;;  %v12225_v39 = vpop.f32.mrf.mxu2  ;;  %3915 = vmatmul.f32.vlgmr.msra.gmra.mxu1 %v12165_v50  ;;  %v7144_v20 = vld [vmem:[%s13686_s6 + $0x8] sm:$0xff]  ;;  %v7145_v12 = vld [vmem:[%s13686_s6 + $0x278] sm:$0xff]  ;;  %v3120_v50 = vmax.f32 %v2969_v19, %v3065_v29  ;;  %v6585_v29 = vunpack.i.l.bf16 %v12231_v51 }
 0x3b0   :  { %14293 = vst [vmem:[#allocation24_spill] sm:$0xff] %v12225_v39  ;;  %3983 = vmatpush.msra.mxu3 %v7144_v20  ;;  %v3060_v43 = vsel %vm1628_vm5, %v14295_v10, %v14294_v42  ;;  %4022 = vmatpush.msra.mxu2 %v7145_v12  ;;  %v7146_v28 = vld [vmem:[%s13686_s6 + $0x3f8] sm:$0xff]  ;;  %v12245_v20 = vpop.permute.xlu1 %6588  ;;  %v2896_v63 = vmax.f32 %v14296_v14, %v2841_v27  ;;  %v12253_v10 = vpop.permute.xlu2 %6593  ;;  %v14299_v12 = vmax.f32 %v14298_v0, 0.0  ;;  %v7150_v0 = vld [vmem:[%s13686_s6 + $0x3e8] sm:$0xff] }
 0x3b1   :  { %4037 = vmatpush.msra.mxu0 %v7146_v28  ;;  %v2971_v42 = vsel %vm1499_vm2, %v14297_v15, %v6515_v34  ;;  %v3106_v39 = vmax.f32 %v2964_v9, %v3060_v43  ;;  %v7147_v28 = vld [vmem:[%s13686_s6 + $0x148] sm:$0xff]  ;;  %v14300_v34 = vld [vmem:[#allocation43_spill] sm:$0xff]  ;;  %v13957_v15 = vunpack.i.h.bf16 %v12245_v20 }
 0x3b2   :  { %v2882_v21 = vmax.f32 %v14299_v12, %v2836_v23  ;;  %4002 = vmatpush.msrb.mxu1 %v7147_v28  ;;  %4060 = vmatpush.msrb.mxu3 %v7148_v47  ;;  %v14301_v9 = vmax.f32 %v14300_v34, 0.0  ;;  %v3119_v19 = vmax.f32 %v2971_v42, %v3067_v8  ;;  %v12272_v23 = vpop.f32.mrf.mxu3  ;;  %v7151_v43 = vld [vmem:[%s13686_s6 + $0x138] sm:$0xff]  ;;  %v7152_v14 = vld [vmem:[%s13686_s6 + $0x4e8] sm:$0xff]  ;;  %v6590_v12 = vunpack.i.l.bf16 %v12245_v20 }
 0x3b3   :  { %4023 = vmatpush.msra.mxu2 %v7149_v53  ;;  %4038 = vmatpush.msra.mxu0 %v7150_v0  ;;  %v13956_v28 = vunpack.i.h.bf16 %v12231_v51  ;;  %v13958_v8 = vunpack.i.h.bf16 %v12253_v10  ;;  %v7153_v42 = vld [vmem:[%s13686_s6 + $0x258] sm:$0xff]  ;;  %v12291_v53 = vmax.f32 %v2896_v63, %v3120_v50  ;;  %v7155_v34 = vld [vmem:[%s13686_s6 + $0x128] sm:$0xff] }
 0x3b4   :  { %v2895_v27 = vmax.f32 %v14301_v9, %v2843_v41  ;;  %4003 = vmatpush.msrb.mxu1 %v7151_v43  ;;  %4061 = vmatpush.msrb.mxu3 %v7152_v14  ;;  %v6595_v41 = vunpack.i.l.bf16 %v12253_v10  ;;  %v7154_v47 = vld [vmem:[%s13686_s6 + $0x3d8] sm:$0xff]  ;;  %v12293_v0 = vmax.f32 %v2882_v21, %v3106_v39  ;;  %v12301_v43 = vpop.f32.mrf.mxu1  ;;  %v7157_v14 = vld [vmem:[%s13686_s6 + $0x248] sm:$0xff]  ;;  %v14302_v21 = vunpack.i.h.bf16 %v12122_v61 }
 0x3b5   :  { %4024 = vmatpush.msra.mxu2 %v7153_v42  ;;  %4039 = vmatpush.msra.mxu0 %v7154_v47  ;;  %v7156_v9 = vld [vmem:[%s13686_s6 + $0x4d8] sm:$0xff]  ;;  %v7158_v63 = vld [vmem:[%s13686_s6 + $0x3c8] sm:$0xff]  ;;  %v12315_v42 = vpop.f32.mrf.mxu0 }
 0x3b6   :  { %4004 = vmatpush.msrb.mxu1 %v7155_v34  ;;  %4062 = vmatpush.msrb.mxu3 %v7156_v9  ;;  %v2839_v50 = vsel %vm1241_vm4, %v14302_v21, %v6585_v29  ;;  %v12313_v39 = vmax.f32 %v2895_v27, %v3119_v19  ;;  %14303 = vst [vmem:[#allocation27_spill] sm:$0xff] %v12315_v42  ;;  %v7159_v47 = vld [vmem:[%s13686_s6 + $0x118] sm:$0xff]  ;;  %v7160_v34 = vld [vmem:[%s13686_s6 + $0x4c8] sm:$0xff]  ;;  %v14304_v27 = vunpack.i.h.bf16 %v12112_v48 }
 0x3b7   :  { %4025 = vmatpush.msra.mxu2 %v7157_v14  ;;  %4040 = vmatpush.msra.mxu0 %v7158_v63  ;;  %v2965_v9 = vsel %vm1499_vm2, %v6590_v12, %v13957_v15  ;;  %v2837_v14 = vsel %vm1241_vm4, %v6585_v29, %v13956_v28  ;;  %v12335_v63 = vpop.f32.mrf.mxu2  ;;  %v3061_v21 = vsel %vm1628_vm5, %v6595_v41, %v13958_v8  ;;  %v14309_v29 = vunpack.i.l.bf16 %v12122_v61  ;;  %v14310_v15 = vld [vmem:[#allocation30_spill] sm:$0xff] }
 0x3b8   :  { %4005 = vmatpush.msrb.mxu1 %v7159_v47  ;;  %4063 = vmatpush.msrb.mxu3 %v7160_v34  ;;  %v2967_v19 = vsel %vm1499_vm2, %v14304_v27, %v6590_v12  ;;  %14305 = vst [vmem:[#allocation12_spill] sm:$0xff] %v12335_v63  ;;  %v14306_v47 = vunpack.i.h.bf16 %v12124_v38  ;;  %v14307_v12 = vld [vmem:[#allocation33_spill] sm:$0xff]  ;;  %v14311_v63 = vunpack.i.l.bf16 %v14310_v15  ;;  %v14312_v8 = vunpack.i.l.bf16 %v12112_v48 }
 0x3b9   :  { %3872 = vmatmul.f32.gmra.mxu0 %v12313_v39  ;;  %3895 = vmatmul.f32.gmra.mxu3 %v12291_v53  ;;  %v14308_v27 = vunpack.i.l.bf16 %v14307_v12  ;;  %v7162_v12 = vld [vmem:[%s13686_s6 + $0x238] sm:$0xff]  ;;  %v7163_v48 = vld [vmem:[%s13686_s6 + $0x108] sm:$0xff] }
 0x3ba   :  { %v3063_v34 = vsel %vm1628_vm5, %v14306_v47, %v6595_v41  ;;  %v2994_v42 = vsel %vm1499_vm2, %v14312_v8, %v14311_v63  ;;  %3938 = vmatmul.f32.vlgmr.msrb.gmra.mxu2 %v12293_v0  ;;  %v7161_v41 = vld [vmem:[%s13686_s6 + $0x3b8] sm:$0xff]  ;;  %v14313_v47 = vmax.f32 %v10923_v24, 0.0  ;;  %4006 = vmatpush.msrb.mxu1 %v7163_v48  ;;  %v14314_v8 = vmax.f32 %v11045_v36, 0.0 }
 0x3bb   :  { %v2866_v28 = vsel %vm1241_vm4, %v14309_v29, %v14308_v27  ;;  %4041 = vmatpush.msra.mxu0 %v7161_v41  ;;  %4026 = vmatpush.msra.mxu2 %v7162_v12  ;;  %v3121_v15 = vmax.f32 %v2967_v19, %v3063_v34  ;;  %v3122_v27 = vmax.f32 %v2965_v9, %v3061_v21  ;;  %v7164_v24 = vld [vmem:[%s13686_s6 + $0x4b8] sm:$0xff]  ;;  %v12379_v29 = vpop.f32.mrf.mxu3  ;;  %v14317_v19 = vunpack.i.l.bf16 %v12124_v38  ;;  %v7166_v9 = vld [vmem:[%s13686_s6 + $0x228] sm:$0xff] }
 0x3bc   :  { %v2897_v61 = vmax.f32 %v14313_v47, %v2839_v50  ;;  %v2898_v63 = vmax.f32 %v14314_v8, %v2837_v14  ;;  %4064 = vmatpush.msrb.mxu3 %v7164_v24  ;;  %v7165_v50 = vld [vmem:[%s13686_s6 + $0x3a8] sm:$0xff]  ;;  %v14315_v41 = vld [vmem:[#allocation18_spill] sm:$0xff]  ;;  %v14318_v21 = vmax.f32 %v10912_v2, 0.0 }
 0x3bd   :  { %4042 = vmatpush.msra.mxu0 %v7165_v50  ;;  %v14316_v47 = vunpack.i.l.bf16 %v14315_v41  ;;  %4027 = vmatpush.msra.mxu2 %v7166_v9  ;;  %v7167_v14 = vld [vmem:[%s13686_s6 + $0x5f8] sm:$0xff]  ;;  %v7168_v38 = vld [vmem:[%s13686_s6 + $0x4a8] sm:$0xff]  ;;  %v12417_v41 = vpop.f32.mrf.mxu1 }
 0x3be   :  { %4083 = vmatpush.msra.mxu1 %v7167_v14  ;;  %v2883_v34 = vmax.f32 %v14318_v21, %v2866_v28  ;;  %4065 = vmatpush.msrb.mxu3 %v7168_v38  ;;  %v7169_v48 = vld [vmem:[%s13686_s6 + $0x398] sm:$0xff]  ;;  %v7171_v2 = vld [vmem:[%s13686_s6 + $0x5e8] sm:$0xff]  ;;  %v12407_v28 = vmax.f32 %v2897_v61, %v3121_v15  ;;  %v14321_v21 = vunpack.i.h.bf16 %v12245_v20 }
 0x3bf   :  { %v3090_v36 = vsel %vm1628_vm5, %v14317_v19, %v14316_v47  ;;  %4043 = vmatpush.msra.mxu0 %v7169_v48  ;;  %v7170_v8 = vld [vmem:[%s13686_s6 + $0x218] sm:$0xff]  ;;  %v7173_v50 = vld [vmem:[%s13686_s6 + $0x388] sm:$0xff]  ;;  %v12419_v47 = vpop.f32.mrf.mxu0  ;;  %v14324_v48 = vunpack.i.h.bf16 %v12231_v51  ;;  %v14327_v51 = vunpack.i.h.bf16 %v12253_v10 }
 0x3c0   :  { %v3107_v12 = vmax.f32 %v2994_v42, %v3090_v36  ;;  %4028 = vmatpush.msra.mxu2 %v7170_v8  ;;  %4084 = vmatpush.msra.mxu1 %v7171_v2  ;;  %v12409_v42 = vmax.f32 %v2898_v63, %v3122_v27  ;;  %v7172_v24 = vld [vmem:[%s13686_s6 + $0x498] sm:$0xff]  ;;  %v7174_v61 = vld [vmem:[%s13686_s6 + $0x208] sm:$0xff]  ;;  %v12435_v36 = vpop.f32.mrf.mxu2 }
 0x3c1   :  { %4066 = vmatpush.msrb.mxu3 %v7172_v24  ;;  %4044 = vmatpush.msra.mxu0 %v7173_v50  ;;  %v7175_v15 = vld [vmem:[%s13686_s6 + $0x5d8] sm:$0xff]  ;;  %v7176_v27 = vld [vmem:[%s13686_s6 + $0x488] sm:$0xff] }
 0x3c2   :  { %4029 = vmatpush.msra.mxu2 %v7174_v61  ;;  %4085 = vmatpush.msra.mxu1 %v7175_v15  ;;  %v12427_v63 = vmax.f32 %v2883_v34, %v3107_v12  ;;  %v7177_v19 = vld [vmem:[%s13686_s6 + $0x6f8] sm:$0xff]  ;;  %v14319_v9 = vld [vmem:[#allocation32_spill] sm:$0xff] }
 0x3c3   :  { %4067 = vmatpush.msrb.mxu3 %v7176_v27  ;;  %3918 = vmatmul.f32.gmra.mxu1 %v12407_v28  ;;  %v14320_v14 = vunpack.i.l.bf16 %v14319_v9  ;;  %v14322_v12 = vld [vmem:[#allocation19_spill] sm:$0xff]  ;;  %v7179_v20 = vld [vmem:[%s13686_s6 + $0x5c8] sm:$0xff]  ;;  %v12471_v27 = vpop.f32.mrf.mxu3  ;;  %v14328_v9 = vmax.f32 %v11053_v17, 0.0 }
 0x3c4   :  { %4106 = vmatpush.msrb.mxu2 %v7177_v19  ;;  %v14323_v38 = vunpack.i.l.bf16 %v14322_v12  ;;  %3961 = vmatmul.f32.vlgmr.msrb.gmra.mxu0 %v12427_v63  ;;  %v7178_v2 = vld [vmem:[%s13686_s6 + $0x378] sm:$0xff]  ;;  %v7181_v15 = vld [vmem:[%s13686_s6 + $0x6e8] sm:$0xff] }
 0x3c5   :  { %3941 = vmatmul.f32.gmra.mxu2 %v12409_v42  ;;  %v2995_v34 = vsel %vm1499_vm2, %v14321_v21, %v14320_v14  ;;  %3984 = vmatmul.f32.vlgmr.msra.gmra.mxu3 %v11564_v30  ;;  %v14325_v24 = vld [vmem:[#allocation11_spill] sm:$0xff]  ;;  %v7182_v19 = vld [vmem:[%s13686_s6 + $0x368] sm:$0xff]  ;;  %vm5556_vm2 = vcmask 1043456  }
 0x3c6   :  { %v2867_v8 = vsel %vm1241_vm4, %v14324_v48, %v14323_v38  ;;  %4045 = vmatpush.msra.mxu0 %v7178_v2  ;;  %4086 = vmatpush.msra.mxu1 %v7179_v20  ;;  %v14326_v50 = vunpack.i.l.bf16 %v14325_v24  ;;  %v7180_v30 = vld [vmem:[%s13686_s6 + $0x478] sm:$0xff]  ;;  %v7184_v12 = vld [vmem:[%s13686_s6 + $0x468] sm:$0xff]  ;;  %v3636_v20 = vpop.f32.mrf.mxu1 }
 0x3c7   :  { %4068 = vmatpush.msrb.mxu3 %v7180_v30  ;;  %4107 = vmatpush.msrb.mxu2 %v7181_v15  ;;  %v7183_v10 = vld [vmem:[%s13686_s6 + $0x5b8] sm:$0xff]  ;;  %v2899_v14 = vmax.f32 %v14328_v9, %v2867_v8  ;;  %v7187_v17 = vld [vmem:[%s13686_s6 + $0x5a8] sm:$0xff]  ;;  %v12499_v2 = vpop.f32.mrf.mxu0 }
 0x3c8   :  { %v3091_v61 = vsel %vm1628_vm5, %v14327_v51, %v14326_v50  ;;  %4046 = vmatpush.msra.mxu0 %v7182_v19  ;;  %4087 = vmatpush.msra.mxu1 %v7183_v10  ;;  %v7185_v38 = vld [vmem:[%s13686_s6 + $0x6d8] sm:$0xff]  ;;  %v7189_v8 = vld [vmem:[%s13686_s6 + $0x6c8] sm:$0xff]  ;;  %v3659_v30 = vpop.f32.mrf.mxu2 }
 0x3c9   :  { %v3123_v21 = vmax.f32 %v2995_v34, %v3091_v61  ;;  %4069 = vmatpush.msrb.mxu3 %v7184_v12  ;;  %4108 = vmatpush.msrb.mxu2 %v7185_v38  ;;  %v7186_v48 = vld [vmem:[%s13686_s6 + $0x358] sm:$0xff]  ;;  %v7190_v24 = vld [vmem:[%s13686_s6 + $0x348] sm:$0xff]  ;;  %v3637_v38 = vadd.f32 %v3636_v20, %v12471_v27 }
 0x3ca   :  { %4047 = vmatpush.msra.mxu0 %v7186_v48  ;;  %4088 = vmatpush.msra.mxu1 %v7187_v17  ;;  %v7188_v34 = vld [vmem:[%s13686_s6 + $0x458] sm:$0xff]  ;;  %v7191_v51 = vld [vmem:[%s13686_s6 + $0x448] sm:$0xff] }
 0x3cb   :  { %4070 = vmatpush.msrb.mxu3 %v7188_v34  ;;  %4109 = vmatpush.msrb.mxu2 %v7189_v8  ;;  %v12505_v50 = vmax.f32 %v2899_v14, %v3123_v21  ;;  %v7192_v61 = vld [vmem:[%s13686_s6 + $0x6b8] sm:$0xff]  ;;  %v7201_v21 = vld [vmem:[%s13686_s6 + $0x308] sm:$0xff] }
 0x3cc   :  { %4048 = vmatpush.msra.mxu0 %v7190_v24  ;;  %4089 = vmatpush.msra.mxu1 %v11212_v60  ;;  %v7193_v60 = vld [vmem:[%s13686_s6 + $0x338] sm:$0xff]  ;;  %v14336_v34 = vld [vmem:[#allocation41_spill] sm:$0xff] }
 0x3cd   :  { %4071 = vmatpush.msrb.mxu3 %v7191_v51  ;;  %4110 = vmatpush.msrb.mxu2 %v7192_v61  ;;  %v7194_v15 = vld [vmem:[%s13686_s6 + $0x438] sm:$0xff] }
 0x3ce   :  { %3964 = vmatmul.f32.gmra.mxu0 %v12505_v50  ;;  %3987 = vmatmul.f32.gmra.mxu3 %v11949_v7  ;;  %v7195_v7 = vld [vmem:[%s13686_s6 + $0x6a8] sm:$0xff]  ;;  %v7198_v19 = vld [vmem:[%s13686_s6 + $0x698] sm:$0xff]  ;;  %v3639_v9 = vpop.f32.mrf.mxu1 }
 0x3cf   :  { %4007 = vmatmul.f32.vlgmr.msrb.gmra.mxu1 %v11677_v49  ;;  %4030 = vmatmul.f32.vlgmr.msra.gmra.mxu2 %v11953_v54  ;;  %v3616_v49 = vpop.f32.mrf.mxu3  ;;  %v7196_v54 = vld [vmem:[%s13686_s6 + $0x328] sm:$0xff]  ;;  %v7199_v10 = vld [vmem:[%s13686_s6 + $0x318] sm:$0xff]  ;;  %v3682_v14 = vpop.f32.mrf.mxu0 }
 0x3d0   :  { %4049 = vmatpush.msra.mxu0 %v7193_v60  ;;  %4090 = vmatpush.msra.mxu1 %v11232_v37  ;;  %v7197_v37 = vld [vmem:[%s13686_s6 + $0x428] sm:$0xff]  ;;  %v3662_v12 = vpop.f32.mrf.mxu2  ;;  %v7203_v48 = vld [vmem:[%s13686_s6 + $0x7f8] sm:$0xff] }
 0x3d1   :  { %4072 = vmatpush.msrb.mxu3 %v7194_v15  ;;  %4111 = vmatpush.msrb.mxu2 %v7195_v7  ;;  %v14334_v27 = vld [vmem:[#allocation39_spill] sm:$0xff]  ;;  %v14338_v24 = vld [vmem:[#allocation38_spill] sm:$0xff] }
 0x3d2   :  { %4050 = vmatpush.msra.mxu0 %v7196_v54  ;;  %4091 = vmatpush.msra.mxu1 %v11247_v58  ;;  %v7200_v58 = vld [vmem:[%s13686_s6 + $0x418] sm:$0xff] }
 0x3d3   :  { %4073 = vmatpush.msrb.mxu3 %v7197_v37  ;;  %4112 = vmatpush.msrb.mxu2 %v7198_v19  ;;  %v14341_v19 = vld [vmem:[#allocation26_spill] sm:$0xff] }
 0x3d4   :  { %4051 = vmatpush.msra.mxu0 %v7199_v10  ;;  %4092 = vmatpush.msra.mxu1 %v11267_v1  ;;  %v7202_v1 = vld [vmem:[%s13686_s6 + $0x408] sm:$0xff] }
 0x3d5   :  { %4074 = vmatpush.msrb.mxu3 %v7200_v58  ;;  %4113 = vmatpush.msrb.mxu2 %v11253_v59  ;;  %v3453_v59 = vadd.f32 %v12054_v3, %v12066_v22  ;;  %v7204_v3 = vld [vmem:[%s13686_s6 + $0x7e8] sm:$0xff]  ;;  %s7240_s6 = smov 16  }
 0x3d6   :  { %4052 = vmatpush.msra.mxu0 %v7201_v21  ;;  %4093 = vmatpush.msra.mxu1 %v11286_v45  ;;  %v14343_v58 = vld [vmem:[#allocation21_spill] sm:$0xff] }
 0x3d7   :  { %4075 = vmatpush.msrb.mxu3 %v7202_v1  ;;  %4114 = vmatpush.msrb.mxu2 %v11276_v57  ;;  %v3476_v45 = vadd.f32 %v12106_v25, %v3453_v59  ;;  %v3660_v57 = vadd.f32 %v3659_v30, %v3637_v38  ;;  %v3705_v22 = vpop.f32.mrf.mxu3  ;;  %v14339_v30 = vld [vmem:[#allocation8_spill] sm:$0xff]  ;;  %v14345_v1 = vld [vmem:[#allocation29_spill] sm:$0xff] }
 0x3d8   :  { %4129 = vmatpush.msrb.mxu0 %v7203_v48  ;;  %4010 = vmatmul.f32.gmra.mxu1 %v12048_v62 }
 0x3d9   :  { %4033 = vmatmul.f32.gmra.mxu2 %v12050_v4  ;;  %4053 = vmatmul.f32.vlgmr.msra.gmra.mxu0 %v12148_v6  ;;  %v3499_v62 = vadd.f32 %v12183_v35, %v3476_v45  ;;  %v3728_v4 = vpop.f32.mrf.mxu1  ;;  %v3456_v6 = vadd.f32 %v12174_v40, %v12163_v46  ;;  %v14330_v35 = vld [vmem:[#allocation42_spill] sm:$0xff]  ;;  %v14331_v46 = vld [vmem:[#allocation23_spill] sm:$0xff] }
 0x3da   :  { %4076 = vmatmul.f32.vlgmr.msrb.gmra.mxu3 %v12150_v52  ;;  %4094 = vmatpush.msra.mxu1 %v11304_v55  ;;  %v3683_v55 = vadd.f32 %v3682_v14, %v3660_v57  ;;  %v3640_v52 = vadd.f32 %v3639_v9, %v3616_v49  ;;  %v14340_v49 = vld [vmem:[#allocation9_spill] sm:$0xff]  ;;  %v14344_v14 = vld [vmem:[#allocation22_spill] sm:$0xff] }
 0x3db   :  { %4115 = vmatpush.msrb.mxu2 %v11293_v18  ;;  %4130 = vmatpush.msrb.mxu0 %v7204_v3  ;;  %v3522_v25 = vadd.f32 %v12272_v23, %v3499_v62  ;;  %v3685_v18 = vpop.f32.mrf.mxu0  ;;  %v14333_v23 = vld [vmem:[#allocation12_spill] sm:$0xff] }
 0x3dc   :  { %4095 = vmatpush.msra.mxu1 %v11325_v11  ;;  %v14329_v11 = vld [vmem:[#allocation24_spill] sm:$0xff] }
 0x3dd   :  { %4116 = vmatpush.msrb.mxu2 %v11313_v26  ;;  %4131 = vmatpush.msrb.mxu0 %v11298_v16  ;;  %v3706_v26 = vadd.f32 %v3705_v22, %v3683_v55  ;;  %v3751_v16 = vpop.f32.mrf.mxu2 }
 0x3de   :  { %4096 = vmatpush.msra.mxu1 %v11352_v5  ;;  %v3479_v5 = vadd.f32 %v14329_v11, %v3456_v6 }
 0x3df   :  { %4117 = vmatpush.msrb.mxu2 %v11334_v31  ;;  %4132 = vmatpush.msrb.mxu0 %v11318_v13  ;;  %v3545_v31 = vadd.f32 %v12301_v43, %v3522_v25  ;;  %v3663_v13 = vadd.f32 %v3662_v12, %v3640_v52  ;;  %v3729_v17 = vadd.f32 %v3728_v4, %v3706_v26  ;;  %v3708_v43 = vpop.f32.mrf.mxu3 }
 0x3e0   :  { %4097 = vmatpush.msra.mxu1 %v11373_v56  ;;  %v14332_v56 = vld [vmem:[#allocation27_spill] sm:$0xff] }
 0x3e1   :  { %4118 = vmatpush.msrb.mxu2 %v11361_v32  ;;  %4133 = vmatpush.msrb.mxu0 %v11339_v44  ;;  %v3502_v40 = vadd.f32 %v14332_v56, %v3479_v5  ;;  %v3568_v32 = vadd.f32 %v14333_v23, %v3545_v31  ;;  %v14335_v44 = vld [vmem:[#allocation46_spill] sm:$0xff]  ;;  %v3686_v8 = vadd.f32 %v3685_v18, %v3663_v13  ;;  %v3731_v7 = vpop.f32.mrf.mxu1 }
 0x3e2   :  { %4056 = vmatmul.f32.gmra.mxu0 %v12313_v39  ;;  %4079 = vmatmul.f32.gmra.mxu3 %v12291_v53  ;;  %v14337_v53 = vld [vmem:[#allocation45_spill] sm:$0xff]  ;;  %v3752_v20 = vadd.f32 %v3751_v16, %v3729_v17 }
 0x3e3   :  { %4098 = vmatpush.msra.mxu1 %v14330_v35  ;;  %4119 = vmatpush.msrb.mxu2 %v14331_v46  ;;  %v3525_v39 = vadd.f32 %v12379_v29, %v3502_v40  ;;  %v3774_v51 = vpop.f32.mrf.mxu0  ;;  %v12597_v61 = vadd.f32 %v12419_v47, %v3568_v32  ;;  %v3709_v60 = vadd.f32 %v3708_v43, %v3686_v8 }
 0x3e4   :  { %4099 = vmatmul.f32.vlgmr.msra.gmra.mxu1 %v14334_v27  ;;  %4134 = vmatpush.msrb.mxu0 %v14335_v44  ;;  %v12601_v15 = vadd.f32 %v3774_v51, %v3752_v20 }
 0x3e5   :  { %4120 = vmatpush.msrb.mxu2 %v14336_v34  ;;  %v3548_v29 = vadd.f32 %v12417_v41, %v3525_v39  ;;  %v3754_v37 = vpop.f32.mrf.mxu2  ;;  %v14342_v41 = vld [vmem:[#allocation25_spill] sm:$0xff] }
 0x3e6   :  { %4135 = vmatpush.msrb.mxu0 %v14337_v53  ;;  %v12607_v54 = vpack.i.bf16 %v12601_v15, %v12597_v61 }
 0x3e7   :  { %4121 = vmatpush.msrb.mxu2 %v14338_v24  ;;  %v3571_v47 = vadd.f32 %v12435_v36, %v3548_v29 }
 0x3e8   :  { %4136 = vmatpush.msrb.mxu0 %v14339_v30  ;;  %4122 = vmatmul.f32.vlgmr.msrb.gmra.mxu2 %v12293_v0  ;;  %v3732_v0 = vadd.f32 %v3731_v7, %v3709_v60  ;;  %v3801_v12 = vpop.f32.mrf.mxu3 }
 0x3e9   :  { %6608 = vrot.lane.b32.xlu2 %v12607_v54, %s7240_s6  ;;  %6603 = vrot.lane.b32.xlu1 %v12607_v54, %s7241_s5 }
 0x3ea   :  { %4137 = vmatpush.msrb.mxu0 %v14340_v49  ;;  %v3755_v10 = vadd.f32 %v3754_v37, %v3732_v0  ;;  %6598 = vrot.lane.b32.xlu0 %v12607_v54, %s7239_s19 }
 0x3eb   :  { %v3777_v36 = vpop.f32.mrf.mxu0 }
 0x3ec   :  { %4102 = vmatmul.f32.gmra.mxu1 %v12407_v28  ;;  %4138 = vmatpush.msrb.mxu0 %v14341_v19  ;;  %v12620_v28 = vadd.f32 %v12499_v2, %v3571_v47  ;;  %v12624_v9 = vadd.f32 %v3777_v36, %v3755_v10  ;;  %v14346_v2 = vld [vmem:[#allocation16_spill] sm:$0xff] }
 0x3ee   :  { %4139 = vmatpush.msrb.mxu0 %v14342_v41  ;;  %v12629_v21 = vpack.i.bf16 %v12624_v9, %v12620_v28 }
 0x3f0   :  { %4140 = vmatpush.msrb.mxu0 %v14343_v58  ;;  %4125 = vmatmul.f32.gmra.mxu2 %v12409_v42  ;;  %v14347_v42 = vld [vmem:[#allocation44_spill] sm:$0xff] }
 0x3f1   :  { %6623 = vrot.lane.b32.xlu1 %v12629_v21, %s7240_s6  ;;  %6613 = vrot.lane.b32.xlu2 %v12629_v21, %s7239_s19 }
 0x3f2   :  { %4141 = vmatpush.msrb.mxu0 %v14344_v14  ;;  %6618 = vrot.lane.b32.xlu0 %v12629_v21, %s7241_s5  ;;  %v3824_v59 = vpop.f32.mrf.mxu1 }
 0x3f3   :  { %v3825_v13 = vadd.f32 %v3824_v59, %v3801_v12 }
 0x3f4   :  { %4142 = vmatpush.msrb.mxu0 %v14345_v1 }
 0x3f6   :  { %4143 = vmatpush.msrb.mxu0 %v14346_v2 }
 0x3f8   :  { %4144 = vmatpush.msrb.mxu0 %v14347_v42 }
 0x3f9   :  { %4145 = vmatmul.f32.vlgmr.msrb.gmra.mxu0 %v12427_v63 }
 0x401   :  { %4148 = vmatmul.f32.gmra.mxu0 %v12505_v50 }
 0x41c   :  { %v3847_v38 = vpop.f32.mrf.mxu2 }
 0x41d   :  { %v3848_v56 = vadd.f32 %v3847_v38, %v3825_v13 }
 0x41e   :  { %v3804_v48 = vpop.f32.mrf.mxu3 }
 0x422   :  { %v3827_v57 = vpop.f32.mrf.mxu1 }
 0x423   :  { %v3828_v43 = vadd.f32 %v3827_v57, %v3804_v48  ;;  %v4521_v57 = vld [vmem:[%s13688_s8 + $0x18] sm:$0xff] }
 0x427   :  { %v3850_v3 = vpop.f32.mrf.mxu2 }
 0x428   :  { %v3851_v20 = vadd.f32 %v3850_v3, %v3828_v43  ;;  %v4519_v3 = vld [vmem:[%s13688_s8 + $0x8] sm:$0xff] }
 0x42b   :  { %v3870_v45 = vpop.f32.mrf.mxu0 }
 0x42c   :  { %v3916_v25 = vpop.f32.mrf.mxu1  ;;  %v3871_v32 = vadd.f32 %v3870_v45, %v3848_v56 }
 0x431   :  { %v3893_v22 = vpop.f32.mrf.mxu3 }
 0x432   :  { %v3894_v27 = vadd.f32 %v3893_v22, %v3871_v32  ;;  %v4520_v22 = vld [vmem:[%s13688_s8 + $0x10] sm:$0xff] }
 0x434   :  { %v3917_v24 = vadd.f32 %v3916_v25, %v3894_v27 }
 0x436   :  { %v3873_v62 = vpop.f32.mrf.mxu0 }
 0x437   :  { %v3874_v30 = vadd.f32 %v3873_v62, %v3851_v20  ;;  %v4518_v62 = vld [vmem:[%s13688_s8] sm:$0xff] }
 0x43c   :  { %v3896_v18 = vpop.f32.mrf.mxu3 }
 0x43d   :  { %v3939_v55 = vpop.f32.mrf.mxu2  ;;  %v3897_v49 = vadd.f32 %v3896_v18, %v3874_v30 }
 0x43e   :  { %v3940_v60 = vadd.f32 %v3939_v55, %v3917_v24 }
 0x440   :  { %v3919_v4 = vpop.f32.mrf.mxu1 }
 0x441   :  { %v3962_v6 = vpop.f32.mrf.mxu0  ;;  %v3920_v58 = vadd.f32 %v3919_v4, %v3897_v49 }
 0x442   :  { %v12642_v0 = vadd.f32 %v3962_v6, %v3940_v60 }
 0x443   :  { %v12702_v25 = vpop.permute.xlu2 %6608 }
 0x448   :  { %v3942_v52 = vpop.f32.mrf.mxu2  ;;  %v3985_v26 = vpop.f32.mrf.mxu3 }
 0x449   :  { %v3943_v2 = vadd.f32 %v3942_v52, %v3920_v58 }
 0x44b   :  { %v3965_v16 = vpop.f32.mrf.mxu0 }
 0x44c   :  { %v4008_v63 = vpop.f32.mrf.mxu1  ;;  %v12651_v38 = vadd.f32 %v3965_v16, %v3943_v2 }
 0x44d   :  { %v4009_v35 = vadd.f32 %v4008_v63, %v3985_v26 }
 0x451   :  { %v3988_v50 = vpop.f32.mrf.mxu3 }
 0x452   :  { %v4031_v11 = vpop.f32.mrf.mxu2 }
 0x453   :  { %v4032_v40 = vadd.f32 %v4031_v11, %v4009_v35 }
 0x455   :  { %v4011_v5 = vpop.f32.mrf.mxu1 }
 0x456   :  { %v4054_v31 = vpop.f32.mrf.mxu0  ;;  %v4012_v39 = vadd.f32 %v4011_v5, %v3988_v50 }
 0x457   :  { %v4055_v44 = vadd.f32 %v4054_v31, %v4032_v40 }
 0x45b   :  { %v12704_v55 = vpop.permute.xlu1 %6603 }
 0x45c   :  { %v4034_v46 = vpop.f32.mrf.mxu2  ;;  %v6599_v18 = vpop.permute.xlu0 %6598 }
 0x45d   :  { %v4077_v23 = vpop.f32.mrf.mxu3  ;;  %v4035_v51 = vadd.f32 %v4034_v46, %v4012_v39  ;;  %v6600_v43 = vunpack.i.l.bf16 %v6599_v18 }
 0x45e   :  { %v4078_v53 = vadd.f32 %v4077_v23, %v4055_v44 }
 0x45f   :  { %v4057_v17 = vpop.f32.mrf.mxu0 }
 0x460   :  { %v4058_v37 = vadd.f32 %v4057_v17, %v4035_v51 }
 0x461   :  { %v4100_v34 = vpop.f32.mrf.mxu1 }
 0x462   :  { %v4101_v7 = vadd.f32 %v4100_v34, %v4078_v53  ;;  %v6601_v34 = vunpack.i.h.bf16 %v6599_v18  ;;  %v6611_v18 = vunpack.i.h.bf16 %v12702_v25 }
 0x463   :  { %v12708_v6 = vpop.permute.xlu1 %6623 }
 0x464   :  { %v6619_v52 = vpop.permute.xlu0 %6618  ;;  %v4283_v60 = vsel %vm1080_vm6, %v6601_v34, %v6600_v43 }
 0x465   :  { %v4080_v29 = vpop.f32.mrf.mxu3 }
 0x466   :  { %v4081_v41 = vadd.f32 %v4080_v29, %v4058_v37 }
 0x469   :  { %v4103_v36 = vpop.f32.mrf.mxu1 }
 0x46a   :  { %v4104_v42 = vadd.f32 %v4103_v36, %v4081_v41  ;;  %v6620_v41 = vunpack.i.l.bf16 %v6619_v52 }
 0x46b   :  { %v4123_v8 = vpop.f32.mrf.mxu2 }
 0x46c   :  { %v4124_v47 = vadd.f32 %v4123_v8, %v4101_v7  ;;  %v4279_v7 = vsel %vm1080_vm6, %v6600_v43, %v6601_v34 }
 0x473   :  { %v4126_v1 = vpop.f32.mrf.mxu2 }
 0x474   :  { %v4127_v12 = vadd.f32 %v4126_v1, %v4104_v42  ;;  %v6605_v1 = vunpack.i.l.bf16 %v12704_v55 }
 0x476   :  { %v4146_v19 = vpop.f32.mrf.mxu0 }
 0x477   :  { %v12644_v10 = vadd.f32 %v4146_v19, %v4124_v47  ;;  %v6621_v19 = vunpack.i.h.bf16 %v6619_v52  ;;  %v6610_v52 = vunpack.i.l.bf16 %v12702_v25 }
 0x479   :  { %v6627_v14 = vpack.i.bf16 %v12644_v10, %v12642_v0 }
 0x47b   :  { %6628 = vrot.lane.b32.xlu1 %v6627_v14, %s7239_s19  ;;  %6638 = vrot.lane.b32.xlu0 %v6627_v14, %s7240_s6 }
 0x47c   :  { %6633 = vrot.lane.b32.xlu2 %v6627_v14, %s7241_s5 }
 0x47e   :  { %v4149_v59 = vpop.f32.mrf.mxu0 }
 0x47f   :  { %v12653_v48 = vadd.f32 %v4149_v59, %v4127_v12 }
 0x481   :  { %v6647_v45 = vpack.i.bf16 %v12653_v48, %v12651_v38 }
 0x483   :  { %6658 = vrot.lane.b32.xlu1 %v12629_v21, %s7242_s21  ;;  %6648 = vrot.lane.b32.xlu0 %v6647_v45, %s7239_s19 }
 0x484   :  { %6643 = vrot.lane.b32.xlu2 %v6627_v14, %s7242_s21 }
 0x48b   :  { %6673 = vrot.lane.b32.xlu1 %v6647_v45, %s7241_s5  ;;  %6653 = vrot.lane.b32.xlu0 %v6627_v14, %s7243_s22 }
 0x48c   :  { %6663 = vrot.lane.b32.xlu2 %v12629_v21, %s7243_s22 }
 0x493   :  { %6678 = vrot.lane.b32.xlu1 %v12607_v54, %s7243_s22  ;;  %6668 = vrot.lane.b32.xlu0 %v12607_v54, %s7242_s21 }
 0x494   :  { %6683 = vrot.lane.b32.xlu2 %v6647_v45, %s7240_s6 }
 0x49b   :  { %6698 = vrot.lane.b32.xlu1 %v6647_v45, %s7243_s22  ;;  %6688 = vrot.lane.b32.xlu0 %v6647_v45, %s7242_s21 }
 0x49c   :  { %6708 = vrot.lane.b32.xlu2 %v6647_v45, %s7244_s2 }
 0x4a3   :  { %6703 = vrot.lane.b32.xlu1 %v12629_v21, %s7244_s2  ;;  %6693 = vrot.lane.b32.xlu0 %v6627_v14, %s7244_s2 }
 0x4a4   :  { %6713 = vrot.lane.b32.xlu2 %v12607_v54, %s7244_s2 }
 0x4ab   :  { %6718 = vrot.lane.b32.xlu1 %v6627_v14, %s7245_s23  ;;  %6728 = vrot.lane.b32.xlu0 %v6647_v45, %s7245_s23 }
 0x4ac   :  { %6723 = vrot.lane.b32.xlu2 %v12629_v21, %s7245_s23 }
 0x4b3   :  { %6748 = vrot.lane.b32.xlu1 %v6647_v45, %s7235_s29  ;;  %6733 = vrot.lane.b32.xlu0 %v12607_v54, %s7245_s23  ;;  %v4252_v45 = vsel %vm4246_vm12, %v6621_v19, %v6620_v41 }
 0x4b4   :  { %6738 = vrot.lane.b32.xlu2 %v6627_v14, %s7235_s29  ;;  %v6606_v14 = vunpack.i.h.bf16 %v12704_v55 }
 0x4b6   :  { %v4247_v55 = vsel %vm4246_vm12, %v6605_v1, %v6606_v14 }
 0x4bb   :  { %6753 = vrot.lane.b32.xlu1 %v12607_v54, %s7235_s29  ;;  %6743 = vrot.lane.b32.xlu0 %v12629_v21, %s7235_s29  ;;  %v6614_v54 = vpop.permute.xlu2 %6613 }
 0x4bc   :  { %4539 = vperm.xlu2 %6356, %v4521_v57   ;;  %v6616_v32 = vunpack.i.h.bf16 %v6614_v54  ;;  %v6615_v27 = vunpack.i.l.bf16 %v6614_v54  ;;  %v4248_v57 = vsel %vm4246_vm12, %v6620_v41, %v6621_v19 }
 0x4be   :  { %v4284_v20 = vsel %vm1080_vm6, %v6616_v32, %v6615_v27  ;;  %v4280_v24 = vsel %vm1080_vm6, %v6615_v27, %v6616_v32 }
 0x4c3   :  { %4529 = vperm.xlu1 %6355, %v4519_v3   ;;  %4534 = vperm.xlu0 %5714, %v4520_v22  }
 0x4c4   :  { %4524 = vperm.xlu2 %6356, %v4518_v62  }
 0x4d6   :  { %v6634_v21 = vpop.permute.xlu2 %6633 }
 0x4d7   :  { %v6636_v29 = vunpack.i.h.bf16 %v6634_v21  ;;  %v6635_v49 = vunpack.i.l.bf16 %v6634_v21  ;;  %v4251_v21 = vsel %vm4246_vm12, %v6606_v14, %v6605_v1 }
 0x4d9   :  { %v4253_v2 = vsel %vm4246_vm12, %v6636_v29, %v6635_v49  ;;  %v4249_v42 = vsel %vm4246_vm12, %v6635_v49, %v6636_v29 }
 0x4de   :  { %v12706_v4 = vpop.permute.xlu2 %6643 }
 0x4df   :  { %v6646_v32 = vunpack.i.h.bf16 %v12706_v4  ;;  %v6645_v27 = vunpack.i.l.bf16 %v12706_v4 }
 0x4e6   :  { %v12710_v26 = vpop.permute.xlu2 %6663 }
 0x4ed   :  { %v6629_v16 = vpop.permute.xlu1 %6628  ;;  %v12712_v63 = vpop.permute.xlu0 %6638 }
 0x4ee   :  { %v12714_v11 = vpop.permute.xlu2 %6683  ;;  %v6631_v31 = vunpack.i.h.bf16 %v6629_v16  ;;  %v6630_v13 = vunpack.i.l.bf16 %v6629_v16  ;;  %v6641_v62 = vunpack.i.h.bf16 %v12712_v63  ;;  %v6640_v54 = vunpack.i.l.bf16 %v12712_v63 }
 0x4ef   :  { %v6686_v12 = vunpack.i.h.bf16 %v12714_v11  ;;  %v6685_v59 = vunpack.i.l.bf16 %v12714_v11  ;;  %v6626_v16 = vunpack.i.h.bf16 %v12708_v6  ;;  %v6625_v11 = vunpack.i.l.bf16 %v12708_v6 }
 0x4f0   :  { %v4285_v53 = vsel %vm1080_vm6, %v6631_v31, %v6630_v13  ;;  %v4281_v8 = vsel %vm1080_vm6, %v6630_v13, %v6631_v31  ;;  %v4220_v31 = vsel %vm4213_vm13, %v6641_v62, %v6640_v54  ;;  %v4216_v25 = vsel %vm4213_vm13, %v6640_v54, %v6641_v62 }
 0x4f1   :  { %v4221_v63 = vsel %vm4213_vm13, %v6686_v12, %v6685_v59  ;;  %v4218_v13 = vsel %vm4213_vm13, %v6611_v18, %v6610_v52  ;;  %v4219_v6 = vsel %vm4213_vm13, %v6626_v16, %v6625_v11 }
 0x4f5   :  { %v12716_v50 = vpop.permute.xlu1 %6658  ;;  %v6649_v5 = vpop.permute.xlu0 %6648 }
 0x4f6   :  { %v6651_v35 = vunpack.i.h.bf16 %v6649_v5  ;;  %v6650_v46 = vunpack.i.l.bf16 %v6649_v5  ;;  %v12719_v56 = vpop.permute.xlu2 %6708  ;;  %v4217_v5 = vsel %vm4213_vm13, %v6685_v59, %v6686_v12 }
 0x4f7   :  { %v6711_v40 = vunpack.i.h.bf16 %v12719_v56  ;;  %v6710_v23 = vunpack.i.l.bf16 %v12719_v56  ;;  %v12861_v56 = vld [vmem:[%s13687_s7 + $0x10] sm:$0xff] }
 0x4f8   :  { %v4286_v44 = vsel %vm1080_vm6, %v6651_v35, %v6650_v46  ;;  %v4282_v17 = vsel %vm1080_vm6, %v6650_v46, %v6651_v35  ;;  %v4215_v35 = vsel %vm4213_vm13, %v6625_v11, %v6626_v16  ;;  %v4214_v46 = vsel %vm4213_vm13, %v6610_v52, %v6611_v18 }
 0x4f9   :  { %4555 = vmatpush.msra.mxu3 %v4286_v44  ;;  %v4388_v39 = vsel %vm4384_vm11, %v6710_v23, %v6711_v40  ;;  %4642 = vmatpush.msra.mxu0 %v4282_v17  ;;  %v4392_v18 = vsel %vm4384_vm11, %v6711_v40, %v6710_v23  ;;  %v4424_v40 = vsel %vm4417_vm14, %v6646_v32, %v6645_v27 }
 0x4fa   :  { %4584 = vmatpush.msrb.mxu1 %v4388_v39 }
 0x4fb   :  { %4556 = vmatpush.msra.mxu3 %v4285_v53  ;;  %4643 = vmatpush.msra.mxu0 %v4281_v8 }
 0x4fd   :  { %v6674_v51 = vpop.permute.xlu1 %6673  ;;  %v12741_v30 = vpop.permute.xlu0 %6653  ;;  %4557 = vmatpush.msra.mxu3 %v4284_v20  ;;  %4644 = vmatpush.msra.mxu0 %v4280_v24  ;;  %v6666_v24 = vunpack.i.h.bf16 %v12710_v26 }
 0x4fe   :  { %v6676_v37 = vunpack.i.h.bf16 %v6674_v51  ;;  %v6675_v47 = vunpack.i.l.bf16 %v6674_v51  ;;  %v6656_v44 = vunpack.i.h.bf16 %v12741_v30  ;;  %v6655_v17 = vunpack.i.l.bf16 %v12741_v30 }
 0x4ff   :  { %4558 = vmatpush.msra.mxu3 %v4283_v60  ;;  %4645 = vmatpush.msra.mxu0 %v4279_v7  ;;  %v6665_v51 = vunpack.i.l.bf16 %v12710_v26  ;;  %v6661_v60 = vunpack.i.h.bf16 %v12716_v50  ;;  %v6660_v30 = vunpack.i.l.bf16 %v12716_v50 }
 0x500   :  { %v4254_v36 = vsel %vm4246_vm12, %v6676_v37, %v6675_v47  ;;  %v4250_v58 = vsel %vm4246_vm12, %v6675_v47, %v6676_v37  ;;  %v4187_v26 = vsel %vm4180_vm15, %v6656_v44, %v6655_v17  ;;  %v4420_v37 = vsel %vm4417_vm14, %v6645_v27, %v6646_v32  ;;  %v12819_v47 = vpop.permute.xlu2 %6713  ;;  %v4437_v27 = vld [vmem:[%s13687_s7 + $0x18] sm:$0xff] }
 0x501   :  { %4559 = vmatpush.msra.mxu3 %v4254_v36  ;;  %4646 = vmatpush.msra.mxu0 %v4250_v58  ;;  %v4183_v14 = vsel %vm4180_vm15, %v6655_v17, %v6656_v44  ;;  %v4186_v1 = vsel %vm4180_vm15, %v6666_v24, %v6665_v51  ;;  %v4182_v59 = vsel %vm4180_vm15, %v6665_v51, %v6666_v24 }
 0x502   :  { %v4423_v4 = vsel %vm4417_vm14, %v6661_v60, %v6660_v30 }
 0x503   :  { %4560 = vmatpush.msra.mxu3 %v4253_v2  ;;  %4647 = vmatpush.msra.mxu0 %v4249_v42  ;;  %v4419_v2 = vsel %vm4417_vm14, %v6660_v30, %v6661_v60 }
 0x505   :  { %v12764_v3 = vpop.permute.xlu1 %6678  ;;  %v12766_v22 = vpop.permute.xlu0 %6668  ;;  %4561 = vmatpush.msra.mxu3 %v4252_v45  ;;  %4648 = vmatpush.msra.mxu0 %v4248_v57  ;;  %v4434_v45 = vld [vmem:[%s13687_s7] sm:$0xff] }
 0x506   :  { %v6681_v19 = vunpack.i.h.bf16 %v12764_v3  ;;  %v6680_v41 = vunpack.i.l.bf16 %v12764_v3  ;;  %v6671_v36 = vunpack.i.h.bf16 %v12766_v22  ;;  %v6670_v58 = vunpack.i.l.bf16 %v12766_v22 }
 0x507   :  { %4562 = vmatpush.msra.mxu3 %v4251_v21  ;;  %4649 = vmatpush.msra.mxu0 %v4247_v55 }
 0x508   :  { %v4185_v22 = vsel %vm4180_vm15, %v6681_v19, %v6680_v41  ;;  %v4418_v62 = vsel %vm4417_vm14, %v6670_v58, %v6671_v36  ;;  %v4181_v55 = vsel %vm4180_vm15, %v6680_v41, %v6681_v19 }
 0x509   :  { %4563 = vmatpush.msra.mxu3 %v4221_v63  ;;  %4650 = vmatpush.msra.mxu0 %v4217_v5  ;;  %v6716_v63 = vunpack.i.h.bf16 %v12819_v47  ;;  %v6715_v5 = vunpack.i.l.bf16 %v12819_v47  ;;  %v4440_v47 = vld [vmem:[%s13687_s7 + $0x30] sm:$0xff] }
 0x50b   :  { %4564 = vmatpush.msra.mxu3 %v4220_v31  ;;  %4651 = vmatpush.msra.mxu0 %v4216_v25  ;;  %v6724_v31 = vpop.permute.xlu2 %6723  ;;  %v4385_v32 = vsel %vm4384_vm11, %v6715_v5, %v6716_v63  ;;  %v4389_v17 = vsel %vm4384_vm11, %v6716_v63, %v6715_v5  ;;  %v4435_v5 = vld [vmem:[%s13687_s7 + $0x8] sm:$0xff] }
 0x50d   :  { %v6699_v34 = vpop.permute.xlu1 %6698  ;;  %v6689_v43 = vpop.permute.xlu0 %6688  ;;  %4565 = vmatpush.msra.mxu3 %v4219_v6  ;;  %4652 = vmatpush.msra.mxu0 %v4215_v35 }
 0x50e   :  { %v6701_v39 = vunpack.i.h.bf16 %v6699_v34  ;;  %v6700_v53 = vunpack.i.l.bf16 %v6699_v34  ;;  %v6691_v8 = vunpack.i.h.bf16 %v6689_v43  ;;  %v6690_v20 = vunpack.i.l.bf16 %v6689_v43 }
 0x50f   :  { %4566 = vmatpush.msra.mxu3 %v4218_v13  ;;  %4653 = vmatpush.msra.mxu0 %v4214_v46  ;;  %v4422_v34 = vsel %vm4417_vm14, %v6671_v36, %v6670_v58 }
 0x510   :  { %v4188_v7 = vsel %vm4180_vm15, %v6701_v39, %v6700_v53  ;;  %v4421_v29 = vsel %vm4417_vm14, %v6690_v20, %v6691_v8  ;;  %v4184_v49 = vsel %vm4180_vm15, %v6700_v53, %v6701_v39  ;;  %v4425_v11 = vsel %vm4417_vm14, %v6691_v8, %v6690_v20  ;;  %v12896_v20 = vld [vmem:[%s13687_s7 + $0x28] sm:$0xff] }
 0x511   :  { %4567 = vmatpush.msra.mxu3 %v4188_v7  ;;  %4625 = vmatpush.msra.mxu2 %v4421_v29  ;;  %v6726_v53 = vunpack.i.h.bf16 %v6724_v31  ;;  %v6725_v8 = vunpack.i.l.bf16 %v6724_v31 }
 0x512   :  { %4654 = vmatpush.msra.mxu0 %v4184_v49 }
 0x513   :  { %4568 = vmatpush.msra.mxu3 %v4187_v26  ;;  %4626 = vmatpush.msra.mxu2 %v4420_v37  ;;  %v4353_v7 = vsel %vm4351_vm1, %v6725_v8, %v6726_v53  ;;  %v4357_v29 = vsel %vm4351_vm1, %v6726_v53, %v6725_v8  ;;  %v6739_v49 = vpop.permute.xlu2 %6738 }
 0x514   :  { %4655 = vmatpush.msra.mxu0 %v4183_v14  ;;  %v6741_v14 = vunpack.i.h.bf16 %v6739_v49 }
 0x515   :  { %v6704_v42 = vpop.permute.xlu1 %6703  ;;  %v6694_v12 = vpop.permute.xlu0 %6693  ;;  %4569 = vmatpush.msra.mxu3 %v4186_v1  ;;  %4627 = vmatpush.msra.mxu2 %v4419_v2  ;;  %v6740_v1 = vunpack.i.l.bf16 %v6739_v49  ;;  %v4442_v2 = vld [vmem:[%s13687_s7 + $0x40] sm:$0xff] }
 0x516   :  { %v6696_v57 = vunpack.i.h.bf16 %v6694_v12  ;;  %v6695_v3 = vunpack.i.l.bf16 %v6694_v12  ;;  %4656 = vmatpush.msra.mxu0 %v4182_v59  ;;  %v6706_v54 = vunpack.i.h.bf16 %v6704_v42  ;;  %v6705_v21 = vunpack.i.l.bf16 %v6704_v42 }
 0x517   :  { %4570 = vmatpush.msra.mxu3 %v4185_v22  ;;  %4628 = vmatpush.msra.mxu2 %v4418_v62 }
 0x518   :  { %4657 = vmatpush.msra.mxu0 %v4181_v55  ;;  %4571 = vmatmul.f32.vlgmr.msra.gmra.mxu3 %v4434_v45  ;;  %v4387_v52 = vsel %vm4384_vm11, %v6695_v3, %v6696_v57  ;;  %v4391_v16 = vsel %vm4384_vm11, %v6696_v57, %v6695_v3  ;;  %v4386_v23 = vsel %vm4384_vm11, %v6705_v21, %v6706_v54 }
 0x519   :  { %4658 = vmatmul.f32.vlgmr.msra.gmra.mxu0 %v4434_v45  ;;  %4671 = vmatpush.msrb.mxu2 %v4392_v18  ;;  %v4390_v25 = vsel %vm4384_vm11, %v6706_v54, %v6705_v21  ;;  %v4321_v57 = vsel %vm1241_vm4, %v6740_v1, %v6741_v14  ;;  %v4325_v3 = vsel %vm1241_vm4, %v6741_v14, %v6740_v1  ;;  %v4443_v54 = vld [vmem:[%s13687_s7 + $0x48] sm:$0xff] }
 0x51a   :  { %4712 = vmatpush.msrb.mxu3 %v4425_v11  ;;  %4585 = vmatpush.msrb.mxu1 %v4387_v52 }
 0x51b   :  { %4672 = vmatpush.msrb.mxu2 %v4391_v16  ;;  %v4445_v16 = vld [vmem:[%s13687_s7 + $0x58] sm:$0xff] }
 0x51c   :  { %4713 = vmatpush.msrb.mxu3 %v4424_v40  ;;  %4586 = vmatpush.msrb.mxu1 %v4386_v23 }
 0x51d   :  { %5677 = vmatmul.msk.f32.vlgmr.msra.gmra.mxu2 %vm4542_vm0, %v12861_v56  ;;  %v6719_v13 = vpop.permute.xlu1 %6718  ;;  %v6729_v6 = vpop.permute.xlu0 %6728 }
 0x51e   :  { %4673 = vmatpush.msrb.mxu2 %v4390_v25  ;;  %4714 = vmatpush.msrb.mxu3 %v4423_v4  ;;  %v6731_v35 = vunpack.i.h.bf16 %v6729_v6  ;;  %v6730_v46 = vunpack.i.l.bf16 %v6729_v6  ;;  %v6721_v44 = vunpack.i.h.bf16 %v6719_v13  ;;  %v6720_v50 = vunpack.i.l.bf16 %v6719_v13 }
 0x51f   :  { %4587 = vmatpush.msrb.mxu1 %v4385_v32 }
 0x520   :  { %4674 = vmatpush.msrb.mxu2 %v4389_v17  ;;  %4715 = vmatpush.msrb.mxu3 %v4422_v34  ;;  %v4355_v43 = vsel %vm4351_vm1, %v6730_v46, %v6731_v35  ;;  %v4359_v39 = vsel %vm4351_vm1, %v6731_v35, %v6730_v46  ;;  %v4354_v24 = vsel %vm4351_vm1, %v6720_v50, %v6721_v44 }
 0x521   :  { %4574 = vmatmul.f32.gmra.mxu3 %v4437_v27  ;;  %4661 = vmatmul.f32.gmra.mxu0 %v4437_v27  ;;  %v4358_v51 = vsel %vm4351_vm1, %v6721_v44, %v6720_v50  ;;  %v4737_v44 = vld [vmem:[%s13691_s11] sm:$0x3] }
 0x522   :  { %4588 = vmatpush.msrb.mxu1 %v4355_v43  ;;  %4675 = vmatpush.msrb.mxu2 %v4359_v39  ;;  %v4739_v53 = vperm.slane %v4737_v44, 0 }
 0x524   :  { %4589 = vmatpush.msrb.mxu1 %v4354_v24  ;;  %4676 = vmatpush.msrb.mxu2 %v4358_v51 }
 0x525   :  { %5678 = vmatmul.msk.f32.gmra.mxu2 %vm4542_vm0, %v12896_v20  ;;  %v6749_v60 = vpop.permute.xlu1 %6748  ;;  %v6734_v30 = vpop.permute.xlu0 %6733 }
 0x526   :  { %v6736_v26 = vunpack.i.h.bf16 %v6734_v30  ;;  %v6735_v37 = vunpack.i.l.bf16 %v6734_v30  ;;  %4590 = vmatpush.msrb.mxu1 %v4353_v7  ;;  %4677 = vmatpush.msrb.mxu2 %v4357_v29  ;;  %v6751_v19 = vunpack.i.h.bf16 %v6749_v60  ;;  %v6750_v41 = vunpack.i.l.bf16 %v6749_v60 }
 0x527   :  { %v4740_v60 = vperm.slane %v4737_v44, 1 }
 0x528   :  { %v4352_v36 = vsel %vm4351_vm1, %v6735_v37, %v6736_v26  ;;  %v4356_v58 = vsel %vm4351_vm1, %v6736_v26, %v6735_v37  ;;  %v4322_v42 = vsel %vm1241_vm4, %v6750_v41, %v6751_v19  ;;  %v4326_v12 = vsel %vm1241_vm4, %v6751_v19, %v6750_v41 }
 0x529   :  { %4577 = vmatmul.f32.gmra.mxu3 %v4440_v47  ;;  %4664 = vmatmul.f32.gmra.mxu0 %v4440_v47 }
 0x52a   :  { %4591 = vmatpush.msrb.mxu1 %v4352_v36  ;;  %4678 = vmatpush.msrb.mxu2 %v4356_v58 }
 0x52c   :  { %4592 = vmatpush.msrb.mxu1 %v4322_v42  ;;  %4679 = vmatpush.msrb.mxu2 %v4326_v12 }
 0x52d   :  { %5679 = vmatmul.msk.f32.gmra.mxu2 %vm4542_vm0, %v4442_v2  ;;  %v6754_v59 = vpop.permute.xlu1 %6753  ;;  %v6744_v45 = vpop.permute.xlu0 %6743 }
 0x52e   :  { %v6746_v22 = vunpack.i.h.bf16 %v6744_v45  ;;  %v6745_v62 = vunpack.i.l.bf16 %v6744_v45  ;;  %4593 = vmatpush.msrb.mxu1 %v4321_v57  ;;  %4680 = vmatpush.msrb.mxu2 %v4325_v3  ;;  %v6756_v21 = vunpack.i.h.bf16 %v6754_v59  ;;  %v6755_v55 = vunpack.i.l.bf16 %v6754_v59 }
 0x530   :  { %v4320_v18 = vsel %vm1241_vm4, %v6745_v62, %v6746_v22  ;;  %v4324_v52 = vsel %vm1241_vm4, %v6746_v22, %v6745_v62  ;;  %v4319_v11 = vsel %vm1241_vm4, %v6755_v55, %v6756_v21  ;;  %v4323_v63 = vsel %vm1241_vm4, %v6756_v21, %v6755_v55 }
 0x531   :  { %4580 = vmatmul.f32.gmra.mxu3 %v4443_v54  ;;  %4667 = vmatmul.f32.gmra.mxu0 %v4443_v54 }
 0x532   :  { %4594 = vmatpush.msrb.mxu1 %v4320_v18  ;;  %4681 = vmatpush.msrb.mxu2 %v4324_v52 }
 0x534   :  { %4595 = vmatpush.msrb.mxu1 %v4319_v11  ;;  %4682 = vmatpush.msrb.mxu2 %v4323_v63 }
 0x535   :  { %5680 = vmatmul.msk.f32.gmra.mxu2 %vm4542_vm0, %v4445_v16  ;;  %v4530_v50 = vpop.permute.xlu1 %4529  ;;  %v4535_v47 = vpop.permute.xlu0 %4534 }
 0x536   :  { %4596 = vmatpush.msrb.mxu1 %v12651_v38  ;;  %4683 = vmatpush.msrb.mxu2 %v12653_v48 }
 0x538   :  { %4597 = vmatpush.msrb.mxu1 %v12642_v0  ;;  %4684 = vmatpush.msrb.mxu2 %v12644_v10  ;;  %v4438_v0 = vld [vmem:[%s13687_s7 + $0x20] sm:$0xff] }
 0x539   :  { %5681 = vmatmul.msk.f32.vlgmr.msrb.gmra.mxu3 %vm4542_vm0, %v12861_v56  ;;  %v12968_v56 = vpop.permute.xlu2 %4539 }
 0x53a   :  { %4598 = vmatpush.msrb.mxu1 %v12620_v28  ;;  %4685 = vmatpush.msrb.mxu2 %v12624_v9  ;;  %v4441_v28 = vld [vmem:[%s13687_s7 + $0x38] sm:$0xff] }
 0x53c   :  { %4599 = vmatpush.msrb.mxu1 %v12597_v61  ;;  %4686 = vmatpush.msrb.mxu2 %v12601_v15  ;;  %v4444_v61 = vld [vmem:[%s13687_s7 + $0x50] sm:$0xff] }
 0x53d   :  { %4600 = vmatmul.f32.vlgmr.msrb.gmra.mxu1 %v4435_v5  ;;  %4687 = vmatmul.f32.vlgmr.msrb.gmra.mxu2 %v4435_v5 }
 0x541   :  { %5682 = vmatmul.msk.f32.gmra.mxu3 %vm4542_vm0, %v12896_v20  ;;  %v4525_v25 = vpop.permute.xlu2 %4524 }
 0x545   :  { %4603 = vmatmul.f32.gmra.mxu1 %v4438_v0  ;;  %4690 = vmatmul.f32.gmra.mxu2 %v4438_v0 }
 0x549   :  { %5683 = vmatmul.msk.f32.gmra.mxu3 %vm4542_vm0, %v4442_v2 }
 0x54d   :  { %4606 = vmatmul.f32.gmra.mxu1 %v4441_v28  ;;  %4693 = vmatmul.f32.gmra.mxu2 %v4441_v28 }
 0x551   :  { %5684 = vmatmul.msk.f32.gmra.mxu3 %vm4542_vm0, %v4445_v16 }
 0x555   :  { %4609 = vmatmul.f32.gmra.mxu1 %v4444_v61  ;;  %4696 = vmatmul.f32.gmra.mxu2 %v4444_v61 }
 0x596   :  { %v4659_v31 = vpop.f32.mrf.mxu0 }
 0x597   :  { %v4660_v32 = vadd.f32 %v4659_v31, %v4525_v25 }
 0x59b   :  { %v4572_v15 = vpop.f32.mrf.mxu3 }
 0x59c   :  { %v4573_v13 = vadd.f32 %v4572_v15, %v4525_v25 }
 0x59e   :  { %v4662_v34 = vpop.f32.mrf.mxu0 }
 0x59f   :  { %v4663_v29 = vadd.f32 %v4662_v34, %v4530_v50 }
 0x5a0   :  { %v4630_v9 = vpop.f32.mrf.mxu2 }
 0x5a4   :  { %v4575_v10 = vpop.f32.mrf.mxu3 }
 0x5a5   :  { %v4576_v43 = vadd.f32 %v4575_v10, %v4530_v50 }
 0x5a6   :  { %v4665_v1 = vpop.f32.mrf.mxu0 }
 0x5a7   :  { %v4666_v45 = vadd.f32 %v4665_v1, %v4535_v47 }
 0x5a8   :  { %v4633_v38 = vpop.f32.mrf.mxu2 }
 0x5ac   :  { %v4578_v48 = vpop.f32.mrf.mxu3 }
 0x5ad   :  { %v4579_v41 = vadd.f32 %v4578_v48, %v4535_v47 }
 0x5ae   :  { %v4668_v16 = vpop.f32.mrf.mxu0 }
 0x5af   :  { %v4669_v0 = vadd.f32 %v4668_v16, %v12968_v56 }
 0x5b0   :  { %v4636_v40 = vpop.f32.mrf.mxu2 }
 0x5b4   :  { %v4581_v23 = vpop.f32.mrf.mxu3 }
 0x5b8   :  { %v12970_v4 = vpop.f32.mrf.mxu2 }
 0x5ba   :  { %v4601_v6 = vpop.f32.mrf.mxu1 }
 0x5bb   :  { %v4602_v35 = vadd.f32 %v4601_v6, %v4573_v13 }
 0x5bc   :  { %v4717_v46 = vpop.f32.mrf.mxu3 }
 0x5bd   :  { %v4631_v27 = vadd.f32 %v4630_v9, %v4602_v35  ;;  %v4582_v9 = vadd.f32 %v4581_v23, %v12968_v56  ;;  %v5101_v35 = vld [vmem:[%s13690_s10 + $0x10] sm:$0xff] }
 0x5bf   :  { %v4729_v20 = vmax.f32 %v4631_v27, 0.0  ;;  %v5100_v27 = vld [vmem:[%s13690_s10 + $0x8] sm:$0xff] }
 0x5c0   :  { %v4688_v17 = vpop.f32.mrf.mxu2 }
 0x5c1   :  { %v4689_v39 = vadd.f32 %v4688_v17, %v4660_v32  ;;  %v12975_v49 = vmul.f32 %v4739_v53, %v4729_v20 }
 0x5c2   :  { %v4604_v8 = vpop.f32.mrf.mxu1 }
 0x5c3   :  { %v4605_v24 = vadd.f32 %v4604_v8, %v4576_v43  ;;  %v4718_v51 = vadd.f32 %v4717_v46, %v4689_v39  ;;  %v5102_v46 = vld [vmem:[%s13690_s10 + $0x18] sm:$0xff] }
 0x5c4   :  { %v4720_v7 = vpop.f32.mrf.mxu3 }
 0x5c5   :  { %v4730_v30 = vmax.f32 %v4718_v51, 0.0  ;;  %v4634_v26 = vadd.f32 %v4633_v38, %v4605_v24 }
 0x5c7   :  { %v12977_v37 = vmul.f32 %v4740_v60, %v4730_v30  ;;  %v4731_v2 = vmax.f32 %v4634_v26, 0.0 }
 0x5c8   :  { %v4691_v19 = vpop.f32.mrf.mxu2 }
 0x5c9   :  { %v4692_v36 = vadd.f32 %v4691_v19, %v4663_v29  ;;  %v12981_v58 = vpack.i.bf16 %v12977_v37, %v12975_v49  ;;  %v12987_v57 = vmul.f32 %v4739_v53, %v4731_v2 }
 0x5ca   :  { %v4607_v14 = vpop.f32.mrf.mxu1 }
 0x5cb   :  { %v4608_v42 = vadd.f32 %v4607_v14, %v4579_v41  ;;  %v4721_v12 = vadd.f32 %v4720_v7, %v4692_v36  ;;  %6768 = vrot.lane.b32.xlu1 %v12981_v58, %s7241_s5  ;;  %6758 = vrot.lane.b32.xlu2 %v12981_v58, %s7239_s19 }
 0x5cc   :  { %v4723_v54 = vpop.f32.mrf.mxu3 }
 0x5cd   :  { %v4732_v59 = vmax.f32 %v4721_v12, 0.0  ;;  %v4637_v3 = vadd.f32 %v4636_v40, %v4608_v42 }
 0x5cf   :  { %v12989_v22 = vmul.f32 %v4740_v60, %v4732_v59  ;;  %v4733_v18 = vmax.f32 %v4637_v3, 0.0 }
 0x5d0   :  { %v4694_v62 = vpop.f32.mrf.mxu2 }
 0x5d1   :  { %v4695_v21 = vadd.f32 %v4694_v62, %v4666_v45  ;;  %v6777_v55 = vpack.i.bf16 %v12989_v22, %v12987_v57  ;;  %v12998_v63 = vmul.f32 %v4739_v53, %v4733_v18 }
 0x5d2   :  { %v4610_v61 = vpop.f32.mrf.mxu1 }
 0x5d3   :  { %v4724_v52 = vadd.f32 %v4723_v54, %v4695_v21  ;;  %6778 = vrot.lane.b32.xlu0 %v6777_v55, %s7239_s19  ;;  %6773 = vrot.lane.b32.xlu1 %v12981_v58, %s7245_s23  ;;  %v4611_v48 = vadd.f32 %v4610_v61, %v4582_v9 }
 0x5d4   :  { %6763 = vrot.lane.b32.xlu2 %v12981_v58, %s7244_s2  ;;  %v4726_v38 = vpop.f32.mrf.mxu3 }
 0x5d5   :  { %v4734_v11 = vmax.f32 %v4724_v52, 0.0  ;;  %v4640_v31 = vadd.f32 %v12970_v4, %v4611_v48  ;;  %v5099_v4 = vld [vmem:[%s13690_s10] sm:$0xff] }
 0x5d7   :  { %v13000_v5 = vmul.f32 %v4740_v60, %v4734_v11  ;;  %v4735_v13 = vmax.f32 %v4640_v31, 0.0 }
 0x5d8   :  { %v4697_v28 = vpop.f32.mrf.mxu2 }
 0x5d9   :  { %v6797_v15 = vpack.i.bf16 %v13000_v5, %v12998_v63  ;;  %v4698_v10 = vadd.f32 %v4697_v28, %v4669_v0  ;;  %v13015_v23 = vmul.f32 %v4739_v53, %v4735_v13 }
 0x5db   :  { %6783 = vrot.lane.b32.xlu0 %v6777_v55, %s7244_s2  ;;  %6798 = vrot.lane.b32.xlu1 %v6797_v15, %s7239_s19  ;;  %v4727_v40 = vadd.f32 %v4726_v38, %v4698_v10 }
 0x5dc   :  { %6788 = vrot.lane.b32.xlu2 %v6777_v55, %s7241_s5 }
 0x5dd   :  { %v4736_v25 = vmax.f32 %v4727_v40, 0.0 }
 0x5df   :  { %v13013_v56 = vmul.f32 %v4740_v60, %v4736_v25 }
 0x5e1   :  { %v6822_v6 = vpack.i.bf16 %v13013_v56, %v13015_v23 }
 0x5e3   :  { %6808 = vrot.lane.b32.xlu0 %v6797_v15, %s7241_s5  ;;  %6803 = vrot.lane.b32.xlu1 %v6797_v15, %s7244_s2 }
 0x5e4   :  { %6793 = vrot.lane.b32.xlu2 %v6777_v55, %s7245_s23 }
 0x5eb   :  { %6813 = vrot.lane.b32.xlu0 %v6797_v15, %s7245_s23  ;;  %6833 = vrot.lane.b32.xlu1 %v6777_v55, %s7240_s6 }
 0x5ec   :  { %6823 = vrot.lane.b32.xlu2 %v6822_v6, %s7244_s2 }
 0x5f3   :  { %6818 = vrot.lane.b32.xlu0 %v6822_v6, %s7239_s19  ;;  %6848 = vrot.lane.b32.xlu1 %v6822_v6, %s7241_s5 }
 0x5f4   :  { %6828 = vrot.lane.b32.xlu2 %v6797_v15, %s7240_s6 }
 0x5fb   :  { %6843 = vrot.lane.b32.xlu0 %v12981_v58, %s7240_s6  ;;  %6853 = vrot.lane.b32.xlu1 %v6822_v6, %s7245_s23 }
 0x5fc   :  { %6838 = vrot.lane.b32.xlu2 %v6797_v15, %s7235_s29 }
 0x603   :  { %6863 = vrot.lane.b32.xlu0 %v6822_v6, %s7240_s6  ;;  %6858 = vrot.lane.b32.xlu1 %v6777_v55, %s7235_s29 }
 0x604   :  { %6883 = vrot.lane.b32.xlu2 %v6822_v6, %s7243_s22 }
 0x60b   :  { %6868 = vrot.lane.b32.xlu0 %v6822_v6, %s7235_s29  ;;  %6878 = vrot.lane.b32.xlu1 %v6797_v15, %s7243_s22 }
 0x60c   :  { %6888 = vrot.lane.b32.xlu2 %v6777_v55, %s7243_s22 }
 0x613   :  { %6873 = vrot.lane.b32.xlu0 %v12981_v58, %s7235_s29  ;;  %6908 = vrot.lane.b32.xlu1 %v6822_v6, %s7242_s21 }
 0x614   :  { %6898 = vrot.lane.b32.xlu2 %v6797_v15, %s7242_s21 }
 0x61b   :  { %6893 = vrot.lane.b32.xlu0 %v12981_v58, %s7243_s22  ;;  %6913 = vrot.lane.b32.xlu1 %v12981_v58, %s7242_s21 }
 0x61c   :  { %5105 = vperm.xlu2 %6356, %v5099_v4  }
 0x623   :  { %6903 = vrot.lane.b32.xlu0 %v6777_v55, %s7242_s21  ;;  %5115 = vperm.xlu1 %6355, %v5101_v35  }
 0x624   :  { %5120 = vperm.xlu2 %6356, %v5102_v46  }
 0x625   :  { %v13053_v32 = vpop.permute.xlu2 %6758 }
 0x626   :  { %v6761_v28 = vunpack.i.h.bf16 %v13053_v32  ;;  %v6760_v61 = vunpack.i.l.bf16 %v13053_v32 }
 0x628   :  { %v4867_v4 = vsel %vm1080_vm6, %v6761_v28, %v6760_v61  ;;  %v4863_v35 = vsel %vm1080_vm6, %v6760_v61, %v6761_v28 }
 0x62b   :  { %5110 = vperm.xlu0 %5714, %v5100_v27  }
 0x62e   :  { %v13058_v44 = vpop.permute.xlu2 %6763 }
 0x62f   :  { %v6766_v36 = vunpack.i.h.bf16 %v13058_v44  ;;  %v6765_v58 = vunpack.i.l.bf16 %v13058_v44 }
 0x631   :  { %v4967_v42 = vsel %vm4384_vm11, %v6765_v58, %v6766_v36 }
 0x636   :  { %v13060_v50 = vpop.permute.xlu2 %6788 }
 0x63d   :  { %v13062_v17 = vpop.permute.xlu1 %6768 }
 0x63e   :  { %v13064_v34 = vpop.permute.xlu2 %6793 }
 0x645   :  { %v6779_v43 = vpop.permute.xlu0 %6778  ;;  %v13066_v39 = vpop.permute.xlu1 %6773 }
 0x646   :  { %v6824_v53 = vpop.permute.xlu2 %6823  ;;  %v6781_v52 = vunpack.i.h.bf16 %v6779_v43  ;;  %v6780_v16 = vunpack.i.l.bf16 %v6779_v43 }
 0x647   :  { %v6826_v8 = vunpack.i.h.bf16 %v6824_v53  ;;  %v6825_v20 = vunpack.i.l.bf16 %v6824_v53 }
 0x648   :  { %v4868_v48 = vsel %vm1080_vm6, %v6781_v52, %v6780_v16  ;;  %v4864_v40 = vsel %vm1080_vm6, %v6780_v16, %v6781_v52 }
 0x649   :  { %v4970_v24 = vsel %vm4384_vm11, %v6825_v20, %v6826_v8  ;;  %v13072_v51 = vsel %vm4384_vm11, %v6826_v8, %v6825_v20  ;;  %v6791_v8 = vunpack.i.h.bf16 %v13060_v50  ;;  %v6790_v20 = vunpack.i.l.bf16 %v13060_v50 }
 0x64a   :  { %5164 = vmatpush.msrb.mxu0 %v4970_v24  ;;  %v6771_v24 = vunpack.i.h.bf16 %v13062_v17  ;;  %v6770_v50 = vunpack.i.l.bf16 %v13062_v17 }
 0x64d   :  { %v13074_v60 = vpop.permute.xlu0 %6783  ;;  %v6799_v30 = vpop.permute.xlu1 %6798 }
 0x64e   :  { %v6786_v26 = vunpack.i.h.bf16 %v13074_v60  ;;  %v6785_v47 = vunpack.i.l.bf16 %v13074_v60  ;;  %v13092_v1 = vpop.permute.xlu2 %6828  ;;  %v6801_v54 = vunpack.i.h.bf16 %v6799_v30  ;;  %v6800_v21 = vunpack.i.l.bf16 %v6799_v30 }
 0x64f   :  { %v6796_v30 = vunpack.i.h.bf16 %v13064_v34  ;;  %v6831_v61 = vunpack.i.h.bf16 %v13092_v1 }
 0x650   :  { %v4968_v2 = vsel %vm4384_vm11, %v6785_v47, %v6786_v26  ;;  %v4869_v15 = vsel %vm1080_vm6, %v6801_v54, %v6800_v21  ;;  %v4865_v9 = vsel %vm1080_vm6, %v6800_v21, %v6801_v54 }
 0x655   :  { %v13076_v7 = vpop.permute.xlu0 %6808  ;;  %v13078_v29 = vpop.permute.xlu1 %6803 }
 0x656   :  { %v6806_v19 = vunpack.i.h.bf16 %v13078_v29  ;;  %v6805_v41 = vunpack.i.l.bf16 %v13078_v29  ;;  %v13110_v45 = vpop.permute.xlu2 %6838  ;;  %v6811_v31 = vunpack.i.h.bf16 %v13076_v7  ;;  %v6810_v25 = vunpack.i.l.bf16 %v13076_v7 }
 0x657   :  { %v6795_v7 = vunpack.i.l.bf16 %v13064_v34  ;;  %v4972_v29 = vsel %vm4384_vm11, %v6786_v26, %v6785_v47  ;;  %v5019_v47 = vld [vmem:[%s13689_s9 + $0x20] sm:$0xff]  ;;  %v5022_v34 = vld [vmem:[%s13689_s9 + $0x38] sm:$0xff] }
 0x658   :  { %v4969_v14 = vsel %vm4384_vm11, %v6805_v41, %v6806_v19  ;;  %v4837_v54 = vsel %vm4246_vm12, %v6811_v31, %v6810_v25  ;;  %v4833_v21 = vsel %vm4246_vm12, %v6810_v25, %v6811_v31 }
 0x659   :  { %5165 = vmatpush.msrb.mxu0 %v4969_v14 }
 0x65b   :  { %5166 = vmatpush.msrb.mxu0 %v4968_v2 }
 0x65d   :  { %v13106_v12 = vpop.permute.xlu0 %6813  ;;  %v13108_v59 = vpop.permute.xlu1 %6833  ;;  %5167 = vmatpush.msrb.mxu0 %v4967_v42  ;;  %v6776_v42 = vunpack.i.h.bf16 %v13066_v39 }
 0x65e   :  { %v6816_v46 = vunpack.i.h.bf16 %v13106_v12  ;;  %v6815_v32 = vunpack.i.l.bf16 %v13106_v12  ;;  %v13138_v27 = vpop.permute.xlu2 %6883 }
 0x660   :  { %v4937_v17 = vsel %vm4351_vm1, %v6815_v32, %v6816_v46 }
 0x665   :  { %v6819_v3 = vpop.permute.xlu0 %6818  ;;  %v6849_v62 = vpop.permute.xlu1 %6848 }
 0x666   :  { %v6821_v55 = vunpack.i.h.bf16 %v6819_v3  ;;  %v6820_v18 = vunpack.i.l.bf16 %v6819_v3  ;;  %v6851_v10 = vunpack.i.h.bf16 %v6849_v62  ;;  %v6850_v38 = vunpack.i.l.bf16 %v6849_v62  ;;  %v6889_v31 = vpop.permute.xlu2 %6888 }
 0x667   :  { %v6775_v3 = vunpack.i.l.bf16 %v13066_v39 }
 0x668   :  { %v4870_v11 = vsel %vm1080_vm6, %v6821_v55, %v6820_v18  ;;  %v4866_v0 = vsel %vm1080_vm6, %v6820_v18, %v6821_v55  ;;  %v4838_v14 = vsel %vm4246_vm12, %v6851_v10, %v6850_v38  ;;  %v4834_v62 = vsel %vm4246_vm12, %v6850_v38, %v6851_v10 }
 0x669   :  { %5135 = vmatpush.msra.mxu1 %v4870_v11  ;;  %5222 = vmatpush.msra.mxu3 %v4866_v0  ;;  %v4836_v55 = vsel %vm4246_vm12, %v6791_v8, %v6790_v20  ;;  %v4936_v18 = vsel %vm4351_vm1, %v6795_v7, %v6796_v30  ;;  %v4832_v11 = vsel %vm4246_vm12, %v6790_v20, %v6791_v8  ;;  %v6886_v20 = vunpack.i.h.bf16 %v13138_v27 }
 0x66a   :  { %v4835_v0 = vsel %vm4246_vm12, %v6771_v24, %v6770_v50  ;;  %v4935_v28 = vsel %vm4351_vm1, %v6775_v3, %v6776_v42  ;;  %v4831_v38 = vsel %vm4246_vm12, %v6770_v50, %v6771_v24  ;;  %v4939_v12 = vsel %vm4351_vm1, %v6776_v42, %v6775_v3  ;;  %v5025_v42 = vld [vmem:[%s13689_s9 + $0x50] sm:$0xff]  ;;  %v5023_v3 = vld [vmem:[%s13689_s9 + $0x40] sm:$0xff] }
 0x66b   :  { %5136 = vmatpush.msra.mxu1 %v4869_v15  ;;  %5223 = vmatpush.msra.mxu3 %v4865_v9  ;;  %v6830_v15 = vunpack.i.l.bf16 %v13092_v1 }
 0x66d   :  { %v13128_v13 = vpop.permute.xlu0 %6843  ;;  %v13130_v6 = vpop.permute.xlu1 %6853  ;;  %5137 = vmatpush.msra.mxu1 %v4868_v48  ;;  %5224 = vmatpush.msra.mxu3 %v4864_v40  ;;  %v6836_v48 = vunpack.i.h.bf16 %v13108_v59  ;;  %v6835_v40 = vunpack.i.l.bf16 %v13108_v59  ;;  %v4805_v8 = vsel %vm4213_vm13, %v6831_v61, %v6830_v15  ;;  %v6885_v59 = vunpack.i.l.bf16 %v13138_v27 }
 0x66e   :  { %v6856_v43 = vunpack.i.h.bf16 %v13130_v6  ;;  %v6855_v53 = vunpack.i.l.bf16 %v13130_v6  ;;  %v4801_v24 = vsel %vm4213_vm13, %v6830_v15, %v6831_v61  ;;  %v4941_v6 = vsel %vm4351_vm1, %v6816_v46, %v6815_v32  ;;  %v5020_v46 = vld [vmem:[%s13689_s9 + $0x28] sm:$0xff] }
 0x66f   :  { %5138 = vmatpush.msra.mxu1 %v4867_v4  ;;  %5225 = vmatpush.msra.mxu3 %v4863_v35  ;;  %v6846_v4 = vunpack.i.h.bf16 %v13128_v13  ;;  %v6845_v35 = vunpack.i.l.bf16 %v13128_v13  ;;  %v6840_v13 = vunpack.i.l.bf16 %v13110_v45 }
 0x670   :  { %v4938_v2 = vsel %vm4351_vm1, %v6855_v53, %v6856_v43  ;;  %v4942_v44 = vsel %vm4351_vm1, %v6856_v43, %v6855_v53  ;;  %v4940_v43 = vsel %vm4351_vm1, %v6796_v30, %v6795_v7  ;;  %v5021_v53 = vld [vmem:[%s13689_s9 + $0x30] sm:$0xff]  ;;  %v5024_v7 = vld [vmem:[%s13689_s9 + $0x48] sm:$0xff] }
 0x671   :  { %5139 = vmatpush.msra.mxu1 %v4838_v14  ;;  %5168 = vmatpush.msrb.mxu0 %v4938_v2  ;;  %v4804_v14 = vsel %vm4213_vm13, %v6836_v48, %v6835_v40  ;;  %v6841_v2 = vunpack.i.h.bf16 %v13110_v45  ;;  %v4803_v27 = vsel %vm4213_vm13, %v6846_v4, %v6845_v35 }
 0x672   :  { %5226 = vmatpush.msra.mxu3 %v4834_v62 }
 0x673   :  { %5140 = vmatpush.msra.mxu1 %v4837_v54  ;;  %5169 = vmatpush.msrb.mxu0 %v4937_v17  ;;  %v4800_v54 = vsel %vm4213_vm13, %v6835_v40, %v6836_v48  ;;  %v4905_v40 = vsel %vm1241_vm4, %v6840_v13, %v6841_v2  ;;  %v4909_v32 = vsel %vm1241_vm4, %v6841_v2, %v6840_v13 }
 0x674   :  { %5227 = vmatpush.msra.mxu3 %v4833_v21 }
 0x675   :  { %v6864_v52 = vpop.permute.xlu0 %6863  ;;  %v13178_v16 = vpop.permute.xlu1 %6858  ;;  %5141 = vmatpush.msra.mxu1 %v4836_v55  ;;  %5170 = vmatpush.msrb.mxu0 %v4936_v18 }
 0x676   :  { %v6866_v9 = vunpack.i.h.bf16 %v6864_v52  ;;  %v6865_v10 = vunpack.i.l.bf16 %v6864_v52  ;;  %5228 = vmatpush.msra.mxu3 %v4832_v11  ;;  %v6891_v52 = vunpack.i.h.bf16 %v6889_v31  ;;  %v4799_v11 = vsel %vm4213_vm13, %v6845_v35, %v6846_v4 }
 0x677   :  { %5142 = vmatpush.msra.mxu1 %v4835_v0  ;;  %5171 = vmatpush.msrb.mxu0 %v4935_v28  ;;  %v4774_v0 = vsel %vm4180_vm15, %v6886_v20, %v6885_v59  ;;  %v6890_v28 = vunpack.i.l.bf16 %v6889_v31  ;;  %v6861_v61 = vunpack.i.h.bf16 %v13178_v16  ;;  %v6860_v15 = vunpack.i.l.bf16 %v13178_v16  ;;  %v5026_v16 = vld [vmem:[%s13689_s9 + $0x58] sm:$0xff] }
 0x678   :  { %5229 = vmatpush.msra.mxu3 %v4831_v38  ;;  %v4806_v25 = vsel %vm4213_vm13, %v6866_v9, %v6865_v10  ;;  %v4802_v1 = vsel %vm4213_vm13, %v6865_v10, %v6866_v9  ;;  %v4770_v10 = vsel %vm4180_vm15, %v6885_v59, %v6886_v20  ;;  %v6899_v38 = vpop.permute.xlu2 %6898 }
 0x679   :  { %5143 = vmatpush.msra.mxu1 %v4806_v25  ;;  %v4772_v25 = vsel %vm4180_vm15, %v6891_v52, %v6890_v28  ;;  %v6901_v4 = vunpack.i.h.bf16 %v6899_v38  ;;  %v6900_v35 = vunpack.i.l.bf16 %v6899_v38  ;;  %v4768_v59 = vsel %vm4180_vm15, %v6890_v28, %v6891_v52  ;;  %v5015_v28 = vld [vmem:[%s13689_s9] sm:$0xff] }
 0x67a   :  { %5230 = vmatpush.msra.mxu3 %v4802_v1  ;;  %v4904_v1 = vsel %vm1241_vm4, %v6860_v15, %v6861_v61  ;;  %v4908_v30 = vsel %vm1241_vm4, %v6861_v61, %v6860_v15 }
 0x67b   :  { %5144 = vmatpush.msra.mxu1 %v4805_v8  ;;  %v5005_v38 = vsel %vm4417_vm14, %v6901_v4, %v6900_v35 }
 0x67c   :  { %5231 = vmatpush.msra.mxu3 %v4801_v24 }
 0x67d   :  { %v13212_v50 = vpop.permute.xlu0 %6868  ;;  %v6879_v62 = vpop.permute.xlu1 %6878  ;;  %5145 = vmatpush.msra.mxu1 %v4804_v14 }
 0x67e   :  { %v6871_v17 = vunpack.i.h.bf16 %v13212_v50  ;;  %v6870_v21 = vunpack.i.l.bf16 %v13212_v50  ;;  %v6881_v55 = vunpack.i.h.bf16 %v6879_v62  ;;  %v6880_v18 = vunpack.i.l.bf16 %v6879_v62  ;;  %5232 = vmatpush.msra.mxu3 %v4800_v54 }
 0x67f   :  { %5146 = vmatpush.msra.mxu1 %v4803_v27 }
 0x680   :  { %5233 = vmatpush.msra.mxu3 %v4799_v11  ;;  %v4906_v9 = vsel %vm1241_vm4, %v6870_v21, %v6871_v17  ;;  %v4773_v48 = vsel %vm4180_vm15, %v6881_v55, %v6880_v18  ;;  %v4769_v31 = vsel %vm4180_vm15, %v6880_v18, %v6881_v55  ;;  %v5001_v18 = vsel %vm4417_vm14, %v6900_v35, %v6901_v4  ;;  %v5106_v61 = vpop.permute.xlu2 %5105 }
 0x681   :  { %5147 = vmatpush.msra.mxu1 %v4774_v0  ;;  %5172 = vmatpush.msrb.mxu0 %v4906_v9  ;;  %v4910_v39 = vsel %vm1241_vm4, %v6871_v17, %v6870_v21 }
 0x682   :  { %5234 = vmatpush.msra.mxu3 %v4770_v10 }
 0x683   :  { %5148 = vmatpush.msra.mxu1 %v4773_v48  ;;  %5173 = vmatpush.msrb.mxu0 %v4905_v40 }
 0x684   :  { %5235 = vmatpush.msra.mxu3 %v4769_v31 }
 0x685   :  { %v13252_v8 = vpop.permute.xlu0 %6873  ;;  %v6909_v20 = vpop.permute.xlu1 %6908  ;;  %5149 = vmatpush.msra.mxu1 %v4772_v25  ;;  %5174 = vmatpush.msrb.mxu0 %v4904_v1 }
 0x686   :  { %v6876_v24 = vunpack.i.h.bf16 %v13252_v8  ;;  %v6875_v14 = vunpack.i.l.bf16 %v13252_v8  ;;  %v6911_v62 = vunpack.i.h.bf16 %v6909_v20  ;;  %v6910_v54 = vunpack.i.l.bf16 %v6909_v20  ;;  %5236 = vmatpush.msra.mxu3 %v4768_v59 }
 0x688   :  { %v4903_v27 = vsel %vm1241_vm4, %v6875_v14, %v6876_v24  ;;  %v5002_v55 = vsel %vm4417_vm14, %v6910_v54, %v6911_v62  ;;  %v4907_v45 = vsel %vm1241_vm4, %v6876_v24, %v6875_v14 }
 0x689   :  { %5175 = vmatpush.msrb.mxu0 %v4903_v27  ;;  %5205 = vmatpush.msra.mxu2 %v5002_v55 }
 0x68b   :  { %5176 = vmatpush.msrb.mxu0 %v13015_v23  ;;  %5206 = vmatpush.msra.mxu2 %v5001_v18 }
 0x68d   :  { %v6894_v52 = vpop.permute.xlu0 %6893  ;;  %5177 = vmatpush.msrb.mxu0 %v12998_v63  ;;  %v13282_v63 = vld [vmem:[%s13689_s9 + $0x8] sm:$0xff]  ;;  %v6914_v23 = vpop.permute.xlu1 %6913 }
 0x68e   :  { %v6896_v11 = vunpack.i.h.bf16 %v6894_v52  ;;  %v6895_v0 = vunpack.i.l.bf16 %v6894_v52  ;;  %v6916_v31 = vunpack.i.h.bf16 %v6914_v23  ;;  %v6915_v25 = vunpack.i.l.bf16 %v6914_v23 }
 0x68f   :  { %5178 = vmatpush.msrb.mxu0 %v12987_v57  ;;  %v5006_v57 = vsel %vm4417_vm14, %v6911_v62, %v6910_v54 }
 0x690   :  { %v4771_v9 = vsel %vm4180_vm15, %v6896_v11, %v6895_v0  ;;  %v4767_v10 = vsel %vm4180_vm15, %v6895_v0, %v6896_v11  ;;  %v5003_v1 = vsel %vm4417_vm14, %v6916_v31, %v6915_v25 }
 0x691   :  { %5150 = vmatpush.msra.mxu1 %v4771_v9  ;;  %5179 = vmatpush.msrb.mxu0 %v12975_v49  ;;  %v4973_v49 = vsel %vm4384_vm11, %v6806_v19, %v6805_v41  ;;  %v5018_v19 = vld [vmem:[%s13689_s9 + $0x18] sm:$0xff]  ;;  %v4971_v41 = vsel %vm4384_vm11, %v6766_v36, %v6765_v58  ;;  %v5017_v36 = vld [vmem:[%s13689_s9 + $0x10] sm:$0xff]  ;;  %v4999_v58 = vsel %vm4417_vm14, %v6915_v25, %v6916_v31 }
 0x692   :  { %5237 = vmatpush.msra.mxu3 %v4767_v10  ;;  %5151 = vmatmul.f32.vlgmr.msra.gmra.mxu1 %v5015_v28 }
 0x693   :  { %5238 = vmatmul.f32.vlgmr.msra.gmra.mxu3 %v5015_v28  ;;  %5251 = vmatpush.msrb.mxu1 %v13072_v51 }
 0x694   :  { %5292 = vmatpush.msra.mxu0 %v5006_v57 }
 0x695   :  { %5180 = vmatmul.f32.vlgmr.msrb.gmra.mxu0 %v13282_v63  ;;  %5252 = vmatpush.msrb.mxu1 %v4973_v49  ;;  %v6904_v48 = vpop.permute.xlu0 %6903 }
 0x696   :  { %5293 = vmatpush.msra.mxu0 %v5005_v38  ;;  %v6906_v51 = vunpack.i.h.bf16 %v6904_v48  ;;  %v6905_v40 = vunpack.i.l.bf16 %v6904_v48 }
 0x697   :  { %5253 = vmatpush.msrb.mxu1 %v4972_v29 }
 0x698   :  { %v5000_v60 = vsel %vm4417_vm14, %v6905_v40, %v6906_v51  ;;  %v5004_v26 = vsel %vm4417_vm14, %v6906_v51, %v6905_v40 }
 0x699   :  { %5254 = vmatpush.msrb.mxu1 %v4971_v41  ;;  %5207 = vmatpush.msra.mxu2 %v5000_v60 }
 0x69a   :  { %5294 = vmatpush.msra.mxu0 %v5004_v26  ;;  %5154 = vmatmul.f32.gmra.mxu1 %v5018_v19  ;;  %v5121_v26 = vpop.permute.xlu2 %5120 }
 0x69b   :  { %5241 = vmatmul.f32.gmra.mxu3 %v5018_v19  ;;  %5255 = vmatpush.msrb.mxu1 %v4942_v44 }
 0x69c   :  { %5208 = vmatpush.msra.mxu2 %v4999_v58  ;;  %5295 = vmatpush.msra.mxu0 %v5003_v1 }
 0x69d   :  { %5183 = vmatmul.f32.gmra.mxu0 %v5019_v47  ;;  %5685 = vmatmul.msk.f32.vlgmr.msra.gmra.mxu2 %vm4542_vm0, %v5017_v36  ;;  %v5111_v24 = vpop.permute.xlu0 %5110 }
 0x69e   :  { %5256 = vmatpush.msrb.mxu1 %v4941_v6 }
 0x6a0   :  { %5257 = vmatpush.msrb.mxu1 %v4940_v43 }
 0x6a2   :  { %5258 = vmatpush.msrb.mxu1 %v4939_v12 }
 0x6a3   :  { %5157 = vmatmul.f32.gmra.mxu1 %v5021_v53  ;;  %5244 = vmatmul.f32.gmra.mxu3 %v5021_v53 }
 0x6a4   :  { %5259 = vmatpush.msrb.mxu1 %v4910_v39 }
 0x6a5   :  { %5186 = vmatmul.f32.gmra.mxu0 %v5022_v34  ;;  %5686 = vmatmul.msk.f32.gmra.mxu2 %vm4542_vm0, %v5020_v46 }
 0x6a6   :  { %5260 = vmatpush.msrb.mxu1 %v4909_v32 }
 0x6a8   :  { %5261 = vmatpush.msrb.mxu1 %v4908_v30 }
 0x6aa   :  { %5262 = vmatpush.msrb.mxu1 %v4907_v45 }
 0x6ab   :  { %5160 = vmatmul.f32.gmra.mxu1 %v5024_v7  ;;  %5247 = vmatmul.f32.gmra.mxu3 %v5024_v7 }
 0x6ac   :  { %5263 = vmatpush.msrb.mxu1 %v13013_v56 }
 0x6ad   :  { %5189 = vmatmul.f32.gmra.mxu0 %v5025_v42  ;;  %5687 = vmatmul.msk.f32.gmra.mxu2 %vm4542_vm0, %v5023_v3 }
 0x6ae   :  { %5264 = vmatpush.msrb.mxu1 %v13000_v5 }
 0x6b0   :  { %5265 = vmatpush.msrb.mxu1 %v12989_v22 }
 0x6b2   :  { %5266 = vmatpush.msrb.mxu1 %v12977_v37 }
 0x6b3   :  { %5267 = vmatmul.f32.vlgmr.msrb.gmra.mxu1 %v13282_v63  ;;  %v5116_v63 = vpop.permute.xlu1 %5115 }
 0x6b5   :  { %5688 = vmatmul.msk.f32.gmra.mxu2 %vm4542_vm0, %v5026_v16  ;;  %5689 = vmatmul.msk.f32.vlgmr.msra.gmra.mxu0 %vm4542_vm0, %v5017_v36 }
 0x6bb   :  { %5270 = vmatmul.f32.gmra.mxu1 %v5019_v47 }
 0x6bd   :  { %5690 = vmatmul.msk.f32.gmra.mxu0 %vm4542_vm0, %v5020_v46 }
 0x6c3   :  { %5273 = vmatmul.f32.gmra.mxu1 %v5022_v34 }
 0x6c5   :  { %5691 = vmatmul.msk.f32.gmra.mxu0 %vm4542_vm0, %v5023_v3 }
 0x6cb   :  { %5276 = vmatmul.f32.gmra.mxu1 %v5025_v42 }
 0x6cd   :  { %5692 = vmatmul.msk.f32.gmra.mxu0 %vm4542_vm0, %v5026_v16 }
 0x70f   :  { %v5152_v37 = vpop.f32.mrf.mxu1 }
 0x710   :  { %v5153_v4 = vadd.f32 %v5152_v37, %v5106_v61 }
 0x712   :  { %v5181_v22 = vpop.f32.mrf.mxu0 }
 0x713   :  { %v5182_v35 = vadd.f32 %v5181_v22, %v5153_v4  ;;  %v5428_v22 = vld [vmem:[%s13692_s12 + $0x78] sm:$0xff]  ;;  %v5423_v4 = vld [vmem:[%s13692_s12 + $0x50] sm:$0xff] }
 0x714   :  { %5445 = vmatpush.msrb.mxu2 %v5428_v22 }
 0x716   :  { %v5239_v50 = vpop.f32.mrf.mxu3 }
 0x717   :  { %v5155_v5 = vpop.f32.mrf.mxu1  ;;  %v5240_v8 = vadd.f32 %v5239_v50, %v5106_v61  ;;  %v5442_v50 = vld [vmem:[%s13692_s12 + $0xe8] sm:$0xff]  ;;  %v5424_v61 = vld [vmem:[%s13692_s12 + $0x58] sm:$0xff] }
 0x718   :  { %v5156_v54 = vadd.f32 %v5155_v5, %v5111_v24  ;;  %v5444_v5 = vld [vmem:[%s13692_s12 + $0xf8] sm:$0xff] }
 0x719   :  { %5474 = vmatpush.msrb.mxu3 %v5444_v5 }
 0x71a   :  { %v5184_v56 = vpop.f32.mrf.mxu0 }
 0x71b   :  { %v5185_v0 = vadd.f32 %v5184_v56, %v5156_v54  ;;  %v5427_v56 = vld [vmem:[%s13692_s12 + $0x70] sm:$0xff]  ;;  %v5436_v54 = vld [vmem:[%s13692_s12 + $0xb8] sm:$0xff] }
 0x71c   :  { %5446 = vmatpush.msrb.mxu2 %v5427_v56 }
 0x71e   :  { %v5242_v20 = vpop.f32.mrf.mxu3 }
 0x71f   :  { %v5243_v28 = vadd.f32 %v5242_v20, %v5111_v24  ;;  %v5438_v20 = vld [vmem:[%s13692_s12 + $0xc8] sm:$0xff]  ;;  %v5437_v24 = vld [vmem:[%s13692_s12 + $0xc0] sm:$0xff] }
 0x720   :  { %v5158_v2 = vpop.f32.mrf.mxu1  ;;  %v5210_v17 = vpop.f32.mrf.mxu2 }
 0x721   :  { %v13407_v14 = vadd.f32 %v5210_v17, %v5182_v35  ;;  %v5159_v49 = vadd.f32 %v5158_v2, %v5116_v63  ;;  %v5443_v2 = vld [vmem:[%s13692_s12 + $0xf0] sm:$0xff]  ;;  %v5425_v17 = vld [vmem:[%s13692_s12 + $0x60] sm:$0xff] }
 0x722   :  { %v5187_v13 = vpop.f32.mrf.mxu0  ;;  %5475 = vmatpush.msrb.mxu3 %v5443_v2  ;;  %v5439_v35 = vld [vmem:[%s13692_s12 + $0xd0] sm:$0xff] }
 0x723   :  { %v5309_v52 = vmax.f32 %v13407_v14, 0.0  ;;  %v5188_v25 = vadd.f32 %v5187_v13, %v5159_v49  ;;  %v5426_v13 = vld [vmem:[%s13692_s12 + $0x68] sm:$0xff]  ;;  %v5415_v49 = vld [vmem:[%s13692_s12 + $0x10] sm:$0xff] }
 0x724   :  { %5447 = vmatpush.msrb.mxu2 %v5426_v13  ;;  %5476 = vmatpush.msrb.mxu3 %v5442_v50 }
 0x726   :  { %v5245_v38 = vpop.f32.mrf.mxu3  ;;  %5448 = vmatpush.msrb.mxu2 %v5425_v17 }
 0x727   :  { %v5246_v19 = vadd.f32 %v5245_v38, %v5116_v63  ;;  %v5416_v63 = vld [vmem:[%s13692_s12 + $0x18] sm:$0xff]  ;;  %v5431_v38 = vld [vmem:[%s13692_s12 + $0x90] sm:$0xff] }
 0x728   :  { %v5161_v21 = vpop.f32.mrf.mxu1  ;;  %v5213_v27 = vpop.f32.mrf.mxu2  ;;  %5449 = vmatpush.msrb.mxu2 %v5424_v61 }
 0x729   :  { %v13417_v57 = vadd.f32 %v5213_v27, %v5185_v0  ;;  %v5162_v36 = vadd.f32 %v5161_v21, %v5121_v26  ;;  %v5441_v21 = vld [vmem:[%s13692_s12 + $0xe0] sm:$0xff]  ;;  %v5419_v27 = vld [vmem:[%s13692_s12 + $0x30] sm:$0xff]  ;;  %v5418_v0 = vld [vmem:[%s13692_s12 + $0x28] sm:$0xff] }
 0x72a   :  { %v5190_v15 = vpop.f32.mrf.mxu0  ;;  %5477 = vmatpush.msrb.mxu3 %v5441_v21  ;;  %5450 = vmatpush.msrb.mxu2 %v5423_v4 }
 0x72b   :  { %v5311_v29 = vmax.f32 %v13417_v57, 0.0  ;;  %v5191_v12 = vadd.f32 %v5190_v15, %v5162_v36  ;;  %v5440_v15 = vld [vmem:[%s13692_s12 + $0xd8] sm:$0xff] }
 0x72c   :  { %5478 = vmatpush.msrb.mxu3 %v5440_v15 }
 0x72e   :  { %v5248_v6 = vpop.f32.mrf.mxu3  ;;  %5479 = vmatpush.msrb.mxu3 %v5439_v35 }
 0x72f   :  { %v5249_v46 = vadd.f32 %v5248_v6, %v5121_v26 }
 0x730   :  { %v5268_v59 = vpop.f32.mrf.mxu1  ;;  %v5216_v40 = vpop.f32.mrf.mxu2  ;;  %5480 = vmatpush.msrb.mxu3 %v5438_v20 }
 0x731   :  { %v5269_v62 = vadd.f32 %v5268_v59, %v5240_v8  ;;  %v13430_v44 = vadd.f32 %v5216_v40, %v5188_v25  ;;  %v5422_v8 = vld [vmem:[%s13692_s12 + $0x48] sm:$0xff]  ;;  %v5421_v59 = vld [vmem:[%s13692_s12 + $0x40] sm:$0xff] }
 0x732   :  { %v5297_v55 = vpop.f32.mrf.mxu0  ;;  %5451 = vmatpush.msrb.mxu2 %v5422_v8  ;;  %5481 = vmatpush.msrb.mxu3 %v5437_v24  ;;  %v5430_v40 = vld [vmem:[%s13692_s12 + $0x88] sm:$0xff]  ;;  %v5413_v25 = vld [vmem:[%s13692_s12] sm:$0xff] }
 0x733   :  { %v13409_v18 = vadd.f32 %v5297_v55, %v5269_v62  ;;  %v5313_v43 = vmax.f32 %v13430_v44, 0.0  ;;  %v5420_v62 = vld [vmem:[%s13692_s12 + $0x38] sm:$0xff]  ;;  %v5435_v55 = vld [vmem:[%s13692_s12 + $0xb0] sm:$0xff] }
 0x734   :  { %5452 = vmatpush.msrb.mxu2 %v5421_v59  ;;  %5482 = vmatpush.msrb.mxu3 %v5436_v54 }
 0x735   :  { %v5310_v11 = vmax.f32 %v13409_v18, 0.0 }
 0x736   :  { %5453 = vmatpush.msrb.mxu2 %v5420_v62  ;;  %5483 = vmatpush.msrb.mxu3 %v5435_v55 }
 0x737   :  { %v6927_v9 = vpack.i.bf16 %v5310_v11, %v5309_v52 }
 0x738   :  { %v5271_v10 = vpop.f32.mrf.mxu1  ;;  %v5219_v34 = vpop.f32.mrf.mxu2  ;;  %5454 = vmatpush.msrb.mxu2 %v5419_v27 }
 0x739   :  { %v5272_v23 = vadd.f32 %v5271_v10, %v5243_v28  ;;  %6928 = vrot.lane.b32.xlu2 %v6927_v9, %s7242_s21  ;;  %6923 = vrot.lane.b32.xlu1 %v6927_v9, %s7244_s2  ;;  %v13443_v30 = vadd.f32 %v5219_v34, %v5191_v12  ;;  %v5434_v28 = vld [vmem:[%s13692_s12 + $0xa8] sm:$0xff]  ;;  %v5433_v10 = vld [vmem:[%s13692_s12 + $0xa0] sm:$0xff] }
 0x73a   :  { %6918 = vrot.lane.b32.xlu0 %v6927_v9, %s7235_s29  ;;  %v5300_v48 = vpop.f32.mrf.mxu0  ;;  %v5417_v9 = vld [vmem:[%s13692_s12 + $0x20] sm:$0xff]  ;;  %5455 = vmatpush.msrb.mxu2 %v5418_v0 }
 0x73b   :  { %v13422_v51 = vadd.f32 %v5300_v48, %v5272_v23  ;;  %v5315_v3 = vmax.f32 %v13443_v30, 0.0  ;;  %5484 = vmatpush.msrb.mxu3 %v5434_v28  ;;  %v5432_v23 = vld [vmem:[%s13692_s12 + $0x98] sm:$0xff]  ;;  %v5414_v48 = vld [vmem:[%s13692_s12 + $0x8] sm:$0xff]  ;;  %v5545_v30 = vld [vmem:[%s13695_s15 + $0x50] sm:$0xff] }
 0x73c   :  { %5456 = vmatpush.msrb.mxu2 %v5417_v9 }
 0x73d   :  { %v5312_v31 = vmax.f32 %v13422_v51, 0.0  ;;  %5485 = vmatpush.msrb.mxu3 %v5433_v10 }
 0x73e   :  { %5457 = vmatpush.msrb.mxu2 %v5416_v63 }
 0x73f   :  { %v6942_v41 = vpack.i.bf16 %v5312_v31, %v5311_v29  ;;  %5486 = vmatpush.msrb.mxu3 %v5432_v23 }
 0x740   :  { %v5274_v60 = vpop.f32.mrf.mxu1  ;;  %5458 = vmatpush.msrb.mxu2 %v5415_v49 }
 0x741   :  { %v5275_v47 = vadd.f32 %v5274_v60, %v5246_v19  ;;  %6943 = vrot.lane.b32.xlu2 %v6942_v41, %s7242_s21  ;;  %6938 = vrot.lane.b32.xlu1 %v6942_v41, %s7244_s2  ;;  %v5429_v19 = vld [vmem:[%s13692_s12 + $0x80] sm:$0xff] }
 0x742   :  { %6933 = vrot.lane.b32.xlu0 %v6942_v41, %s7235_s29  ;;  %v5303_v58 = vpop.f32.mrf.mxu0  ;;  %5487 = vmatpush.msrb.mxu3 %v5431_v38 }
 0x743   :  { %v13435_v1 = vadd.f32 %v5303_v58, %v5275_v47  ;;  %5459 = vmatpush.msrb.mxu2 %v5414_v48 }
 0x744   :  { %5488 = vmatpush.msrb.mxu3 %v5430_v40 }
 0x745   :  { %v5314_v53 = vmax.f32 %v13435_v1, 0.0  ;;  %5460 = vmatpush.msrb.mxu2 %v5413_v25 }
 0x746   :  { %5489 = vmatpush.msrb.mxu3 %v5429_v19 }
 0x747   :  { %v6957_v39 = vpack.i.bf16 %v5314_v53, %v5313_v43 }
 0x748   :  { %v5277_v32 = vpop.f32.mrf.mxu1 }
 0x749   :  { %v5278_v7 = vadd.f32 %v5277_v32, %v5249_v46  ;;  %6958 = vrot.lane.b32.xlu2 %v6957_v39, %s7242_s21  ;;  %6953 = vrot.lane.b32.xlu1 %v6957_v39, %s7244_s2 }
 0x74a   :  { %6948 = vrot.lane.b32.xlu0 %v6957_v39, %s7235_s29  ;;  %v5306_v45 = vpop.f32.mrf.mxu0 }
 0x74b   :  { %v13448_v42 = vadd.f32 %v5306_v45, %v5278_v7 }
 0x74d   :  { %v5316_v16 = vmax.f32 %v13448_v42, 0.0 }
 0x74f   :  { %v6972_v37 = vpack.i.bf16 %v5316_v16, %v5315_v3 }
 0x751   :  { %6973 = vrot.lane.b32.xlu2 %v6972_v37, %s7242_s21  ;;  %6968 = vrot.lane.b32.xlu1 %v6972_v37, %s7244_s2 }
 0x752   :  { %6963 = vrot.lane.b32.xlu0 %v6972_v37, %s7235_s29 }
 0x793   :  { %v6929_v41 = vpop.permute.xlu2 %6928 }
 0x794   :  { %v6931_v60 = vunpack.i.h.bf16 %v6929_v41  ;;  %v6930_v26 = vunpack.i.l.bf16 %v6929_v41 }
 0x796   :  { %v5389_v39 = vsel %vm4417_vm14, %v6930_v26, %v6931_v60  ;;  %v5393_v32 = vsel %vm4417_vm14, %v6931_v60, %v6930_v26 }
 0x79b   :  { %v6944_v47 = vpop.permute.xlu2 %6943 }
 0x79c   :  { %v6946_v50 = vunpack.i.h.bf16 %v6944_v47  ;;  %v6945_v17 = vunpack.i.l.bf16 %v6944_v47 }
 0x79e   :  { %v5390_v14 = vsel %vm4417_vm14, %v6945_v17, %v6946_v50  ;;  %v5394_v18 = vsel %vm4417_vm14, %v6946_v50, %v6945_v17 }
 0x7a3   :  { %v6959_v20 = vpop.permute.xlu2 %6958 }
 0x7a4   :  { %v6961_v9 = vunpack.i.h.bf16 %v6959_v20  ;;  %v6960_v10 = vunpack.i.l.bf16 %v6959_v20  ;;  %v5543_v20 = vld [vmem:[%s13695_s15 + $0x40] sm:$0xff] }
 0x7a6   :  { %v5391_v41 = vsel %vm4417_vm14, %v6960_v10, %v6961_v9  ;;  %v5395_v57 = vsel %vm4417_vm14, %v6961_v9, %v6960_v10 }
 0x7ab   :  { %v6924_v36 = vpop.permute.xlu1 %6923 }
 0x7ac   :  { %v6926_v58 = vunpack.i.h.bf16 %v6924_v36  ;;  %v6925_v6 = vunpack.i.l.bf16 %v6924_v36  ;;  %v6919_v12 = vpop.permute.xlu0 %6918 }
 0x7ad   :  { %v6921_v34 = vunpack.i.h.bf16 %v6919_v12  ;;  %v6920_v46 = vunpack.i.l.bf16 %v6919_v12 }
 0x7ae   :  { %v5365_v7 = vsel %vm4384_vm11, %v6925_v6, %v6926_v58  ;;  %v5369_v45 = vsel %vm4384_vm11, %v6926_v58, %v6925_v6 }
 0x7af   :  { %v5397_v37 = vmax.f32 %v5365_v7, %v5389_v39  ;;  %v5398_v22 = vmax.f32 %v5369_v45, %v5393_v32  ;;  %v5333_v5 = vsel %vm1241_vm4, %v6920_v46, %v6921_v34  ;;  %v5337_v56 = vsel %vm1241_vm4, %v6921_v34, %v6920_v46 }
 0x7b0   :  { %v5341_v2 = vmax.f32 %v5309_v52, %v5333_v5  ;;  %v5342_v13 = vmax.f32 %v5310_v11, %v5337_v56 }
 0x7b2   :  { %v5405_v21 = vmax.f32 %v5341_v2, %v5397_v37  ;;  %v5406_v61 = vmax.f32 %v5342_v13, %v5398_v22 }
 0x7b3   :  { %v6939_v15 = vpop.permute.xlu1 %6938 }
 0x7b4   :  { %v6941_v4 = vunpack.i.h.bf16 %v6939_v15  ;;  %v6940_v35 = vunpack.i.l.bf16 %v6939_v15  ;;  %v6934_v8 = vpop.permute.xlu0 %6933  ;;  %5461 = vmatmul.f32.vlgmr.msrb.gmra.mxu2 %v5405_v21  ;;  %5490 = vmatmul.f32.vlgmr.msrb.gmra.mxu3 %v5406_v61 }
 0x7b5   :  { %v6936_v59 = vunpack.i.h.bf16 %v6934_v8  ;;  %v6935_v24 = vunpack.i.l.bf16 %v6934_v8  ;;  %v5547_v8 = vld [vmem:[%s13695_s15 + $0x60] sm:$0xf] }
 0x7b6   :  { %v5366_v52 = vsel %vm4384_vm11, %v6940_v35, %v6941_v4  ;;  %v5370_v11 = vsel %vm4384_vm11, %v6941_v4, %v6940_v35  ;;  %5694 = vmatpush.msk.msrb.mxu0 %vm5556_vm2, %v5547_v8 }
 0x7b7   :  { %v5334_v62 = vsel %vm1241_vm4, %v6935_v24, %v6936_v59  ;;  %v5338_v54 = vsel %vm1241_vm4, %v6936_v59, %v6935_v24  ;;  %v5399_v27 = vmax.f32 %v5366_v52, %v5390_v14  ;;  %v5400_v55 = vmax.f32 %v5370_v11, %v5394_v18  ;;  %v5542_v59 = vld [vmem:[%s13695_s15 + $0x38] sm:$0xff]  ;;  %v5541_v24 = vld [vmem:[%s13695_s15 + $0x30] sm:$0xff]  ;;  %v5540_v52 = vld [vmem:[%s13695_s15 + $0x28] sm:$0xff] }
 0x7b8   :  { %v5343_v0 = vmax.f32 %v5311_v29, %v5334_v62  ;;  %v5344_v28 = vmax.f32 %v5312_v31, %v5338_v54  ;;  %v6974_v31 = vpop.permute.xlu2 %6973  ;;  %5564 = vmatpush.msrb.mxu0 %v5546_v33  ;;  %v5539_v11 = vld [vmem:[%s13695_s15 + $0x20] sm:$0xff]  ;;  %v5538_v62 = vld [vmem:[%s13695_s15 + $0x18] sm:$0xff]  ;;  %v5537_v54 = vld [vmem:[%s13695_s15 + $0x10] sm:$0xff] }
 0x7b9   :  { %v6976_v12 = vunpack.i.h.bf16 %v6974_v31  ;;  %v6975_v34 = vunpack.i.l.bf16 %v6974_v31  ;;  %v6977_v31 = vld [vmem:[%s13696_s16] ss:$0 sm:$0xff] }
 0x7ba   :  { %v5407_v63 = vmax.f32 %v5343_v0, %v5399_v27  ;;  %v5408_v23 = vmax.f32 %v5344_v28, %v5400_v55  ;;  %5565 = vmatpush.msrb.mxu0 %v5545_v30  ;;  %v5506_v0 = vld [vmem:[%s13693_s13 + $0x18] sm:$0xff]  ;;  %v5536_v28 = vld [vmem:[%s13695_s15 + $0x8] sm:$0xff] }
 0x7bb   :  { %v6954_v49 = vpop.permute.xlu1 %6953  ;;  %v5392_v56 = vsel %vm4417_vm14, %v6975_v34, %v6976_v12  ;;  %v5396_v44 = vsel %vm4417_vm14, %v6976_v12, %v6975_v34 }
 0x7bc   :  { %v6956_v38 = vunpack.i.h.bf16 %v6954_v49  ;;  %v6955_v48 = vunpack.i.l.bf16 %v6954_v49  ;;  %v6949_v40 = vpop.permute.xlu0 %6948  ;;  %5464 = vmatmul.f32.gmra.mxu2 %v5407_v63  ;;  %5493 = vmatmul.f32.gmra.mxu3 %v5408_v23  ;;  %v5505_v63 = vld [vmem:[%s13693_s13 + $0x10] sm:$0xff]  ;;  %v5535_v23 = vld [vmem:[%s13695_s15] sm:$0xff] }
 0x7bd   :  { %v6951_v25 = vunpack.i.h.bf16 %v6949_v40  ;;  %v6950_v19 = vunpack.i.l.bf16 %v6949_v40 }
 0x7be   :  { %v5367_v51 = vsel %vm4384_vm11, %v6955_v48, %v6956_v38  ;;  %v5371_v29 = vsel %vm4384_vm11, %v6956_v38, %v6955_v48  ;;  %v5504_v48 = vld [vmem:[%s13693_s13 + $0x8] sm:$0xff] }
 0x7bf   :  { %v5335_v60 = vsel %vm1241_vm4, %v6950_v19, %v6951_v25  ;;  %v5339_v26 = vsel %vm1241_vm4, %v6951_v25, %v6950_v19  ;;  %v5401_v47 = vmax.f32 %v5367_v51, %v5391_v41  ;;  %v5402_v36 = vmax.f32 %v5371_v29, %v5395_v57  ;;  %v5503_v19 = vld [vmem:[%s13693_s13] sm:$0xff]  ;;  %s5586_s13 = sshll.u32 %s7246_s18, 4  ;;  %s5587_s13 = int_to_ptr.vmem [resolvable:$true] %s5586_s13 }
 0x7c0   :  { %v5345_v58 = vmax.f32 %v5313_v43, %v5335_v60  ;;  %v5346_v6 = vmax.f32 %v5314_v53, %v5339_v26  ;;  %v5511_v51 = vld [vmem:[%s13694_s14] sm:$0x3] }
 0x7c2   :  { %v5409_v46 = vmax.f32 %v5345_v58, %v5401_v47  ;;  %v5410_v39 = vmax.f32 %v5346_v6, %v5402_v36 }
 0x7c3   :  { %v6969_v32 = vpop.permute.xlu1 %6968 }
 0x7c4   :  { %v6971_v7 = vunpack.i.h.bf16 %v6969_v32  ;;  %v6970_v45 = vunpack.i.l.bf16 %v6969_v32  ;;  %v6964_v37 = vpop.permute.xlu0 %6963  ;;  %5467 = vmatmul.f32.gmra.mxu2 %v5409_v46  ;;  %5496 = vmatmul.f32.gmra.mxu3 %v5410_v39 }
 0x7c5   :  { %v6966_v22 = vunpack.i.h.bf16 %v6964_v37  ;;  %v6965_v5 = vunpack.i.l.bf16 %v6964_v37 }
 0x7c6   :  { %v5368_v1 = vsel %vm4384_vm11, %v6970_v45, %v6971_v7  ;;  %v5372_v43 = vsel %vm4384_vm11, %v6971_v7, %v6970_v45 }
 0x7c7   :  { %v5336_v53 = vsel %vm1241_vm4, %v6965_v5, %v6966_v22  ;;  %v5340_v2 = vsel %vm1241_vm4, %v6966_v22, %v6965_v5  ;;  %v5403_v13 = vmax.f32 %v5368_v1, %v5392_v56  ;;  %v5404_v50 = vmax.f32 %v5372_v43, %v5396_v44 }
 0x7c8   :  { %v5347_v17 = vmax.f32 %v5315_v3, %v5336_v53  ;;  %v5348_v21 = vmax.f32 %v5316_v16, %v5340_v2  ;;  %v5544_v16 = vld [vmem:[%s13695_s15 + $0x48] sm:$0xff] }
 0x7c9   :  { %5566 = vmatpush.msrb.mxu0 %v5544_v16 }
 0x7ca   :  { %v5411_v61 = vmax.f32 %v5347_v17, %v5403_v13  ;;  %v5412_v15 = vmax.f32 %v5348_v21, %v5404_v50 }
 0x7cb   :  { %5567 = vmatpush.msrb.mxu0 %v5543_v20 }
 0x7cc   :  { %5470 = vmatmul.f32.gmra.mxu2 %v5411_v61  ;;  %5499 = vmatmul.f32.gmra.mxu3 %v5412_v15 }
 0x7cd   :  { %5568 = vmatpush.msrb.mxu0 %v5542_v59 }
 0x7cf   :  { %5569 = vmatpush.msrb.mxu0 %v5541_v24 }
 0x7d1   :  { %5570 = vmatpush.msrb.mxu0 %v5540_v52 }
 0x7d3   :  { %5571 = vmatpush.msrb.mxu0 %v5539_v11 }
 0x7d5   :  { %5572 = vmatpush.msrb.mxu0 %v5538_v62 }
 0x7d7   :  { %5573 = vmatpush.msrb.mxu0 %v5537_v54 }
 0x7d9   :  { %5574 = vmatpush.msrb.mxu0 %v5536_v28 }
 0x7db   :  { %5575 = vmatpush.msrb.mxu0 %v5535_v23 }
 0x837   :  { %v5462_v4 = vpop.f32.mrf.mxu2  ;;  %v5491_v35 = vpop.f32.mrf.mxu3 }
 0x838   :  { %v5492_v40 = vadd.f32 %v5491_v35, %v5462_v4 }
 0x83a   :  { %v5507_v57 = vmul.f32 %v5503_v19, %v5492_v40 }
 0x83f   :  { %v5465_v42 = vpop.f32.mrf.mxu2  ;;  %v5494_v3 = vpop.f32.mrf.mxu3 }
 0x840   :  { %v5495_v49 = vadd.f32 %v5494_v3, %v5465_v42 }
 0x842   :  { %v5508_v41 = vmul.f32 %v5504_v48, %v5495_v49 }
 0x847   :  { %v5468_v14 = vpop.f32.mrf.mxu2  ;;  %v5497_v18 = vpop.f32.mrf.mxu3 }
 0x848   :  { %v5498_v9 = vadd.f32 %v5497_v18, %v5468_v14 }
 0x84a   :  { %v5509_v25 = vmul.f32 %v5505_v63, %v5498_v9 }
 0x84f   :  { %v5471_v27 = vpop.f32.mrf.mxu2  ;;  %v5500_v55 = vpop.f32.mrf.mxu3 }
 0x850   :  { %v5501_v10 = vadd.f32 %v5500_v55, %v5471_v27 }
 0x852   :  { %v5510_v38 = vmul.f32 %v5506_v0, %v5501_v10 }
 0x854   :  { %5527 = vmatpush.msra.mxu1 %v5510_v38 }
 0x856   :  { %5528 = vmatpush.msra.mxu1 %v5509_v25 }
 0x858   :  { %5529 = vmatpush.msra.mxu1 %v5508_v41 }
 0x85a   :  { %5530 = vmatpush.msra.mxu1 %v5507_v57 }
 0x85b   :  { %5693 = vmatmul.msk.f32.vlgmr.msra.gmra.mxu1 %vm4542_vm0, %v5511_v51 }
 0x8d8   :  { %v5532_v29 = vpop.f32.mrf.mxu1 }
 0x8d9   :  { %5695 = vmatmul.msk.f32.vlgmr.msrb.gmra.mxu0 %vm5552_vm3, %v5532_v29 }
 0x956   :  { %v5577_v60 = vpop.f32.mrf.mxu0 }
 0x957   :  { %v5578_v26 = vadd.f32 %v6977_v31, %v5577_v60 }
 0x959   :  { %5580 = vst [vmem:[#allocation5] sm:$0x3] %v5578_v26 }
 0x95a   :  { %5591 = dma.vmem_to_hbm [thread:$0]  %s5587_s13, 32, %s5589_s20, [#allocation6]  }
 0x95b   :  { %7229 = dma.done.wait [#allocation6], 32  }
 0x95c   :  { %7230 = vsyncadd [#allocation6], 4294967264 }
 0x95d   :  { %5596 = vsyncpa [#allocation6], 1 }

</bundles_post_ra>
